<compile_context>
chip_gen: v7x
topology: tpu7x:2x2x1
jax: 0.10.0
libtpu: 0.0.40
codegen_flags: <defaults>
</compile_context>

<pallas_src>
import jax
import jax.numpy as jnp
from jax.experimental import pallas as pl
from jax.experimental.pallas import tpu as pltpu

BIG = 1e30      # pad value for data samples: tanh(500*(x - BIG)) == -1 exactly (sigmoid == 0)
TM = 512        # data samples processed per grid step (sublane tile); TM/8 is a power of 2
NCORES = 2      # leading "parallel" grid axis (both TensorCores on v7x; free elsewhere)
LANE = 128


def _crps_kernel(xs_ref, pred_ref, targ_ref, accp_ref, acct_ref):
    """Accumulate per-lane sums of tanh(500*(x - d)) over the sample axis."""
    i = pl.program_id(1)

    @pl.when(i == 0)
    def _():
        accp_ref[...] = jnp.zeros_like(accp_ref)
        acct_ref[...] = jnp.zeros_like(acct_ref)

    xs = xs_ref[...]                 # (1, n_pad): grid pre-scaled by 500 in the wrapper

    # Fold TM sample rows down to 8 sublane rows with full-vreg VALU adds only
    # (all slice offsets are multiples of 8 -> aligned, free views).  The final
    # 8-way sublane + lane reduction happens once, in the wrapper.
    def fold8(v):
        rows = v.shape[0]
        while rows > 8:
            half = rows // 2
            v = v[:half] + v[half:rows]
            rows = half
        return v

    # Process the two streams sequentially so only ONE (TM, n_pad) f32
    # intermediate is live at a time (lower vreg / VMEM pressure).
    p = pred_ref[...] * 500.0        # (TM, 1): scale once per block, not per element
    # sigmoid(1000*(x-d)) == 0.5*(tanh(500*(x-d)) + 1): single EUP op per element.
    accp_ref[...] += fold8(jnp.tanh(xs - p))   # (8, n_pad)

    t = targ_ref[...] * 500.0
    acct_ref[...] += fold8(jnp.tanh(xs - t))   # (8, n_pad)


def crps_pallas(prediction, target, integral_number: int = 1000):
    pred = prediction.reshape(-1).astype(jnp.float32)
    targ = target.reshape(-1).astype(jnp.float32)
    m_pred = pred.shape[0]
    m_targ = targ.shape[0]

    # --- wrapper glue (plain JAX): min/max + linspace grid, as in the reference ---
    min_val = jnp.minimum(jnp.min(pred), jnp.min(targ))
    max_val = jnp.maximum(jnp.max(pred), jnp.max(targ))
    n = int(integral_number)
    x = jnp.linspace(min_val, max_val, n).astype(jnp.float32)

    # Integration grid on the lane axis, pre-scaled by 500 (absorbs the *1000
    # steepness and the tanh half-argument), padded to a lane multiple.
    n_pad = ((n + LANE - 1) // LANE) * LANE
    xs_p = jnp.pad(x * 500.0, (0, n_pad - n)).reshape(1, n_pad)

    # Data samples padded to a multiple of NCORES*TM.  Padded rows (BIG) give
    # tanh == -1 exactly (i.e. sigmoid == 0); corrected analytically below.
    chunk = NCORES * TM
    m_pad = ((max(m_pred, m_targ) + chunk - 1) // chunk) * chunk
    pred_p = jnp.pad(pred, (0, m_pad - m_pred), constant_values=BIG).reshape(m_pad, 1)
    targ_p = jnp.pad(targ, (0, m_pad - m_targ), constant_values=BIG).reshape(m_pad, 1)

    steps = m_pad // chunk           # inner ("arbitrary") reduction steps per core

    # Advisory cost so XLA's scheduler treats this call as the heavy op it is.
    cost = pl.CostEstimate(
        flops=6 * m_pad * n_pad,                     # subs + fold adds (both streams)
        transcendentals=2 * m_pad * n_pad,           # one tanh per (sample, grid point)
        bytes_accessed=4 * (2 * m_pad + n_pad + 2 * NCORES * 8 * n_pad),
    )

    accp, acct = pl.pallas_call(
        _crps_kernel,
        out_shape=(jax.ShapeDtypeStruct((NCORES, 8, n_pad), jnp.float32),
                   jax.ShapeDtypeStruct((NCORES, 8, n_pad), jnp.float32)),
        grid_spec=pltpu.PrefetchScalarGridSpec(
            num_scalar_prefetch=0,
            grid=(NCORES, steps),
            in_specs=[
                pl.BlockSpec((1, n_pad), lambda c, i: (0, 0)),              # scaled grid (resident)
                pl.BlockSpec((TM, 1), lambda c, i: (c * steps + i, 0)),     # prediction samples
                pl.BlockSpec((TM, 1), lambda c, i: (c * steps + i, 0)),     # target samples
            ],
            out_specs=[
                pl.BlockSpec((None, 8, n_pad), lambda c, i: (c, 0, 0)),     # per-core tanh sums (pred)
                pl.BlockSpec((None, 8, n_pad), lambda c, i: (c, 0, 0)),     # per-core tanh sums (targ)
            ],
        ),
        compiler_params=pltpu.CompilerParams(
            dimension_semantics=("parallel", "arbitrary")),
        cost_estimate=cost,
    )(xs_p, pred_p, targ_p)

    # --- combine + trapezoid integration (plain JAX on n-sized vectors) ---
    sum_tanh_p = jnp.sum(accp, axis=(0, 1))[:n]
    sum_tanh_t = jnp.sum(acct, axis=(0, 1))[:n]
    # sum_k sigmoid = 0.5*sum_k tanh + 0.5*m_pad  (padded rows: tanh = -1 -> sigmoid = 0),
    # so the mean over the *real* samples is:
    cdf_pred = (0.5 * sum_tanh_p + 0.5 * m_pad) / m_pred
    cdf_targ = (0.5 * sum_tanh_t + 0.5 * m_pad) / m_targ
    diff = jnp.abs(cdf_pred - cdf_targ)
    y = diff * diff
    dxs = x[1:] - x[:-1]
    return jnp.sum(0.5 * (y[1:] + y[:-1]) * dxs)   # == torch.trapz(diff**2, x)


def _crps_reference(prediction, target, integral_number: int = 1000):
    """Pure-JAX reference mirroring the PyTorch module exactly."""
    pred = prediction.reshape(-1).astype(jnp.float32)
    targ = target.reshape(-1).astype(jnp.float32)
    min_val = jnp.minimum(jnp.min(pred), jnp.min(targ))
    max_val = jnp.maximum(jnp.max(pred), jnp.max(targ))
    x = jnp.linspace(min_val, max_val, integral_number).astype(jnp.float32)

    def cdf(data):
        return jnp.mean(jax.nn.sigmoid((x[None, :] - data[:, None]) * 1000.0), axis=0)

    diff = jnp.abs(cdf(pred) - cdf(targ))
    y = diff ** 2
    return jnp.sum(0.5 * (y[1:] + y[:-1]) * (x[1:] - x[:-1]))


if __name__ == "__main__":
    key = jax.random.PRNGKey(0)
    k1, k2 = jax.random.split(key)
    prediction = jax.random.normal(k1, (2, 4, 16, 16), jnp.float32)
    target = jax.random.normal(k2, (2, 4, 16, 16), jnp.float32) + 0.1

    result = crps_pallas(prediction, target, integral_number=1000)
    jax.block_until_ready(result)

    ref = _crps_reference(prediction, target, integral_number=1000)
    jax.block_until_ready(ref)
    assert jnp.allclose(result, ref, rtol=1e-3, atol=1e-5), (result, ref)

    print("KERNEL_OK")
</pallas_src>

<mosaic_0001>
module attributes {stable_mosaic.version = 11 : i64} {
  func.func @_crps_kernel(%arg0: i32, %arg1: i32, %arg2: memref<1x1024xf32, #tpu.memory_space<vmem>>, %arg3: memref<512x1xf32, #tpu.memory_space<vmem>>, %arg4: memref<512x1xf32, #tpu.memory_space<vmem>>, %arg5: memref<1x8x1024xf32, #tpu.memory_space<vmem>>, %arg6: memref<1x8x1024xf32, #tpu.memory_space<vmem>>) attributes {dimension_semantics = [#tpu.dimension_semantics<parallel>, #tpu.dimension_semantics<arbitrary>], iteration_bounds = array<i64: 2, 2>, scalar_prefetch = 0 : i64, scratch_operands = 0 : i64, tpu.core_type = #tpu.core_type<tc>, window_params = [{pipeline_mode = #tpu.pipeline_mode<synchronous>, transform_indices = @transform_0, window_bounds = array<i64: 1, 1024>}, {transform_indices = @transform_1, window_bounds = array<i64: 512, 1>}, {transform_indices = @transform_2, window_bounds = array<i64: 512, 1>}, {transform_indices = @transform_3, window_bounds = array<i64: 1, 8, 1024>}, {transform_indices = @transform_4, window_bounds = array<i64: 1, 8, 1024>}]} {
    %c0_i32 = arith.constant 0 : i32
    %0 = arith.cmpi eq, %arg1, %c0_i32 : i32
    %1 = arith.extui %0 : i1 to i32
    %c0_i32_0 = arith.constant 0 : i32
    %2 = arith.cmpi ne, %1, %c0_i32_0 : i32
    scf.if %2 {
      %cst_19 = arith.constant 0.000000e+00 : f32
      %66 = vector.broadcast %cst_19 : f32 to vector<8x1024xf32>
      %c0_20 = arith.constant 0 : index
      %c0_21 = arith.constant 0 : index
      %c0_22 = arith.constant 0 : index
      %67 = vector.load %arg5[%c0_20, %c0_21, %c0_22] : memref<1x8x1024xf32, #tpu.memory_space<vmem>>, vector<1x8x1024xf32>
      %68 = vector.shape_cast %67 : vector<1x8x1024xf32> to vector<8x1024xf32>
      %69 = vector.shape_cast %66 : vector<8x1024xf32> to vector<1x8x1024xf32>
      tpu.vector_store %arg5[%c0_20, %c0_21, %c0_22], %69 {strides = array<i32>} : memref<1x8x1024xf32, #tpu.memory_space<vmem>>, vector<1x8x1024xf32>,
      %cst_23 = arith.constant 0.000000e+00 : f32
      %70 = vector.broadcast %cst_23 : f32 to vector<8x1024xf32>
      %c0_24 = arith.constant 0 : index
      %c0_25 = arith.constant 0 : index
      %c0_26 = arith.constant 0 : index
      %71 = vector.load %arg6[%c0_24, %c0_25, %c0_26] : memref<1x8x1024xf32, #tpu.memory_space<vmem>>, vector<1x8x1024xf32>
      %72 = vector.shape_cast %71 : vector<1x8x1024xf32> to vector<8x1024xf32>
      %73 = vector.shape_cast %70 : vector<8x1024xf32> to vector<1x8x1024xf32>
      tpu.vector_store %arg6[%c0_24, %c0_25, %c0_26], %73 {strides = array<i32>} : memref<1x8x1024xf32, #tpu.memory_space<vmem>>, vector<1x8x1024xf32>,
    } else {
    }
    %c0 = arith.constant 0 : index
    %c0_1 = arith.constant 0 : index
    %3 = vector.load %arg2[%c0, %c0_1] : memref<1x1024xf32, #tpu.memory_space<vmem>>, vector<1x1024xf32>
    %c0_2 = arith.constant 0 : index
    %c0_3 = arith.constant 0 : index
    %4 = vector.load %arg3[%c0_2, %c0_3] : memref<512x1xf32, #tpu.memory_space<vmem>>, vector<512x1xf32>
    %cst = arith.constant 5.000000e+02 : f32
    %5 = vector.broadcast %cst : f32 to vector<512x1xf32>
    %6 = arith.mulf %4, %5 : vector<512x1xf32>
    %c0_4 = arith.constant 0 : index
    %c0_5 = arith.constant 0 : index
    %c0_6 = arith.constant 0 : index
    %7 = vector.load %arg5[%c0_4, %c0_5, %c0_6] : memref<1x8x1024xf32, #tpu.memory_space<vmem>>, vector<1x8x1024xf32>
    %8 = vector.shape_cast %7 : vector<1x8x1024xf32> to vector<8x1024xf32>
    %9 = vector.broadcast %3 : vector<1x1024xf32> to vector<512x1024xf32>
    %10 = vector.broadcast %6 : vector<512x1xf32> to vector<512x1024xf32>
    %11 = arith.subf %9, %10 : vector<512x1024xf32>
    %12 = math.tanh %11 : vector<512x1024xf32>
    %13 = vector.extract_strided_slice %12 {offsets = [0, 0], sizes = [256, 1024], strides = [1, 1]} : vector<512x1024xf32> to vector<256x1024xf32>
    %14 = vector.extract_strided_slice %12 {offsets = [256, 0], sizes = [256, 1024], strides = [1, 1]} : vector<512x1024xf32> to vector<256x1024xf32>
    %15 = arith.addf %13, %14 : vector<256x1024xf32>
    %16 = vector.extract_strided_slice %15 {offsets = [0, 0], sizes = [128, 1024], strides = [1, 1]} : vector<256x1024xf32> to vector<128x1024xf32>
    %17 = vector.extract_strided_slice %15 {offsets = [128, 0], sizes = [128, 1024], strides = [1, 1]} : vector<256x1024xf32> to vector<128x1024xf32>
    %18 = arith.addf %16, %17 : vector<128x1024xf32>
    %19 = vector.extract_strided_slice %18 {offsets = [0, 0], sizes = [64, 1024], strides = [1, 1]} : vector<128x1024xf32> to vector<64x1024xf32>
    %20 = vector.extract_strided_slice %18 {offsets = [64, 0], sizes = [64, 1024], strides = [1, 1]} : vector<128x1024xf32> to vector<64x1024xf32>
    %21 = arith.addf %19, %20 : vector<64x1024xf32>
    %22 = vector.extract_strided_slice %21 {offsets = [0, 0], sizes = [32, 1024], strides = [1, 1]} : vector<64x1024xf32> to vector<32x1024xf32>
    %23 = vector.extract_strided_slice %21 {offsets = [32, 0], sizes = [32, 1024], strides = [1, 1]} : vector<64x1024xf32> to vector<32x1024xf32>
    %24 = arith.addf %22, %23 : vector<32x1024xf32>
    %25 = vector.extract_strided_slice %24 {offsets = [0, 0], sizes = [16, 1024], strides = [1, 1]} : vector<32x1024xf32> to vector<16x1024xf32>
    %26 = vector.extract_strided_slice %24 {offsets = [16, 0], sizes = [16, 1024], strides = [1, 1]} : vector<32x1024xf32> to vector<16x1024xf32>
    %27 = arith.addf %25, %26 : vector<16x1024xf32>
    %28 = vector.extract_strided_slice %27 {offsets = [0, 0], sizes = [8, 1024], strides = [1, 1]} : vector<16x1024xf32> to vector<8x1024xf32>
    %29 = vector.extract_strided_slice %27 {offsets = [8, 0], sizes = [8, 1024], strides = [1, 1]} : vector<16x1024xf32> to vector<8x1024xf32>
    %30 = arith.addf %28, %29 : vector<8x1024xf32>
    %31 = arith.addf %8, %30 : vector<8x1024xf32>
    %c0_7 = arith.constant 0 : index
    %c0_8 = arith.constant 0 : index
    %c0_9 = arith.constant 0 : index
    %32 = vector.load %arg5[%c0_7, %c0_8, %c0_9] : memref<1x8x1024xf32, #tpu.memory_space<vmem>>, vector<1x8x1024xf32>
    %33 = vector.shape_cast %32 : vector<1x8x1024xf32> to vector<8x1024xf32>
    %34 = vector.shape_cast %31 : vector<8x1024xf32> to vector<1x8x1024xf32>
    tpu.vector_store %arg5[%c0_7, %c0_8, %c0_9], %34 {strides = array<i32>} : memref<1x8x1024xf32, #tpu.memory_space<vmem>>, vector<1x8x1024xf32>,
    %c0_10 = arith.constant 0 : index
    %c0_11 = arith.constant 0 : index
    %35 = vector.load %arg4[%c0_10, %c0_11] : memref<512x1xf32, #tpu.memory_space<vmem>>, vector<512x1xf32>
    %cst_12 = arith.constant 5.000000e+02 : f32
    %36 = vector.broadcast %cst_12 : f32 to vector<512x1xf32>
    %37 = arith.mulf %35, %36 : vector<512x1xf32>
    %c0_13 = arith.constant 0 : index
    %c0_14 = arith.constant 0 : index
    %c0_15 = arith.constant 0 : index
    %38 = vector.load %arg6[%c0_13, %c0_14, %c0_15] : memref<1x8x1024xf32, #tpu.memory_space<vmem>>, vector<1x8x1024xf32>
    %39 = vector.shape_cast %38 : vector<1x8x1024xf32> to vector<8x1024xf32>
    %40 = vector.broadcast %3 : vector<1x1024xf32> to vector<512x1024xf32>
    %41 = vector.broadcast %37 : vector<512x1xf32> to vector<512x1024xf32>
    %42 = arith.subf %40, %41 : vector<512x1024xf32>
    %43 = math.tanh %42 : vector<512x1024xf32>
    %44 = vector.extract_strided_slice %43 {offsets = [0, 0], sizes = [256, 1024], strides = [1, 1]} : vector<512x1024xf32> to vector<256x1024xf32>
    %45 = vector.extract_strided_slice %43 {offsets = [256, 0], sizes = [256, 1024], strides = [1, 1]} : vector<512x1024xf32> to vector<256x1024xf32>
    %46 = arith.addf %44, %45 : vector<256x1024xf32>
    %47 = vector.extract_strided_slice %46 {offsets = [0, 0], sizes = [128, 1024], strides = [1, 1]} : vector<256x1024xf32> to vector<128x1024xf32>
    %48 = vector.extract_strided_slice %46 {offsets = [128, 0], sizes = [128, 1024], strides = [1, 1]} : vector<256x1024xf32> to vector<128x1024xf32>
    %49 = arith.addf %47, %48 : vector<128x1024xf32>
    %50 = vector.extract_strided_slice %49 {offsets = [0, 0], sizes = [64, 1024], strides = [1, 1]} : vector<128x1024xf32> to vector<64x1024xf32>
    %51 = vector.extract_strided_slice %49 {offsets = [64, 0], sizes = [64, 1024], strides = [1, 1]} : vector<128x1024xf32> to vector<64x1024xf32>
    %52 = arith.addf %50, %51 : vector<64x1024xf32>
    %53 = vector.extract_strided_slice %52 {offsets = [0, 0], sizes = [32, 1024], strides = [1, 1]} : vector<64x1024xf32> to vector<32x1024xf32>
    %54 = vector.extract_strided_slice %52 {offsets = [32, 0], sizes = [32, 1024], strides = [1, 1]} : vector<64x1024xf32> to vector<32x1024xf32>
    %55 = arith.addf %53, %54 : vector<32x1024xf32>
    %56 = vector.extract_strided_slice %55 {offsets = [0, 0], sizes = [16, 1024], strides = [1, 1]} : vector<32x1024xf32> to vector<16x1024xf32>
    %57 = vector.extract_strided_slice %55 {offsets = [16, 0], sizes = [16, 1024], strides = [1, 1]} : vector<32x1024xf32> to vector<16x1024xf32>
    %58 = arith.addf %56, %57 : vector<16x1024xf32>
    %59 = vector.extract_strided_slice %58 {offsets = [0, 0], sizes = [8, 1024], strides = [1, 1]} : vector<16x1024xf32> to vector<8x1024xf32>
    %60 = vector.extract_strided_slice %58 {offsets = [8, 0], sizes = [8, 1024], strides = [1, 1]} : vector<16x1024xf32> to vector<8x1024xf32>
    %61 = arith.addf %59, %60 : vector<8x1024xf32>
    %62 = arith.addf %39, %61 : vector<8x1024xf32>
    %c0_16 = arith.constant 0 : index
    %c0_17 = arith.constant 0 : index
    %c0_18 = arith.constant 0 : index
    %63 = vector.load %arg6[%c0_16, %c0_17, %c0_18] : memref<1x8x1024xf32, #tpu.memory_space<vmem>>, vector<1x8x1024xf32>
    %64 = vector.shape_cast %63 : vector<1x8x1024xf32> to vector<8x1024xf32>
    %65 = vector.shape_cast %62 : vector<8x1024xf32> to vector<1x8x1024xf32>
    tpu.vector_store %arg6[%c0_16, %c0_17, %c0_18], %65 {strides = array<i32>} : memref<1x8x1024xf32, #tpu.memory_space<vmem>>, vector<1x8x1024xf32>,
    return
  }
  func.func @transform_0(%arg0: i32, %arg1: i32) -> (i32, i32) {
    %c0_i32 = arith.constant 0 : i32
    %c0_i32_0 = arith.constant 0 : i32
    %c0_i32_1 = arith.constant 0 : i32
    return %c0_i32, %c0_i32_0 : i32, i32
  }
  func.func @transform_1(%arg0: i32, %arg1: i32) -> (i32, i32) {
    %c2_i32 = arith.constant 2 : i32
    %0 = arith.muli %arg0, %c2_i32 : i32
    %1 = arith.addi %0, %arg1 : i32
    %c0_i32 = arith.constant 0 : i32
    %c0_i32_0 = arith.constant 0 : i32
    return %1, %c0_i32 : i32, i32
  }
  func.func @transform_2(%arg0: i32, %arg1: i32) -> (i32, i32) {
    %c2_i32 = arith.constant 2 : i32
    %0 = arith.muli %arg0, %c2_i32 : i32
    %1 = arith.addi %0, %arg1 : i32
    %c0_i32 = arith.constant 0 : i32
    %c0_i32_0 = arith.constant 0 : i32
    return %1, %c0_i32 : i32, i32
  }
  func.func @transform_3(%arg0: i32, %arg1: i32) -> (i32, i32, i32) {
    %c0_i32 = arith.constant 0 : i32
    %c0_i32_0 = arith.constant 0 : i32
    %c0_i32_1 = arith.constant 0 : i32
    return %arg0, %c0_i32, %c0_i32_0 : i32, i32, i32
  }
  func.func @transform_4(%arg0: i32, %arg1: i32) -> (i32, i32, i32) {
    %c0_i32 = arith.constant 0 : i32
    %c0_i32_0 = arith.constant 0 : i32
    %c0_i32_1 = arith.constant 0 : i32
    return %arg0, %c0_i32, %c0_i32_0 : i32, i32, i32
  }
}

</mosaic_0001>

<bundles_post_ra>
// kernel: tpu_custom_call.1
= control target key start
LH: loop header
LB: loop body
LE: loop exit
PB: predicated region body
PF: predicated region fallthrough
CT: control target
= control target key end

     0   :  { %10 = vsyncpa [#allocation3], 0  ;;  %s13371_s0 = inlined_call_operand.vmem [shape: f32[1,1024], index: 0, kind: input, shape index: {}]   ;;  %s13372_s1 = inlined_call_operand.vmem [shape: f32[2048,1], index: 1, kind: input, shape index: {}]   ;;  %s13373_s2 = inlined_call_operand.vmem [shape: f32[2048,1], index: 2, kind: input, shape index: {}]   ;;  %s13374_s3 = inlined_call_operand.hbm [shape: f32[2,8,1024], index: 3, kind: output, shape index: {0}]   ;;  %s13375_s4 = inlined_call_operand.hbm [shape: f32[2,8,1024], index: 4, kind: output, shape index: {1}]  }
   0x1   :  { %12 = vsyncpa [#allocation3 + $0x1], 0 }
   0x2   :  { %13 = vsyncpa [#allocation5], 0 }
   0x3   :  { %15 = vsyncpa [#allocation5 + $0x1], 0  ;;  %s6794_s15 = smov 0   ;;  %s6796_s16 = smov 0  }
   0x4   :  { %s6798_s17 = smov 0   ;;  %s6800_s18 = smov 0  }
   0x5   :  { %s6802_s19 = smov 0   ;;  %s6804_s20 = smov 0  }
   0x6   :  { %s6806_s21 = smov 0   ;;  %s6808_s22 = smov 0  }
   0x7 LB: > { %s4481_s23 = sadd.s32 4294967295, %s6763_s22   ;;  %s4482_s24 = sadd.s32 4294967294, %s6763_s22   ;;  %s6763_s22 = sphi %s6808_s22, %s21_s22   ;;  %s6759_s21 = sphi %s6806_s21, %s15738_s21   ;;  %s6755_s20 = sphi %s6804_s20, %s15737_s20   ;;  %s6751_s19 = sphi %s6802_s19, %s15736_s19   ;;  %s6747_s18 = sphi %s6800_s18, %s15735_s18   ;;  %s6743_s17 = sphi %s6798_s17, %s15734_s17   ;;  %s6739_s16 = sphi %s6796_s16, %s15733_s16   ;;  %s6735_s15 = sphi %s6794_s15, %s15732_s15  }
   0x8   : > { %s30_s25 = sadd.s32 1, %s6755_s20  ;;  %s33_s26 = sadd.s32 1, %s6759_s21 }
   0x9   : > { %p31_p0 = scmp.ge.s32.totalorder %s30_s25, 2  ;;  %p131_p1 = scmp.ne.s32.totalorder %s6743_s17, %s6739_s16 }
   0xa   : > { %p132_p2 = scmp.eq.s32.totalorder %s4481_s23, 3  ;;  %p137_p4 = scmp.ne.s32.totalorder %s6739_s16, %s6735_s15 }
   0xb   : > { %s15740_s25 = smov (%p31_p0, %s30_s25), 0  ;;  %s15742_s26 = smov (!%p31_p0, %s33_s26), %s6759_s21 }
   0xc   : > { %p6843_p3 = por %p132_p2, %p131_p1  ;;  %p35_p5 = scmp.ge.s32.totalorder %s15742_s26, 2 }
   0xd   : > { %p138_p6 = scmp.eq.s32.totalorder %s4482_s24, 3  ;;  %p4489_p7 = scmp.ge.s32.totalorder %s6763_s22, 1 }
   0xe   : > { %p211_p8 = scmp.lt.s32.totalorder %s6763_s22, 5  ;;  %s15744_s26 = smov (%p35_p5, %s15742_s26), 0 }
   0xf   : > { %13402 = sst [smem:[#allocation8_spill]] %s15744_s26  ;;  %p6853_p9 = por %p138_p6, %p137_p4 }
  0x10   : > { %p212_p10 = pnand %p4489_p7, %p211_p8  ;;  %s118_s29 = ssub.s32 %s6759_s21, %s15744_s26 }
  0x11   : > { %s121_s30 = sadd.s32 1, %s6743_s17  ;;  %p119_p11 = scmp.eq.s32.totalorder %s118_s29, 0 }
  0x12   : > { %215 = sbr.rel (%p212_p10) target bundleno = 1347 (0x543), region = 32 }
  0x13   : > { %s6861_s5 = scalar_select %p119_p11, %s6743_s17, %s121_s30  }
  0x19   : > { %s6864_s6 = sand.u32 1, %s6739_s16   ;;  %s4492_s7 = sshll.u32 %s6751_s19, 1 }
  0x1a   : > { %s4490_s8 = sshll.u32 %s6864_s6, 6  ;;  %s252_s9 = sadd.s32 %s6747_s18, %s4492_s7 }
  0x1b   : > { %s4493_s10 = sshll.u32 %s252_s9, 6  ;;  %s6879_s30 = scalar_lea.vmem [#allocation2], %s4490_s8 }
  0x1c   : > { %p254_p12 = scmp.lt.s32.totalorder %s4493_s10, 255  ;;  %s6881_s26 = scalar_lea.vmem [#allocation4], %s4490_s8 }
  0x1d   : > { %p4498_p13 = scmp.ne.s32.totalorder %s6747_s18, 0 }
  0x1e   : > { %s15746_s10 = smov (!%p254_p12, %s4493_s10), 255  ;;  %v6765_v0 = vmov (!%p4498_p13), 0.0  }
  0x1f   : > { %s4494_s11 = sshll.u32 %s15746_s10, 3  ;;  %274 = sbr.rel (%p4498_p13) target bundleno = 39 (0x27), region = 36  ;;  %275 = vst [vmem:[%s6879_s30] sm:$0xff] (!%p4498_p13), %v6765_v0  ;;  %276 = vst [vmem:[%s6879_s30 + $0x8] sm:$0xff] (!%p4498_p13), %v6765_v0 }
  0x20   : > { %s6872_s14 = scalar_lea.vmem %s13372_s1, %s4494_s11  ;;  %s6877_s29 = scalar_lea.vmem %s13373_s2, %s4494_s11  ;;  %277 = vst [vmem:[%s6879_s30 + $0x10] sm:$0xff] (!%p4498_p13), %v6765_v0  ;;  %278 = vst [vmem:[%s6879_s30 + $0x18] sm:$0xff] (!%p4498_p13), %v6765_v0 }
  0x21   : > { %279 = vst [vmem:[%s6879_s30 + $0x20] sm:$0xff] (!%p4498_p13), %v6765_v0  ;;  %280 = vst [vmem:[%s6879_s30 + $0x28] sm:$0xff] (!%p4498_p13), %v6765_v0 }
  0x22   : > { %281 = vst [vmem:[%s6879_s30 + $0x30] sm:$0xff] (!%p4498_p13), %v6765_v0  ;;  %282 = vst [vmem:[%s6879_s30 + $0x38] sm:$0xff] (!%p4498_p13), %v6765_v0 }
  0x23   : > { %283 = vst [vmem:[%s6881_s26] sm:$0xff] (!%p4498_p13), %v6765_v0  ;;  %284 = vst [vmem:[%s6881_s26 + $0x8] sm:$0xff] (!%p4498_p13), %v6765_v0 }
  0x24   : > { %285 = vst [vmem:[%s6881_s26 + $0x10] sm:$0xff] (!%p4498_p13), %v6765_v0  ;;  %286 = vst [vmem:[%s6881_s26 + $0x18] sm:$0xff] (!%p4498_p13), %v6765_v0 }
  0x25   : > { %287 = vst [vmem:[%s6881_s26 + $0x20] sm:$0xff] (!%p4498_p13), %v6765_v0  ;;  %288 = vst [vmem:[%s6881_s26 + $0x28] sm:$0xff] (!%p4498_p13), %v6765_v0 }
  0x26   : > { %289 = vst [vmem:[%s6881_s26 + $0x30] sm:$0xff] %v6765_v0  ;;  %290 = vst [vmem:[%s6881_s26 + $0x38] sm:$0xff] %v6765_v0 }
  0x27 PF: > { %v294_v1 = vld [vmem:[%s6872_s14 + $0x10] sm:$0xff]  ;;  %v292_v2 = vld [vmem:[%s6872_s14] sm:$0xff]  ;;  %v295_v3 = vld [vmem:[%s6872_s14 + $0x18] sm:$0xff]  ;;  %v6766_v4 = vmov 0   ;;  %s4507_s8 = sshll.u32 %s6751_s19, 10  ;;  %s4353_s12 = sshll.u32 %s6879_s30, 4  ;;  %s12311_s12 = int_to_ptr.vmem [resolvable:$true] %s4353_s12 }
  0x28   : > { %4588 = vset.pattern.permute.xlu1 %v6766_v4  ;;  %4587 = vset.pattern.permute.xlu0 %v6766_v4  ;;  %v358_v5 = vmul.f32 500.0, %v294_v1  ;;  %v356_v6 = vmul.f32 500.0, %v292_v2  ;;  %v293_v7 = vld [vmem:[%s6872_s14 + $0x8] sm:$0xff]  ;;  %v359_v8 = vmul.f32 500.0, %v295_v3  ;;  %v296_v11 = vld [vmem:[%s6872_s14 + $0x20] sm:$0xff]  ;;  %v299_v14 = vld [vmem:[%s6872_s14 + $0x38] sm:$0xff]  ;;  %s12299_s11 = scalar_lea.hbm %s13374_s3, %s4507_s8 }
  0x29   : > { %v357_v9 = vmul.f32 500.0, %v293_v7  ;;  %v297_v10 = vld [vmem:[%s6872_s14 + $0x28] sm:$0xff]  ;;  %v360_v13 = vmul.f32 500.0, %v296_v11  ;;  %v298_v15 = vld [vmem:[%s6872_s14 + $0x30] sm:$0xff]  ;;  %v363_v16 = vmul.f32 500.0, %v299_v14  ;;  %v300_v19 = vld [vmem:[%s6872_s14 + $0x40] sm:$0xff] }
  0x2a   : > { %481 = vperm.xlu1 %4588, %v358_v5   ;;  %471 = vperm.xlu0 %4587, %v356_v6   ;;  %v361_v12 = vmul.f32 500.0, %v297_v10  ;;  %v362_v17 = vmul.f32 500.0, %v298_v15  ;;  %v301_v18 = vld [vmem:[%s6872_s14 + $0x48] sm:$0xff]  ;;  %v364_v21 = vmul.f32 500.0, %v300_v19  ;;  %v303_v22 = vld [vmem:[%s6872_s14 + $0x58] sm:$0xff]  ;;  %v302_v23 = vld [vmem:[%s6872_s14 + $0x50] sm:$0xff] }
  0x2b   : > { %v365_v20 = vmul.f32 500.0, %v301_v18  ;;  %v367_v24 = vmul.f32 500.0, %v303_v22  ;;  %v366_v25 = vmul.f32 500.0, %v302_v23  ;;  %v305_v26 = vld [vmem:[%s6872_s14 + $0x68] sm:$0xff]  ;;  %v304_v27 = vld [vmem:[%s6872_s14 + $0x60] sm:$0xff]  ;;  %v307_v30 = vld [vmem:[%s6872_s14 + $0x78] sm:$0xff] }
  0x2c   : > { %v369_v28 = vmul.f32 500.0, %v305_v26  ;;  %v368_v29 = vmul.f32 500.0, %v304_v27  ;;  %v306_v31 = vld [vmem:[%s6872_s14 + $0x70] sm:$0xff]  ;;  %v371_v32 = vmul.f32 500.0, %v307_v30  ;;  %v309_v34 = vld [vmem:[%s6872_s14 + $0x88] sm:$0xff]  ;;  %v308_v35 = vld [vmem:[%s6872_s14 + $0x80] sm:$0xff] }
  0x2d   : > { %v370_v33 = vmul.f32 500.0, %v306_v31  ;;  %v373_v36 = vmul.f32 500.0, %v309_v34  ;;  %v372_v37 = vmul.f32 500.0, %v308_v35  ;;  %v311_v38 = vld [vmem:[%s6872_s14 + $0x98] sm:$0xff]  ;;  %v310_v39 = vld [vmem:[%s6872_s14 + $0x90] sm:$0xff]  ;;  %v313_v42 = vld [vmem:[%s6872_s14 + $0xa8] sm:$0xff] }
  0x2e   : > { %486 = vperm.xlu1 %4588, %v359_v8   ;;  %476 = vperm.xlu0 %4587, %v357_v9   ;;  %v375_v40 = vmul.f32 500.0, %v311_v38  ;;  %v374_v41 = vmul.f32 500.0, %v310_v39  ;;  %v312_v43 = vld [vmem:[%s6872_s14 + $0xa0] sm:$0xff]  ;;  %v377_v44 = vmul.f32 500.0, %v313_v42  ;;  %v315_v46 = vld [vmem:[%s6872_s14 + $0xb8] sm:$0xff]  ;;  %v314_v47 = vld [vmem:[%s6872_s14 + $0xb0] sm:$0xff] }
  0x2f   : > { %v376_v45 = vmul.f32 500.0, %v312_v43  ;;  %v379_v48 = vmul.f32 500.0, %v315_v46  ;;  %v378_v49 = vmul.f32 500.0, %v314_v47  ;;  %v317_v50 = vld [vmem:[%s6872_s14 + $0xc8] sm:$0xff]  ;;  %v316_v51 = vld [vmem:[%s6872_s14 + $0xc0] sm:$0xff]  ;;  %v319_v54 = vld [vmem:[%s6872_s14 + $0xd8] sm:$0xff] }
  0x30   : > { %v381_v52 = vmul.f32 500.0, %v317_v50  ;;  %v380_v53 = vmul.f32 500.0, %v316_v51  ;;  %v318_v55 = vld [vmem:[%s6872_s14 + $0xd0] sm:$0xff]  ;;  %v383_v56 = vmul.f32 500.0, %v319_v54  ;;  %v321_v58 = vld [vmem:[%s6872_s14 + $0xe8] sm:$0xff]  ;;  %v320_v59 = vld [vmem:[%s6872_s14 + $0xe0] sm:$0xff] }
  0x31   : > { %v382_v57 = vmul.f32 500.0, %v318_v55  ;;  %v385_v60 = vmul.f32 500.0, %v321_v58  ;;  %v384_v61 = vmul.f32 500.0, %v320_v59  ;;  %v323_v62 = vld [vmem:[%s6872_s14 + $0xf8] sm:$0xff]  ;;  %v322_v63 = vld [vmem:[%s6872_s14 + $0xf0] sm:$0xff]  ;;  %v325_v2 = vld [vmem:[%s6872_s14 + $0x108] sm:$0xff] }
  0x32   : > { %496 = vperm.xlu1 %4588, %v361_v12   ;;  %491 = vperm.xlu0 %4587, %v360_v13   ;;  %v387_v0 = vmul.f32 500.0, %v323_v62  ;;  %v386_v1 = vmul.f32 500.0, %v322_v63  ;;  %v324_v3 = vld [vmem:[%s6872_s14 + $0x100] sm:$0xff]  ;;  %v389_v4 = vmul.f32 500.0, %v325_v2  ;;  %v327_v6 = vld [vmem:[%s6872_s14 + $0x118] sm:$0xff]  ;;  %v326_v7 = vld [vmem:[%s6872_s14 + $0x110] sm:$0xff] }
  0x33   : > { %v388_v5 = vmul.f32 500.0, %v324_v3  ;;  %v391_v8 = vmul.f32 500.0, %v327_v6  ;;  %v390_v9 = vmul.f32 500.0, %v326_v7  ;;  %v329_v10 = vld [vmem:[%s6872_s14 + $0x128] sm:$0xff]  ;;  %v328_v11 = vld [vmem:[%s6872_s14 + $0x120] sm:$0xff]  ;;  %v331_v14 = vld [vmem:[%s6872_s14 + $0x138] sm:$0xff] }
  0x34   : > { %v393_v12 = vmul.f32 500.0, %v329_v10  ;;  %v392_v13 = vmul.f32 500.0, %v328_v11  ;;  %v330_v15 = vld [vmem:[%s6872_s14 + $0x130] sm:$0xff]  ;;  %v333_v18 = vld [vmem:[%s6872_s14 + $0x148] sm:$0xff]  ;;  %v332_v19 = vld [vmem:[%s6872_s14 + $0x140] sm:$0xff]  ;;  %s4334_s13 = scalar_lea.sflag [#allocation3], %s6864_s6 }
  0x35   : > { %v335_v22 = vld [vmem:[%s6872_s14 + $0x158] sm:$0xff]  ;;  %v334_v23 = vld [vmem:[%s6872_s14 + $0x150] sm:$0xff]  ;;  %v337_v26 = vld [vmem:[%s6872_s14 + $0x168] sm:$0xff]  ;;  %s6767_s23 = smov [#allocation2]  }
  0x36   : > { %506 = vperm.xlu1 %4588, %v363_v16   ;;  %501 = vperm.xlu0 %4587, %v362_v17   ;;  %v395_v16 = vmul.f32 500.0, %v331_v14  ;;  %v394_v17 = vmul.f32 500.0, %v330_v15  ;;  %v336_v27 = vld [vmem:[%s6872_s14 + $0x160] sm:$0xff]  ;;  %v339_v30 = vld [vmem:[%s6872_s14 + $0x178] sm:$0xff]  ;;  %v338_v31 = vld [vmem:[%s6872_s14 + $0x170] sm:$0xff]  ;;  %s6641_s24 = sshll.u32 %s6767_s23, 4  ;;  %s6642_s24 = int_to_ptr.vmem [resolvable:$false] %s6641_s24 }
  0x37   : > { %v341_v34 = vld [vmem:[%s6872_s14 + $0x188] sm:$0xff]  ;;  %v340_v35 = vld [vmem:[%s6872_s14 + $0x180] sm:$0xff]  ;;  %v343_v38 = vld [vmem:[%s6872_s14 + $0x198] sm:$0xff]  ;;  %p6644_p4 = scmp.lt.s32.totalorder %s12311_s12, %s6642_s24 }
  0x38   : > { %v342_v39 = vld [vmem:[%s6872_s14 + $0x190] sm:$0xff]  ;;  %v345_v42 = vld [vmem:[%s6872_s14 + $0x1a8] sm:$0xff]  ;;  %v344_v43 = vld [vmem:[%s6872_s14 + $0x1a0] sm:$0xff] }
  0x39   : > { %v347_v46 = vld [vmem:[%s6872_s14 + $0x1b8] sm:$0xff]  ;;  %v346_v47 = vld [vmem:[%s6872_s14 + $0x1b0] sm:$0xff]  ;;  %v349_v50 = vld [vmem:[%s6872_s14 + $0x1c8] sm:$0xff] }
  0x3a   : > { %516 = vperm.xlu1 %4588, %v365_v20   ;;  %511 = vperm.xlu0 %4587, %v364_v21   ;;  %v397_v20 = vmul.f32 500.0, %v333_v18  ;;  %v396_v21 = vmul.f32 500.0, %v332_v19  ;;  %v348_v51 = vld [vmem:[%s6872_s14 + $0x1c0] sm:$0xff]  ;;  %v351_v54 = vld [vmem:[%s6872_s14 + $0x1d8] sm:$0xff]  ;;  %v350_v55 = vld [vmem:[%s6872_s14 + $0x1d0] sm:$0xff] }
  0x3b   : > { %v353_v58 = vld [vmem:[%s6872_s14 + $0x1e8] sm:$0xff]  ;;  %v352_v59 = vld [vmem:[%s6872_s14 + $0x1e0] sm:$0xff]  ;;  %v355_v62 = vld [vmem:[%s6872_s14 + $0x1f8] sm:$0xff] }
  0x3c   : > { %v354_v63 = vld [vmem:[%s6872_s14 + $0x1f0] sm:$0xff]  ;;  %v2334_v2 = vld [vmem:[%s6877_s29 + $0x8] sm:$0xff]  ;;  %v2333_v3 = vld [vmem:[%s6877_s29] sm:$0xff]  ;;  %s6637_s14 = scalar_lea.vmem %s12311_s12, 1024 }
  0x3d   : > { %v2336_v6 = vld [vmem:[%s6877_s29 + $0x18] sm:$0xff]  ;;  %v2335_v7 = vld [vmem:[%s6877_s29 + $0x10] sm:$0xff]  ;;  %v2338_v11 = vld [vmem:[%s6877_s29 + $0x28] sm:$0xff]  ;;  %p6638_p0 = scmp.ne.s32.totalorder %s12311_s12, %s6637_s14 }
  0x3e   : > { %526 = vperm.xlu1 %4588, %v367_v24   ;;  %521 = vperm.xlu0 %4587, %v366_v25   ;;  %v399_v24 = vmul.f32 500.0, %v335_v22  ;;  %v398_v25 = vmul.f32 500.0, %v334_v23  ;;  %v2399_v10 = vmul.f32 500.0, %v2335_v7  ;;  %v291_v23 = vld [vmem:[%s13371_s0] sm:$0xff] }
  0x3f   : > { %p6639_p1 = pnand %p6638_p0, %p6843_p3 }
  0x41   : > { %p6640_p2 = pneg %p6639_p1 }
  0x42   : > { %536 = vperm.xlu1 %4588, %v369_v28   ;;  %531 = vperm.xlu0 %4587, %v368_v29   ;;  %v401_v28 = vmul.f32 500.0, %v337_v26  ;;  %v400_v29 = vmul.f32 500.0, %v336_v27 }
  0x46   : > { %546 = vperm.xlu1 %4588, %v371_v32   ;;  %541 = vperm.xlu0 %4587, %v370_v33   ;;  %v403_v32 = vmul.f32 500.0, %v339_v30  ;;  %v402_v33 = vmul.f32 500.0, %v338_v31  ;;  %v2344_v31 = vld [vmem:[%s6877_s29 + $0x58] sm:$0xff] }
  0x4a   : > { %556 = vperm.xlu1 %4588, %v373_v36   ;;  %551 = vperm.xlu0 %4587, %v372_v37   ;;  %v405_v36 = vmul.f32 500.0, %v341_v34  ;;  %v404_v37 = vmul.f32 500.0, %v340_v35  ;;  %v2343_v35 = vld [vmem:[%s6877_s29 + $0x50] sm:$0xff] }
  0x4e   : > { %566 = vperm.xlu1 %4588, %v375_v40   ;;  %561 = vperm.xlu0 %4587, %v374_v41   ;;  %v407_v40 = vmul.f32 500.0, %v343_v38  ;;  %v406_v41 = vmul.f32 500.0, %v342_v39 }
  0x52   : > { %576 = vperm.xlu1 %4588, %v377_v44   ;;  %571 = vperm.xlu0 %4587, %v376_v45   ;;  %v409_v44 = vmul.f32 500.0, %v345_v42  ;;  %v408_v45 = vmul.f32 500.0, %v344_v43  ;;  %v2407_v43 = vmul.f32 500.0, %v2343_v35 }
  0x56   : > { %586 = vperm.xlu1 %4588, %v379_v48   ;;  %581 = vperm.xlu0 %4587, %v378_v49   ;;  %v411_v48 = vmul.f32 500.0, %v347_v46  ;;  %v410_v49 = vmul.f32 500.0, %v346_v47  ;;  %v2345_v47 = vld [vmem:[%s6877_s29 + $0x60] sm:$0xff] }
  0x5a   : > { %596 = vperm.xlu1 %4588, %v381_v52   ;;  %591 = vperm.xlu0 %4587, %v380_v53   ;;  %v413_v52 = vmul.f32 500.0, %v349_v50  ;;  %v412_v53 = vmul.f32 500.0, %v348_v51 }
  0x5e   : > { %606 = vperm.xlu1 %4588, %v383_v56   ;;  %601 = vperm.xlu0 %4587, %v382_v57   ;;  %v415_v56 = vmul.f32 500.0, %v351_v54  ;;  %v414_v57 = vmul.f32 500.0, %v350_v55  ;;  %v2409_v54 = vmul.f32 500.0, %v2345_v47  ;;  %v2348_v55 = vld [vmem:[%s6877_s29 + $0x78] sm:$0xff] }
  0x62   : > { %616 = vperm.xlu1 %4588, %v385_v60   ;;  %611 = vperm.xlu0 %4587, %v384_v61   ;;  %v417_v60 = vmul.f32 500.0, %v353_v58  ;;  %v416_v61 = vmul.f32 500.0, %v352_v59  ;;  %v2347_v58 = vld [vmem:[%s6877_s29 + $0x70] sm:$0xff] }
  0x66   : > { %626 = vperm.xlu1 %4588, %v387_v0   ;;  %621 = vperm.xlu0 %4587, %v386_v1   ;;  %v419_v0 = vmul.f32 500.0, %v355_v62  ;;  %v418_v1 = vmul.f32 500.0, %v354_v63  ;;  %v2411_v63 = vmul.f32 500.0, %v2347_v58 }
  0x6a   : > { %636 = vperm.xlu1 %4588, %v389_v4   ;;  %631 = vperm.xlu0 %4587, %v388_v5   ;;  %v2398_v4 = vmul.f32 500.0, %v2334_v2  ;;  %v2397_v5 = vmul.f32 500.0, %v2333_v3 }
  0x6e   : > { %646 = vperm.xlu1 %4588, %v391_v8   ;;  %641 = vperm.xlu0 %4587, %v390_v9   ;;  %v2400_v8 = vmul.f32 500.0, %v2336_v6  ;;  %v429_v9 = vlaneseq }
  0x70   : > { %v430_v14 = vshrl.u32 %v429_v9, 7 }
  0x72   : > { %656 = vperm.xlu1 %4588, %v393_v12   ;;  %651 = vperm.xlu0 %4587, %v392_v13   ;;  %v2337_v12 = vld [vmem:[%s6877_s29 + $0x20] sm:$0xff]  ;;  %v2402_v13 = vmul.f32 500.0, %v2338_v11  ;;  %v431_v19 = vsub.s32 0, %v430_v14  ;;  %v435_v22 = vsub.s32 1, %v430_v14  ;;  %v443_v26 = vsub.s32 3, %v430_v14 }
  0x73   : > { %v2401_v15 = vmul.f32 500.0, %v2337_v12  ;;  %v459_v38 = vsub.s32 7, %v430_v14 }
  0x74   : > { %v6980_v34 = vrot.slane %v291_v23, %v435_v22  ;;  %v6985_v39 = vrot.slane %v291_v23, %v443_v26 }
  0x75   : > { %v6998_v50 = vrot.slane %v291_v23, %v459_v38  ;;  %v2350_v38 = vld [vmem:[%s6877_s29 + $0x88] sm:$0xff] }
  0x76   : > { %666 = vperm.xlu1 %4588, %v395_v16   ;;  %661 = vperm.xlu0 %4587, %v394_v17   ;;  %v2340_v16 = vld [vmem:[%s6877_s29 + $0x38] sm:$0xff]  ;;  %v2339_v17 = vld [vmem:[%s6877_s29 + $0x30] sm:$0xff] }
  0x77   : > { %v2404_v18 = vmul.f32 500.0, %v2340_v16 }
  0x7a   : > { %676 = vperm.xlu1 %4588, %v397_v20   ;;  %671 = vperm.xlu0 %4587, %v396_v21   ;;  %v2403_v20 = vmul.f32 500.0, %v2339_v17  ;;  %v2342_v21 = vld [vmem:[%s6877_s29 + $0x48] sm:$0xff] }
  0x7b   : > { %v2406_v27 = vmul.f32 500.0, %v2342_v21 }
  0x7e   : > { %686 = vperm.xlu1 %4588, %v399_v24   ;;  %681 = vperm.xlu0 %4587, %v398_v25   ;;  %v2341_v24 = vld [vmem:[%s6877_s29 + $0x40] sm:$0xff]  ;;  %v439_v25 = vsub.s32 2, %v430_v14 }
  0x7f   : > { %v2405_v30 = vmul.f32 500.0, %v2341_v24 }
  0x82   : > { %696 = vperm.xlu1 %4588, %v401_v28   ;;  %691 = vperm.xlu0 %4587, %v400_v29   ;;  %v447_v28 = vsub.s32 4, %v430_v14  ;;  %v6977_v29 = vrot.slane %v291_v23, %v431_v19 }
  0x86   : > { %706 = vperm.xlu1 %4588, %v403_v32   ;;  %701 = vperm.xlu0 %4587, %v402_v33   ;;  %v451_v32 = vsub.s32 5, %v430_v14 }
  0x8a   : > { %716 = vperm.xlu1 %4588, %v405_v36   ;;  %711 = vperm.xlu0 %4587, %v404_v37   ;;  %v455_v36 = vsub.s32 6, %v430_v14  ;;  %v6983_v37 = vrot.slane %v291_v23, %v439_v25 }
  0x8e   : > { %726 = vperm.xlu1 %4588, %v407_v40   ;;  %721 = vperm.xlu0 %4587, %v406_v41   ;;  %v2408_v40 = vmul.f32 500.0, %v2344_v31  ;;  %v6987_v41 = vrot.slane %v291_v23, %v447_v28 }
  0x92   : > { %736 = vperm.xlu1 %4588, %v409_v44   ;;  %731 = vperm.xlu0 %4587, %v408_v45   ;;  %v2346_v44 = vld [vmem:[%s6877_s29 + $0x68] sm:$0xff]  ;;  %v6991_v45 = vrot.slane %v291_v23, %v451_v32 }
  0x96   : > { %746 = vperm.xlu1 %4588, %v411_v48   ;;  %741 = vperm.xlu0 %4587, %v410_v49   ;;  %v6995_v48 = vrot.slane %v291_v23, %v455_v36 }
  0x9a   : > { %756 = vperm.xlu1 %4588, %v413_v52   ;;  %751 = vperm.xlu0 %4587, %v412_v53   ;;  %v2410_v52 = vmul.f32 500.0, %v2346_v44 }
  0x9e   : > { %766 = vperm.xlu1 %4588, %v415_v56   ;;  %761 = vperm.xlu0 %4587, %v414_v57  }
  0xa2   : > { %776 = vperm.xlu1 %4588, %v417_v60   ;;  %771 = vperm.xlu0 %4587, %v416_v61   ;;  %v2412_v61 = vmul.f32 500.0, %v2348_v55 }
  0xa6   : > { %786 = vperm.xlu1 %4588, %v419_v0   ;;  %781 = vperm.xlu0 %4587, %v418_v1  }
  0xa9   : > { %v482_v33 = vpop.permute.xlu1 %481  ;;  %v472_v57 = vpop.permute.xlu0 %471 }
  0xaa   : > { %2476 = vperm.xlu1 %4588, %v2398_v4   ;;  %2471 = vperm.xlu0 %4587, %v2397_v5   ;;  %v805_v42 = vsub.f32 %v6977_v29, %v482_v33  ;;  %v806_v46 = vsub.f32 %v6980_v34, %v482_v33  ;;  %v807_v49 = vsub.f32 %v6983_v37, %v482_v33 }
  0xab   : > { %v808_v51 = vsub.f32 %v6985_v39, %v482_v33  ;;  %v809_v53 = vsub.f32 %v6987_v41, %v482_v33  ;;  %v810_v56 = vsub.f32 %v6991_v45, %v482_v33  ;;  %v811_v59 = vsub.f32 %v6995_v48, %v482_v33 }
  0xac   : > { %4589 = vtanh.f32 %v805_v42  ;;  %v812_v60 = vsub.f32 %v6998_v50, %v482_v33  ;;  %v789_v62 = vsub.f32 %v6977_v29, %v472_v57  ;;  %v790_v0 = vsub.f32 %v6980_v34, %v472_v57 }
  0xad   : > { %4591 = vtanh.f32 %v806_v46  ;;  %v791_v1 = vsub.f32 %v6983_v37, %v472_v57  ;;  %v792_v2 = vsub.f32 %v6985_v39, %v472_v57  ;;  %v793_v3 = vsub.f32 %v6987_v41, %v472_v57  ;;  %v487_v5 = vpop.permute.xlu1 %486  ;;  %v477_v22 = vpop.permute.xlu0 %476 }
  0xae   : > { %2486 = vperm.xlu1 %4588, %v2400_v8   ;;  %2481 = vperm.xlu0 %4587, %v2399_v10   ;;  %4593 = vtanh.f32 %v807_v49  ;;  %v794_v4 = vsub.f32 %v6991_v45, %v472_v57  ;;  %v795_v7 = vsub.f32 %v6995_v48, %v472_v57  ;;  %v796_v9 = vsub.f32 %v6998_v50, %v472_v57 }
  0xaf   : > { %4595 = vtanh.f32 %v808_v51  ;;  %v813_v11 = vsub.f32 %v6977_v29, %v487_v5  ;;  %v816_v17 = vsub.f32 %v6985_v39, %v487_v5  ;;  %v817_v19 = vsub.f32 %v6987_v41, %v487_v5 }
  0xb0   : > { %4597 = vtanh.f32 %v809_v53  ;;  %v818_v21 = vsub.f32 %v6991_v45, %v487_v5  ;;  %v819_v24 = vsub.f32 %v6995_v48, %v487_v5  ;;  %v820_v26 = vsub.f32 %v6998_v50, %v487_v5 }
  0xb1   : > { %4599 = vtanh.f32 %v810_v56  ;;  %v797_v28 = vsub.f32 %v6977_v29, %v477_v22  ;;  %v798_v31 = vsub.f32 %v6980_v34, %v477_v22  ;;  %v799_v33 = vsub.f32 %v6983_v37, %v477_v22  ;;  %v497_v47 = vpop.permute.xlu1 %496 }
  0xb2   : > { %2496 = vperm.xlu1 %4588, %v2402_v13   ;;  %2491 = vperm.xlu0 %4587, %v2401_v15   ;;  %4601 = vtanh.f32 %v811_v59  ;;  %v814_v13 = vsub.f32 %v6980_v34, %v487_v5  ;;  %v815_v15 = vsub.f32 %v6983_v37, %v487_v5  ;;  %v800_v36 = vsub.f32 %v6985_v39, %v477_v22 }
  0xb3   : > { %4603 = vtanh.f32 %v812_v60  ;;  %v802_v46 = vsub.f32 %v6991_v45, %v477_v22  ;;  %v803_v51 = vsub.f32 %v6995_v48, %v477_v22  ;;  %v804_v55 = vsub.f32 %v6998_v50, %v477_v22  ;;  %v2352_v60 = vld [vmem:[%s6877_s29 + $0x98] sm:$0xff] }
  0xb4   : > { %4605 = vtanh.f32 %v789_v62  ;;  %v829_v57 = vsub.f32 %v6977_v29, %v497_v47  ;;  %v830_v59 = vsub.f32 %v6980_v34, %v497_v47 }
  0xb5   : > { %4607 = vtanh.f32 %v790_v0 }
  0xb6   : > { %2506 = vperm.xlu1 %4588, %v2404_v18   ;;  %2501 = vperm.xlu0 %4587, %v2403_v20   ;;  %v7013_v6 = vpop.eup %4589  ;;  %4609 = vtanh.f32 %v791_v1  ;;  %v832_v1 = vsub.f32 %v6985_v39, %v497_v47 }
  0xb7   : > { %13404 = vst [vmem:[#allocation9_spill] sm:$0xff] %v7013_v6  ;;  %v7016_v8 = vpop.eup %4591  ;;  %4611 = vtanh.f32 %v792_v2 }
  0xb8   : > { %13405 = vst [vmem:[#allocation10_spill] sm:$0xff] %v7016_v8  ;;  %v7019_v10 = vpop.eup %4593  ;;  %4613 = vtanh.f32 %v793_v3  ;;  %v833_v3 = vsub.f32 %v6987_v41, %v497_v47 }
  0xb9   : > { %13406 = vst [vmem:[#allocation11_spill] sm:$0xff] %v7019_v10  ;;  %v7022_v12 = vpop.eup %4595  ;;  %4615 = vtanh.f32 %v794_v4  ;;  %v2416_v4 = vmul.f32 500.0, %v2352_v60 }
  0xba   : > { %2516 = vperm.xlu1 %4588, %v2406_v27   ;;  %2511 = vperm.xlu0 %4587, %v2405_v30   ;;  %13407 = vst [vmem:[#allocation12_spill] sm:$0xff] %v7022_v12  ;;  %v7025_v14 = vpop.eup %4597  ;;  %4617 = vtanh.f32 %v795_v7 }
  0xbb   : > { %13408 = vst [vmem:[#allocation13_spill] sm:$0xff] %v7025_v14  ;;  %v7028_v16 = vpop.eup %4599  ;;  %4619 = vtanh.f32 %v796_v9  ;;  %v834_v9 = vsub.f32 %v6991_v45, %v497_v47 }
  0xbc   : > { %13409 = vst [vmem:[#allocation14_spill] sm:$0xff] %v7028_v16  ;;  %v7031_v18 = vpop.eup %4601  ;;  %4621 = vtanh.f32 %v813_v11  ;;  %v492_v11 = vpop.permute.xlu0 %491 }
  0xbd   : > { %13410 = vst [vmem:[#allocation15_spill] sm:$0xff] %v7031_v18  ;;  %v7034_v20 = vpop.eup %4603  ;;  %4623 = vtanh.f32 %v814_v13 }
  0xbe   : > { %2526 = vperm.xlu1 %4588, %v2408_v40   ;;  %2521 = vperm.xlu0 %4587, %v2407_v43   ;;  %13411 = vst [vmem:[#allocation16_spill] sm:$0xff] %v7034_v20  ;;  %v7037_v23 = vpop.eup %4605  ;;  %4625 = vtanh.f32 %v815_v15  ;;  %v2349_v40 = vld [vmem:[%s6877_s29 + $0x80] sm:$0xff]  ;;  %v801_v43 = vsub.f32 %v6987_v41, %v477_v22  ;;  %v835_v15 = vsub.f32 %v6995_v48, %v497_v47 }
  0xbf   : > { %v7040_v25 = vpop.eup %4607  ;;  %4627 = vtanh.f32 %v816_v17  ;;  %v2413_v53 = vmul.f32 500.0, %v2349_v40  ;;  %v2353_v22 = vld [vmem:[%s6877_s29 + $0xa0] sm:$0xff] }
  0xc0   : > { %v7043_v27 = vpop.eup %4609  ;;  %4629 = vtanh.f32 %v817_v19  ;;  %v836_v19 = vsub.f32 %v6998_v50, %v497_v47  ;;  %v2417_v40 = vmul.f32 500.0, %v2353_v22  ;;  %v2385_v20 = vld [vmem:[%s6877_s29 + $0x1a0] sm:$0xff] }
  0xc1   : > { %v7046_v30 = vpop.eup %4611  ;;  %4631 = vtanh.f32 %v818_v21  ;;  %v2354_v21 = vld [vmem:[%s6877_s29 + $0xa8] sm:$0xff]  ;;  %v2449_v16 = vmul.f32 500.0, %v2385_v20 }
  0xc2   : > { %2536 = vperm.xlu1 %4588, %v2410_v52   ;;  %2531 = vperm.xlu0 %4587, %v2409_v54   ;;  %v7049_v32 = vpop.eup %4613  ;;  %4633 = vtanh.f32 %v819_v24  ;;  %v2414_v52 = vmul.f32 500.0, %v2350_v38  ;;  %v2418_v38 = vmul.f32 500.0, %v2354_v21 }
  0xc3   : > { %v7052_v35 = vpop.eup %4615  ;;  %4635 = vtanh.f32 %v820_v26  ;;  %v821_v26 = vsub.f32 %v6977_v29, %v492_v11 }
  0xc4   : > { %v7057_v42 = vpop.eup %4617  ;;  %4637 = vtanh.f32 %v797_v28 }
  0xc5   : > { %v7060_v44 = vpop.eup %4619  ;;  %4639 = vtanh.f32 %v798_v31  ;;  %v822_v31 = vsub.f32 %v6980_v34, %v492_v11 }
  0xc6   : > { %2546 = vperm.xlu1 %4588, %v2412_v61   ;;  %2541 = vperm.xlu0 %4587, %v2411_v63   ;;  %v7063_v49 = vpop.eup %4621  ;;  %4641 = vtanh.f32 %v799_v33  ;;  %v2351_v61 = vld [vmem:[%s6877_s29 + $0x90] sm:$0xff]  ;;  %v831_v63 = vsub.f32 %v6983_v37, %v497_v47 }
  0xc7   : > { %v7066_v54 = vpop.eup %4623  ;;  %4643 = vtanh.f32 %v800_v36  ;;  %v2415_v5 = vmul.f32 500.0, %v2351_v61  ;;  %v823_v36 = vsub.f32 %v6983_v37, %v492_v11  ;;  %v827_v61 = vsub.f32 %v6995_v48, %v492_v11 }
  0xc8   : > { %v7069_v56 = vpop.eup %4625  ;;  %4645 = vtanh.f32 %v801_v43 }
  0xc9   : > { %v7072_v58 = vpop.eup %4627  ;;  %4647 = vtanh.f32 %v802_v46  ;;  %v824_v46 = vsub.f32 %v6985_v39, %v492_v11 }
  0xca   : > { %2556 = vperm.xlu1 %4588, %v2414_v52   ;;  %2551 = vperm.xlu0 %4587, %v2413_v53   ;;  %v7077_v62 = vpop.eup %4629  ;;  %4649 = vtanh.f32 %v803_v51  ;;  %v825_v51 = vsub.f32 %v6987_v41, %v492_v11  ;;  %v826_v53 = vsub.f32 %v6991_v45, %v492_v11 }
  0xcb   : > { %13412 = vst [vmem:[#allocation17_spill] sm:$0xff] %v7077_v62  ;;  %v7080_v0 = vpop.eup %4631  ;;  %4651 = vtanh.f32 %v804_v55  ;;  %v507_v55 = vpop.permute.xlu1 %506 }
  0xcc   : > { %13413 = vst [vmem:[#allocation18_spill] sm:$0xff] %v7080_v0  ;;  %v7083_v2 = vpop.eup %4633  ;;  %4653 = vtanh.f32 %v829_v57  ;;  %v2356_v57 = vld [vmem:[%s6877_s29 + $0xb8] sm:$0xff]  ;;  %v847_v22 = vsub.f32 %v6983_v37, %v507_v55 }
  0xcd   : > { %13414 = vst [vmem:[#allocation19_spill] sm:$0xff] %v7083_v2  ;;  %v7086_v7 = vpop.eup %4635  ;;  %4655 = vtanh.f32 %v830_v59  ;;  %v2355_v59 = vld [vmem:[%s6877_s29 + $0xb0] sm:$0xff] }
  0xce   : > { %13415 = vst [vmem:[#allocation20_spill] sm:$0xff] %v7086_v7  ;;  %v7089_v13 = vpop.eup %4637  ;;  %4657 = vtanh.f32 %v831_v63  ;;  %2566 = vperm.xlu1 %4588, %v2416_v4   ;;  %2561 = vperm.xlu0 %4587, %v2415_v5   ;;  %v845_v4 = vsub.f32 %v6977_v29, %v507_v55  ;;  %v2420_v5 = vmul.f32 500.0, %v2356_v57 }
  0xcf   : > { %v7092_v17 = vpop.eup %4639  ;;  %4659 = vtanh.f32 %v832_v1  ;;  %v828_v1 = vsub.f32 %v6998_v50, %v492_v11 }
  0xd0   : > { %v7097_v24 = vpop.eup %4641  ;;  %4661 = vtanh.f32 %v833_v3 }
  0xd1   : > { %v7100_v28 = vpop.eup %4643  ;;  %4663 = vtanh.f32 %v834_v9  ;;  %v2419_v9 = vmul.f32 500.0, %v2355_v59  ;;  %v852_v59 = vsub.f32 %v6998_v50, %v507_v55 }
  0xd2   : > { %v7103_v33 = vpop.eup %4645  ;;  %4665 = vtanh.f32 %v835_v15  ;;  %2576 = vperm.xlu1 %4588, %v2418_v38   ;;  %2571 = vperm.xlu0 %4587, %v2417_v40   ;;  %v850_v40 = vsub.f32 %v6991_v45, %v507_v55 }
  0xd3   : > { %v7106_v43 = vpop.eup %4647  ;;  %4667 = vtanh.f32 %v836_v19  ;;  %v846_v19 = vsub.f32 %v6980_v34, %v507_v55 }
  0xd4   : > { %v7109_v47 = vpop.eup %4649  ;;  %4669 = vtanh.f32 %v821_v26  ;;  %v848_v26 = vsub.f32 %v6985_v39, %v507_v55 }
  0xd5   : > { %v7112_v52 = vpop.eup %4651  ;;  %4671 = vtanh.f32 %v822_v31 }
  0xd6   : > { %v7117_v60 = vpop.eup %4653  ;;  %4673 = vtanh.f32 %v823_v36  ;;  %2586 = vperm.xlu1 %4588, %v2420_v5   ;;  %2581 = vperm.xlu0 %4587, %v2419_v9   ;;  %v849_v36 = vsub.f32 %v6987_v41, %v507_v55 }
  0xd7   : > { %13416 = vst [vmem:[#allocation21_spill] sm:$0xff] %v7117_v60  ;;  %v7120_v63 = vpop.eup %4655  ;;  %4675 = vtanh.f32 %v824_v46  ;;  %v502_v46 = vpop.permute.xlu0 %501 }
  0xd8   : > { %13417 = vst [vmem:[#allocation22_spill] sm:$0xff] %v7120_v63  ;;  %v7123_v3 = vpop.eup %4657  ;;  %4677 = vtanh.f32 %v825_v51  ;;  %v838_v5 = vsub.f32 %v6980_v34, %v502_v46 }
  0xd9   : > { %13418 = vst [vmem:[#allocation23_spill] sm:$0xff] %v7123_v3  ;;  %v7126_v15 = vpop.eup %4659  ;;  %4679 = vtanh.f32 %v826_v53  ;;  %v851_v53 = vsub.f32 %v6995_v48, %v507_v55  ;;  %v840_v55 = vsub.f32 %v6985_v39, %v502_v46 }
  0xda   : > { %13419 = vst [vmem:[#allocation24_spill] sm:$0xff] %v7126_v15  ;;  %v7129_v21 = vpop.eup %4661  ;;  %4681 = vtanh.f32 %v827_v61 }
  0xdb   : > { %13420 = vst [vmem:[#allocation25_spill] sm:$0xff] %v7129_v21  ;;  %v7132_v11 = vpop.eup %4663  ;;  %4683 = vtanh.f32 %v828_v1  ;;  %v837_v1 = vsub.f32 %v6977_v29, %v502_v46 }
  0xdc   : > { %13421 = vst [vmem:[#allocation26_spill] sm:$0xff] %v7132_v11  ;;  %v7135_v31 = vpop.eup %4665  ;;  %4685 = vtanh.f32 %v845_v4 }
  0xdd   : > { %13422 = vst [vmem:[#allocation27_spill] sm:$0xff] %v7135_v31  ;;  %v7138_v38 = vpop.eup %4667  ;;  %4687 = vtanh.f32 %v846_v19  ;;  %v839_v19 = vsub.f32 %v6983_v37, %v502_v46 }
  0xde   : > { %13423 = vst [vmem:[#allocation28_spill] sm:$0xff] %v7138_v38  ;;  %v7141_v51 = vpop.eup %4669  ;;  %4689 = vtanh.f32 %v847_v22 }
  0xdf   : > { %13424 = vst [vmem:[#allocation29_spill] sm:$0xff] %v7141_v51  ;;  %v7144_v57 = vpop.eup %4671  ;;  %4691 = vtanh.f32 %v848_v26  ;;  %v2358_v26 = vld [vmem:[%s6877_s29 + $0xc8] sm:$0xff] }
  0xe0   : > { %13425 = vst [vmem:[#allocation30_spill] sm:$0xff] %v7144_v57  ;;  %v7147_v61 = vpop.eup %4673  ;;  %4693 = vtanh.f32 %v849_v36  ;;  %v841_v57 = vsub.f32 %v6987_v41, %v502_v46 }
  0xe1   : > { %13426 = vst [vmem:[#allocation31_spill] sm:$0xff] %v7147_v61  ;;  %v7150_v4 = vpop.eup %4675  ;;  %4695 = vtanh.f32 %v850_v40  ;;  %v2357_v61 = vld [vmem:[%s6877_s29 + $0xc0] sm:$0xff]  ;;  %v2422_v40 = vmul.f32 500.0, %v2358_v26 }
  0xe2   : > { %13427 = vst [vmem:[#allocation32_spill] sm:$0xff] %v7150_v4  ;;  %v7153_v9 = vpop.eup %4677  ;;  %4697 = vtanh.f32 %v851_v53  ;;  %v2421_v4 = vmul.f32 500.0, %v2357_v61  ;;  %v842_v53 = vsub.f32 %v6991_v45, %v502_v46 }
  0xe3   : > { %13428 = vst [vmem:[#allocation33_spill] sm:$0xff] %v7153_v9  ;;  %v7156_v22 = vpop.eup %4679  ;;  %4699 = vtanh.f32 %v852_v59  ;;  %v517_v9 = vpop.permute.xlu1 %516  ;;  %v843_v59 = vsub.f32 %v6995_v48, %v502_v46  ;;  %2596 = vperm.xlu1 %4588, %v2422_v40  }
  0xe4   : > { %13429 = vst [vmem:[#allocation34_spill] sm:$0xff] %v7156_v22  ;;  %v7161_v36 = vpop.eup %4681  ;;  %4701 = vtanh.f32 %v837_v1  ;;  %2591 = vperm.xlu0 %4587, %v2421_v4   ;;  %v861_v61 = vsub.f32 %v6977_v29, %v517_v9  ;;  %v863_v4 = vsub.f32 %v6983_v37, %v517_v9 }
  0xe5   : > { %13430 = vst [vmem:[#allocation35_spill] sm:$0xff] %v7161_v36  ;;  %v7164_v51 = vpop.eup %4683  ;;  %4703 = vtanh.f32 %v838_v5  ;;  %v844_v36 = vsub.f32 %v6998_v50, %v502_v46  ;;  %v862_v5 = vsub.f32 %v6980_v34, %v517_v9  ;;  %v864_v46 = vsub.f32 %v6985_v39, %v517_v9 }
  0xe6   : > { %13431 = vst [vmem:[#allocation36_spill] sm:$0xff] %v7164_v51  ;;  %v7167_v38 = vpop.eup %4685  ;;  %4705 = vtanh.f32 %v839_v19 }
  0xe7   : > { %13432 = vst [vmem:[#allocation37_spill] sm:$0xff] %v7167_v38  ;;  %v7170_v22 = vpop.eup %4687  ;;  %4707 = vtanh.f32 %v840_v55 }
  0xe8   : > { %13433 = vst [vmem:[#allocation38_spill] sm:$0xff] %v7170_v22  ;;  %v7173_v1 = vpop.eup %4689  ;;  %4709 = vtanh.f32 %v841_v57  ;;  %v865_v57 = vsub.f32 %v6987_v41, %v517_v9 }
  0xe9   : > { %13434 = vst [vmem:[#allocation39_spill] sm:$0xff] %v7173_v1  ;;  %v7176_v26 = vpop.eup %4691  ;;  %4711 = vtanh.f32 %v842_v53  ;;  %v866_v53 = vsub.f32 %v6991_v45, %v517_v9 }
  0xea   : > { %13435 = vst [vmem:[#allocation40_spill] sm:$0xff] %v7176_v26  ;;  %v7179_v38 = vpop.eup %4693  ;;  %4713 = vtanh.f32 %v843_v59  ;;  %v512_v26 = vpop.permute.xlu0 %511  ;;  %v867_v59 = vsub.f32 %v6995_v48, %v517_v9 }
  0xeb   : > { %13436 = vst [vmem:[#allocation41_spill] sm:$0xff] %v7179_v38  ;;  %v7182_v19 = vpop.eup %4695  ;;  %4715 = vtanh.f32 %v844_v36  ;;  %v857_v1 = vsub.f32 %v6987_v41, %v512_v26 }
  0xec   : > { %13437 = vst [vmem:[#allocation42_spill] sm:$0xff] %v7182_v19  ;;  %v7185_v55 = vpop.eup %4697  ;;  %4717 = vtanh.f32 %v861_v61  ;;  %v853_v61 = vsub.f32 %v6977_v29, %v512_v26 }
  0xed   : > { %13438 = vst [vmem:[#allocation43_spill] sm:$0xff] %v7185_v55  ;;  %v7188_v40 = vpop.eup %4699  ;;  %4719 = vtanh.f32 %v862_v5  ;;  %v868_v55 = vsub.f32 %v6998_v50, %v517_v9  ;;  %v854_v5 = vsub.f32 %v6980_v34, %v512_v26  ;;  %v856_v9 = vsub.f32 %v6985_v39, %v512_v26 }
  0xee   : > { %13439 = vst [vmem:[#allocation44_spill] sm:$0xff] %v7188_v40  ;;  %v7191_v38 = vpop.eup %4701  ;;  %4721 = vtanh.f32 %v863_v4  ;;  %v855_v4 = vsub.f32 %v6983_v37, %v512_v26 }
  0xef   : > { %13440 = vst [vmem:[#allocation45_spill] sm:$0xff] %v7191_v38  ;;  %v7194_v36 = vpop.eup %4703  ;;  %4723 = vtanh.f32 %v864_v46  ;;  %v2360_v46 = vld [vmem:[%s6877_s29 + $0xd8] sm:$0xff] }
  0xf0   : > { %13441 = vst [vmem:[#allocation46_spill] sm:$0xff] %v7194_v36  ;;  %v7197_v19 = vpop.eup %4705  ;;  %4725 = vtanh.f32 %v865_v57 }
  0xf1   : > { %13442 = vst [vmem:[#allocation47_spill] sm:$0xff] %v7197_v19  ;;  %v7200_v40 = vpop.eup %4707  ;;  %4727 = vtanh.f32 %v866_v53  ;;  %v2359_v19 = vld [vmem:[%s6877_s29 + $0xd0] sm:$0xff]  ;;  %v2424_v53 = vmul.f32 500.0, %v2360_v46 }
  0xf2   : > { %13443 = vst [vmem:[#allocation48_spill] sm:$0xff] %v7200_v40  ;;  %v7203_v38 = vpop.eup %4709  ;;  %4729 = vtanh.f32 %v867_v59  ;;  %v2423_v40 = vmul.f32 500.0, %v2359_v19  ;;  %v858_v59 = vsub.f32 %v6991_v45, %v512_v26 }
  0xf3   : > { %13444 = vst [vmem:[#allocation49_spill] sm:$0xff] %v7203_v38  ;;  %v7206_v36 = vpop.eup %4711  ;;  %4731 = vtanh.f32 %v868_v55  ;;  %v527_v38 = vpop.permute.xlu1 %526  ;;  %v859_v55 = vsub.f32 %v6995_v48, %v512_v26  ;;  %2606 = vperm.xlu1 %4588, %v2424_v53  }
  0xf4   : > { %13445 = vst [vmem:[#allocation50_spill] sm:$0xff] %v7206_v36  ;;  %v7211_v57 = vpop.eup %4713  ;;  %4733 = vtanh.f32 %v853_v61  ;;  %2601 = vperm.xlu0 %4587, %v2423_v40   ;;  %v877_v19 = vsub.f32 %v6977_v29, %v527_v38  ;;  %v879_v40 = vsub.f32 %v6983_v37, %v527_v38 }
  0xf5   : > { %13446 = vst [vmem:[#allocation51_spill] sm:$0xff] %v7211_v57  ;;  %v7214_v22 = vpop.eup %4715  ;;  %4735 = vtanh.f32 %v854_v5  ;;  %v860_v57 = vsub.f32 %v6998_v50, %v512_v26  ;;  %v878_v5 = vsub.f32 %v6980_v34, %v527_v38  ;;  %v880_v26 = vsub.f32 %v6985_v39, %v527_v38 }
  0xf6   : > { %13447 = vst [vmem:[#allocation52_spill] sm:$0xff] %v7214_v22  ;;  %v7217_v51 = vpop.eup %4717  ;;  %4737 = vtanh.f32 %v855_v4 }
  0xf7   : > { %13448 = vst [vmem:[#allocation53_spill] sm:$0xff] %v7217_v51  ;;  %v7220_v36 = vpop.eup %4719  ;;  %4739 = vtanh.f32 %v856_v9 }
  0xf8   : > { %13449 = vst [vmem:[#allocation54_spill] sm:$0xff] %v7220_v36  ;;  %v7223_v61 = vpop.eup %4721  ;;  %4741 = vtanh.f32 %v857_v1  ;;  %v881_v1 = vsub.f32 %v6987_v41, %v527_v38 }
  0xf9   : > { %13450 = vst [vmem:[#allocation55_spill] sm:$0xff] %v7223_v61  ;;  %v7226_v46 = vpop.eup %4723  ;;  %4743 = vtanh.f32 %v858_v59  ;;  %v882_v59 = vsub.f32 %v6991_v45, %v527_v38 }
  0xfa   : > { %13451 = vst [vmem:[#allocation56_spill] sm:$0xff] %v7226_v46  ;;  %v7229_v51 = vpop.eup %4725  ;;  %4745 = vtanh.f32 %v859_v55  ;;  %v522_v46 = vpop.permute.xlu0 %521  ;;  %v883_v55 = vsub.f32 %v6995_v48, %v527_v38 }
  0xfb   : > { %13452 = vst [vmem:[#allocation57_spill] sm:$0xff] %v7229_v51  ;;  %v7232_v4 = vpop.eup %4727  ;;  %4747 = vtanh.f32 %v860_v57  ;;  %v873_v61 = vsub.f32 %v6987_v41, %v522_v46 }
  0xfc   : > { %13453 = vst [vmem:[#allocation58_spill] sm:$0xff] %v7232_v4  ;;  %v7235_v9 = vpop.eup %4729  ;;  %4749 = vtanh.f32 %v877_v19  ;;  %v869_v19 = vsub.f32 %v6977_v29, %v522_v46 }
  0xfd   : > { %13454 = vst [vmem:[#allocation59_spill] sm:$0xff] %v7235_v9  ;;  %v7238_v53 = vpop.eup %4731  ;;  %4751 = vtanh.f32 %v878_v5  ;;  %v884_v9 = vsub.f32 %v6998_v50, %v527_v38  ;;  %v870_v5 = vsub.f32 %v6980_v34, %v522_v46  ;;  %v872_v38 = vsub.f32 %v6985_v39, %v522_v46 }
  0xfe   : > { %13455 = vst [vmem:[#allocation60_spill] sm:$0xff] %v7238_v53  ;;  %v7241_v51 = vpop.eup %4733  ;;  %4753 = vtanh.f32 %v879_v40  ;;  %v871_v40 = vsub.f32 %v6983_v37, %v522_v46 }
  0xff   : > { %13456 = vst [vmem:[#allocation61_spill] sm:$0xff] %v7241_v51  ;;  %v7244_v57 = vpop.eup %4735  ;;  %4755 = vtanh.f32 %v880_v26  ;;  %v2362_v26 = vld [vmem:[%s6877_s29 + $0xe8] sm:$0xff] }
 0x100   : > { %13457 = vst [vmem:[#allocation62_spill] sm:$0xff] %v7244_v57  ;;  %v7247_v4 = vpop.eup %4737  ;;  %4757 = vtanh.f32 %v881_v1 }
 0x101   : > { %13458 = vst [vmem:[#allocation63_spill] sm:$0xff] %v7247_v4  ;;  %v7250_v53 = vpop.eup %4739  ;;  %4759 = vtanh.f32 %v882_v59  ;;  %v2361_v4 = vld [vmem:[%s6877_s29 + $0xe0] sm:$0xff]  ;;  %v2426_v59 = vmul.f32 500.0, %v2362_v26 }
 0x102   : > { %13459 = vst [vmem:[#allocation64_spill] sm:$0xff] %v7250_v53  ;;  %v7253_v51 = vpop.eup %4741  ;;  %4761 = vtanh.f32 %v883_v55  ;;  %v2425_v53 = vmul.f32 500.0, %v2361_v4  ;;  %v874_v55 = vsub.f32 %v6991_v45, %v522_v46 }
 0x103   : > { %13460 = vst [vmem:[#allocation65_spill] sm:$0xff] %v7253_v51  ;;  %v7256_v57 = vpop.eup %4743  ;;  %4763 = vtanh.f32 %v884_v9  ;;  %v537_v51 = vpop.permute.xlu1 %536  ;;  %v875_v9 = vsub.f32 %v6995_v48, %v522_v46  ;;  %2616 = vperm.xlu1 %4588, %v2426_v59  }
 0x104   : > { %13461 = vst [vmem:[#allocation66_spill] sm:$0xff] %v7256_v57  ;;  %v7261_v1 = vpop.eup %4745  ;;  %4765 = vtanh.f32 %v869_v19  ;;  %2611 = vperm.xlu0 %4587, %v2425_v53   ;;  %v893_v4 = vsub.f32 %v6977_v29, %v537_v51  ;;  %v895_v53 = vsub.f32 %v6983_v37, %v537_v51 }
 0x105   : > { %13462 = vst [vmem:[#allocation67_spill] sm:$0xff] %v7261_v1  ;;  %v7264_v36 = vpop.eup %4747  ;;  %4767 = vtanh.f32 %v870_v5  ;;  %v876_v1 = vsub.f32 %v6998_v50, %v522_v46  ;;  %v894_v5 = vsub.f32 %v6980_v34, %v537_v51  ;;  %v896_v46 = vsub.f32 %v6985_v39, %v537_v51 }
 0x106   : > { %13463 = vst [vmem:[#allocation68_spill] sm:$0xff] %v7264_v36  ;;  %v7267_v22 = vpop.eup %4749  ;;  %4769 = vtanh.f32 %v871_v40 }
 0x107   : > { %13464 = vst [vmem:[#allocation69_spill] sm:$0xff] %v7267_v22  ;;  %v7270_v57 = vpop.eup %4751  ;;  %4771 = vtanh.f32 %v872_v38 }
 0x108   : > { %13465 = vst [vmem:[#allocation70_spill] sm:$0xff] %v7270_v57  ;;  %v7273_v19 = vpop.eup %4753  ;;  %4773 = vtanh.f32 %v873_v61  ;;  %v897_v61 = vsub.f32 %v6987_v41, %v537_v51 }
 0x109   : > { %13466 = vst [vmem:[#allocation71_spill] sm:$0xff] %v7273_v19  ;;  %v7276_v26 = vpop.eup %4755  ;;  %4775 = vtanh.f32 %v874_v55  ;;  %v898_v55 = vsub.f32 %v6991_v45, %v537_v51 }
 0x10a   : > { %13467 = vst [vmem:[#allocation72_spill] sm:$0xff] %v7276_v26  ;;  %v7279_v22 = vpop.eup %4757  ;;  %4777 = vtanh.f32 %v875_v9  ;;  %v532_v26 = vpop.permute.xlu0 %531  ;;  %v899_v9 = vsub.f32 %v6995_v48, %v537_v51 }
 0x10b   : > { %13468 = vst [vmem:[#allocation73_spill] sm:$0xff] %v7279_v22  ;;  %v7282_v40 = vpop.eup %4759  ;;  %4779 = vtanh.f32 %v876_v1  ;;  %v889_v19 = vsub.f32 %v6987_v41, %v532_v26 }
 0x10c   : > { %13469 = vst [vmem:[#allocation74_spill] sm:$0xff] %v7282_v40  ;;  %v7285_v38 = vpop.eup %4761  ;;  %4781 = vtanh.f32 %v893_v4  ;;  %v885_v4 = vsub.f32 %v6977_v29, %v532_v26 }
 0x10d   : > { %13470 = vst [vmem:[#allocation75_spill] sm:$0xff] %v7285_v38  ;;  %v7288_v59 = vpop.eup %4763  ;;  %4783 = vtanh.f32 %v894_v5  ;;  %v900_v38 = vsub.f32 %v6998_v50, %v537_v51  ;;  %v886_v5 = vsub.f32 %v6980_v34, %v532_v26  ;;  %v888_v51 = vsub.f32 %v6985_v39, %v532_v26 }
 0x10e   : > { %13471 = vst [vmem:[#allocation76_spill] sm:$0xff] %v7288_v59  ;;  %v7291_v22 = vpop.eup %4765  ;;  %4785 = vtanh.f32 %v895_v53  ;;  %v887_v53 = vsub.f32 %v6983_v37, %v532_v26 }
 0x10f   : > { %13472 = vst [vmem:[#allocation77_spill] sm:$0xff] %v7291_v22  ;;  %v7294_v1 = vpop.eup %4767  ;;  %4787 = vtanh.f32 %v896_v46  ;;  %v2364_v46 = vld [vmem:[%s6877_s29 + $0xf8] sm:$0xff] }
 0x110   : > { %13473 = vst [vmem:[#allocation78_spill] sm:$0xff] %v7294_v1  ;;  %v7297_v40 = vpop.eup %4769  ;;  %4789 = vtanh.f32 %v897_v61 }
 0x111   : > { %13474 = vst [vmem:[#allocation79_spill] sm:$0xff] %v7297_v40  ;;  %v7300_v59 = vpop.eup %4771  ;;  %4791 = vtanh.f32 %v898_v55  ;;  %v2363_v40 = vld [vmem:[%s6877_s29 + $0xf0] sm:$0xff]  ;;  %v2428_v55 = vmul.f32 500.0, %v2364_v46 }
 0x112   : > { %13475 = vst [vmem:[#allocation80_spill] sm:$0xff] %v7300_v59  ;;  %v7303_v22 = vpop.eup %4773  ;;  %4793 = vtanh.f32 %v899_v9  ;;  %v2427_v59 = vmul.f32 500.0, %v2363_v40  ;;  %v890_v9 = vsub.f32 %v6991_v45, %v532_v26 }
 0x113   : > { %13476 = vst [vmem:[#allocation81_spill] sm:$0xff] %v7303_v22  ;;  %v7306_v1 = vpop.eup %4775  ;;  %4795 = vtanh.f32 %v900_v38  ;;  %v547_v22 = vpop.permute.xlu1 %546  ;;  %v891_v38 = vsub.f32 %v6995_v48, %v532_v26  ;;  %2626 = vperm.xlu1 %4588, %v2428_v55  }
 0x114   : > { %13477 = vst [vmem:[#allocation82_spill] sm:$0xff] %v7306_v1  ;;  %v7311_v61 = vpop.eup %4777  ;;  %4797 = vtanh.f32 %v885_v4  ;;  %2621 = vperm.xlu0 %4587, %v2427_v59   ;;  %v909_v40 = vsub.f32 %v6977_v29, %v547_v22  ;;  %v911_v59 = vsub.f32 %v6983_v37, %v547_v22 }
 0x115   : > { %13478 = vst [vmem:[#allocation83_spill] sm:$0xff] %v7311_v61  ;;  %v7314_v57 = vpop.eup %4779  ;;  %4799 = vtanh.f32 %v886_v5  ;;  %v892_v61 = vsub.f32 %v6998_v50, %v532_v26  ;;  %v910_v5 = vsub.f32 %v6980_v34, %v547_v22  ;;  %v912_v26 = vsub.f32 %v6985_v39, %v547_v22 }
 0x116   : > { %13479 = vst [vmem:[#allocation84_spill] sm:$0xff] %v7314_v57  ;;  %v7317_v36 = vpop.eup %4781  ;;  %4801 = vtanh.f32 %v887_v53 }
 0x117   : > { %13480 = vst [vmem:[#allocation85_spill] sm:$0xff] %v7317_v36  ;;  %v7320_v1 = vpop.eup %4783  ;;  %4803 = vtanh.f32 %v888_v51 }
 0x118   : > { %13481 = vst [vmem:[#allocation86_spill] sm:$0xff] %v7320_v1  ;;  %v7323_v4 = vpop.eup %4785  ;;  %4805 = vtanh.f32 %v889_v19  ;;  %v913_v19 = vsub.f32 %v6987_v41, %v547_v22 }
 0x119   : > { %13482 = vst [vmem:[#allocation87_spill] sm:$0xff] %v7323_v4  ;;  %v7326_v46 = vpop.eup %4787  ;;  %4807 = vtanh.f32 %v890_v9  ;;  %v914_v9 = vsub.f32 %v6991_v45, %v547_v22 }
 0x11a   : > { %13483 = vst [vmem:[#allocation88_spill] sm:$0xff] %v7326_v46  ;;  %v7329_v36 = vpop.eup %4789  ;;  %4809 = vtanh.f32 %v891_v38  ;;  %v542_v46 = vpop.permute.xlu0 %541  ;;  %v915_v38 = vsub.f32 %v6995_v48, %v547_v22 }
 0x11b   : > { %13484 = vst [vmem:[#allocation89_spill] sm:$0xff] %v7329_v36  ;;  %v7332_v53 = vpop.eup %4791  ;;  %4811 = vtanh.f32 %v892_v61  ;;  %v905_v4 = vsub.f32 %v6987_v41, %v542_v46 }
 0x11c   : > { %13485 = vst [vmem:[#allocation90_spill] sm:$0xff] %v7332_v53  ;;  %v7335_v51 = vpop.eup %4793  ;;  %4813 = vtanh.f32 %v909_v40  ;;  %v901_v40 = vsub.f32 %v6977_v29, %v542_v46 }
 0x11d   : > { %13486 = vst [vmem:[#allocation91_spill] sm:$0xff] %v7335_v51  ;;  %v7338_v55 = vpop.eup %4795  ;;  %4815 = vtanh.f32 %v910_v5  ;;  %v916_v51 = vsub.f32 %v6998_v50, %v547_v22  ;;  %v902_v5 = vsub.f32 %v6980_v34, %v542_v46  ;;  %v904_v22 = vsub.f32 %v6985_v39, %v542_v46 }
 0x11e   : > { %13487 = vst [vmem:[#allocation92_spill] sm:$0xff] %v7338_v55  ;;  %v7341_v36 = vpop.eup %4797  ;;  %4817 = vtanh.f32 %v911_v59  ;;  %v903_v59 = vsub.f32 %v6983_v37, %v542_v46 }
 0x11f   : > { %13488 = vst [vmem:[#allocation93_spill] sm:$0xff] %v7341_v36  ;;  %v7344_v61 = vpop.eup %4799  ;;  %4819 = vtanh.f32 %v912_v26  ;;  %v2366_v26 = vld [vmem:[%s6877_s29 + $0x108] sm:$0xff] }
 0x120   : > { %13489 = vst [vmem:[#allocation94_spill] sm:$0xff] %v7344_v61  ;;  %v7347_v53 = vpop.eup %4801  ;;  %4821 = vtanh.f32 %v913_v19 }
 0x121   : > { %13490 = vst [vmem:[#allocation95_spill] sm:$0xff] %v7347_v53  ;;  %v7350_v55 = vpop.eup %4803  ;;  %4823 = vtanh.f32 %v914_v9  ;;  %v2365_v53 = vld [vmem:[%s6877_s29 + $0x100] sm:$0xff]  ;;  %v2430_v9 = vmul.f32 500.0, %v2366_v26 }
 0x122   : > { %13491 = vst [vmem:[#allocation96_spill] sm:$0xff] %v7350_v55  ;;  %v7353_v36 = vpop.eup %4805  ;;  %4825 = vtanh.f32 %v915_v38  ;;  %v2429_v55 = vmul.f32 500.0, %v2365_v53  ;;  %v906_v38 = vsub.f32 %v6991_v45, %v542_v46 }
 0x123   : > { %13492 = vst [vmem:[#allocation97_spill] sm:$0xff] %v7353_v36  ;;  %v7356_v61 = vpop.eup %4807  ;;  %4827 = vtanh.f32 %v916_v51  ;;  %v557_v36 = vpop.permute.xlu1 %556  ;;  %v907_v51 = vsub.f32 %v6995_v48, %v542_v46  ;;  %2636 = vperm.xlu1 %4588, %v2430_v9  }
 0x124   : > { %13493 = vst [vmem:[#allocation98_spill] sm:$0xff] %v7356_v61  ;;  %v7361_v19 = vpop.eup %4809  ;;  %4829 = vtanh.f32 %v901_v40  ;;  %2631 = vperm.xlu0 %4587, %v2429_v55   ;;  %v925_v53 = vsub.f32 %v6977_v29, %v557_v36  ;;  %v927_v55 = vsub.f32 %v6983_v37, %v557_v36 }
 0x125   : > { %13494 = vst [vmem:[#allocation99_spill] sm:$0xff] %v7361_v19  ;;  %v7364_v1 = vpop.eup %4811  ;;  %4831 = vtanh.f32 %v902_v5  ;;  %v908_v19 = vsub.f32 %v6998_v50, %v542_v46  ;;  %v926_v5 = vsub.f32 %v6980_v34, %v557_v36  ;;  %v928_v46 = vsub.f32 %v6985_v39, %v557_v36 }
 0x126   : > { %13495 = vst [vmem:[#allocation100_spill] sm:$0xff] %v7364_v1  ;;  %v7367_v57 = vpop.eup %4813  ;;  %4833 = vtanh.f32 %v903_v59 }
 0x127   : > { %13496 = vst [vmem:[#allocation101_spill] sm:$0xff] %v7367_v57  ;;  %v7370_v61 = vpop.eup %4815  ;;  %4835 = vtanh.f32 %v904_v22 }
 0x128   : > { %13497 = vst [vmem:[#allocation102_spill] sm:$0xff] %v7370_v61  ;;  %v7373_v40 = vpop.eup %4817  ;;  %4837 = vtanh.f32 %v905_v4  ;;  %v929_v4 = vsub.f32 %v6987_v41, %v557_v36 }
 0x129   : > { %13498 = vst [vmem:[#allocation103_spill] sm:$0xff] %v7373_v40  ;;  %v7376_v26 = vpop.eup %4819  ;;  %4839 = vtanh.f32 %v906_v38  ;;  %v930_v38 = vsub.f32 %v6991_v45, %v557_v36 }
 0x12a   : > { %13499 = vst [vmem:[#allocation104_spill] sm:$0xff] %v7376_v26  ;;  %v7379_v57 = vpop.eup %4821  ;;  %4841 = vtanh.f32 %v907_v51  ;;  %v552_v26 = vpop.permute.xlu0 %551  ;;  %v931_v51 = vsub.f32 %v6995_v48, %v557_v36 }
 0x12b   : > { %13500 = vst [vmem:[#allocation105_spill] sm:$0xff] %v7379_v57  ;;  %v7382_v59 = vpop.eup %4823  ;;  %4843 = vtanh.f32 %v908_v19  ;;  %v921_v40 = vsub.f32 %v6987_v41, %v552_v26 }
 0x12c   : > { %13501 = vst [vmem:[#allocation106_spill] sm:$0xff] %v7382_v59  ;;  %v7385_v22 = vpop.eup %4825  ;;  %4845 = vtanh.f32 %v925_v53  ;;  %v917_v53 = vsub.f32 %v6977_v29, %v552_v26 }
 0x12d   : > { %13502 = vst [vmem:[#allocation107_spill] sm:$0xff] %v7385_v22  ;;  %v7388_v9 = vpop.eup %4827  ;;  %4847 = vtanh.f32 %v926_v5  ;;  %v932_v22 = vsub.f32 %v6998_v50, %v557_v36  ;;  %v918_v5 = vsub.f32 %v6980_v34, %v552_v26  ;;  %v920_v36 = vsub.f32 %v6985_v39, %v552_v26 }
 0x12e   : > { %13503 = vst [vmem:[#allocation108_spill] sm:$0xff] %v7388_v9  ;;  %v7391_v57 = vpop.eup %4829  ;;  %4849 = vtanh.f32 %v927_v55  ;;  %v919_v55 = vsub.f32 %v6983_v37, %v552_v26 }
 0x12f   : > { %13504 = vst [vmem:[#allocation109_spill] sm:$0xff] %v7391_v57  ;;  %v7394_v19 = vpop.eup %4831  ;;  %4851 = vtanh.f32 %v928_v46  ;;  %v2368_v46 = vld [vmem:[%s6877_s29 + $0x118] sm:$0xff] }
 0x130   : > { %13505 = vst [vmem:[#allocation110_spill] sm:$0xff] %v7394_v19  ;;  %v7397_v59 = vpop.eup %4833  ;;  %4853 = vtanh.f32 %v929_v4 }
 0x131   : > { %13506 = vst [vmem:[#allocation111_spill] sm:$0xff] %v7397_v59  ;;  %v7400_v9 = vpop.eup %4835  ;;  %4855 = vtanh.f32 %v930_v38  ;;  %v2367_v59 = vld [vmem:[%s6877_s29 + $0x110] sm:$0xff]  ;;  %v2432_v38 = vmul.f32 500.0, %v2368_v46 }
 0x132   : > { %13507 = vst [vmem:[#allocation112_spill] sm:$0xff] %v7400_v9  ;;  %v7403_v57 = vpop.eup %4837  ;;  %4857 = vtanh.f32 %v931_v51  ;;  %v2431_v9 = vmul.f32 500.0, %v2367_v59  ;;  %v922_v51 = vsub.f32 %v6991_v45, %v552_v26 }
 0x133   : > { %13508 = vst [vmem:[#allocation113_spill] sm:$0xff] %v7403_v57  ;;  %v7406_v19 = vpop.eup %4839  ;;  %4859 = vtanh.f32 %v932_v22  ;;  %v567_v57 = vpop.permute.xlu1 %566  ;;  %v923_v22 = vsub.f32 %v6995_v48, %v552_v26  ;;  %2646 = vperm.xlu1 %4588, %v2432_v38  }
 0x134   : > { %13509 = vst [vmem:[#allocation114_spill] sm:$0xff] %v7406_v19  ;;  %v7411_v4 = vpop.eup %4841  ;;  %4861 = vtanh.f32 %v917_v53  ;;  %2641 = vperm.xlu0 %4587, %v2431_v9   ;;  %v941_v59 = vsub.f32 %v6977_v29, %v567_v57  ;;  %v943_v9 = vsub.f32 %v6983_v37, %v567_v57 }
 0x135   : > { %13510 = vst [vmem:[#allocation115_spill] sm:$0xff] %v7411_v4  ;;  %v7414_v61 = vpop.eup %4843  ;;  %4863 = vtanh.f32 %v918_v5  ;;  %v924_v4 = vsub.f32 %v6998_v50, %v552_v26  ;;  %v942_v5 = vsub.f32 %v6980_v34, %v567_v57  ;;  %v944_v26 = vsub.f32 %v6985_v39, %v567_v57 }
 0x136   : > { %13511 = vst [vmem:[#allocation116_spill] sm:$0xff] %v7414_v61  ;;  %v7417_v1 = vpop.eup %4845  ;;  %4865 = vtanh.f32 %v919_v55 }
 0x137   : > { %13512 = vst [vmem:[#allocation117_spill] sm:$0xff] %v7417_v1  ;;  %v7420_v19 = vpop.eup %4847  ;;  %4867 = vtanh.f32 %v920_v36 }
 0x138   : > { %13513 = vst [vmem:[#allocation118_spill] sm:$0xff] %v7420_v19  ;;  %v7423_v53 = vpop.eup %4849  ;;  %4869 = vtanh.f32 %v921_v40  ;;  %v945_v40 = vsub.f32 %v6987_v41, %v567_v57 }
 0x139   : > { %13514 = vst [vmem:[#allocation119_spill] sm:$0xff] %v7423_v53  ;;  %v7426_v46 = vpop.eup %4851  ;;  %4871 = vtanh.f32 %v922_v51  ;;  %v946_v51 = vsub.f32 %v6991_v45, %v567_v57 }
 0x13a   : > { %13515 = vst [vmem:[#allocation120_spill] sm:$0xff] %v7426_v46  ;;  %v7429_v61 = vpop.eup %4853  ;;  %4873 = vtanh.f32 %v923_v22  ;;  %v562_v46 = vpop.permute.xlu0 %561  ;;  %v947_v22 = vsub.f32 %v6995_v48, %v567_v57 }
 0x13b   : > { %13516 = vst [vmem:[#allocation121_spill] sm:$0xff] %v7429_v61  ;;  %v7432_v55 = vpop.eup %4855  ;;  %4875 = vtanh.f32 %v924_v4  ;;  %v937_v53 = vsub.f32 %v6987_v41, %v562_v46 }
 0x13c   : > { %13517 = vst [vmem:[#allocation122_spill] sm:$0xff] %v7432_v55  ;;  %v7435_v36 = vpop.eup %4857  ;;  %4877 = vtanh.f32 %v941_v59  ;;  %v933_v59 = vsub.f32 %v6977_v29, %v562_v46 }
 0x13d   : > { %13518 = vst [vmem:[#allocation123_spill] sm:$0xff] %v7435_v36  ;;  %v7438_v38 = vpop.eup %4859  ;;  %4879 = vtanh.f32 %v942_v5  ;;  %v948_v36 = vsub.f32 %v6998_v50, %v567_v57  ;;  %v934_v5 = vsub.f32 %v6980_v34, %v562_v46  ;;  %v936_v57 = vsub.f32 %v6985_v39, %v562_v46 }
 0x13e   : > { %13519 = vst [vmem:[#allocation124_spill] sm:$0xff] %v7438_v38  ;;  %v7441_v61 = vpop.eup %4861  ;;  %4881 = vtanh.f32 %v943_v9  ;;  %v935_v9 = vsub.f32 %v6983_v37, %v562_v46 }
 0x13f   : > { %13520 = vst [vmem:[#allocation125_spill] sm:$0xff] %v7441_v61  ;;  %v7444_v4 = vpop.eup %4863  ;;  %4883 = vtanh.f32 %v944_v26  ;;  %v2370_v26 = vld [vmem:[%s6877_s29 + $0x128] sm:$0xff] }
 0x140   : > { %13521 = vst [vmem:[#allocation126_spill] sm:$0xff] %v7444_v4  ;;  %v7447_v55 = vpop.eup %4865  ;;  %4885 = vtanh.f32 %v945_v40 }
 0x141   : > { %13522 = vst [vmem:[#allocation127_spill] sm:$0xff] %v7447_v55  ;;  %v7450_v38 = vpop.eup %4867  ;;  %4887 = vtanh.f32 %v946_v51  ;;  %v2369_v55 = vld [vmem:[%s6877_s29 + $0x120] sm:$0xff]  ;;  %v2434_v51 = vmul.f32 500.0, %v2370_v26 }
 0x142   : > { %13523 = vst [vmem:[#allocation128_spill] sm:$0xff] %v7450_v38  ;;  %v7453_v61 = vpop.eup %4869  ;;  %4889 = vtanh.f32 %v947_v22  ;;  %v2433_v38 = vmul.f32 500.0, %v2369_v55  ;;  %v938_v22 = vsub.f32 %v6991_v45, %v562_v46 }
 0x143   : > { %13524 = vst [vmem:[#allocation129_spill] sm:$0xff] %v7453_v61  ;;  %v7456_v4 = vpop.eup %4871  ;;  %4891 = vtanh.f32 %v948_v36  ;;  %v577_v61 = vpop.permute.xlu1 %576  ;;  %v939_v36 = vsub.f32 %v6995_v48, %v562_v46  ;;  %2656 = vperm.xlu1 %4588, %v2434_v51  }
 0x144   : > { %13525 = vst [vmem:[#allocation130_spill] sm:$0xff] %v7456_v4  ;;  %v7461_v40 = vpop.eup %4873  ;;  %4893 = vtanh.f32 %v933_v59  ;;  %2651 = vperm.xlu0 %4587, %v2433_v38   ;;  %v957_v55 = vsub.f32 %v6977_v29, %v577_v61  ;;  %v959_v38 = vsub.f32 %v6983_v37, %v577_v61 }
 0x145   : > { %13526 = vst [vmem:[#allocation131_spill] sm:$0xff] %v7461_v40  ;;  %v7464_v19 = vpop.eup %4875  ;;  %4895 = vtanh.f32 %v934_v5  ;;  %v940_v40 = vsub.f32 %v6998_v50, %v562_v46  ;;  %v958_v5 = vsub.f32 %v6980_v34, %v577_v61  ;;  %v960_v46 = vsub.f32 %v6985_v39, %v577_v61 }
 0x146   : > { %13527 = vst [vmem:[#allocation132_spill] sm:$0xff] %v7464_v19  ;;  %v7467_v1 = vpop.eup %4877  ;;  %4897 = vtanh.f32 %v935_v9 }
 0x147   : > { %13528 = vst [vmem:[#allocation133_spill] sm:$0xff] %v7467_v1  ;;  %v7470_v4 = vpop.eup %4879  ;;  %4899 = vtanh.f32 %v936_v57 }
 0x148   : > { %13529 = vst [vmem:[#allocation134_spill] sm:$0xff] %v7470_v4  ;;  %v7473_v59 = vpop.eup %4881  ;;  %4901 = vtanh.f32 %v937_v53  ;;  %v961_v53 = vsub.f32 %v6987_v41, %v577_v61 }
 0x149   : > { %13530 = vst [vmem:[#allocation135_spill] sm:$0xff] %v7473_v59  ;;  %v7476_v26 = vpop.eup %4883  ;;  %4903 = vtanh.f32 %v938_v22  ;;  %v962_v22 = vsub.f32 %v6991_v45, %v577_v61 }
 0x14a   : > { %13531 = vst [vmem:[#allocation136_spill] sm:$0xff] %v7476_v26  ;;  %v7479_v1 = vpop.eup %4885  ;;  %4905 = vtanh.f32 %v939_v36  ;;  %v572_v26 = vpop.permute.xlu0 %571  ;;  %v963_v36 = vsub.f32 %v6995_v48, %v577_v61 }
 0x14b   : > { %13532 = vst [vmem:[#allocation137_spill] sm:$0xff] %v7479_v1  ;;  %v7482_v9 = vpop.eup %4887  ;;  %4907 = vtanh.f32 %v940_v40  ;;  %v953_v59 = vsub.f32 %v6987_v41, %v572_v26 }
 0x14c   : > { %13533 = vst [vmem:[#allocation138_spill] sm:$0xff] %v7482_v9  ;;  %v7485_v57 = vpop.eup %4889  ;;  %4909 = vtanh.f32 %v957_v55  ;;  %v949_v55 = vsub.f32 %v6977_v29, %v572_v26 }
 0x14d   : > { %13534 = vst [vmem:[#allocation139_spill] sm:$0xff] %v7485_v57  ;;  %v7488_v51 = vpop.eup %4891  ;;  %4911 = vtanh.f32 %v958_v5  ;;  %v964_v57 = vsub.f32 %v6998_v50, %v577_v61  ;;  %v950_v5 = vsub.f32 %v6980_v34, %v572_v26  ;;  %v952_v61 = vsub.f32 %v6985_v39, %v572_v26 }
 0x14e   : > { %13535 = vst [vmem:[#allocation140_spill] sm:$0xff] %v7488_v51  ;;  %v7491_v1 = vpop.eup %4893  ;;  %4913 = vtanh.f32 %v959_v38  ;;  %v951_v38 = vsub.f32 %v6983_v37, %v572_v26 }
 0x14f   : > { %13536 = vst [vmem:[#allocation141_spill] sm:$0xff] %v7491_v1  ;;  %v7494_v40 = vpop.eup %4895  ;;  %4915 = vtanh.f32 %v960_v46  ;;  %v2372_v46 = vld [vmem:[%s6877_s29 + $0x138] sm:$0xff] }
 0x150   : > { %13537 = vst [vmem:[#allocation142_spill] sm:$0xff] %v7494_v40  ;;  %v7497_v9 = vpop.eup %4897  ;;  %4917 = vtanh.f32 %v961_v53 }
 0x151   : > { %13538 = vst [vmem:[#allocation143_spill] sm:$0xff] %v7497_v9  ;;  %v7500_v51 = vpop.eup %4899  ;;  %4919 = vtanh.f32 %v962_v22  ;;  %v2371_v9 = vld [vmem:[%s6877_s29 + $0x130] sm:$0xff]  ;;  %v2436_v22 = vmul.f32 500.0, %v2372_v46 }
 0x152   : > { %13539 = vst [vmem:[#allocation144_spill] sm:$0xff] %v7500_v51  ;;  %v7503_v1 = vpop.eup %4901  ;;  %4921 = vtanh.f32 %v963_v36  ;;  %v2435_v51 = vmul.f32 500.0, %v2371_v9  ;;  %v954_v36 = vsub.f32 %v6991_v45, %v572_v26 }
 0x153   : > { %13540 = vst [vmem:[#allocation145_spill] sm:$0xff] %v7503_v1  ;;  %v7506_v40 = vpop.eup %4903  ;;  %4923 = vtanh.f32 %v964_v57  ;;  %v587_v1 = vpop.permute.xlu1 %586  ;;  %v955_v57 = vsub.f32 %v6995_v48, %v572_v26  ;;  %2666 = vperm.xlu1 %4588, %v2436_v22  }
 0x154   : > { %13541 = vst [vmem:[#allocation146_spill] sm:$0xff] %v7506_v40  ;;  %v7511_v53 = vpop.eup %4905  ;;  %4925 = vtanh.f32 %v949_v55  ;;  %2661 = vperm.xlu0 %4587, %v2435_v51   ;;  %v973_v9 = vsub.f32 %v6977_v29, %v587_v1  ;;  %v975_v51 = vsub.f32 %v6983_v37, %v587_v1 }
 0x155   : > { %13542 = vst [vmem:[#allocation147_spill] sm:$0xff] %v7511_v53  ;;  %v7514_v4 = vpop.eup %4907  ;;  %4927 = vtanh.f32 %v950_v5  ;;  %v956_v53 = vsub.f32 %v6998_v50, %v572_v26  ;;  %v974_v5 = vsub.f32 %v6980_v34, %v587_v1  ;;  %v976_v26 = vsub.f32 %v6985_v39, %v587_v1 }
 0x156   : > { %13543 = vst [vmem:[#allocation148_spill] sm:$0xff] %v7514_v4  ;;  %v7517_v19 = vpop.eup %4909  ;;  %4929 = vtanh.f32 %v951_v38 }
 0x157   : > { %13544 = vst [vmem:[#allocation149_spill] sm:$0xff] %v7517_v19  ;;  %v7520_v40 = vpop.eup %4911  ;;  %4931 = vtanh.f32 %v952_v61 }
 0x158   : > { %13545 = vst [vmem:[#allocation150_spill] sm:$0xff] %v7520_v40  ;;  %v7523_v55 = vpop.eup %4913  ;;  %4933 = vtanh.f32 %v953_v59  ;;  %v977_v59 = vsub.f32 %v6987_v41, %v587_v1 }
 0x159   : > { %13546 = vst [vmem:[#allocation151_spill] sm:$0xff] %v7523_v55  ;;  %v7526_v46 = vpop.eup %4915  ;;  %4935 = vtanh.f32 %v954_v36  ;;  %v978_v36 = vsub.f32 %v6991_v45, %v587_v1 }
 0x15a   : > { %13547 = vst [vmem:[#allocation152_spill] sm:$0xff] %v7526_v46  ;;  %v7529_v19 = vpop.eup %4917  ;;  %4937 = vtanh.f32 %v955_v57  ;;  %v582_v46 = vpop.permute.xlu0 %581  ;;  %v979_v57 = vsub.f32 %v6995_v48, %v587_v1 }
 0x15b   : > { %13548 = vst [vmem:[#allocation153_spill] sm:$0xff] %v7529_v19  ;;  %v7532_v38 = vpop.eup %4919  ;;  %4939 = vtanh.f32 %v956_v53  ;;  %v969_v55 = vsub.f32 %v6987_v41, %v582_v46 }
 0x15c   : > { %13549 = vst [vmem:[#allocation154_spill] sm:$0xff] %v7532_v38  ;;  %v7535_v61 = vpop.eup %4921  ;;  %4941 = vtanh.f32 %v973_v9  ;;  %v965_v9 = vsub.f32 %v6977_v29, %v582_v46 }
 0x15d   : > { %13550 = vst [vmem:[#allocation155_spill] sm:$0xff] %v7535_v61  ;;  %v7538_v22 = vpop.eup %4923  ;;  %4943 = vtanh.f32 %v974_v5  ;;  %v980_v61 = vsub.f32 %v6998_v50, %v587_v1  ;;  %v966_v5 = vsub.f32 %v6980_v34, %v582_v46  ;;  %v968_v1 = vsub.f32 %v6985_v39, %v582_v46 }
 0x15e   : > { %13551 = vst [vmem:[#allocation156_spill] sm:$0xff] %v7538_v22  ;;  %v7541_v19 = vpop.eup %4925  ;;  %4945 = vtanh.f32 %v975_v51  ;;  %v967_v51 = vsub.f32 %v6983_v37, %v582_v46 }
 0x15f   : > { %13552 = vst [vmem:[#allocation157_spill] sm:$0xff] %v7541_v19  ;;  %v7544_v53 = vpop.eup %4927  ;;  %4947 = vtanh.f32 %v976_v26  ;;  %v2374_v26 = vld [vmem:[%s6877_s29 + $0x148] sm:$0xff] }
 0x160   : > { %13553 = vst [vmem:[#allocation158_spill] sm:$0xff] %v7544_v53  ;;  %v7547_v38 = vpop.eup %4929  ;;  %4949 = vtanh.f32 %v977_v59 }
 0x161   : > { %13554 = vst [vmem:[#allocation159_spill] sm:$0xff] %v7547_v38  ;;  %v7550_v22 = vpop.eup %4931  ;;  %4951 = vtanh.f32 %v978_v36  ;;  %v2373_v38 = vld [vmem:[%s6877_s29 + $0x140] sm:$0xff]  ;;  %v2438_v36 = vmul.f32 500.0, %v2374_v26 }
 0x162   : > { %13555 = vst [vmem:[#allocation160_spill] sm:$0xff] %v7550_v22  ;;  %v7553_v19 = vpop.eup %4933  ;;  %4953 = vtanh.f32 %v979_v57  ;;  %v2437_v22 = vmul.f32 500.0, %v2373_v38  ;;  %v970_v57 = vsub.f32 %v6991_v45, %v582_v46 }
 0x163   : > { %13556 = vst [vmem:[#allocation161_spill] sm:$0xff] %v7553_v19  ;;  %v7556_v53 = vpop.eup %4935  ;;  %4955 = vtanh.f32 %v980_v61  ;;  %v597_v19 = vpop.permute.xlu1 %596  ;;  %v971_v61 = vsub.f32 %v6995_v48, %v582_v46  ;;  %2676 = vperm.xlu1 %4588, %v2438_v36  }
 0x164   : > { %13557 = vst [vmem:[#allocation162_spill] sm:$0xff] %v7556_v53  ;;  %v7561_v59 = vpop.eup %4937  ;;  %4957 = vtanh.f32 %v965_v9  ;;  %2671 = vperm.xlu0 %4587, %v2437_v22   ;;  %v989_v38 = vsub.f32 %v6977_v29, %v597_v19  ;;  %v991_v22 = vsub.f32 %v6983_v37, %v597_v19 }
 0x165   : > { %13558 = vst [vmem:[#allocation163_spill] sm:$0xff] %v7561_v59  ;;  %v7564_v40 = vpop.eup %4939  ;;  %4959 = vtanh.f32 %v966_v5  ;;  %v972_v59 = vsub.f32 %v6998_v50, %v582_v46  ;;  %v990_v5 = vsub.f32 %v6980_v34, %v597_v19  ;;  %v992_v46 = vsub.f32 %v6985_v39, %v597_v19 }
 0x166   : > { %13559 = vst [vmem:[#allocation164_spill] sm:$0xff] %v7564_v40  ;;  %v7567_v4 = vpop.eup %4941  ;;  %4961 = vtanh.f32 %v967_v51 }
 0x167   : > { %13560 = vst [vmem:[#allocation165_spill] sm:$0xff] %v7567_v4  ;;  %v7570_v53 = vpop.eup %4943  ;;  %4963 = vtanh.f32 %v968_v1 }
 0x168   : > { %13561 = vst [vmem:[#allocation166_spill] sm:$0xff] %v7570_v53  ;;  %v7573_v9 = vpop.eup %4945  ;;  %4965 = vtanh.f32 %v969_v55  ;;  %v993_v55 = vsub.f32 %v6987_v41, %v597_v19 }
 0x169   : > { %13562 = vst [vmem:[#allocation167_spill] sm:$0xff] %v7573_v9  ;;  %v7576_v26 = vpop.eup %4947  ;;  %4967 = vtanh.f32 %v970_v57  ;;  %v994_v57 = vsub.f32 %v6991_v45, %v597_v19 }
 0x16a   : > { %13563 = vst [vmem:[#allocation168_spill] sm:$0xff] %v7576_v26  ;;  %v7579_v4 = vpop.eup %4949  ;;  %4969 = vtanh.f32 %v971_v61  ;;  %v592_v26 = vpop.permute.xlu0 %591  ;;  %v995_v61 = vsub.f32 %v6995_v48, %v597_v19 }
 0x16b   : > { %13564 = vst [vmem:[#allocation169_spill] sm:$0xff] %v7579_v4  ;;  %v7582_v51 = vpop.eup %4951  ;;  %4971 = vtanh.f32 %v972_v59  ;;  %v985_v9 = vsub.f32 %v6987_v41, %v592_v26 }
 0x16c   : > { %13565 = vst [vmem:[#allocation170_spill] sm:$0xff] %v7582_v51  ;;  %v7585_v1 = vpop.eup %4953  ;;  %4973 = vtanh.f32 %v989_v38  ;;  %v981_v38 = vsub.f32 %v6977_v29, %v592_v26 }
 0x16d   : > { %13566 = vst [vmem:[#allocation171_spill] sm:$0xff] %v7585_v1  ;;  %v7588_v36 = vpop.eup %4955  ;;  %4975 = vtanh.f32 %v990_v5  ;;  %v996_v1 = vsub.f32 %v6998_v50, %v597_v19  ;;  %v982_v5 = vsub.f32 %v6980_v34, %v592_v26  ;;  %v984_v19 = vsub.f32 %v6985_v39, %v592_v26 }
 0x16e   : > { %13567 = vst [vmem:[#allocation172_spill] sm:$0xff] %v7588_v36  ;;  %v7591_v4 = vpop.eup %4957  ;;  %4977 = vtanh.f32 %v991_v22  ;;  %v983_v22 = vsub.f32 %v6983_v37, %v592_v26 }
 0x16f   : > { %13568 = vst [vmem:[#allocation173_spill] sm:$0xff] %v7591_v4  ;;  %v7594_v59 = vpop.eup %4959  ;;  %4979 = vtanh.f32 %v992_v46  ;;  %v2376_v46 = vld [vmem:[%s6877_s29 + $0x158] sm:$0xff] }
 0x170   : > { %13569 = vst [vmem:[#allocation174_spill] sm:$0xff] %v7594_v59  ;;  %v7597_v51 = vpop.eup %4961  ;;  %4981 = vtanh.f32 %v993_v55 }
 0x171   : > { %13570 = vst [vmem:[#allocation175_spill] sm:$0xff] %v7597_v51  ;;  %v7600_v36 = vpop.eup %4963  ;;  %4983 = vtanh.f32 %v994_v57  ;;  %v2375_v51 = vld [vmem:[%s6877_s29 + $0x150] sm:$0xff]  ;;  %v2440_v57 = vmul.f32 500.0, %v2376_v46 }
 0x172   : > { %13571 = vst [vmem:[#allocation176_spill] sm:$0xff] %v7600_v36  ;;  %v7603_v4 = vpop.eup %4965  ;;  %4985 = vtanh.f32 %v995_v61  ;;  %v2439_v36 = vmul.f32 500.0, %v2375_v51  ;;  %v986_v61 = vsub.f32 %v6991_v45, %v592_v26 }
 0x173   : > { %13572 = vst [vmem:[#allocation177_spill] sm:$0xff] %v7603_v4  ;;  %v7606_v59 = vpop.eup %4967  ;;  %4987 = vtanh.f32 %v996_v1  ;;  %v607_v4 = vpop.permute.xlu1 %606  ;;  %v987_v1 = vsub.f32 %v6995_v48, %v592_v26  ;;  %2686 = vperm.xlu1 %4588, %v2440_v57  }
 0x174   : > { %13573 = vst [vmem:[#allocation178_spill] sm:$0xff] %v7606_v59  ;;  %v7611_v55 = vpop.eup %4969  ;;  %4989 = vtanh.f32 %v981_v38  ;;  %2681 = vperm.xlu0 %4587, %v2439_v36   ;;  %v1005_v51 = vsub.f32 %v6977_v29, %v607_v4  ;;  %v1007_v36 = vsub.f32 %v6983_v37, %v607_v4 }
 0x175   : > { %13574 = vst [vmem:[#allocation179_spill] sm:$0xff] %v7611_v55  ;;  %v7614_v53 = vpop.eup %4971  ;;  %4991 = vtanh.f32 %v982_v5  ;;  %v988_v55 = vsub.f32 %v6998_v50, %v592_v26  ;;  %v1006_v5 = vsub.f32 %v6980_v34, %v607_v4  ;;  %v1008_v26 = vsub.f32 %v6985_v39, %v607_v4 }
 0x176   : > { %13575 = vst [vmem:[#allocation180_spill] sm:$0xff] %v7614_v53  ;;  %v7617_v40 = vpop.eup %4973  ;;  %4993 = vtanh.f32 %v983_v22 }
 0x177   : > { %13576 = vst [vmem:[#allocation181_spill] sm:$0xff] %v7617_v40  ;;  %v7620_v59 = vpop.eup %4975  ;;  %4995 = vtanh.f32 %v984_v19 }
 0x178   : > { %13577 = vst [vmem:[#allocation182_spill] sm:$0xff] %v7620_v59  ;;  %v7623_v38 = vpop.eup %4977  ;;  %4997 = vtanh.f32 %v985_v9  ;;  %v1009_v9 = vsub.f32 %v6987_v41, %v607_v4 }
 0x179   : > { %13578 = vst [vmem:[#allocation183_spill] sm:$0xff] %v7623_v38  ;;  %v7626_v46 = vpop.eup %4979  ;;  %4999 = vtanh.f32 %v986_v61  ;;  %v1010_v61 = vsub.f32 %v6991_v45, %v607_v4 }
 0x17a   : > { %13579 = vst [vmem:[#allocation184_spill] sm:$0xff] %v7626_v46  ;;  %v7629_v53 = vpop.eup %4981  ;;  %5001 = vtanh.f32 %v987_v1  ;;  %v602_v46 = vpop.permute.xlu0 %601  ;;  %v1011_v1 = vsub.f32 %v6995_v48, %v607_v4 }
 0x17b   : > { %13580 = vst [vmem:[#allocation185_spill] sm:$0xff] %v7629_v53  ;;  %v7632_v22 = vpop.eup %4983  ;;  %5003 = vtanh.f32 %v988_v55  ;;  %v1001_v38 = vsub.f32 %v6987_v41, %v602_v46 }
 0x17c   : > { %13581 = vst [vmem:[#allocation186_spill] sm:$0xff] %v7632_v22  ;;  %v7635_v19 = vpop.eup %4985  ;;  %5005 = vtanh.f32 %v1005_v51  ;;  %v997_v51 = vsub.f32 %v6977_v29, %v602_v46 }
 0x17d   : > { %13582 = vst [vmem:[#allocation187_spill] sm:$0xff] %v7635_v19  ;;  %v7638_v57 = vpop.eup %4987  ;;  %5007 = vtanh.f32 %v1006_v5  ;;  %v1012_v19 = vsub.f32 %v6998_v50, %v607_v4  ;;  %v998_v5 = vsub.f32 %v6980_v34, %v602_v46  ;;  %v1000_v4 = vsub.f32 %v6985_v39, %v602_v46 }
 0x17e   : > { %13583 = vst [vmem:[#allocation188_spill] sm:$0xff] %v7638_v57  ;;  %v7641_v53 = vpop.eup %4989  ;;  %5009 = vtanh.f32 %v1007_v36  ;;  %v999_v36 = vsub.f32 %v6983_v37, %v602_v46 }
 0x17f   : > { %13584 = vst [vmem:[#allocation189_spill] sm:$0xff] %v7641_v53  ;;  %v7644_v55 = vpop.eup %4991  ;;  %5011 = vtanh.f32 %v1008_v26  ;;  %v2378_v26 = vld [vmem:[%s6877_s29 + $0x168] sm:$0xff] }
 0x180   : > { %13585 = vst [vmem:[#allocation190_spill] sm:$0xff] %v7644_v55  ;;  %v7647_v22 = vpop.eup %4993  ;;  %5013 = vtanh.f32 %v1009_v9 }
 0x181   : > { %13586 = vst [vmem:[#allocation191_spill] sm:$0xff] %v7647_v22  ;;  %v7650_v57 = vpop.eup %4995  ;;  %5015 = vtanh.f32 %v1010_v61  ;;  %v2377_v22 = vld [vmem:[%s6877_s29 + $0x160] sm:$0xff]  ;;  %v2442_v61 = vmul.f32 500.0, %v2378_v26 }
 0x182   : > { %13587 = vst [vmem:[#allocation192_spill] sm:$0xff] %v7650_v57  ;;  %v7653_v53 = vpop.eup %4997  ;;  %5017 = vtanh.f32 %v1011_v1  ;;  %v2441_v57 = vmul.f32 500.0, %v2377_v22  ;;  %v1002_v1 = vsub.f32 %v6991_v45, %v602_v46 }
 0x183   : > { %13588 = vst [vmem:[#allocation193_spill] sm:$0xff] %v7653_v53  ;;  %v7656_v55 = vpop.eup %4999  ;;  %5019 = vtanh.f32 %v1012_v19  ;;  %v617_v53 = vpop.permute.xlu1 %616  ;;  %v1003_v19 = vsub.f32 %v6995_v48, %v602_v46  ;;  %2696 = vperm.xlu1 %4588, %v2442_v61  }
 0x184   : > { %13589 = vst [vmem:[#allocation194_spill] sm:$0xff] %v7656_v55  ;;  %v7661_v9 = vpop.eup %5001  ;;  %5021 = vtanh.f32 %v997_v51  ;;  %2691 = vperm.xlu0 %4587, %v2441_v57   ;;  %v1021_v22 = vsub.f32 %v6977_v29, %v617_v53  ;;  %v1023_v57 = vsub.f32 %v6983_v37, %v617_v53 }
 0x185   : > { %13590 = vst [vmem:[#allocation195_spill] sm:$0xff] %v7661_v9  ;;  %v7664_v59 = vpop.eup %5003  ;;  %5023 = vtanh.f32 %v998_v5  ;;  %v1004_v9 = vsub.f32 %v6998_v50, %v602_v46  ;;  %v1022_v5 = vsub.f32 %v6980_v34, %v617_v53  ;;  %v1024_v46 = vsub.f32 %v6985_v39, %v617_v53 }
 0x186   : > { %13591 = vst [vmem:[#allocation196_spill] sm:$0xff] %v7664_v59  ;;  %v7667_v40 = vpop.eup %5005  ;;  %5025 = vtanh.f32 %v999_v36 }
 0x187   : > { %13592 = vst [vmem:[#allocation197_spill] sm:$0xff] %v7667_v40  ;;  %v7670_v55 = vpop.eup %5007  ;;  %5027 = vtanh.f32 %v1000_v4 }
 0x188   : > { %13593 = vst [vmem:[#allocation198_spill] sm:$0xff] %v7670_v55  ;;  %v7673_v51 = vpop.eup %5009  ;;  %5029 = vtanh.f32 %v1001_v38  ;;  %v1025_v38 = vsub.f32 %v6987_v41, %v617_v53 }
 0x189   : > { %13594 = vst [vmem:[#allocation199_spill] sm:$0xff] %v7673_v51  ;;  %v7676_v26 = vpop.eup %5011  ;;  %5031 = vtanh.f32 %v1002_v1  ;;  %v1026_v1 = vsub.f32 %v6991_v45, %v617_v53 }
 0x18a   : > { %13595 = vst [vmem:[#allocation200_spill] sm:$0xff] %v7676_v26  ;;  %v7679_v40 = vpop.eup %5013  ;;  %5033 = vtanh.f32 %v1003_v19  ;;  %v612_v26 = vpop.permute.xlu0 %611  ;;  %v1027_v19 = vsub.f32 %v6995_v48, %v617_v53 }
 0x18b   : > { %13596 = vst [vmem:[#allocation201_spill] sm:$0xff] %v7679_v40  ;;  %v7682_v36 = vpop.eup %5015  ;;  %5035 = vtanh.f32 %v1004_v9  ;;  %v1017_v51 = vsub.f32 %v6987_v41, %v612_v26 }
 0x18c   : > { %13597 = vst [vmem:[#allocation202_spill] sm:$0xff] %v7682_v36  ;;  %v7685_v4 = vpop.eup %5017  ;;  %5037 = vtanh.f32 %v1021_v22  ;;  %v1013_v22 = vsub.f32 %v6977_v29, %v612_v26 }
 0x18d   : > { %13598 = vst [vmem:[#allocation203_spill] sm:$0xff] %v7685_v4  ;;  %v7688_v61 = vpop.eup %5019  ;;  %5039 = vtanh.f32 %v1022_v5  ;;  %v1028_v4 = vsub.f32 %v6998_v50, %v617_v53  ;;  %v1014_v5 = vsub.f32 %v6980_v34, %v612_v26  ;;  %v1016_v53 = vsub.f32 %v6985_v39, %v612_v26 }
 0x18e   : > { %13599 = vst [vmem:[#allocation204_spill] sm:$0xff] %v7688_v61  ;;  %v7691_v40 = vpop.eup %5021  ;;  %5041 = vtanh.f32 %v1023_v57  ;;  %v1015_v57 = vsub.f32 %v6983_v37, %v612_v26 }
 0x18f   : > { %13600 = vst [vmem:[#allocation205_spill] sm:$0xff] %v7691_v40  ;;  %v7694_v9 = vpop.eup %5023  ;;  %5043 = vtanh.f32 %v1024_v46  ;;  %v2380_v46 = vld [vmem:[%s6877_s29 + $0x178] sm:$0xff] }
 0x190   : > { %13601 = vst [vmem:[#allocation206_spill] sm:$0xff] %v7694_v9  ;;  %v7697_v36 = vpop.eup %5025  ;;  %5045 = vtanh.f32 %v1025_v38 }
 0x191   : > { %13602 = vst [vmem:[#allocation207_spill] sm:$0xff] %v7697_v36  ;;  %v7700_v61 = vpop.eup %5027  ;;  %5047 = vtanh.f32 %v1026_v1  ;;  %v2379_v36 = vld [vmem:[%s6877_s29 + $0x170] sm:$0xff]  ;;  %v2444_v1 = vmul.f32 500.0, %v2380_v46 }
 0x192   : > { %13603 = vst [vmem:[#allocation208_spill] sm:$0xff] %v7700_v61  ;;  %v7703_v40 = vpop.eup %5029  ;;  %5049 = vtanh.f32 %v1027_v19  ;;  %v2443_v61 = vmul.f32 500.0, %v2379_v36  ;;  %v1018_v19 = vsub.f32 %v6991_v45, %v612_v26 }
 0x193   : > { %13604 = vst [vmem:[#allocation209_spill] sm:$0xff] %v7703_v40  ;;  %v7706_v9 = vpop.eup %5031  ;;  %5051 = vtanh.f32 %v1028_v4  ;;  %v627_v40 = vpop.permute.xlu1 %626  ;;  %v1019_v4 = vsub.f32 %v6995_v48, %v612_v26  ;;  %2706 = vperm.xlu1 %4588, %v2444_v1  }
 0x194   : > { %13605 = vst [vmem:[#allocation210_spill] sm:$0xff] %v7706_v9  ;;  %v7711_v38 = vpop.eup %5033  ;;  %5053 = vtanh.f32 %v1013_v22  ;;  %2701 = vperm.xlu0 %4587, %v2443_v61   ;;  %v1037_v36 = vsub.f32 %v6977_v29, %v627_v40  ;;  %v1039_v61 = vsub.f32 %v6983_v37, %v627_v40 }
 0x195   : > { %13606 = vst [vmem:[#allocation211_spill] sm:$0xff] %v7711_v38  ;;  %v7714_v55 = vpop.eup %5035  ;;  %5055 = vtanh.f32 %v1014_v5  ;;  %v1020_v38 = vsub.f32 %v6998_v50, %v612_v26  ;;  %v1038_v5 = vsub.f32 %v6980_v34, %v627_v40  ;;  %v1040_v26 = vsub.f32 %v6985_v39, %v627_v40 }
 0x196   : > { %13607 = vst [vmem:[#allocation212_spill] sm:$0xff] %v7714_v55  ;;  %v7717_v59 = vpop.eup %5037  ;;  %5057 = vtanh.f32 %v1015_v57 }
 0x197   : > { %13608 = vst [vmem:[#allocation213_spill] sm:$0xff] %v7717_v59  ;;  %v7720_v9 = vpop.eup %5039  ;;  %5059 = vtanh.f32 %v1016_v53 }
 0x198   : > { %13609 = vst [vmem:[#allocation214_spill] sm:$0xff] %v7720_v9  ;;  %v7723_v22 = vpop.eup %5041  ;;  %5061 = vtanh.f32 %v1017_v51  ;;  %v1041_v51 = vsub.f32 %v6987_v41, %v627_v40 }
 0x199   : > { %13610 = vst [vmem:[#allocation215_spill] sm:$0xff] %v7723_v22  ;;  %v7726_v46 = vpop.eup %5043  ;;  %5063 = vtanh.f32 %v1018_v19  ;;  %v1042_v19 = vsub.f32 %v6991_v45, %v627_v40 }
 0x19a   : > { %13611 = vst [vmem:[#allocation216_spill] sm:$0xff] %v7726_v46  ;;  %v7729_v55 = vpop.eup %5045  ;;  %5065 = vtanh.f32 %v1019_v4  ;;  %v622_v46 = vpop.permute.xlu0 %621  ;;  %v1043_v4 = vsub.f32 %v6995_v48, %v627_v40 }
 0x19b   : > { %13612 = vst [vmem:[#allocation217_spill] sm:$0xff] %v7729_v55  ;;  %v7732_v57 = vpop.eup %5047  ;;  %5067 = vtanh.f32 %v1020_v38  ;;  %v1033_v22 = vsub.f32 %v6987_v41, %v622_v46 }
 0x19c   : > { %13613 = vst [vmem:[#allocation218_spill] sm:$0xff] %v7732_v57  ;;  %v7735_v53 = vpop.eup %5049  ;;  %5069 = vtanh.f32 %v1037_v36  ;;  %v1029_v36 = vsub.f32 %v6977_v29, %v622_v46 }
 0x19d   : > { %13614 = vst [vmem:[#allocation219_spill] sm:$0xff] %v7735_v53  ;;  %v7738_v1 = vpop.eup %5051  ;;  %5071 = vtanh.f32 %v1038_v5  ;;  %v1044_v53 = vsub.f32 %v6998_v50, %v627_v40  ;;  %v1030_v5 = vsub.f32 %v6980_v34, %v622_v46  ;;  %v1032_v40 = vsub.f32 %v6985_v39, %v622_v46 }
 0x19e   : > { %13615 = vst [vmem:[#allocation220_spill] sm:$0xff] %v7738_v1  ;;  %v7741_v55 = vpop.eup %5053  ;;  %5073 = vtanh.f32 %v1039_v61  ;;  %v1031_v61 = vsub.f32 %v6983_v37, %v622_v46 }
 0x19f   : > { %13616 = vst [vmem:[#allocation221_spill] sm:$0xff] %v7741_v55  ;;  %v7744_v38 = vpop.eup %5055  ;;  %5075 = vtanh.f32 %v1040_v26  ;;  %v2382_v26 = vld [vmem:[%s6877_s29 + $0x188] sm:$0xff] }
 0x1a0   : > { %13617 = vst [vmem:[#allocation222_spill] sm:$0xff] %v7744_v38  ;;  %v7747_v57 = vpop.eup %5057  ;;  %5077 = vtanh.f32 %v1041_v51 }
 0x1a1   : > { %13618 = vst [vmem:[#allocation223_spill] sm:$0xff] %v7747_v57  ;;  %v7750_v1 = vpop.eup %5059  ;;  %5079 = vtanh.f32 %v1042_v19  ;;  %v2381_v57 = vld [vmem:[%s6877_s29 + $0x180] sm:$0xff]  ;;  %v2446_v19 = vmul.f32 500.0, %v2382_v26 }
 0x1a2   : > { %13619 = vst [vmem:[#allocation224_spill] sm:$0xff] %v7750_v1  ;;  %v7753_v55 = vpop.eup %5061  ;;  %5081 = vtanh.f32 %v1043_v4  ;;  %v2445_v1 = vmul.f32 500.0, %v2381_v57  ;;  %v1034_v4 = vsub.f32 %v6991_v45, %v622_v46 }
 0x1a3   : > { %13620 = vst [vmem:[#allocation225_spill] sm:$0xff] %v7753_v55  ;;  %v7756_v38 = vpop.eup %5063  ;;  %5083 = vtanh.f32 %v1044_v53  ;;  %v637_v55 = vpop.permute.xlu1 %636  ;;  %v1035_v53 = vsub.f32 %v6995_v48, %v622_v46  ;;  %2716 = vperm.xlu1 %4588, %v2446_v19  }
 0x1a4   : > { %13621 = vst [vmem:[#allocation226_spill] sm:$0xff] %v7756_v38  ;;  %v7761_v51 = vpop.eup %5065  ;;  %5085 = vtanh.f32 %v1029_v36  ;;  %2711 = vperm.xlu0 %4587, %v2445_v1   ;;  %v1053_v57 = vsub.f32 %v6977_v29, %v637_v55  ;;  %v1055_v1 = vsub.f32 %v6983_v37, %v637_v55 }
 0x1a5   : > { %13622 = vst [vmem:[#allocation227_spill] sm:$0xff] %v7761_v51  ;;  %v7764_v9 = vpop.eup %5067  ;;  %5087 = vtanh.f32 %v1030_v5  ;;  %v1036_v51 = vsub.f32 %v6998_v50, %v622_v46  ;;  %v1054_v5 = vsub.f32 %v6980_v34, %v637_v55  ;;  %v1056_v46 = vsub.f32 %v6985_v39, %v637_v55 }
 0x1a6   : > { %13623 = vst [vmem:[#allocation228_spill] sm:$0xff] %v7764_v9  ;;  %v7767_v59 = vpop.eup %5069  ;;  %5089 = vtanh.f32 %v1031_v61 }
 0x1a7   : > { %13624 = vst [vmem:[#allocation229_spill] sm:$0xff] %v7767_v59  ;;  %v7770_v38 = vpop.eup %5071  ;;  %5091 = vtanh.f32 %v1032_v40 }
 0x1a8   : > { %13625 = vst [vmem:[#allocation230_spill] sm:$0xff] %v7770_v38  ;;  %v7773_v36 = vpop.eup %5073  ;;  %5093 = vtanh.f32 %v1033_v22  ;;  %v1057_v22 = vsub.f32 %v6987_v41, %v637_v55 }
 0x1a9   : > { %13626 = vst [vmem:[#allocation231_spill] sm:$0xff] %v7773_v36  ;;  %v7776_v26 = vpop.eup %5075  ;;  %5095 = vtanh.f32 %v1034_v4  ;;  %v1058_v4 = vsub.f32 %v6991_v45, %v637_v55 }
 0x1aa   : > { %13627 = vst [vmem:[#allocation232_spill] sm:$0xff] %v7776_v26  ;;  %v7779_v59 = vpop.eup %5077  ;;  %5097 = vtanh.f32 %v1035_v53  ;;  %v632_v26 = vpop.permute.xlu0 %631  ;;  %v1059_v53 = vsub.f32 %v6995_v48, %v637_v55 }
 0x1ab   : > { %13628 = vst [vmem:[#allocation233_spill] sm:$0xff] %v7779_v59  ;;  %v7782_v61 = vpop.eup %5079  ;;  %5099 = vtanh.f32 %v1036_v51  ;;  %v1049_v36 = vsub.f32 %v6987_v41, %v632_v26 }
 0x1ac   : > { %13629 = vst [vmem:[#allocation234_spill] sm:$0xff] %v7782_v61  ;;  %v7785_v40 = vpop.eup %5081  ;;  %5101 = vtanh.f32 %v1053_v57  ;;  %v1045_v57 = vsub.f32 %v6977_v29, %v632_v26 }
 0x1ad   : > { %13630 = vst [vmem:[#allocation235_spill] sm:$0xff] %v7785_v40  ;;  %v7788_v19 = vpop.eup %5083  ;;  %5103 = vtanh.f32 %v1054_v5  ;;  %v1060_v40 = vsub.f32 %v6998_v50, %v637_v55  ;;  %v1046_v5 = vsub.f32 %v6980_v34, %v632_v26  ;;  %v1048_v55 = vsub.f32 %v6985_v39, %v632_v26 }
 0x1ae   : > { %13631 = vst [vmem:[#allocation236_spill] sm:$0xff] %v7788_v19  ;;  %v7791_v59 = vpop.eup %5085  ;;  %5105 = vtanh.f32 %v1055_v1  ;;  %v1047_v1 = vsub.f32 %v6983_v37, %v632_v26  ;;  %v642_v31 = vpop.permute.xlu0 %641 }
 0x1af   : > { %13632 = vst [vmem:[#allocation237_spill] sm:$0xff] %v7791_v59  ;;  %v7794_v51 = vpop.eup %5087  ;;  %5107 = vtanh.f32 %v1056_v46  ;;  %v2384_v46 = vld [vmem:[%s6877_s29 + $0x198] sm:$0xff]  ;;  %v1065_v18 = vsub.f32 %v6987_v41, %v642_v31  ;;  %v1068_v6 = vsub.f32 %v6998_v50, %v642_v31 }
 0x1b0   : > { %13633 = vst [vmem:[#allocation238_spill] sm:$0xff] %v7794_v51  ;;  %v7797_v61 = vpop.eup %5089  ;;  %5109 = vtanh.f32 %v1057_v22 }
 0x1b1   : > { %13634 = vst [vmem:[#allocation239_spill] sm:$0xff] %v7797_v61  ;;  %v7800_v19 = vpop.eup %5091  ;;  %5111 = vtanh.f32 %v1058_v4  ;;  %v2383_v61 = vld [vmem:[%s6877_s29 + $0x190] sm:$0xff]  ;;  %v2448_v4 = vmul.f32 500.0, %v2384_v46 }
 0x1b2   : > { %13635 = vst [vmem:[#allocation240_spill] sm:$0xff] %v7800_v19  ;;  %v7803_v59 = vpop.eup %5093  ;;  %5113 = vtanh.f32 %v1059_v53  ;;  %v2447_v19 = vmul.f32 500.0, %v2383_v61  ;;  %v1050_v53 = vsub.f32 %v6991_v45, %v632_v26  ;;  %v652_v2 = vpop.permute.xlu0 %651 }
 0x1b3   : > { %13636 = vst [vmem:[#allocation241_spill] sm:$0xff] %v7803_v59  ;;  %v7806_v51 = vpop.eup %5095  ;;  %5115 = vtanh.f32 %v1060_v40  ;;  %v647_v59 = vpop.permute.xlu1 %646  ;;  %v1051_v40 = vsub.f32 %v6995_v48, %v632_v26  ;;  %2726 = vperm.xlu1 %4588, %v2448_v4  }
 0x1b4   : > { %13637 = vst [vmem:[#allocation242_spill] sm:$0xff] %v7806_v51  ;;  %v7811_v22 = vpop.eup %5097  ;;  %5117 = vtanh.f32 %v1045_v57  ;;  %2721 = vperm.xlu0 %4587, %v2447_v19   ;;  %v1069_v61 = vsub.f32 %v6977_v29, %v647_v59  ;;  %v1071_v19 = vsub.f32 %v6983_v37, %v647_v59  ;;  %v1076_v21 = vsub.f32 %v6998_v50, %v647_v59 }
 0x1b5   : > { %13638 = vst [vmem:[#allocation243_spill] sm:$0xff] %v7811_v22  ;;  %v7814_v38 = vpop.eup %5099  ;;  %5119 = vtanh.f32 %v1046_v5  ;;  %v1052_v22 = vsub.f32 %v6998_v50, %v632_v26  ;;  %v1070_v5 = vsub.f32 %v6980_v34, %v647_v59  ;;  %v1072_v26 = vsub.f32 %v6985_v39, %v647_v59 }
 0x1b6   : > { %13639 = vst [vmem:[#allocation244_spill] sm:$0xff] %v7814_v38  ;;  %v7817_v9 = vpop.eup %5101  ;;  %5121 = vtanh.f32 %v1047_v1 }
 0x1b7   : > { %v7820_v51 = vpop.eup %5103  ;;  %5123 = vtanh.f32 %v1048_v55  ;;  %v657_v12 = vpop.permute.xlu1 %656 }
 0x1b8   : > { %v7823_v57 = vpop.eup %5105  ;;  %5125 = vtanh.f32 %v1049_v36  ;;  %v1073_v36 = vsub.f32 %v6987_v41, %v647_v59  ;;  %2731 = vperm.xlu0 %4587, %v2449_v16   ;;  %v1085_v20 = vsub.f32 %v6977_v29, %v657_v12  ;;  %v1087_v16 = vsub.f32 %v6983_v37, %v657_v12 }
 0x1b9   : > { %v7826_v46 = vpop.eup %5107  ;;  %5127 = vtanh.f32 %v1050_v53  ;;  %v1074_v53 = vsub.f32 %v6991_v45, %v647_v59 }
 0x1ba   : > { %v7829_v38 = vpop.eup %5109  ;;  %5129 = vtanh.f32 %v1051_v40  ;;  %v1075_v40 = vsub.f32 %v6995_v48, %v647_v59  ;;  %v1064_v59 = vsub.f32 %v6985_v39, %v642_v31 }
 0x1bb   : > { %v7832_v1 = vpop.eup %5111  ;;  %5131 = vtanh.f32 %v1052_v22 }
 0x1bc   : > { %v7835_v55 = vpop.eup %5113  ;;  %5133 = vtanh.f32 %v1069_v61  ;;  %v1061_v61 = vsub.f32 %v6977_v29, %v642_v31 }
 0x1bd   : > { %v7838_v4 = vpop.eup %5115  ;;  %5135 = vtanh.f32 %v1070_v5  ;;  %v1062_v5 = vsub.f32 %v6980_v34, %v642_v31 }
 0x1be   : > { %v7841_v11 = vpop.eup %5117  ;;  %5137 = vtanh.f32 %v1071_v19  ;;  %v1063_v19 = vsub.f32 %v6983_v37, %v642_v31 }
 0x1bf   : > { %v7844_v22 = vpop.eup %5119  ;;  %5139 = vtanh.f32 %v1072_v26  ;;  %v2386_v26 = vld [vmem:[%s6877_s29 + $0x1a8] sm:$0xff] }
 0x1c0   : > { %v7847_v15 = vpop.eup %5121  ;;  %5141 = vtanh.f32 %v1073_v36 }
 0x1c1   : > { %v7850_v3 = vpop.eup %5123  ;;  %5143 = vtanh.f32 %v1074_v53  ;;  %v2450_v53 = vmul.f32 500.0, %v2386_v26 }
 0x1c2   : > { %v7853_v63 = vpop.eup %5125  ;;  %5145 = vtanh.f32 %v1075_v40  ;;  %v1066_v40 = vsub.f32 %v6991_v45, %v642_v31 }
 0x1c3   : > { %v7856_v60 = vpop.eup %5127  ;;  %5147 = vtanh.f32 %v1076_v21  ;;  %v1067_v21 = vsub.f32 %v6995_v48, %v642_v31  ;;  %2736 = vperm.xlu1 %4588, %v2450_v53   ;;  %v1088_v31 = vsub.f32 %v6985_v39, %v657_v12 }
 0x1c4   : > { %v7861_v36 = vpop.eup %5129  ;;  %5149 = vtanh.f32 %v1061_v61 }
 0x1c5   : > { %v7864_v14 = vpop.eup %5131  ;;  %5151 = vtanh.f32 %v1062_v5  ;;  %v1086_v5 = vsub.f32 %v6980_v34, %v657_v12 }
 0x1c6   : > { %v7867_v10 = vpop.eup %5133  ;;  %5153 = vtanh.f32 %v1063_v19 }
 0x1c7   : > { %v7870_v8 = vpop.eup %5135  ;;  %5155 = vtanh.f32 %v1064_v59 }
 0x1c8   : > { %v7873_v61 = vpop.eup %5137  ;;  %5157 = vtanh.f32 %v1065_v18  ;;  %v1089_v18 = vsub.f32 %v6987_v41, %v657_v12 }
 0x1c9   : > { %v7876_v26 = vpop.eup %5139  ;;  %5159 = vtanh.f32 %v1066_v40  ;;  %v1090_v40 = vsub.f32 %v6991_v45, %v657_v12 }
 0x1ca   : > { %13640 = vst [vmem:[#allocation245_spill] sm:$0xff] %v7876_v26  ;;  %v7879_v7 = vpop.eup %5141  ;;  %5161 = vtanh.f32 %v1067_v21  ;;  %v1091_v21 = vsub.f32 %v6995_v48, %v657_v12 }
 0x1cb   : > { %13641 = vst [vmem:[#allocation246_spill] sm:$0xff] %v7879_v7  ;;  %v7882_v19 = vpop.eup %5143  ;;  %5163 = vtanh.f32 %v1068_v6  ;;  %v1081_v7 = vsub.f32 %v6987_v41, %v652_v2 }
 0x1cc   : > { %13642 = vst [vmem:[#allocation247_spill] sm:$0xff] %v7882_v19  ;;  %v7885_v59 = vpop.eup %5145  ;;  %5165 = vtanh.f32 %v1085_v20  ;;  %v1077_v20 = vsub.f32 %v6977_v29, %v652_v2 }
 0x1cd   : > { %13643 = vst [vmem:[#allocation248_spill] sm:$0xff] %v7885_v59  ;;  %v7888_v53 = vpop.eup %5147  ;;  %5167 = vtanh.f32 %v1086_v5  ;;  %v1092_v59 = vsub.f32 %v6998_v50, %v657_v12  ;;  %v1078_v5 = vsub.f32 %v6980_v34, %v652_v2  ;;  %v1080_v12 = vsub.f32 %v6985_v39, %v652_v2 }
 0x1ce   : > { %13644 = vst [vmem:[#allocation249_spill] sm:$0xff] %v7888_v53  ;;  %v7891_v0 = vpop.eup %5149  ;;  %5169 = vtanh.f32 %v1087_v16  ;;  %v1079_v16 = vsub.f32 %v6983_v37, %v652_v2 }
 0x1cf   : > { %13645 = vst [vmem:[#allocation250_spill] sm:$0xff] %v7891_v0  ;;  %v7894_v6 = vpop.eup %5151  ;;  %5171 = vtanh.f32 %v1088_v31  ;;  %v2388_v31 = vld [vmem:[%s6877_s29 + $0x1b8] sm:$0xff] }
 0x1d0   : > { %13646 = vst [vmem:[#allocation251_spill] sm:$0xff] %v7894_v6  ;;  %v7897_v19 = vpop.eup %5153  ;;  %5173 = vtanh.f32 %v1089_v18 }
 0x1d1   : > { %13647 = vst [vmem:[#allocation252_spill] sm:$0xff] %v7897_v19  ;;  %v7900_v53 = vpop.eup %5155  ;;  %5175 = vtanh.f32 %v1090_v40  ;;  %v2387_v19 = vld [vmem:[%s6877_s29 + $0x1b0] sm:$0xff]  ;;  %v2452_v40 = vmul.f32 500.0, %v2388_v31 }
 0x1d2   : > { %13648 = vst [vmem:[#allocation253_spill] sm:$0xff] %v7900_v53  ;;  %v7903_v0 = vpop.eup %5157  ;;  %5177 = vtanh.f32 %v1091_v21  ;;  %v2451_v53 = vmul.f32 500.0, %v2387_v19  ;;  %v1082_v21 = vsub.f32 %v6991_v45, %v652_v2 }
 0x1d3   : > { %13649 = vst [vmem:[#allocation254_spill] sm:$0xff] %v7903_v0  ;;  %v7906_v6 = vpop.eup %5159  ;;  %5179 = vtanh.f32 %v1092_v59  ;;  %v667_v0 = vpop.permute.xlu1 %666  ;;  %v1083_v59 = vsub.f32 %v6995_v48, %v652_v2  ;;  %2746 = vperm.xlu1 %4588, %v2452_v40  }
 0x1d4   : > { %13650 = vst [vmem:[#allocation255_spill] sm:$0xff] %v7906_v6  ;;  %v7911_v18 = vpop.eup %5161  ;;  %5181 = vtanh.f32 %v1077_v20  ;;  %2741 = vperm.xlu0 %4587, %v2451_v53   ;;  %v1101_v19 = vsub.f32 %v6977_v29, %v667_v0  ;;  %v1103_v53 = vsub.f32 %v6983_v37, %v667_v0 }
 0x1d5   : > { %13651 = vst [vmem:[#allocation256_spill] sm:$0xff] %v7911_v18  ;;  %v7914_v62 = vpop.eup %5163  ;;  %5183 = vtanh.f32 %v1078_v5  ;;  %v1084_v18 = vsub.f32 %v6998_v50, %v652_v2  ;;  %v1102_v5 = vsub.f32 %v6980_v34, %v667_v0  ;;  %v1104_v2 = vsub.f32 %v6985_v39, %v667_v0 }
 0x1d6   : > { %13652 = vst [vmem:[#allocation257_spill] sm:$0xff] %v7914_v62  ;;  %v7917_v26 = vpop.eup %5165  ;;  %5185 = vtanh.f32 %v1079_v16 }
 0x1d7   : > { %13653 = vst [vmem:[#allocation258_spill] sm:$0xff] %v7917_v26  ;;  %v7920_v6 = vpop.eup %5167  ;;  %5187 = vtanh.f32 %v1080_v12 }
 0x1d8   : > { %13654 = vst [vmem:[#allocation259_spill] sm:$0xff] %v7920_v6  ;;  %v7923_v20 = vpop.eup %5169  ;;  %5189 = vtanh.f32 %v1081_v7  ;;  %v1105_v7 = vsub.f32 %v6987_v41, %v667_v0 }
 0x1d9   : > { %13655 = vst [vmem:[#allocation260_spill] sm:$0xff] %v7923_v20  ;;  %v7926_v31 = vpop.eup %5171  ;;  %5191 = vtanh.f32 %v1082_v21  ;;  %v1106_v21 = vsub.f32 %v6991_v45, %v667_v0 }
 0x1da   : > { %13656 = vst [vmem:[#allocation261_spill] sm:$0xff] %v7926_v31  ;;  %v7929_v26 = vpop.eup %5173  ;;  %5193 = vtanh.f32 %v1083_v59  ;;  %v662_v31 = vpop.permute.xlu0 %661  ;;  %v1107_v59 = vsub.f32 %v6995_v48, %v667_v0 }
 0x1db   : > { %13657 = vst [vmem:[#allocation262_spill] sm:$0xff] %v7929_v26  ;;  %v7932_v16 = vpop.eup %5175  ;;  %5195 = vtanh.f32 %v1084_v18  ;;  %v1097_v20 = vsub.f32 %v6987_v41, %v662_v31 }
 0x1dc   : > { %13658 = vst [vmem:[#allocation263_spill] sm:$0xff] %v7932_v16  ;;  %v7935_v12 = vpop.eup %5177  ;;  %5197 = vtanh.f32 %v1101_v19  ;;  %v1093_v19 = vsub.f32 %v6977_v29, %v662_v31 }
 0x1dd   : > { %13659 = vst [vmem:[#allocation264_spill] sm:$0xff] %v7935_v12  ;;  %v7938_v40 = vpop.eup %5179  ;;  %5199 = vtanh.f32 %v1102_v5  ;;  %v1108_v12 = vsub.f32 %v6998_v50, %v667_v0  ;;  %v1094_v5 = vsub.f32 %v6980_v34, %v662_v31  ;;  %v1096_v0 = vsub.f32 %v6985_v39, %v662_v31 }
 0x1de   : > { %13660 = vst [vmem:[#allocation265_spill] sm:$0xff] %v7938_v40  ;;  %v7941_v26 = vpop.eup %5181  ;;  %5201 = vtanh.f32 %v1103_v53  ;;  %v1095_v53 = vsub.f32 %v6983_v37, %v662_v31 }
 0x1df   : > { %13661 = vst [vmem:[#allocation266_spill] sm:$0xff] %v7941_v26  ;;  %v7944_v18 = vpop.eup %5183  ;;  %5203 = vtanh.f32 %v1104_v2  ;;  %v2390_v2 = vld [vmem:[%s6877_s29 + $0x1c8] sm:$0xff] }
 0x1e0   : > { %13662 = vst [vmem:[#allocation267_spill] sm:$0xff] %v7944_v18  ;;  %v7947_v16 = vpop.eup %5185  ;;  %5205 = vtanh.f32 %v1105_v7 }
 0x1e1   : > { %13663 = vst [vmem:[#allocation268_spill] sm:$0xff] %v7947_v16  ;;  %v7950_v40 = vpop.eup %5187  ;;  %5207 = vtanh.f32 %v1106_v21  ;;  %v2389_v16 = vld [vmem:[%s6877_s29 + $0x1c0] sm:$0xff]  ;;  %v2454_v21 = vmul.f32 500.0, %v2390_v2 }
 0x1e2   : > { %13664 = vst [vmem:[#allocation269_spill] sm:$0xff] %v7950_v40  ;;  %v7953_v26 = vpop.eup %5189  ;;  %5209 = vtanh.f32 %v1107_v59  ;;  %v2453_v40 = vmul.f32 500.0, %v2389_v16  ;;  %v1098_v59 = vsub.f32 %v6991_v45, %v662_v31 }
 0x1e3   : > { %13665 = vst [vmem:[#allocation270_spill] sm:$0xff] %v7953_v26  ;;  %v7956_v18 = vpop.eup %5191  ;;  %5211 = vtanh.f32 %v1108_v12  ;;  %v677_v26 = vpop.permute.xlu1 %676  ;;  %v1099_v12 = vsub.f32 %v6995_v48, %v662_v31  ;;  %2756 = vperm.xlu1 %4588, %v2454_v21  }
 0x1e4   : > { %13666 = vst [vmem:[#allocation271_spill] sm:$0xff] %v7956_v18  ;;  %v7961_v7 = vpop.eup %5193  ;;  %5213 = vtanh.f32 %v1093_v19  ;;  %2751 = vperm.xlu0 %4587, %v2453_v40   ;;  %v1117_v16 = vsub.f32 %v6977_v29, %v677_v26  ;;  %v1119_v40 = vsub.f32 %v6983_v37, %v677_v26 }
 0x1e5   : > { %13667 = vst [vmem:[#allocation272_spill] sm:$0xff] %v7961_v7  ;;  %v7964_v6 = vpop.eup %5195  ;;  %5215 = vtanh.f32 %v1094_v5  ;;  %v1100_v7 = vsub.f32 %v6998_v50, %v662_v31  ;;  %v1118_v5 = vsub.f32 %v6980_v34, %v677_v26  ;;  %v1120_v31 = vsub.f32 %v6985_v39, %v677_v26 }
 0x1e6   : > { %13668 = vst [vmem:[#allocation273_spill] sm:$0xff] %v7964_v6  ;;  %v7967_v62 = vpop.eup %5197  ;;  %5217 = vtanh.f32 %v1095_v53 }
 0x1e7   : > { %13669 = vst [vmem:[#allocation274_spill] sm:$0xff] %v7967_v62  ;;  %v7970_v18 = vpop.eup %5199  ;;  %5219 = vtanh.f32 %v1096_v0 }
 0x1e8   : > { %13670 = vst [vmem:[#allocation275_spill] sm:$0xff] %v7970_v18  ;;  %v7973_v19 = vpop.eup %5201  ;;  %5221 = vtanh.f32 %v1097_v20  ;;  %v1121_v20 = vsub.f32 %v6987_v41, %v677_v26 }
 0x1e9   : > { %13671 = vst [vmem:[#allocation276_spill] sm:$0xff] %v7973_v19  ;;  %v7976_v2 = vpop.eup %5203  ;;  %5223 = vtanh.f32 %v1098_v59  ;;  %v1122_v59 = vsub.f32 %v6991_v45, %v677_v26 }
 0x1ea   : > { %13672 = vst [vmem:[#allocation277_spill] sm:$0xff] %v7976_v2  ;;  %v7979_v62 = vpop.eup %5205  ;;  %5225 = vtanh.f32 %v1099_v12  ;;  %v672_v2 = vpop.permute.xlu0 %671  ;;  %v1123_v12 = vsub.f32 %v6995_v48, %v677_v26 }
 0x1eb   : > { %13673 = vst [vmem:[#allocation278_spill] sm:$0xff] %v7979_v62  ;;  %v7982_v53 = vpop.eup %5207  ;;  %5227 = vtanh.f32 %v1100_v7  ;;  %v1113_v19 = vsub.f32 %v6987_v41, %v672_v2 }
 0x1ec   : > { %13674 = vst [vmem:[#allocation279_spill] sm:$0xff] %v7982_v53  ;;  %v7985_v0 = vpop.eup %5209  ;;  %5229 = vtanh.f32 %v1117_v16  ;;  %v1109_v16 = vsub.f32 %v6977_v29, %v672_v2 }
 0x1ed   : > { %13675 = vst [vmem:[#allocation280_spill] sm:$0xff] %v7985_v0  ;;  %v7988_v21 = vpop.eup %5211  ;;  %5231 = vtanh.f32 %v1118_v5  ;;  %v1124_v0 = vsub.f32 %v6998_v50, %v677_v26  ;;  %v1110_v5 = vsub.f32 %v6980_v34, %v672_v2  ;;  %v1112_v26 = vsub.f32 %v6985_v39, %v672_v2 }
 0x1ee   : > { %13676 = vst [vmem:[#allocation281_spill] sm:$0xff] %v7988_v21  ;;  %v7991_v62 = vpop.eup %5213  ;;  %5233 = vtanh.f32 %v1119_v40  ;;  %v1111_v40 = vsub.f32 %v6983_v37, %v672_v2 }
 0x1ef   : > { %13677 = vst [vmem:[#allocation282_spill] sm:$0xff] %v7991_v62  ;;  %v7994_v7 = vpop.eup %5215  ;;  %5235 = vtanh.f32 %v1120_v31  ;;  %v2392_v31 = vld [vmem:[%s6877_s29 + $0x1d8] sm:$0xff] }
 0x1f0   : > { %13678 = vst [vmem:[#allocation283_spill] sm:$0xff] %v7994_v7  ;;  %v7997_v53 = vpop.eup %5217  ;;  %5237 = vtanh.f32 %v1121_v20 }
 0x1f1   : > { %13679 = vst [vmem:[#allocation284_spill] sm:$0xff] %v7997_v53  ;;  %v8000_v21 = vpop.eup %5219  ;;  %5239 = vtanh.f32 %v1122_v59  ;;  %v2391_v53 = vld [vmem:[%s6877_s29 + $0x1d0] sm:$0xff]  ;;  %v2456_v59 = vmul.f32 500.0, %v2392_v31 }
 0x1f2   : > { %13680 = vst [vmem:[#allocation285_spill] sm:$0xff] %v8000_v21  ;;  %v8003_v62 = vpop.eup %5221  ;;  %5241 = vtanh.f32 %v1123_v12  ;;  %v2455_v21 = vmul.f32 500.0, %v2391_v53  ;;  %v1114_v12 = vsub.f32 %v6991_v45, %v672_v2 }
 0x1f3   : > { %13681 = vst [vmem:[#allocation286_spill] sm:$0xff] %v8003_v62  ;;  %v8006_v7 = vpop.eup %5223  ;;  %5243 = vtanh.f32 %v1124_v0  ;;  %v687_v62 = vpop.permute.xlu1 %686  ;;  %v1115_v0 = vsub.f32 %v6995_v48, %v672_v2  ;;  %2766 = vperm.xlu1 %4588, %v2456_v59  }
 0x1f4   : > { %13682 = vst [vmem:[#allocation287_spill] sm:$0xff] %v8006_v7  ;;  %v8011_v20 = vpop.eup %5225  ;;  %5245 = vtanh.f32 %v1109_v16  ;;  %2761 = vperm.xlu0 %4587, %v2455_v21   ;;  %v1133_v53 = vsub.f32 %v6977_v29, %v687_v62  ;;  %v1135_v21 = vsub.f32 %v6983_v37, %v687_v62 }
 0x1f5   : > { %13683 = vst [vmem:[#allocation288_spill] sm:$0xff] %v8011_v20  ;;  %v8014_v18 = vpop.eup %5227  ;;  %5247 = vtanh.f32 %v1110_v5  ;;  %v1116_v20 = vsub.f32 %v6998_v50, %v672_v2  ;;  %v1134_v5 = vsub.f32 %v6980_v34, %v687_v62  ;;  %v1136_v2 = vsub.f32 %v6985_v39, %v687_v62 }
 0x1f6   : > { %13684 = vst [vmem:[#allocation289_spill] sm:$0xff] %v8014_v18  ;;  %v8017_v6 = vpop.eup %5229  ;;  %5249 = vtanh.f32 %v1111_v40 }
 0x1f7   : > { %13685 = vst [vmem:[#allocation290_spill] sm:$0xff] %v8017_v6  ;;  %v8020_v7 = vpop.eup %5231  ;;  %5251 = vtanh.f32 %v1112_v26 }
 0x1f8   : > { %13686 = vst [vmem:[#allocation291_spill] sm:$0xff] %v8020_v7  ;;  %v8023_v16 = vpop.eup %5233  ;;  %5253 = vtanh.f32 %v1113_v19  ;;  %v1137_v19 = vsub.f32 %v6987_v41, %v687_v62 }
 0x1f9   : > { %13687 = vst [vmem:[#allocation292_spill] sm:$0xff] %v8023_v16  ;;  %v8026_v31 = vpop.eup %5235  ;;  %5255 = vtanh.f32 %v1114_v12  ;;  %v1138_v12 = vsub.f32 %v6991_v45, %v687_v62 }
 0x1fa   : > { %13688 = vst [vmem:[#allocation293_spill] sm:$0xff] %v8026_v31  ;;  %v8029_v6 = vpop.eup %5237  ;;  %5257 = vtanh.f32 %v1115_v0  ;;  %v682_v31 = vpop.permute.xlu0 %681  ;;  %v1139_v0 = vsub.f32 %v6995_v48, %v687_v62 }
 0x1fb   : > { %13689 = vst [vmem:[#allocation294_spill] sm:$0xff] %v8029_v6  ;;  %v8032_v40 = vpop.eup %5239  ;;  %5259 = vtanh.f32 %v1116_v20  ;;  %v1129_v16 = vsub.f32 %v6987_v41, %v682_v31 }
 0x1fc   : > { %13690 = vst [vmem:[#allocation295_spill] sm:$0xff] %v8032_v40  ;;  %v8035_v26 = vpop.eup %5241  ;;  %5261 = vtanh.f32 %v1133_v53  ;;  %v1125_v53 = vsub.f32 %v6977_v29, %v682_v31 }
 0x1fd   : > { %13691 = vst [vmem:[#allocation296_spill] sm:$0xff] %v8035_v26  ;;  %v8038_v59 = vpop.eup %5243  ;;  %5263 = vtanh.f32 %v1134_v5  ;;  %v1140_v26 = vsub.f32 %v6998_v50, %v687_v62  ;;  %v1126_v5 = vsub.f32 %v6980_v34, %v682_v31  ;;  %v1128_v62 = vsub.f32 %v6985_v39, %v682_v31 }
 0x1fe   : > { %13692 = vst [vmem:[#allocation297_spill] sm:$0xff] %v8038_v59  ;;  %v8041_v6 = vpop.eup %5245  ;;  %5265 = vtanh.f32 %v1135_v21  ;;  %v1127_v21 = vsub.f32 %v6983_v37, %v682_v31 }
 0x1ff   : > { %13693 = vst [vmem:[#allocation298_spill] sm:$0xff] %v8041_v6  ;;  %v8044_v20 = vpop.eup %5247  ;;  %5267 = vtanh.f32 %v1136_v2  ;;  %v2394_v2 = vld [vmem:[%s6877_s29 + $0x1e8] sm:$0xff] }
 0x200   : > { %13694 = vst [vmem:[#allocation299_spill] sm:$0xff] %v8044_v20  ;;  %v8047_v40 = vpop.eup %5249  ;;  %5269 = vtanh.f32 %v1137_v19 }
 0x201   : > { %13695 = vst [vmem:[#allocation300_spill] sm:$0xff] %v8047_v40  ;;  %v8050_v59 = vpop.eup %5251  ;;  %5271 = vtanh.f32 %v1138_v12  ;;  %v2393_v40 = vld [vmem:[%s6877_s29 + $0x1e0] sm:$0xff]  ;;  %v2458_v12 = vmul.f32 500.0, %v2394_v2 }
 0x202   : > { %13696 = vst [vmem:[#allocation301_spill] sm:$0xff] %v8050_v59  ;;  %v8053_v6 = vpop.eup %5253  ;;  %5273 = vtanh.f32 %v1139_v0  ;;  %v2457_v59 = vmul.f32 500.0, %v2393_v40  ;;  %v1130_v0 = vsub.f32 %v6991_v45, %v682_v31 }
 0x203   : > { %13697 = vst [vmem:[#allocation302_spill] sm:$0xff] %v8053_v6  ;;  %v8056_v20 = vpop.eup %5255  ;;  %5275 = vtanh.f32 %v1140_v26  ;;  %v697_v6 = vpop.permute.xlu1 %696  ;;  %v1131_v26 = vsub.f32 %v6995_v48, %v682_v31  ;;  %2776 = vperm.xlu1 %4588, %v2458_v12  }
 0x204   : > { %13698 = vst [vmem:[#allocation303_spill] sm:$0xff] %v8056_v20  ;;  %v8061_v19 = vpop.eup %5257  ;;  %5277 = vtanh.f32 %v1125_v53  ;;  %2771 = vperm.xlu0 %4587, %v2457_v59   ;;  %v1149_v40 = vsub.f32 %v6977_v29, %v697_v6  ;;  %v1151_v59 = vsub.f32 %v6983_v37, %v697_v6 }
 0x205   : > { %13699 = vst [vmem:[#allocation304_spill] sm:$0xff] %v8061_v19  ;;  %v8064_v7 = vpop.eup %5259  ;;  %5279 = vtanh.f32 %v1126_v5  ;;  %v1132_v19 = vsub.f32 %v6998_v50, %v682_v31  ;;  %v1150_v5 = vsub.f32 %v6980_v34, %v697_v6  ;;  %v1152_v31 = vsub.f32 %v6985_v39, %v697_v6 }
 0x206   : > { %13700 = vst [vmem:[#allocation305_spill] sm:$0xff] %v8064_v7  ;;  %v8067_v18 = vpop.eup %5261  ;;  %5281 = vtanh.f32 %v1127_v21 }
 0x207   : > { %13701 = vst [vmem:[#allocation306_spill] sm:$0xff] %v8067_v18  ;;  %v8070_v20 = vpop.eup %5263  ;;  %5283 = vtanh.f32 %v1128_v62 }
 0x208   : > { %13702 = vst [vmem:[#allocation307_spill] sm:$0xff] %v8070_v20  ;;  %v8073_v53 = vpop.eup %5265  ;;  %5285 = vtanh.f32 %v1129_v16  ;;  %v1153_v16 = vsub.f32 %v6987_v41, %v697_v6 }
 0x209   : > { %13703 = vst [vmem:[#allocation308_spill] sm:$0xff] %v8073_v53  ;;  %v8076_v2 = vpop.eup %5267  ;;  %5287 = vtanh.f32 %v1130_v0  ;;  %v1154_v0 = vsub.f32 %v6991_v45, %v697_v6 }
 0x20a   : > { %13704 = vst [vmem:[#allocation309_spill] sm:$0xff] %v8076_v2  ;;  %v8079_v18 = vpop.eup %5269  ;;  %5289 = vtanh.f32 %v1131_v26  ;;  %v692_v2 = vpop.permute.xlu0 %691  ;;  %v1155_v26 = vsub.f32 %v6995_v48, %v697_v6 }
 0x20b   : > { %13705 = vst [vmem:[#allocation310_spill] sm:$0xff] %v8079_v18  ;;  %v8082_v21 = vpop.eup %5271  ;;  %5291 = vtanh.f32 %v1132_v19  ;;  %v1156_v19 = vsub.f32 %v6998_v50, %v697_v6  ;;  %v1144_v6 = vsub.f32 %v6985_v39, %v692_v2 }
 0x20c   : > { %13706 = vst [vmem:[#allocation311_spill] sm:$0xff] %v8082_v21  ;;  %v8085_v62 = vpop.eup %5273  ;;  %5293 = vtanh.f32 %v1149_v40  ;;  %v1141_v40 = vsub.f32 %v6977_v29, %v692_v2 }
 0x20d   : > { %13707 = vst [vmem:[#allocation312_spill] sm:$0xff] %v8085_v62  ;;  %v8088_v12 = vpop.eup %5275  ;;  %5295 = vtanh.f32 %v1150_v5  ;;  %v1142_v5 = vsub.f32 %v6980_v34, %v692_v2 }
 0x20e   : > { %13708 = vst [vmem:[#allocation313_spill] sm:$0xff] %v8088_v12  ;;  %v8091_v18 = vpop.eup %5277  ;;  %5297 = vtanh.f32 %v1151_v59  ;;  %v1143_v59 = vsub.f32 %v6983_v37, %v692_v2 }
 0x20f   : > { %13709 = vst [vmem:[#allocation314_spill] sm:$0xff] %v8091_v18  ;;  %v8094_v21 = vpop.eup %5279  ;;  %5299 = vtanh.f32 %v1152_v31 }
 0x210   : > { %13710 = vst [vmem:[#allocation315_spill] sm:$0xff] %v8094_v21  ;;  %v8097_v62 = vpop.eup %5281  ;;  %5301 = vtanh.f32 %v1153_v16  ;;  %v1145_v16 = vsub.f32 %v6987_v41, %v692_v2 }
 0x211   : > { %13711 = vst [vmem:[#allocation316_spill] sm:$0xff] %v8097_v62  ;;  %v8100_v12 = vpop.eup %5283  ;;  %5303 = vtanh.f32 %v1154_v0  ;;  %v1146_v0 = vsub.f32 %v6991_v45, %v692_v2 }
 0x212   : > { %13712 = vst [vmem:[#allocation317_spill] sm:$0xff] %v8100_v12  ;;  %v8103_v53 = vpop.eup %5285  ;;  %5305 = vtanh.f32 %v1155_v26  ;;  %v707_v12 = vpop.permute.xlu1 %706  ;;  %v1147_v26 = vsub.f32 %v6995_v48, %v692_v2 }
 0x213   : > { %13713 = vst [vmem:[#allocation318_spill] sm:$0xff] %v8103_v53  ;;  %v8106_v18 = vpop.eup %5287  ;;  %5307 = vtanh.f32 %v1156_v19  ;;  %v1148_v19 = vsub.f32 %v6998_v50, %v692_v2  ;;  %v1168_v2 = vsub.f32 %v6985_v39, %v707_v12 }
 0x214   : > { %13714 = vst [vmem:[#allocation319_spill] sm:$0xff] %v8106_v18  ;;  %v8109_v31 = vpop.eup %5289  ;;  %5309 = vtanh.f32 %v1141_v40  ;;  %v1165_v40 = vsub.f32 %v6977_v29, %v707_v12 }
 0x215   : > { %13715 = vst [vmem:[#allocation320_spill] sm:$0xff] %v8109_v31  ;;  %v8112_v62 = vpop.eup %5291  ;;  %5311 = vtanh.f32 %v1142_v5  ;;  %v1166_v5 = vsub.f32 %v6980_v34, %v707_v12 }
 0x216   : > { %13716 = vst [vmem:[#allocation321_spill] sm:$0xff] %v8112_v62  ;;  %v8115_v53 = vpop.eup %5293  ;;  %5313 = vtanh.f32 %v1143_v59  ;;  %v1167_v59 = vsub.f32 %v6983_v37, %v707_v12 }
 0x217   : > { %13717 = vst [vmem:[#allocation322_spill] sm:$0xff] %v8115_v53  ;;  %v8118_v18 = vpop.eup %5295  ;;  %5315 = vtanh.f32 %v1144_v6 }
 0x218   : > { %13718 = vst [vmem:[#allocation323_spill] sm:$0xff] %v8118_v18  ;;  %v8121_v31 = vpop.eup %5297  ;;  %5317 = vtanh.f32 %v1145_v16  ;;  %v1169_v16 = vsub.f32 %v6987_v41, %v707_v12 }
 0x219   : > { %13719 = vst [vmem:[#allocation324_spill] sm:$0xff] %v8121_v31  ;;  %v8124_v62 = vpop.eup %5299  ;;  %5319 = vtanh.f32 %v1146_v0  ;;  %v1170_v0 = vsub.f32 %v6991_v45, %v707_v12  ;;  %v702_v31 = vpop.permute.xlu0 %701 }
 0x21a   : > { %13720 = vst [vmem:[#allocation325_spill] sm:$0xff] %v8124_v62  ;;  %v8127_v53 = vpop.eup %5301  ;;  %5321 = vtanh.f32 %v1147_v26  ;;  %v2395_v26 = vld [vmem:[%s6877_s29 + $0x1f0] sm:$0xff] }
 0x21b   : > { %13721 = vst [vmem:[#allocation326_spill] sm:$0xff] %v8127_v53  ;;  %v8130_v18 = vpop.eup %5303  ;;  %5323 = vtanh.f32 %v1148_v19  ;;  %v2396_v53 = vld [vmem:[%s6877_s29 + $0x1f8] sm:$0xff]  ;;  %v2459_v20 = vmul.f32 500.0, %v2395_v26  ;;  %s6643_s29 = scalar_lea.vmem %s6642_s24, 2048 }
 0x21c   : > { %13722 = vst [vmem:[#allocation327_spill] sm:$0xff] %v8130_v18  ;;  %v8133_v6 = vpop.eup %5305  ;;  %5325 = vtanh.f32 %v1165_v40  ;;  %v1171_v18 = vsub.f32 %v6995_v48, %v707_v12  ;;  %v2460_v19 = vmul.f32 500.0, %v2396_v53  ;;  %v1159_v53 = vsub.f32 %v6983_v37, %v702_v31  ;;  %p6645_p5 = scmp.lt.s32.totalorder %s6643_s29, %s6637_s14 }
 0x21d   : > { %13723 = vst [vmem:[#allocation328_spill] sm:$0xff] %v8133_v6  ;;  %v8136_v62 = vpop.eup %5307  ;;  %5327 = vtanh.f32 %v1166_v5  ;;  %v1172_v6 = vsub.f32 %v6998_v50, %v707_v12  ;;  %v1157_v5 = vsub.f32 %v6977_v29, %v702_v31  ;;  %2781 = vperm.xlu0 %4587, %v2459_v20   ;;  %v1160_v12 = vsub.f32 %v6985_v39, %v702_v31 }
 0x21e   : > { %13724 = vst [vmem:[#allocation329_spill] sm:$0xff] %v8136_v62  ;;  %v8141_v21 = vpop.eup %5309  ;;  %5329 = vtanh.f32 %v1167_v59  ;;  %2786 = vperm.xlu1 %4588, %v2460_v19   ;;  %v717_v19 = vpop.permute.xlu1 %716  ;;  %p6646_p6 = por %p6645_p5, %p6644_p4 }
 0x21f   : > { %13725 = vst [vmem:[#allocation330_spill] sm:$0xff] %v8141_v21  ;;  %v8144_v7 = vpop.eup %5311  ;;  %5331 = vtanh.f32 %v1168_v2  ;;  %v1158_v21 = vsub.f32 %v6980_v34, %v702_v31 }
 0x220   : > { %v8147_v40 = vpop.eup %5313  ;;  %5333 = vtanh.f32 %v1169_v16  ;;  %v1161_v16 = vsub.f32 %v6987_v41, %v702_v31  ;;  %p6647_p7 = pnand %p6646_p6, %p6640_p2 }
 0x221   : > { %v8150_v62 = vpop.eup %5315  ;;  %5335 = vtanh.f32 %v1170_v0  ;;  %v1162_v0 = vsub.f32 %v6991_v45, %v702_v31 }
 0x222   : > { %13726 = vst [vmem:[#allocation331_spill] sm:$0xff] %v8150_v62  ;;  %v8153_v59 = vpop.eup %5317  ;;  %5337 = vtanh.f32 %v1171_v18  ;;  %v1163_v18 = vsub.f32 %v6995_v48, %v702_v31 }
 0x223   : > { %13727 = vst [vmem:[#allocation332_spill] sm:$0xff] %v8153_v59  ;;  %v8156_v26 = vpop.eup %5319  ;;  %5339 = vtanh.f32 %v1172_v6  ;;  %v1164_v6 = vsub.f32 %v6998_v50, %v702_v31  ;;  %v1184_v31 = vsub.f32 %v6985_v39, %v717_v19 }
 0x224   : > { %13728 = vst [vmem:[#allocation333_spill] sm:$0xff] %v8156_v26  ;;  %v8159_v2 = vpop.eup %5321  ;;  %5341 = vtanh.f32 %v1157_v5  ;;  %v1181_v5 = vsub.f32 %v6977_v29, %v717_v19 }
 0x225   : > { %13729 = vst [vmem:[#allocation334_spill] sm:$0xff] %v8159_v2  ;;  %v8162_v20 = vpop.eup %5323  ;;  %5343 = vtanh.f32 %v1158_v21  ;;  %v1182_v21 = vsub.f32 %v6980_v34, %v717_v19 }
 0x226   : > { %13730 = vst [vmem:[#allocation335_spill] sm:$0xff] %v8162_v20  ;;  %v8165_v59 = vpop.eup %5325  ;;  %5345 = vtanh.f32 %v1159_v53  ;;  %v1183_v53 = vsub.f32 %v6983_v37, %v717_v19 }
 0x227   : > { %13731 = vst [vmem:[#allocation336_spill] sm:$0xff] %v8165_v59  ;;  %v8168_v26 = vpop.eup %5327  ;;  %5347 = vtanh.f32 %v1160_v12 }
 0x228   : > { %13732 = vst [vmem:[#allocation337_spill] sm:$0xff] %v8168_v26  ;;  %v8171_v2 = vpop.eup %5329  ;;  %5349 = vtanh.f32 %v1161_v16  ;;  %v1185_v16 = vsub.f32 %v6987_v41, %v717_v19 }
 0x229   : > { %13733 = vst [vmem:[#allocation338_spill] sm:$0xff] %v8171_v2  ;;  %v8174_v20 = vpop.eup %5331  ;;  %5351 = vtanh.f32 %v1162_v0  ;;  %v1186_v0 = vsub.f32 %v6991_v45, %v717_v19 }
 0x22a   : > { %13734 = vst [vmem:[#allocation339_spill] sm:$0xff] %v8174_v20  ;;  %v8177_v62 = vpop.eup %5333  ;;  %5353 = vtanh.f32 %v1163_v18  ;;  %v712_v20 = vpop.permute.xlu0 %711  ;;  %v1187_v18 = vsub.f32 %v6995_v48, %v717_v19 }
 0x22b   : > { %13735 = vst [vmem:[#allocation340_spill] sm:$0xff] %v8177_v62  ;;  %v8180_v59 = vpop.eup %5335  ;;  %5355 = vtanh.f32 %v1164_v6  ;;  %v1188_v6 = vsub.f32 %v6998_v50, %v717_v19  ;;  %v1176_v19 = vsub.f32 %v6985_v39, %v712_v20 }
 0x22c   : > { %13736 = vst [vmem:[#allocation341_spill] sm:$0xff] %v8180_v59  ;;  %v8183_v12 = vpop.eup %5337  ;;  %5357 = vtanh.f32 %v1181_v5  ;;  %v1173_v5 = vsub.f32 %v6977_v29, %v712_v20 }
 0x22d   : > { %13737 = vst [vmem:[#allocation342_spill] sm:$0xff] %v8183_v12  ;;  %v8186_v2 = vpop.eup %5339  ;;  %5359 = vtanh.f32 %v1182_v21  ;;  %v1174_v21 = vsub.f32 %v6980_v34, %v712_v20 }
 0x22e   : > { %13738 = vst [vmem:[#allocation343_spill] sm:$0xff] %v8186_v2  ;;  %v8189_v62 = vpop.eup %5341  ;;  %5361 = vtanh.f32 %v1183_v53  ;;  %v1175_v53 = vsub.f32 %v6983_v37, %v712_v20 }
 0x22f   : > { %13739 = vst [vmem:[#allocation344_spill] sm:$0xff] %v8189_v62  ;;  %v8192_v59 = vpop.eup %5343  ;;  %5363 = vtanh.f32 %v1184_v31 }
 0x230   : > { %13740 = vst [vmem:[#allocation345_spill] sm:$0xff] %v8192_v59  ;;  %v8195_v12 = vpop.eup %5345  ;;  %5365 = vtanh.f32 %v1185_v16  ;;  %v1177_v16 = vsub.f32 %v6987_v41, %v712_v20 }
 0x231   : > { %13741 = vst [vmem:[#allocation346_spill] sm:$0xff] %v8195_v12  ;;  %v8198_v2 = vpop.eup %5347  ;;  %5367 = vtanh.f32 %v1186_v0  ;;  %v1178_v0 = vsub.f32 %v6991_v45, %v712_v20 }
 0x232   : > { %13742 = vst [vmem:[#allocation347_spill] sm:$0xff] %v8198_v2  ;;  %v8201_v26 = vpop.eup %5349  ;;  %5369 = vtanh.f32 %v1187_v18  ;;  %v727_v2 = vpop.permute.xlu1 %726  ;;  %v1179_v18 = vsub.f32 %v6995_v48, %v712_v20 }
 0x233   : > { %13743 = vst [vmem:[#allocation348_spill] sm:$0xff] %v8201_v26  ;;  %v8204_v62 = vpop.eup %5351  ;;  %5371 = vtanh.f32 %v1188_v6  ;;  %v1180_v6 = vsub.f32 %v6998_v50, %v712_v20  ;;  %v1200_v20 = vsub.f32 %v6985_v39, %v727_v2 }
 0x234   : > { %13744 = vst [vmem:[#allocation349_spill] sm:$0xff] %v8204_v62  ;;  %v8207_v31 = vpop.eup %5353  ;;  %5373 = vtanh.f32 %v1173_v5  ;;  %v1197_v5 = vsub.f32 %v6977_v29, %v727_v2 }
 0x235   : > { %13745 = vst [vmem:[#allocation350_spill] sm:$0xff] %v8207_v31  ;;  %v8210_v12 = vpop.eup %5355  ;;  %5375 = vtanh.f32 %v1174_v21  ;;  %v1198_v21 = vsub.f32 %v6980_v34, %v727_v2 }
 0x236   : > { %13746 = vst [vmem:[#allocation351_spill] sm:$0xff] %v8210_v12  ;;  %v8213_v26 = vpop.eup %5357  ;;  %5377 = vtanh.f32 %v1175_v53  ;;  %v1199_v53 = vsub.f32 %v6983_v37, %v727_v2 }
 0x237   : > { %13747 = vst [vmem:[#allocation352_spill] sm:$0xff] %v8213_v26  ;;  %v8216_v62 = vpop.eup %5359  ;;  %5379 = vtanh.f32 %v1176_v19 }
 0x238   : > { %13748 = vst [vmem:[#allocation353_spill] sm:$0xff] %v8216_v62  ;;  %v8219_v31 = vpop.eup %5361  ;;  %5381 = vtanh.f32 %v1177_v16  ;;  %v1201_v16 = vsub.f32 %v6987_v41, %v727_v2 }
 0x239   : > { %13749 = vst [vmem:[#allocation354_spill] sm:$0xff] %v8219_v31  ;;  %v8222_v12 = vpop.eup %5363  ;;  %5383 = vtanh.f32 %v1178_v0  ;;  %v1202_v0 = vsub.f32 %v6991_v45, %v727_v2 }
 0x23a   : > { %13750 = vst [vmem:[#allocation355_spill] sm:$0xff] %v8222_v12  ;;  %v8225_v59 = vpop.eup %5365  ;;  %5385 = vtanh.f32 %v1179_v18  ;;  %v722_v12 = vpop.permute.xlu0 %721  ;;  %v1203_v18 = vsub.f32 %v6995_v48, %v727_v2 }
 0x23b   : > { %13751 = vst [vmem:[#allocation356_spill] sm:$0xff] %v8225_v59  ;;  %v8228_v26 = vpop.eup %5367  ;;  %5387 = vtanh.f32 %v1180_v6  ;;  %v1204_v6 = vsub.f32 %v6998_v50, %v727_v2  ;;  %v1192_v2 = vsub.f32 %v6985_v39, %v722_v12 }
 0x23c   : > { %13752 = vst [vmem:[#allocation357_spill] sm:$0xff] %v8228_v26  ;;  %v8231_v19 = vpop.eup %5369  ;;  %5389 = vtanh.f32 %v1197_v5  ;;  %v1189_v5 = vsub.f32 %v6977_v29, %v722_v12 }
 0x23d   : > { %13753 = vst [vmem:[#allocation358_spill] sm:$0xff] %v8231_v19  ;;  %v8234_v31 = vpop.eup %5371  ;;  %5391 = vtanh.f32 %v1198_v21  ;;  %v1190_v21 = vsub.f32 %v6980_v34, %v722_v12 }
 0x23e   : > { %13754 = vst [vmem:[#allocation359_spill] sm:$0xff] %v8234_v31  ;;  %v8237_v59 = vpop.eup %5373  ;;  %5393 = vtanh.f32 %v1199_v53  ;;  %v1191_v53 = vsub.f32 %v6983_v37, %v722_v12 }
 0x23f   : > { %13755 = vst [vmem:[#allocation360_spill] sm:$0xff] %v8237_v59  ;;  %v8240_v26 = vpop.eup %5375  ;;  %5395 = vtanh.f32 %v1200_v20 }
 0x240   : > { %13756 = vst [vmem:[#allocation361_spill] sm:$0xff] %v8240_v26  ;;  %v8243_v19 = vpop.eup %5377  ;;  %5397 = vtanh.f32 %v1201_v16  ;;  %v1193_v16 = vsub.f32 %v6987_v41, %v722_v12 }
 0x241   : > { %13757 = vst [vmem:[#allocation362_spill] sm:$0xff] %v8243_v19  ;;  %v8246_v31 = vpop.eup %5379  ;;  %5399 = vtanh.f32 %v1202_v0  ;;  %v1194_v0 = vsub.f32 %v6991_v45, %v722_v12 }
 0x242   : > { %13758 = vst [vmem:[#allocation363_spill] sm:$0xff] %v8246_v31  ;;  %v8249_v62 = vpop.eup %5381  ;;  %5401 = vtanh.f32 %v1203_v18  ;;  %v737_v31 = vpop.permute.xlu1 %736  ;;  %v1195_v18 = vsub.f32 %v6995_v48, %v722_v12 }
 0x243   : > { %13759 = vst [vmem:[#allocation364_spill] sm:$0xff] %v8249_v62  ;;  %v8252_v59 = vpop.eup %5383  ;;  %5403 = vtanh.f32 %v1204_v6  ;;  %v1196_v6 = vsub.f32 %v6998_v50, %v722_v12  ;;  %v1216_v12 = vsub.f32 %v6985_v39, %v737_v31 }
 0x244   : > { %13760 = vst [vmem:[#allocation365_spill] sm:$0xff] %v8252_v59  ;;  %v8255_v20 = vpop.eup %5385  ;;  %5405 = vtanh.f32 %v1189_v5  ;;  %v1213_v5 = vsub.f32 %v6977_v29, %v737_v31 }
 0x245   : > { %13761 = vst [vmem:[#allocation366_spill] sm:$0xff] %v8255_v20  ;;  %v8258_v19 = vpop.eup %5387  ;;  %5407 = vtanh.f32 %v1190_v21  ;;  %v1214_v21 = vsub.f32 %v6980_v34, %v737_v31 }
 0x246   : > { %13762 = vst [vmem:[#allocation367_spill] sm:$0xff] %v8258_v19  ;;  %v8261_v62 = vpop.eup %5389  ;;  %5409 = vtanh.f32 %v1191_v53  ;;  %v1215_v53 = vsub.f32 %v6983_v37, %v737_v31 }
 0x247   : > { %13763 = vst [vmem:[#allocation368_spill] sm:$0xff] %v8261_v62  ;;  %v8264_v59 = vpop.eup %5391  ;;  %5411 = vtanh.f32 %v1192_v2 }
 0x248   : > { %13764 = vst [vmem:[#allocation369_spill] sm:$0xff] %v8264_v59  ;;  %v8267_v20 = vpop.eup %5393  ;;  %5413 = vtanh.f32 %v1193_v16  ;;  %v1217_v16 = vsub.f32 %v6987_v41, %v737_v31 }
 0x249   : > { %13765 = vst [vmem:[#allocation370_spill] sm:$0xff] %v8267_v20  ;;  %v8270_v19 = vpop.eup %5395  ;;  %5415 = vtanh.f32 %v1194_v0  ;;  %v1218_v0 = vsub.f32 %v6991_v45, %v737_v31 }
 0x24a   : > { %13766 = vst [vmem:[#allocation371_spill] sm:$0xff] %v8270_v19  ;;  %v8273_v26 = vpop.eup %5397  ;;  %5417 = vtanh.f32 %v1195_v18  ;;  %v732_v19 = vpop.permute.xlu0 %731  ;;  %v1219_v18 = vsub.f32 %v6995_v48, %v737_v31 }
 0x24b   : > { %13767 = vst [vmem:[#allocation372_spill] sm:$0xff] %v8273_v26  ;;  %v8276_v62 = vpop.eup %5399  ;;  %5419 = vtanh.f32 %v1196_v6  ;;  %v1220_v6 = vsub.f32 %v6998_v50, %v737_v31  ;;  %v1208_v31 = vsub.f32 %v6985_v39, %v732_v19 }
 0x24c   : > { %13768 = vst [vmem:[#allocation373_spill] sm:$0xff] %v8276_v62  ;;  %v8279_v2 = vpop.eup %5401  ;;  %5421 = vtanh.f32 %v1213_v5  ;;  %v1205_v5 = vsub.f32 %v6977_v29, %v732_v19 }
 0x24d   : > { %13769 = vst [vmem:[#allocation374_spill] sm:$0xff] %v8279_v2  ;;  %v8282_v20 = vpop.eup %5403  ;;  %5423 = vtanh.f32 %v1214_v21  ;;  %v1206_v21 = vsub.f32 %v6980_v34, %v732_v19 }
 0x24e   : > { %13770 = vst [vmem:[#allocation375_spill] sm:$0xff] %v8282_v20  ;;  %v8285_v26 = vpop.eup %5405  ;;  %5425 = vtanh.f32 %v1215_v53  ;;  %v1207_v53 = vsub.f32 %v6983_v37, %v732_v19 }
 0x24f   : > { %13771 = vst [vmem:[#allocation376_spill] sm:$0xff] %v8285_v26  ;;  %v8288_v62 = vpop.eup %5407  ;;  %5427 = vtanh.f32 %v1216_v12 }
 0x250   : > { %13772 = vst [vmem:[#allocation377_spill] sm:$0xff] %v8288_v62  ;;  %v8291_v2 = vpop.eup %5409  ;;  %5429 = vtanh.f32 %v1217_v16  ;;  %v1209_v16 = vsub.f32 %v6987_v41, %v732_v19 }
 0x251   : > { %13773 = vst [vmem:[#allocation378_spill] sm:$0xff] %v8291_v2  ;;  %v8294_v20 = vpop.eup %5411  ;;  %5431 = vtanh.f32 %v1218_v0  ;;  %v1210_v0 = vsub.f32 %v6991_v45, %v732_v19 }
 0x252   : > { %13774 = vst [vmem:[#allocation379_spill] sm:$0xff] %v8294_v20  ;;  %v8297_v59 = vpop.eup %5413  ;;  %5433 = vtanh.f32 %v1219_v18  ;;  %v747_v20 = vpop.permute.xlu1 %746  ;;  %v1211_v18 = vsub.f32 %v6995_v48, %v732_v19 }
 0x253   : > { %13775 = vst [vmem:[#allocation380_spill] sm:$0xff] %v8297_v59  ;;  %v8300_v26 = vpop.eup %5415  ;;  %5435 = vtanh.f32 %v1220_v6  ;;  %v1212_v6 = vsub.f32 %v6998_v50, %v732_v19  ;;  %v1232_v19 = vsub.f32 %v6985_v39, %v747_v20 }
 0x254   : > { %13776 = vst [vmem:[#allocation381_spill] sm:$0xff] %v8300_v26  ;;  %v8303_v12 = vpop.eup %5417  ;;  %5437 = vtanh.f32 %v1205_v5  ;;  %v1229_v5 = vsub.f32 %v6977_v29, %v747_v20 }
 0x255   : > { %13777 = vst [vmem:[#allocation382_spill] sm:$0xff] %v8303_v12  ;;  %v8306_v2 = vpop.eup %5419  ;;  %5439 = vtanh.f32 %v1206_v21  ;;  %v1230_v21 = vsub.f32 %v6980_v34, %v747_v20 }
 0x256   : > { %13778 = vst [vmem:[#allocation383_spill] sm:$0xff] %v8306_v2  ;;  %v8309_v59 = vpop.eup %5421  ;;  %5441 = vtanh.f32 %v1207_v53  ;;  %v1231_v53 = vsub.f32 %v6983_v37, %v747_v20 }
 0x257   : > { %13779 = vst [vmem:[#allocation384_spill] sm:$0xff] %v8309_v59  ;;  %v8312_v26 = vpop.eup %5423  ;;  %5443 = vtanh.f32 %v1208_v31 }
 0x258   : > { %13780 = vst [vmem:[#allocation385_spill] sm:$0xff] %v8312_v26  ;;  %v8315_v12 = vpop.eup %5425  ;;  %5445 = vtanh.f32 %v1209_v16  ;;  %v1233_v16 = vsub.f32 %v6987_v41, %v747_v20 }
 0x259   : > { %13781 = vst [vmem:[#allocation386_spill] sm:$0xff] %v8315_v12  ;;  %v8318_v2 = vpop.eup %5427  ;;  %5447 = vtanh.f32 %v1210_v0  ;;  %v1234_v0 = vsub.f32 %v6991_v45, %v747_v20 }
 0x25a   : > { %13782 = vst [vmem:[#allocation387_spill] sm:$0xff] %v8318_v2  ;;  %v8321_v62 = vpop.eup %5429  ;;  %5449 = vtanh.f32 %v1211_v18  ;;  %v742_v2 = vpop.permute.xlu0 %741  ;;  %v1235_v18 = vsub.f32 %v6995_v48, %v747_v20 }
 0x25b   : > { %13783 = vst [vmem:[#allocation388_spill] sm:$0xff] %v8321_v62  ;;  %v8324_v59 = vpop.eup %5431  ;;  %5451 = vtanh.f32 %v1212_v6  ;;  %v1236_v6 = vsub.f32 %v6998_v50, %v747_v20  ;;  %v1224_v20 = vsub.f32 %v6985_v39, %v742_v2 }
 0x25c   : > { %13784 = vst [vmem:[#allocation389_spill] sm:$0xff] %v8324_v59  ;;  %v8327_v31 = vpop.eup %5433  ;;  %5453 = vtanh.f32 %v1229_v5  ;;  %v1221_v5 = vsub.f32 %v6977_v29, %v742_v2 }
 0x25d   : > { %13785 = vst [vmem:[#allocation390_spill] sm:$0xff] %v8327_v31  ;;  %v8330_v12 = vpop.eup %5435  ;;  %5455 = vtanh.f32 %v1230_v21  ;;  %v1222_v21 = vsub.f32 %v6980_v34, %v742_v2 }
 0x25e   : > { %13786 = vst [vmem:[#allocation391_spill] sm:$0xff] %v8330_v12  ;;  %v8333_v62 = vpop.eup %5437  ;;  %5457 = vtanh.f32 %v1231_v53  ;;  %v1223_v53 = vsub.f32 %v6983_v37, %v742_v2 }
 0x25f   : > { %13787 = vst [vmem:[#allocation392_spill] sm:$0xff] %v8333_v62  ;;  %v8336_v59 = vpop.eup %5439  ;;  %5459 = vtanh.f32 %v1232_v19 }
 0x260   : > { %13788 = vst [vmem:[#allocation393_spill] sm:$0xff] %v8336_v59  ;;  %v8339_v31 = vpop.eup %5441  ;;  %5461 = vtanh.f32 %v1233_v16  ;;  %v1225_v16 = vsub.f32 %v6987_v41, %v742_v2 }
 0x261   : > { %13789 = vst [vmem:[#allocation394_spill] sm:$0xff] %v8339_v31  ;;  %v8342_v12 = vpop.eup %5443  ;;  %5463 = vtanh.f32 %v1234_v0  ;;  %v1226_v0 = vsub.f32 %v6991_v45, %v742_v2 }
 0x262   : > { %13790 = vst [vmem:[#allocation395_spill] sm:$0xff] %v8342_v12  ;;  %v8345_v26 = vpop.eup %5445  ;;  %5465 = vtanh.f32 %v1235_v18  ;;  %v757_v12 = vpop.permute.xlu1 %756  ;;  %v1227_v18 = vsub.f32 %v6995_v48, %v742_v2 }
 0x263   : > { %13791 = vst [vmem:[#allocation396_spill] sm:$0xff] %v8345_v26  ;;  %v8348_v62 = vpop.eup %5447  ;;  %5467 = vtanh.f32 %v1236_v6  ;;  %v1228_v6 = vsub.f32 %v6998_v50, %v742_v2  ;;  %v1248_v2 = vsub.f32 %v6985_v39, %v757_v12 }
 0x264   : > { %13792 = vst [vmem:[#allocation397_spill] sm:$0xff] %v8348_v62  ;;  %v8351_v19 = vpop.eup %5449  ;;  %5469 = vtanh.f32 %v1221_v5  ;;  %v1245_v5 = vsub.f32 %v6977_v29, %v757_v12 }
 0x265   : > { %13793 = vst [vmem:[#allocation398_spill] sm:$0xff] %v8351_v19  ;;  %v8354_v31 = vpop.eup %5451  ;;  %5471 = vtanh.f32 %v1222_v21  ;;  %v1246_v21 = vsub.f32 %v6980_v34, %v757_v12 }
 0x266   : > { %13794 = vst [vmem:[#allocation399_spill] sm:$0xff] %v8354_v31  ;;  %v8357_v26 = vpop.eup %5453  ;;  %5473 = vtanh.f32 %v1223_v53  ;;  %v1247_v53 = vsub.f32 %v6983_v37, %v757_v12 }
 0x267   : > { %13795 = vst [vmem:[#allocation400_spill] sm:$0xff] %v8357_v26  ;;  %v8360_v62 = vpop.eup %5455  ;;  %5475 = vtanh.f32 %v1224_v20 }
 0x268   : > { %13796 = vst [vmem:[#allocation401_spill] sm:$0xff] %v8360_v62  ;;  %v8363_v19 = vpop.eup %5457  ;;  %5477 = vtanh.f32 %v1225_v16  ;;  %v1249_v16 = vsub.f32 %v6987_v41, %v757_v12 }
 0x269   : > { %13797 = vst [vmem:[#allocation402_spill] sm:$0xff] %v8363_v19  ;;  %v8366_v31 = vpop.eup %5459  ;;  %5479 = vtanh.f32 %v1226_v0  ;;  %v1250_v0 = vsub.f32 %v6991_v45, %v757_v12 }
 0x26a   : > { %13798 = vst [vmem:[#allocation403_spill] sm:$0xff] %v8366_v31  ;;  %v8369_v59 = vpop.eup %5461  ;;  %5481 = vtanh.f32 %v1227_v18  ;;  %v752_v31 = vpop.permute.xlu0 %751  ;;  %v1251_v18 = vsub.f32 %v6995_v48, %v757_v12 }
 0x26b   : > { %13799 = vst [vmem:[#allocation404_spill] sm:$0xff] %v8369_v59  ;;  %v8372_v26 = vpop.eup %5463  ;;  %5483 = vtanh.f32 %v1228_v6  ;;  %v1252_v6 = vsub.f32 %v6998_v50, %v757_v12  ;;  %v1240_v12 = vsub.f32 %v6985_v39, %v752_v31 }
 0x26c   : > { %13800 = vst [vmem:[#allocation405_spill] sm:$0xff] %v8372_v26  ;;  %v8375_v20 = vpop.eup %5465  ;;  %5485 = vtanh.f32 %v1245_v5  ;;  %v1237_v5 = vsub.f32 %v6977_v29, %v752_v31 }
 0x26d   : > { %13801 = vst [vmem:[#allocation406_spill] sm:$0xff] %v8375_v20  ;;  %v8378_v19 = vpop.eup %5467  ;;  %5487 = vtanh.f32 %v1246_v21  ;;  %v1238_v21 = vsub.f32 %v6980_v34, %v752_v31 }
 0x26e   : > { %13802 = vst [vmem:[#allocation407_spill] sm:$0xff] %v8378_v19  ;;  %v8381_v59 = vpop.eup %5469  ;;  %5489 = vtanh.f32 %v1247_v53  ;;  %v1239_v53 = vsub.f32 %v6983_v37, %v752_v31 }
 0x26f   : > { %13803 = vst [vmem:[#allocation408_spill] sm:$0xff] %v8381_v59  ;;  %v8384_v26 = vpop.eup %5471  ;;  %5491 = vtanh.f32 %v1248_v2 }
 0x270   : > { %13804 = vst [vmem:[#allocation409_spill] sm:$0xff] %v8384_v26  ;;  %v8387_v20 = vpop.eup %5473  ;;  %5493 = vtanh.f32 %v1249_v16  ;;  %v1241_v16 = vsub.f32 %v6987_v41, %v752_v31 }
 0x271   : > { %13805 = vst [vmem:[#allocation410_spill] sm:$0xff] %v8387_v20  ;;  %v8390_v19 = vpop.eup %5475  ;;  %5495 = vtanh.f32 %v1250_v0  ;;  %v1242_v0 = vsub.f32 %v6991_v45, %v752_v31 }
 0x272   : > { %13806 = vst [vmem:[#allocation411_spill] sm:$0xff] %v8390_v19  ;;  %v8393_v62 = vpop.eup %5477  ;;  %5497 = vtanh.f32 %v1251_v18  ;;  %v767_v19 = vpop.permute.xlu1 %766  ;;  %v1243_v18 = vsub.f32 %v6995_v48, %v752_v31 }
 0x273   : > { %13807 = vst [vmem:[#allocation412_spill] sm:$0xff] %v8393_v62  ;;  %v8396_v59 = vpop.eup %5479  ;;  %5499 = vtanh.f32 %v1252_v6  ;;  %v1244_v6 = vsub.f32 %v6998_v50, %v752_v31  ;;  %v1264_v31 = vsub.f32 %v6985_v39, %v767_v19 }
 0x274   : > { %13808 = vst [vmem:[#allocation413_spill] sm:$0xff] %v8396_v59  ;;  %v8399_v2 = vpop.eup %5481  ;;  %5501 = vtanh.f32 %v1237_v5  ;;  %v1261_v5 = vsub.f32 %v6977_v29, %v767_v19 }
 0x275   : > { %13809 = vst [vmem:[#allocation414_spill] sm:$0xff] %v8399_v2  ;;  %v8402_v20 = vpop.eup %5483  ;;  %5503 = vtanh.f32 %v1238_v21  ;;  %v1262_v21 = vsub.f32 %v6980_v34, %v767_v19 }
 0x276   : > { %13810 = vst [vmem:[#allocation415_spill] sm:$0xff] %v8402_v20  ;;  %v8405_v62 = vpop.eup %5485  ;;  %5505 = vtanh.f32 %v1239_v53  ;;  %v1263_v53 = vsub.f32 %v6983_v37, %v767_v19 }
 0x277   : > { %13811 = vst [vmem:[#allocation416_spill] sm:$0xff] %v8405_v62  ;;  %v8408_v59 = vpop.eup %5487  ;;  %5507 = vtanh.f32 %v1240_v12 }
 0x278   : > { %13812 = vst [vmem:[#allocation417_spill] sm:$0xff] %v8408_v59  ;;  %v8411_v2 = vpop.eup %5489  ;;  %5509 = vtanh.f32 %v1241_v16  ;;  %v1265_v16 = vsub.f32 %v6987_v41, %v767_v19 }
 0x279   : > { %13813 = vst [vmem:[#allocation418_spill] sm:$0xff] %v8411_v2  ;;  %v8414_v20 = vpop.eup %5491  ;;  %5511 = vtanh.f32 %v1242_v0  ;;  %v1266_v0 = vsub.f32 %v6991_v45, %v767_v19 }
 0x27a   : > { %13814 = vst [vmem:[#allocation419_spill] sm:$0xff] %v8414_v20  ;;  %v8417_v26 = vpop.eup %5493  ;;  %5513 = vtanh.f32 %v1243_v18  ;;  %v762_v20 = vpop.permute.xlu0 %761  ;;  %v1267_v18 = vsub.f32 %v6995_v48, %v767_v19 }
 0x27b   : > { %13815 = vst [vmem:[#allocation420_spill] sm:$0xff] %v8417_v26  ;;  %v8420_v62 = vpop.eup %5495  ;;  %5515 = vtanh.f32 %v1244_v6  ;;  %v1268_v6 = vsub.f32 %v6998_v50, %v767_v19  ;;  %v1256_v19 = vsub.f32 %v6985_v39, %v762_v20 }
 0x27c   : > { %13816 = vst [vmem:[#allocation421_spill] sm:$0xff] %v8420_v62  ;;  %v8423_v12 = vpop.eup %5497  ;;  %5517 = vtanh.f32 %v1261_v5  ;;  %v1253_v5 = vsub.f32 %v6977_v29, %v762_v20 }
 0x27d   : > { %13817 = vst [vmem:[#allocation422_spill] sm:$0xff] %v8423_v12  ;;  %v8426_v2 = vpop.eup %5499  ;;  %5519 = vtanh.f32 %v1262_v21  ;;  %v1254_v21 = vsub.f32 %v6980_v34, %v762_v20 }
 0x27e   : > { %13818 = vst [vmem:[#allocation423_spill] sm:$0xff] %v8426_v2  ;;  %v8429_v26 = vpop.eup %5501  ;;  %5521 = vtanh.f32 %v1263_v53  ;;  %v1255_v53 = vsub.f32 %v6983_v37, %v762_v20 }
 0x27f   : > { %13819 = vst [vmem:[#allocation424_spill] sm:$0xff] %v8429_v26  ;;  %v8432_v62 = vpop.eup %5503  ;;  %5523 = vtanh.f32 %v1264_v31 }
 0x280   : > { %13820 = vst [vmem:[#allocation425_spill] sm:$0xff] %v8432_v62  ;;  %v8435_v12 = vpop.eup %5505  ;;  %5525 = vtanh.f32 %v1265_v16  ;;  %v1257_v16 = vsub.f32 %v6987_v41, %v762_v20 }
 0x281   : > { %13821 = vst [vmem:[#allocation426_spill] sm:$0xff] %v8435_v12  ;;  %v8438_v2 = vpop.eup %5507  ;;  %5527 = vtanh.f32 %v1266_v0  ;;  %v1258_v0 = vsub.f32 %v6991_v45, %v762_v20 }
 0x282   : > { %13822 = vst [vmem:[#allocation427_spill] sm:$0xff] %v8438_v2  ;;  %v8441_v59 = vpop.eup %5509  ;;  %5529 = vtanh.f32 %v1267_v18  ;;  %v777_v2 = vpop.permute.xlu1 %776  ;;  %v1259_v18 = vsub.f32 %v6995_v48, %v762_v20 }
 0x283   : > { %13823 = vst [vmem:[#allocation428_spill] sm:$0xff] %v8441_v59  ;;  %v8444_v26 = vpop.eup %5511  ;;  %5531 = vtanh.f32 %v1268_v6  ;;  %v1260_v6 = vsub.f32 %v6998_v50, %v762_v20  ;;  %v1280_v20 = vsub.f32 %v6985_v39, %v777_v2 }
 0x284   : > { %13824 = vst [vmem:[#allocation429_spill] sm:$0xff] %v8444_v26  ;;  %v8447_v31 = vpop.eup %5513  ;;  %5533 = vtanh.f32 %v1253_v5  ;;  %v1277_v5 = vsub.f32 %v6977_v29, %v777_v2 }
 0x285   : > { %13825 = vst [vmem:[#allocation430_spill] sm:$0xff] %v8447_v31  ;;  %v8450_v12 = vpop.eup %5515  ;;  %5535 = vtanh.f32 %v1254_v21  ;;  %v1278_v21 = vsub.f32 %v6980_v34, %v777_v2 }
 0x286   : > { %13826 = vst [vmem:[#allocation431_spill] sm:$0xff] %v8450_v12  ;;  %v8453_v59 = vpop.eup %5517  ;;  %5537 = vtanh.f32 %v1255_v53  ;;  %v1279_v53 = vsub.f32 %v6983_v37, %v777_v2 }
 0x287   : > { %13827 = vst [vmem:[#allocation432_spill] sm:$0xff] %v8453_v59  ;;  %v8456_v26 = vpop.eup %5519  ;;  %5539 = vtanh.f32 %v1256_v19 }
 0x288   : > { %13828 = vst [vmem:[#allocation433_spill] sm:$0xff] %v8456_v26  ;;  %v8459_v31 = vpop.eup %5521  ;;  %5541 = vtanh.f32 %v1257_v16  ;;  %v1281_v16 = vsub.f32 %v6987_v41, %v777_v2 }
 0x289   : > { %13829 = vst [vmem:[#allocation434_spill] sm:$0xff] %v8459_v31  ;;  %v8462_v12 = vpop.eup %5523  ;;  %5543 = vtanh.f32 %v1258_v0  ;;  %v1282_v0 = vsub.f32 %v6991_v45, %v777_v2 }
 0x28a   : > { %13830 = vst [vmem:[#allocation435_spill] sm:$0xff] %v8462_v12  ;;  %v8465_v62 = vpop.eup %5525  ;;  %5545 = vtanh.f32 %v1259_v18  ;;  %v772_v12 = vpop.permute.xlu0 %771  ;;  %v1283_v18 = vsub.f32 %v6995_v48, %v777_v2 }
 0x28b   : > { %13831 = vst [vmem:[#allocation436_spill] sm:$0xff] %v8465_v62  ;;  %v8468_v59 = vpop.eup %5527  ;;  %5547 = vtanh.f32 %v1260_v6  ;;  %v1284_v6 = vsub.f32 %v6998_v50, %v777_v2  ;;  %v1272_v2 = vsub.f32 %v6985_v39, %v772_v12 }
 0x28c   : > { %13832 = vst [vmem:[#allocation437_spill] sm:$0xff] %v8468_v59  ;;  %v8471_v19 = vpop.eup %5529  ;;  %5549 = vtanh.f32 %v1277_v5  ;;  %v1269_v5 = vsub.f32 %v6977_v29, %v772_v12 }
 0x28d   : > { %13833 = vst [vmem:[#allocation438_spill] sm:$0xff] %v8471_v19  ;;  %v8474_v31 = vpop.eup %5531  ;;  %5551 = vtanh.f32 %v1278_v21  ;;  %v1270_v21 = vsub.f32 %v6980_v34, %v772_v12 }
 0x28e   : > { %13834 = vst [vmem:[#allocation439_spill] sm:$0xff] %v8474_v31  ;;  %v8477_v62 = vpop.eup %5533  ;;  %5553 = vtanh.f32 %v1279_v53  ;;  %v1271_v53 = vsub.f32 %v6983_v37, %v772_v12 }
 0x28f   : > { %13835 = vst [vmem:[#allocation440_spill] sm:$0xff] %v8477_v62  ;;  %v8480_v59 = vpop.eup %5535  ;;  %5555 = vtanh.f32 %v1280_v20 }
 0x290   : > { %13836 = vst [vmem:[#allocation441_spill] sm:$0xff] %v8480_v59  ;;  %v8483_v19 = vpop.eup %5537  ;;  %5557 = vtanh.f32 %v1281_v16  ;;  %v1273_v16 = vsub.f32 %v6987_v41, %v772_v12 }
 0x291   : > { %13837 = vst [vmem:[#allocation442_spill] sm:$0xff] %v8483_v19  ;;  %v8486_v31 = vpop.eup %5539  ;;  %5559 = vtanh.f32 %v1282_v0  ;;  %v1274_v0 = vsub.f32 %v6991_v45, %v772_v12 }
 0x292   : > { %13838 = vst [vmem:[#allocation443_spill] sm:$0xff] %v8486_v31  ;;  %v8489_v26 = vpop.eup %5541  ;;  %5561 = vtanh.f32 %v1283_v18  ;;  %v787_v31 = vpop.permute.xlu1 %786  ;;  %v1275_v18 = vsub.f32 %v6995_v48, %v772_v12 }
 0x293   : > { %13839 = vst [vmem:[#allocation444_spill] sm:$0xff] %v8489_v26  ;;  %v8492_v62 = vpop.eup %5543  ;;  %5563 = vtanh.f32 %v1284_v6  ;;  %v1276_v6 = vsub.f32 %v6998_v50, %v772_v12  ;;  %v1296_v12 = vsub.f32 %v6985_v39, %v787_v31 }
 0x294   : > { %13840 = vst [vmem:[#allocation445_spill] sm:$0xff] %v8492_v62  ;;  %v8495_v20 = vpop.eup %5545  ;;  %5565 = vtanh.f32 %v1269_v5  ;;  %v1293_v5 = vsub.f32 %v6977_v29, %v787_v31 }
 0x295   : > { %13841 = vst [vmem:[#allocation446_spill] sm:$0xff] %v8495_v20  ;;  %v8498_v19 = vpop.eup %5547  ;;  %5567 = vtanh.f32 %v1270_v21  ;;  %v1294_v21 = vsub.f32 %v6980_v34, %v787_v31 }
 0x296   : > { %13842 = vst [vmem:[#allocation447_spill] sm:$0xff] %v8498_v19  ;;  %v8501_v26 = vpop.eup %5549  ;;  %5569 = vtanh.f32 %v1271_v53  ;;  %v1295_v53 = vsub.f32 %v6983_v37, %v787_v31 }
 0x297   : > { %13843 = vst [vmem:[#allocation448_spill] sm:$0xff] %v8501_v26  ;;  %v8504_v62 = vpop.eup %5551  ;;  %5571 = vtanh.f32 %v1272_v2 }
 0x298   : > { %13844 = vst [vmem:[#allocation449_spill] sm:$0xff] %v8504_v62  ;;  %v8507_v20 = vpop.eup %5553  ;;  %5573 = vtanh.f32 %v1273_v16  ;;  %v1297_v16 = vsub.f32 %v6987_v41, %v787_v31 }
 0x299   : > { %13845 = vst [vmem:[#allocation450_spill] sm:$0xff] %v8507_v20  ;;  %v8510_v19 = vpop.eup %5555  ;;  %5575 = vtanh.f32 %v1274_v0  ;;  %v1298_v0 = vsub.f32 %v6991_v45, %v787_v31 }
 0x29a   : > { %13846 = vst [vmem:[#allocation451_spill] sm:$0xff] %v8510_v19  ;;  %v8513_v59 = vpop.eup %5557  ;;  %5577 = vtanh.f32 %v1275_v18  ;;  %v782_v19 = vpop.permute.xlu0 %781  ;;  %v1299_v18 = vsub.f32 %v6995_v48, %v787_v31 }
 0x29b   : > { %13847 = vst [vmem:[#allocation452_spill] sm:$0xff] %v8513_v59  ;;  %v8516_v26 = vpop.eup %5559  ;;  %5579 = vtanh.f32 %v1276_v6  ;;  %v1300_v6 = vsub.f32 %v6998_v50, %v787_v31  ;;  %v1288_v31 = vsub.f32 %v6985_v39, %v782_v19 }
 0x29c   : > { %13848 = vst [vmem:[#allocation453_spill] sm:$0xff] %v8516_v26  ;;  %v8519_v2 = vpop.eup %5561  ;;  %5581 = vtanh.f32 %v1293_v5  ;;  %v1285_v5 = vsub.f32 %v6977_v29, %v782_v19 }
 0x29d   : > { %13849 = vst [vmem:[#allocation454_spill] sm:$0xff] %v8519_v2  ;;  %v8522_v20 = vpop.eup %5563  ;;  %5583 = vtanh.f32 %v1294_v21  ;;  %v1286_v21 = vsub.f32 %v6980_v34, %v782_v19 }
 0x29e   : > { %13850 = vst [vmem:[#allocation455_spill] sm:$0xff] %v8522_v20  ;;  %v8525_v59 = vpop.eup %5565  ;;  %5585 = vtanh.f32 %v1295_v53  ;;  %v1287_v53 = vsub.f32 %v6983_v37, %v782_v19 }
 0x29f   : > { %13851 = vst [vmem:[#allocation456_spill] sm:$0xff] %v8525_v59  ;;  %v8528_v26 = vpop.eup %5567  ;;  %5587 = vtanh.f32 %v1296_v12 }
 0x2a0   : > { %13852 = vst [vmem:[#allocation457_spill] sm:$0xff] %v8528_v26  ;;  %v8531_v2 = vpop.eup %5569  ;;  %5589 = vtanh.f32 %v1297_v16  ;;  %v1289_v16 = vsub.f32 %v6987_v41, %v782_v19 }
 0x2a1   : > { %13853 = vst [vmem:[#allocation458_spill] sm:$0xff] %v8531_v2  ;;  %v8534_v20 = vpop.eup %5571  ;;  %5591 = vtanh.f32 %v1298_v0  ;;  %v1290_v0 = vsub.f32 %v6991_v45, %v782_v19 }
 0x2a2   : > { %13854 = vst [vmem:[#allocation459_spill] sm:$0xff] %v8534_v20  ;;  %v8537_v62 = vpop.eup %5573  ;;  %5593 = vtanh.f32 %v1299_v18  ;;  %v2477_v20 = vpop.permute.xlu1 %2476  ;;  %v1291_v18 = vsub.f32 %v6995_v48, %v782_v19 }
 0x2a3   : > { %13855 = vst [vmem:[#allocation460_spill] sm:$0xff] %v8537_v62  ;;  %v8540_v59 = vpop.eup %5575  ;;  %5595 = vtanh.f32 %v1300_v6  ;;  %v1292_v6 = vsub.f32 %v6998_v50, %v782_v19  ;;  %v2800_v19 = vsub.f32 %v6985_v39, %v2477_v20 }
 0x2a4   : > { %13856 = vst [vmem:[#allocation461_spill] sm:$0xff] %v8540_v59  ;;  %v8543_v12 = vpop.eup %5577  ;;  %5597 = vtanh.f32 %v1285_v5  ;;  %v2797_v5 = vsub.f32 %v6977_v29, %v2477_v20 }
 0x2a5   : > { %13857 = vst [vmem:[#allocation462_spill] sm:$0xff] %v8543_v12  ;;  %v8546_v2 = vpop.eup %5579  ;;  %5599 = vtanh.f32 %v1286_v21  ;;  %v2798_v21 = vsub.f32 %v6980_v34, %v2477_v20 }
 0x2a6   : > { %13858 = vst [vmem:[#allocation463_spill] sm:$0xff] %v8546_v2  ;;  %v8549_v62 = vpop.eup %5581  ;;  %5601 = vtanh.f32 %v1287_v53  ;;  %v2799_v53 = vsub.f32 %v6983_v37, %v2477_v20 }
 0x2a7   : > { %13859 = vst [vmem:[#allocation464_spill] sm:$0xff] %v8549_v62  ;;  %v8552_v59 = vpop.eup %5583  ;;  %5603 = vtanh.f32 %v1288_v31 }
 0x2a8   : > { %13860 = vst [vmem:[#allocation465_spill] sm:$0xff] %v8552_v59  ;;  %v8555_v12 = vpop.eup %5585  ;;  %5605 = vtanh.f32 %v1289_v16  ;;  %v2801_v16 = vsub.f32 %v6987_v41, %v2477_v20 }
 0x2a9   : > { %13861 = vst [vmem:[#allocation466_spill] sm:$0xff] %v8555_v12  ;;  %v8558_v2 = vpop.eup %5587  ;;  %5607 = vtanh.f32 %v1290_v0  ;;  %v2802_v0 = vsub.f32 %v6991_v45, %v2477_v20 }
 0x2aa   : > { %13862 = vst [vmem:[#allocation467_spill] sm:$0xff] %v8558_v2  ;;  %v8561_v26 = vpop.eup %5589  ;;  %5609 = vtanh.f32 %v1291_v18  ;;  %v2472_v2 = vpop.permute.xlu0 %2471  ;;  %v2803_v18 = vsub.f32 %v6995_v48, %v2477_v20 }
 0x2ab   : > { %13863 = vst [vmem:[#allocation468_spill] sm:$0xff] %v8561_v26  ;;  %v8564_v62 = vpop.eup %5591  ;;  %5611 = vtanh.f32 %v1292_v6  ;;  %v2804_v6 = vsub.f32 %v6998_v50, %v2477_v20  ;;  %v2792_v20 = vsub.f32 %v6985_v39, %v2472_v2 }
 0x2ac   : > { %13864 = vst [vmem:[#allocation469_spill] sm:$0xff] %v8564_v62  ;;  %v8567_v31 = vpop.eup %5593  ;;  %5613 = vtanh.f32 %v2797_v5  ;;  %v2789_v5 = vsub.f32 %v6977_v29, %v2472_v2 }
 0x2ad   : > { %13865 = vst [vmem:[#allocation470_spill] sm:$0xff] %v8567_v31  ;;  %v8570_v12 = vpop.eup %5595  ;;  %5615 = vtanh.f32 %v2798_v21  ;;  %v2790_v21 = vsub.f32 %v6980_v34, %v2472_v2 }
 0x2ae   : > { %13866 = vst [vmem:[#allocation471_spill] sm:$0xff] %v8570_v12  ;;  %v8573_v26 = vpop.eup %5597  ;;  %5617 = vtanh.f32 %v2799_v53  ;;  %v2791_v53 = vsub.f32 %v6983_v37, %v2472_v2 }
 0x2af   : > { %13867 = vst [vmem:[#allocation472_spill] sm:$0xff] %v8573_v26  ;;  %v8576_v62 = vpop.eup %5599  ;;  %5619 = vtanh.f32 %v2800_v19 }
 0x2b0   : > { %13868 = vst [vmem:[#allocation473_spill] sm:$0xff] %v8576_v62  ;;  %v8579_v31 = vpop.eup %5601  ;;  %5621 = vtanh.f32 %v2801_v16  ;;  %v2793_v16 = vsub.f32 %v6987_v41, %v2472_v2 }
 0x2b1   : > { %13869 = vst [vmem:[#allocation474_spill] sm:$0xff] %v8579_v31  ;;  %v8582_v12 = vpop.eup %5603  ;;  %5623 = vtanh.f32 %v2802_v0  ;;  %v2794_v0 = vsub.f32 %v6991_v45, %v2472_v2 }
 0x2b2   : > { %13870 = vst [vmem:[#allocation475_spill] sm:$0xff] %v8582_v12  ;;  %v8585_v59 = vpop.eup %5605  ;;  %5625 = vtanh.f32 %v2803_v18  ;;  %v2487_v12 = vpop.permute.xlu1 %2486  ;;  %v2795_v18 = vsub.f32 %v6995_v48, %v2472_v2 }
 0x2b3   : > { %13871 = vst [vmem:[#allocation476_spill] sm:$0xff] %v8585_v59  ;;  %v8588_v26 = vpop.eup %5607  ;;  %5627 = vtanh.f32 %v2804_v6  ;;  %v2796_v6 = vsub.f32 %v6998_v50, %v2472_v2  ;;  %v2816_v2 = vsub.f32 %v6985_v39, %v2487_v12 }
 0x2b4   : > { %13872 = vst [vmem:[#allocation477_spill] sm:$0xff] %v8588_v26  ;;  %v8591_v19 = vpop.eup %5609  ;;  %5629 = vtanh.f32 %v2789_v5  ;;  %v2813_v5 = vsub.f32 %v6977_v29, %v2487_v12 }
 0x2b5   : > { %13873 = vst [vmem:[#allocation478_spill] sm:$0xff] %v8591_v19  ;;  %v8594_v31 = vpop.eup %5611  ;;  %5631 = vtanh.f32 %v2790_v21  ;;  %v2814_v21 = vsub.f32 %v6980_v34, %v2487_v12 }
 0x2b6   : > { %13874 = vst [vmem:[#allocation479_spill] sm:$0xff] %v8594_v31  ;;  %v8597_v59 = vpop.eup %5613  ;;  %5633 = vtanh.f32 %v2791_v53  ;;  %v2815_v53 = vsub.f32 %v6983_v37, %v2487_v12 }
 0x2b7   : > { %13875 = vst [vmem:[#allocation480_spill] sm:$0xff] %v8597_v59  ;;  %v8600_v26 = vpop.eup %5615  ;;  %5635 = vtanh.f32 %v2792_v20 }
 0x2b8   : > { %13876 = vst [vmem:[#allocation481_spill] sm:$0xff] %v8600_v26  ;;  %v8603_v19 = vpop.eup %5617  ;;  %5637 = vtanh.f32 %v2793_v16  ;;  %v2817_v16 = vsub.f32 %v6987_v41, %v2487_v12 }
 0x2b9   : > { %13877 = vst [vmem:[#allocation482_spill] sm:$0xff] %v8603_v19  ;;  %v8606_v31 = vpop.eup %5619  ;;  %5639 = vtanh.f32 %v2794_v0  ;;  %v2818_v0 = vsub.f32 %v6991_v45, %v2487_v12 }
 0x2ba   : > { %13878 = vst [vmem:[#allocation483_spill] sm:$0xff] %v8606_v31  ;;  %v8609_v62 = vpop.eup %5621  ;;  %5641 = vtanh.f32 %v2795_v18  ;;  %v2482_v31 = vpop.permute.xlu0 %2481  ;;  %v2819_v18 = vsub.f32 %v6995_v48, %v2487_v12 }
 0x2bb   : > { %13879 = vst [vmem:[#allocation484_spill] sm:$0xff] %v8609_v62  ;;  %v8612_v59 = vpop.eup %5623  ;;  %5643 = vtanh.f32 %v2796_v6  ;;  %v2820_v6 = vsub.f32 %v6998_v50, %v2487_v12  ;;  %v2808_v12 = vsub.f32 %v6985_v39, %v2482_v31 }
 0x2bc   : > { %13880 = vst [vmem:[#allocation485_spill] sm:$0xff] %v8612_v59  ;;  %v8615_v20 = vpop.eup %5625  ;;  %5645 = vtanh.f32 %v2813_v5  ;;  %v2805_v5 = vsub.f32 %v6977_v29, %v2482_v31 }
 0x2bd   : > { %13881 = vst [vmem:[#allocation486_spill] sm:$0xff] %v8615_v20  ;;  %v8618_v19 = vpop.eup %5627  ;;  %5647 = vtanh.f32 %v2814_v21  ;;  %v2806_v21 = vsub.f32 %v6980_v34, %v2482_v31 }
 0x2be   : > { %13882 = vst [vmem:[#allocation487_spill] sm:$0xff] %v8618_v19  ;;  %v8621_v62 = vpop.eup %5629  ;;  %5649 = vtanh.f32 %v2815_v53  ;;  %v2807_v53 = vsub.f32 %v6983_v37, %v2482_v31 }
 0x2bf   : > { %13883 = vst [vmem:[#allocation488_spill] sm:$0xff] %v8621_v62  ;;  %v8624_v59 = vpop.eup %5631  ;;  %5651 = vtanh.f32 %v2816_v2 }
 0x2c0   : > { %13884 = vst [vmem:[#allocation489_spill] sm:$0xff] %v8624_v59  ;;  %v8627_v20 = vpop.eup %5633  ;;  %5653 = vtanh.f32 %v2817_v16  ;;  %v2809_v16 = vsub.f32 %v6987_v41, %v2482_v31 }
 0x2c1   : > { %13885 = vst [vmem:[#allocation490_spill] sm:$0xff] %v8627_v20  ;;  %v8630_v19 = vpop.eup %5635  ;;  %5655 = vtanh.f32 %v2818_v0  ;;  %v2810_v0 = vsub.f32 %v6991_v45, %v2482_v31 }
 0x2c2   : > { %13886 = vst [vmem:[#allocation491_spill] sm:$0xff] %v8630_v19  ;;  %v8633_v26 = vpop.eup %5637  ;;  %5657 = vtanh.f32 %v2819_v18  ;;  %v2497_v19 = vpop.permute.xlu1 %2496  ;;  %v2811_v18 = vsub.f32 %v6995_v48, %v2482_v31 }
 0x2c3   : > { %13887 = vst [vmem:[#allocation492_spill] sm:$0xff] %v8633_v26  ;;  %v8636_v62 = vpop.eup %5639  ;;  %5659 = vtanh.f32 %v2820_v6  ;;  %v2812_v6 = vsub.f32 %v6998_v50, %v2482_v31  ;;  %v2832_v31 = vsub.f32 %v6985_v39, %v2497_v19 }
 0x2c4   : > { %13888 = vst [vmem:[#allocation493_spill] sm:$0xff] %v8636_v62  ;;  %v8639_v2 = vpop.eup %5641  ;;  %5661 = vtanh.f32 %v2805_v5  ;;  %v2829_v5 = vsub.f32 %v6977_v29, %v2497_v19 }
 0x2c5   : > { %13889 = vst [vmem:[#allocation494_spill] sm:$0xff] %v8639_v2  ;;  %v8642_v20 = vpop.eup %5643  ;;  %5663 = vtanh.f32 %v2806_v21  ;;  %v2830_v21 = vsub.f32 %v6980_v34, %v2497_v19 }
 0x2c6   : > { %13890 = vst [vmem:[#allocation495_spill] sm:$0xff] %v8642_v20  ;;  %v8645_v26 = vpop.eup %5645  ;;  %5665 = vtanh.f32 %v2807_v53  ;;  %v2831_v53 = vsub.f32 %v6983_v37, %v2497_v19 }
 0x2c7   : > { %13891 = vst [vmem:[#allocation496_spill] sm:$0xff] %v8645_v26  ;;  %v8648_v62 = vpop.eup %5647  ;;  %5667 = vtanh.f32 %v2808_v12 }
 0x2c8   : > { %13892 = vst [vmem:[#allocation497_spill] sm:$0xff] %v8648_v62  ;;  %v8651_v2 = vpop.eup %5649  ;;  %5669 = vtanh.f32 %v2809_v16  ;;  %v2833_v16 = vsub.f32 %v6987_v41, %v2497_v19 }
 0x2c9   : > { %13893 = vst [vmem:[#allocation498_spill] sm:$0xff] %v8651_v2  ;;  %v8654_v20 = vpop.eup %5651  ;;  %5671 = vtanh.f32 %v2810_v0  ;;  %v2834_v0 = vsub.f32 %v6991_v45, %v2497_v19 }
 0x2ca   : > { %13894 = vst [vmem:[#allocation499_spill] sm:$0xff] %v8654_v20  ;;  %v8657_v59 = vpop.eup %5653  ;;  %5673 = vtanh.f32 %v2811_v18  ;;  %v2492_v20 = vpop.permute.xlu0 %2491  ;;  %v2835_v18 = vsub.f32 %v6995_v48, %v2497_v19 }
 0x2cb   : > { %13895 = vst [vmem:[#allocation500_spill] sm:$0xff] %v8657_v59  ;;  %v8660_v26 = vpop.eup %5655  ;;  %5675 = vtanh.f32 %v2812_v6  ;;  %v2836_v6 = vsub.f32 %v6998_v50, %v2497_v19  ;;  %v2824_v19 = vsub.f32 %v6985_v39, %v2492_v20 }
 0x2cc   : > { %13896 = vst [vmem:[#allocation501_spill] sm:$0xff] %v8660_v26  ;;  %v8663_v12 = vpop.eup %5657  ;;  %5677 = vtanh.f32 %v2829_v5  ;;  %v2821_v5 = vsub.f32 %v6977_v29, %v2492_v20 }
 0x2cd   : > { %13897 = vst [vmem:[#allocation502_spill] sm:$0xff] %v8663_v12  ;;  %v8666_v2 = vpop.eup %5659  ;;  %5679 = vtanh.f32 %v2830_v21  ;;  %v2822_v21 = vsub.f32 %v6980_v34, %v2492_v20 }
 0x2ce   : > { %13898 = vst [vmem:[#allocation503_spill] sm:$0xff] %v8666_v2  ;;  %v8669_v62 = vpop.eup %5661  ;;  %5681 = vtanh.f32 %v2831_v53  ;;  %v2823_v53 = vsub.f32 %v6983_v37, %v2492_v20 }
 0x2cf   : > { %13899 = vst [vmem:[#allocation504_spill] sm:$0xff] %v8669_v62  ;;  %v8672_v26 = vpop.eup %5663  ;;  %5683 = vtanh.f32 %v2832_v31 }
 0x2d0   : > { %13900 = vst [vmem:[#allocation505_spill] sm:$0xff] %v8672_v26  ;;  %v8675_v12 = vpop.eup %5665  ;;  %5685 = vtanh.f32 %v2833_v16  ;;  %v2825_v16 = vsub.f32 %v6987_v41, %v2492_v20 }
 0x2d1   : > { %13901 = vst [vmem:[#allocation506_spill] sm:$0xff] %v8675_v12  ;;  %v8678_v2 = vpop.eup %5667  ;;  %5687 = vtanh.f32 %v2834_v0  ;;  %v2826_v0 = vsub.f32 %v6991_v45, %v2492_v20 }
 0x2d2   : > { %13902 = vst [vmem:[#allocation507_spill] sm:$0xff] %v8678_v2  ;;  %v8681_v59 = vpop.eup %5669  ;;  %5689 = vtanh.f32 %v2835_v18  ;;  %v2507_v2 = vpop.permute.xlu1 %2506  ;;  %v2827_v18 = vsub.f32 %v6995_v48, %v2492_v20 }
 0x2d3   : > { %13903 = vst [vmem:[#allocation508_spill] sm:$0xff] %v8681_v59  ;;  %v8684_v62 = vpop.eup %5671  ;;  %5691 = vtanh.f32 %v2836_v6  ;;  %v2828_v6 = vsub.f32 %v6998_v50, %v2492_v20  ;;  %v2848_v20 = vsub.f32 %v6985_v39, %v2507_v2 }
 0x2d4   : > { %13904 = vst [vmem:[#allocation509_spill] sm:$0xff] %v8684_v62  ;;  %v8687_v31 = vpop.eup %5673  ;;  %5693 = vtanh.f32 %v2821_v5  ;;  %v2845_v5 = vsub.f32 %v6977_v29, %v2507_v2 }
 0x2d5   : > { %13905 = vst [vmem:[#allocation510_spill] sm:$0xff] %v8687_v31  ;;  %v8690_v12 = vpop.eup %5675  ;;  %5695 = vtanh.f32 %v2822_v21  ;;  %v2846_v21 = vsub.f32 %v6980_v34, %v2507_v2 }
 0x2d6   : > { %13906 = vst [vmem:[#allocation511_spill] sm:$0xff] %v8690_v12  ;;  %v8693_v26 = vpop.eup %5677  ;;  %5697 = vtanh.f32 %v2823_v53  ;;  %v2847_v53 = vsub.f32 %v6983_v37, %v2507_v2 }
 0x2d7   : > { %13907 = vst [vmem:[#allocation512_spill] sm:$0xff] %v8693_v26  ;;  %v8696_v62 = vpop.eup %5679  ;;  %5699 = vtanh.f32 %v2824_v19 }
 0x2d8   : > { %13908 = vst [vmem:[#allocation513_spill] sm:$0xff] %v8696_v62  ;;  %v8699_v31 = vpop.eup %5681  ;;  %5701 = vtanh.f32 %v2825_v16  ;;  %v8715_v16 = vadd.f32 %v7817_v9, %v7089_v13  ;;  %v2850_v13 = vsub.f32 %v6991_v45, %v2507_v2  ;;  %v8733_v9 = vpop.permute.xlu0 %2501 }
 0x2d9   : > { %13909 = vst [vmem:[#allocation514_spill] sm:$0xff] %v8699_v31  ;;  %v8702_v12 = vpop.eup %5683  ;;  %5703 = vtanh.f32 %v2826_v0  ;;  %v8719_v0 = vadd.f32 %v7820_v51, %v7092_v17  ;;  %v8739_v51 = vadd.f32 %v7829_v38, %v7103_v33  ;;  %v2852_v33 = vsub.f32 %v6998_v50, %v2507_v2  ;;  %v13971_v31 = vld [vmem:[#allocation263_spill] sm:$0xff] }
 0x2da   : > { %13910 = vst [vmem:[#allocation515_spill] sm:$0xff] %v8702_v12  ;;  %v8705_v59 = vpop.eup %5685  ;;  %5705 = vtanh.f32 %v2827_v18 }
 0x2db   : > { %13911 = vst [vmem:[#allocation516_spill] sm:$0xff] %v8705_v59  ;;  %v8708_v26 = vpop.eup %5687  ;;  %5707 = vtanh.f32 %v2828_v6  ;;  %v2849_v59 = vsub.f32 %v6987_v41, %v2507_v2  ;;  %v8726_v6 = vadd.f32 %v7823_v57, %v7097_v24  ;;  %v2851_v24 = vsub.f32 %v6995_v48, %v2507_v2  ;;  %v13926_v2 = vld [vmem:[#allocation246_spill] sm:$0xff] }
 0x2dc   : > { %13912 = vst [vmem:[#allocation517_spill] sm:$0xff] %v8708_v26  ;;  %v8711_v19 = vpop.eup %5689  ;;  %5709 = vtanh.f32 %v2845_v5  ;;  %v8743_v5 = vadd.f32 %v7832_v1, %v7106_v43  ;;  %v8750_v57 = vadd.f32 %v7835_v55, %v7109_v47  ;;  %v8761_v43 = vadd.f32 %v7841_v11, %v7037_v23 }
 0x2dd   : > { %13913 = vst [vmem:[#allocation518_spill] sm:$0xff] %v8711_v19  ;;  %v8722_v18 = vpop.eup %5691  ;;  %v8730_v19 = vadd.f32 %v7826_v46, %v7100_v28  ;;  %5711 = vtanh.f32 %v2846_v21  ;;  %v8754_v46 = vadd.f32 %v7838_v4, %v7112_v52  ;;  %v8765_v1 = vadd.f32 %v7844_v22, %v7040_v25 }
 0x2de   : > { %13914 = vst [vmem:[#allocation519_spill] sm:$0xff] %v8722_v18  ;;  %v8735_v17 = vpop.eup %5693  ;;  %5713 = vtanh.f32 %v2847_v53  ;;  %v2837_v47 = vsub.f32 %v6977_v29, %v8733_v9  ;;  %v8773_v52 = vadd.f32 %v7847_v15, %v7043_v27  ;;  %v8777_v4 = vadd.f32 %v7850_v3, %v7046_v30  ;;  %v13927_v53 = vld [vmem:[#allocation18_spill] sm:$0xff]  ;;  %v13963_v18 = vld [vmem:[#allocation24_spill] sm:$0xff] }
 0x2df   : > { %13915 = vst [vmem:[#allocation520_spill] sm:$0xff] %v8735_v17  ;;  %v8746_v28 = vpop.eup %5695  ;;  %5715 = vtanh.f32 %v2848_v20  ;;  %v2838_v23 = vsub.f32 %v6980_v34, %v8733_v9  ;;  %v8785_v11 = vadd.f32 %v7853_v63, %v7049_v32  ;;  %v8789_v22 = vadd.f32 %v7856_v60, %v7052_v35  ;;  %v13928_v20 = vld [vmem:[#allocation247_spill] sm:$0xff] }
 0x2e0   : > { %13916 = vst [vmem:[#allocation521_spill] sm:$0xff] %v8746_v28  ;;  %v8757_v38 = vpop.eup %5697  ;;  %5717 = vtanh.f32 %v2849_v59  ;;  %v2839_v27 = vsub.f32 %v6983_v37, %v8733_v9  ;;  %v8797_v3 = vadd.f32 %v7861_v36, %v7057_v42  ;;  %v8801_v15 = vadd.f32 %v7864_v14, %v7060_v44  ;;  %v13923_v36 = vld [vmem:[#allocation245_spill] sm:$0xff]  ;;  %v13957_v28 = vld [vmem:[#allocation22_spill] sm:$0xff] }
 0x2e1   : > { %13917 = vst [vmem:[#allocation522_spill] sm:$0xff] %v8757_v38  ;;  %v8769_v55 = vpop.eup %5699  ;;  %5719 = vtanh.f32 %v2850_v13  ;;  %v2840_v32 = vsub.f32 %v6985_v39, %v8733_v9  ;;  %v8809_v60 = vadd.f32 %v7867_v10, %v7063_v49  ;;  %v8813_v63 = vadd.f32 %v7870_v8, %v7066_v54  ;;  %v8829_v8 = vpop.permute.xlu1 %2516  ;;  %v13925_v54 = vld [vmem:[#allocation17_spill] sm:$0xff]  ;;  %v13930_v13 = vld [vmem:[#allocation19_spill] sm:$0xff] }
 0x2e2   : > { %13918 = vst [vmem:[#allocation523_spill] sm:$0xff] %v8769_v55  ;;  %v8781_v25 = vpop.eup %5701  ;;  %5721 = vtanh.f32 %v2851_v24  ;;  %v2841_v42 = vsub.f32 %v6987_v41, %v8733_v9  ;;  %v8821_v44 = vadd.f32 %v7873_v61, %v7069_v56  ;;  %v8825_v59 = vadd.f32 %v13923_v36, %v7072_v58  ;;  %v13931_v24 = vld [vmem:[#allocation248_spill] sm:$0xff] }
 0x2e3   : > { %13919 = vst [vmem:[#allocation524_spill] sm:$0xff] %v8781_v25  ;;  %v8793_v30 = vpop.eup %5703  ;;  %5723 = vtanh.f32 %v2852_v33  ;;  %v2842_v10 = vsub.f32 %v6991_v45, %v8733_v9  ;;  %v8835_v21 = vadd.f32 %v13926_v2, %v13925_v54  ;;  %v8839_v56 = vadd.f32 %v13928_v20, %v13927_v53  ;;  %v13935_v53 = vld [vmem:[#allocation9_spill] sm:$0xff]  ;;  %v13936_v20 = vld [vmem:[#allocation250_spill] sm:$0xff]  ;;  %v13952_v55 = vld [vmem:[#allocation16_spill] sm:$0xff] }
 0x2e4   : > { %13920 = vst [vmem:[#allocation525_spill] sm:$0xff] %v8793_v30  ;;  %v8805_v35 = vpop.eup %5705  ;;  %5725 = vtanh.f32 %v2837_v47  ;;  %v2843_v58 = vsub.f32 %v6995_v48, %v8733_v9  ;;  %v8847_v33 = vadd.f32 %v13931_v24, %v13930_v13  ;;  %v13932_v47 = vld [vmem:[#allocation20_spill] sm:$0xff]  ;;  %v2844_v54 = vsub.f32 %v6998_v50, %v8733_v9  ;;  %v13947_v30 = vld [vmem:[#allocation14_spill] sm:$0xff] }
 0x2e5   : > { %13921 = vst [vmem:[#allocation526_spill] sm:$0xff] %v8805_v35  ;;  %v8817_v14 = vpop.eup %5707  ;;  %5727 = vtanh.f32 %v2838_v23  ;;  %v13933_v23 = vld [vmem:[#allocation249_spill] sm:$0xff]  ;;  %v2861_v13 = vsub.f32 %v6977_v29, %v8829_v8 }
 0x2e6   : > { %13922 = vst [vmem:[#allocation527_spill] sm:$0xff] %v8817_v14  ;;  %v8831_v49 = vpop.eup %5709  ;;  %5729 = vtanh.f32 %v2839_v27  ;;  %v8851_v36 = vadd.f32 %v13933_v23, %v13932_v47  ;;  %v13937_v27 = vld [vmem:[#allocation10_spill] sm:$0xff]  ;;  %v13940_v47 = vld [vmem:[#allocation11_spill] sm:$0xff]  ;;  %v13941_v23 = vld [vmem:[#allocation252_spill] sm:$0xff] }
 0x2e7   : > { %13924 = vst [vmem:[#allocation245_spill] sm:$0xff] %v8831_v49  ;;  %v8843_v61 = vpop.eup %5711  ;;  %5731 = vtanh.f32 %v2840_v32  ;;  %v8859_v49 = vadd.f32 %v13936_v20, %v13935_v53  ;;  %v8871_v9 = vadd.f32 %v13941_v23, %v13940_v47  ;;  %v13942_v32 = vld [vmem:[#allocation12_spill] sm:$0xff]  ;;  %v2862_v53 = vsub.f32 %v6980_v34, %v8829_v8  ;;  %v13946_v20 = vld [vmem:[#allocation254_spill] sm:$0xff] }
 0x2e8   : > { %13929 = vst [vmem:[#allocation17_spill] sm:$0xff] %v8843_v61  ;;  %v8855_v2 = vpop.eup %5713  ;;  %v13938_v61 = vld [vmem:[#allocation251_spill] sm:$0xff]  ;;  %5733 = vtanh.f32 %v2841_v42  ;;  %v13945_v42 = vld [vmem:[#allocation13_spill] sm:$0xff]  ;;  %v2863_v47 = vsub.f32 %v6983_v37, %v8829_v8  ;;  %v13951_v23 = vld [vmem:[#allocation256_spill] sm:$0xff] }
 0x2e9   : > { %13934 = vst [vmem:[#allocation246_spill] sm:$0xff] %v8855_v2  ;;  %v8863_v14 = vadd.f32 %v13938_v61, %v13937_v27  ;;  %v8867_v24 = vpop.eup %5715  ;;  %v13943_v2 = vld [vmem:[#allocation253_spill] sm:$0xff]  ;;  %5735 = vtanh.f32 %v2842_v10  ;;  %v8883_v27 = vadd.f32 %v13946_v20, %v13945_v42  ;;  %v13950_v10 = vld [vmem:[#allocation15_spill] sm:$0xff]  ;;  %v2864_v42 = vsub.f32 %v6985_v39, %v8829_v8 }
 0x2ea   : > { %13939 = vst [vmem:[#allocation18_spill] sm:$0xff] %v8867_v24  ;;  %v8875_v35 = vadd.f32 %v13943_v2, %v13942_v32  ;;  %v8879_v61 = vpop.eup %5717  ;;  %v13948_v24 = vld [vmem:[#allocation255_spill] sm:$0xff]  ;;  %5737 = vtanh.f32 %v2843_v58  ;;  %v8895_v32 = vadd.f32 %v13951_v23, %v13950_v10  ;;  %v13955_v58 = vld [vmem:[#allocation21_spill] sm:$0xff]  ;;  %v2865_v10 = vsub.f32 %v6987_v41, %v8829_v8 }
 0x2eb   : > { %13944 = vst [vmem:[#allocation247_spill] sm:$0xff] %v8879_v61  ;;  %v8887_v25 = vadd.f32 %v13948_v24, %v13947_v30  ;;  %v8891_v2 = vpop.eup %5719  ;;  %v13953_v61 = vld [vmem:[#allocation257_spill] sm:$0xff]  ;;  %5739 = vtanh.f32 %v2844_v54  ;;  %v13956_v24 = vld [vmem:[#allocation258_spill] sm:$0xff]  ;;  %v13960_v54 = vld [vmem:[#allocation23_spill] sm:$0xff] }
 0x2ec   : > { %13949 = vst [vmem:[#allocation19_spill] sm:$0xff] %v8891_v2  ;;  %v8899_v38 = vadd.f32 %v13953_v61, %v13952_v55  ;;  %v8903_v30 = vpop.eup %5721  ;;  %v8907_v20 = vadd.f32 %v13956_v24, %v13955_v58  ;;  %v13958_v2 = vld [vmem:[#allocation259_spill] sm:$0xff]  ;;  %5741 = vtanh.f32 %v2861_v13  ;;  %v13961_v61 = vld [vmem:[#allocation260_spill] sm:$0xff]  ;;  %v2866_v58 = vsub.f32 %v6991_v45, %v8829_v8  ;;  %v13967_v24 = vld [vmem:[#allocation25_spill] sm:$0xff] }
 0x2ed   : > { %13954 = vst [vmem:[#allocation248_spill] sm:$0xff] %v8903_v30  ;;  %v8911_v17 = vadd.f32 %v13958_v2, %v13957_v28  ;;  %v8915_v55 = vpop.eup %5723  ;;  %v8919_v23 = vadd.f32 %v13961_v61, %v13960_v54  ;;  %v13964_v30 = vld [vmem:[#allocation261_spill] sm:$0xff]  ;;  %5743 = vtanh.f32 %v2862_v53  ;;  %v8927_v28 = vpop.permute.xlu0 %2511  ;;  %v13968_v13 = vld [vmem:[#allocation262_spill] sm:$0xff]  ;;  %v13974_v61 = vld [vmem:[#allocation27_spill] sm:$0xff] }
 0x2ee   : > { %13959 = vst [vmem:[#allocation20_spill] sm:$0xff] %v8915_v55  ;;  %v8923_v26 = vadd.f32 %v13964_v30, %v13963_v18  ;;  %v8929_v2 = vpop.eup %5725  ;;  %v8933_v12 = vadd.f32 %v13968_v13, %v13967_v24  ;;  %v13970_v55 = vld [vmem:[#allocation26_spill] sm:$0xff]  ;;  %v2867_v18 = vsub.f32 %v6995_v48, %v8829_v8  ;;  %5745 = vtanh.f32 %v2863_v47  ;;  %v13975_v53 = vld [vmem:[#allocation264_spill] sm:$0xff] }
 0x2ef   : > { %13962 = vst [vmem:[#allocation249_spill] sm:$0xff] %v8919_v23  ;;  %13966 = vst [vmem:[#allocation250_spill] sm:$0xff] %v8929_v2  ;;  %v8937_v54 = vadd.f32 %v13971_v31, %v13970_v55  ;;  %v8941_v30 = vpop.eup %5727  ;;  %v8945_v62 = vadd.f32 %v13975_v53, %v13974_v61  ;;  %v13978_v2 = vld [vmem:[#allocation265_spill] sm:$0xff]  ;;  %v2868_v24 = vsub.f32 %v6998_v50, %v8829_v8  ;;  %5747 = vtanh.f32 %v2864_v42  ;;  %v13982_v13 = vld [vmem:[#allocation266_spill] sm:$0xff] }
 0x2f0   : > { %13965 = vst [vmem:[#allocation9_spill] sm:$0xff] %v8923_v26  ;;  %13969 = vst [vmem:[#allocation10_spill] sm:$0xff] %v8933_v12  ;;  %v13977_v26 = vld [vmem:[#allocation28_spill] sm:$0xff]  ;;  %v8953_v31 = vpop.eup %5729  ;;  %v13981_v55 = vld [vmem:[#allocation29_spill] sm:$0xff]  ;;  %5749 = vtanh.f32 %v2865_v10  ;;  %v2853_v61 = vsub.f32 %v6977_v29, %v8927_v28 }
 0x2f1   : > { %13972 = vst [vmem:[#allocation251_spill] sm:$0xff] %v8937_v54  ;;  %13973 = vst [vmem:[#allocation11_spill] sm:$0xff] %v8941_v30  ;;  %v8949_v23 = vadd.f32 %v13978_v2, %v13977_v26  ;;  %v8957_v54 = vadd.f32 %v13982_v13, %v13981_v55  ;;  %v13984_v47 = vld [vmem:[#allocation30_spill] sm:$0xff]  ;;  %v13985_v30 = vld [vmem:[#allocation267_spill] sm:$0xff]  ;;  %v8965_v26 = vpop.eup %5731  ;;  %5751 = vtanh.f32 %v2866_v58  ;;  %v2854_v55 = vsub.f32 %v6980_v34, %v8927_v28 }
 0x2f2   : > { %13976 = vst [vmem:[#allocation252_spill] sm:$0xff] %v8945_v62  ;;  %13980 = vst [vmem:[#allocation253_spill] sm:$0xff] %v8953_v31  ;;  %v8961_v12 = vadd.f32 %v13985_v30, %v13984_v47  ;;  %v13988_v2 = vld [vmem:[#allocation31_spill] sm:$0xff]  ;;  %v13989_v53 = vld [vmem:[#allocation268_spill] sm:$0xff]  ;;  %v8977_v30 = vpop.eup %5733  ;;  %5753 = vtanh.f32 %v2867_v18 }
 0x2f3   : > { %13979 = vst [vmem:[#allocation12_spill] sm:$0xff] %v8949_v23  ;;  %13983 = vst [vmem:[#allocation13_spill] sm:$0xff] %v8957_v54  ;;  %v8969_v8 = vadd.f32 %v13989_v53, %v13988_v2  ;;  %v13991_v42 = vld [vmem:[#allocation32_spill] sm:$0xff]  ;;  %v13992_v31 = vld [vmem:[#allocation269_spill] sm:$0xff]  ;;  %v2855_v2 = vsub.f32 %v6983_v37, %v8927_v28  ;;  %5755 = vtanh.f32 %v2868_v24 }
 0x2f4   : > { %13986 = vst [vmem:[#allocation254_spill] sm:$0xff] %v8961_v12  ;;  %13987 = vst [vmem:[#allocation14_spill] sm:$0xff] %v8965_v26  ;;  %v8973_v23 = vadd.f32 %v13992_v31, %v13991_v42  ;;  %v13995_v10 = vld [vmem:[#allocation33_spill] sm:$0xff]  ;;  %v13996_v13 = vld [vmem:[#allocation270_spill] sm:$0xff]  ;;  %v8989_v31 = vpop.eup %5735  ;;  %5757 = vtanh.f32 %v2853_v61 }
 0x2f5   : > { %13990 = vst [vmem:[#allocation255_spill] sm:$0xff] %v8969_v8  ;;  %13994 = vst [vmem:[#allocation256_spill] sm:$0xff] %v8977_v30  ;;  %v8981_v47 = vadd.f32 %v13996_v13, %v13995_v10  ;;  %v13998_v12 = vld [vmem:[#allocation34_spill] sm:$0xff]  ;;  %v13999_v26 = vld [vmem:[#allocation271_spill] sm:$0xff]  ;;  %v2856_v10 = vsub.f32 %v6985_v39, %v8927_v28  ;;  %5759 = vtanh.f32 %v2854_v55 }
 0x2f6   : > { %13993 = vst [vmem:[#allocation15_spill] sm:$0xff] %v8973_v23  ;;  %v8985_v54 = vadd.f32 %v13999_v26, %v13998_v12  ;;  %14001 = vst [vmem:[#allocation21_spill] sm:$0xff] %v8989_v31  ;;  %v14002_v58 = vld [vmem:[#allocation35_spill] sm:$0xff]  ;;  %v14003_v53 = vld [vmem:[#allocation272_spill] sm:$0xff]  ;;  %v9001_v12 = vpop.eup %5737  ;;  %5761 = vtanh.f32 %v2855_v2 }
 0x2f7   : > { %13997 = vst [vmem:[#allocation16_spill] sm:$0xff] %v8981_v47  ;;  %v8993_v42 = vadd.f32 %v14003_v53, %v14002_v58  ;;  %v14005_v23 = vld [vmem:[#allocation36_spill] sm:$0xff]  ;;  %v14006_v30 = vld [vmem:[#allocation273_spill] sm:$0xff]  ;;  %14008 = vst [vmem:[#allocation259_spill] sm:$0xff] %v9001_v12  ;;  %v2857_v58 = vsub.f32 %v6987_v41, %v8927_v28  ;;  %5763 = vtanh.f32 %v2856_v10 }
 0x2f8   : > { %14000 = vst [vmem:[#allocation257_spill] sm:$0xff] %v8985_v54  ;;  %v8997_v8 = vadd.f32 %v14006_v30, %v14005_v23  ;;  %v14009_v18 = vld [vmem:[#allocation37_spill] sm:$0xff]  ;;  %v14010_v26 = vld [vmem:[#allocation274_spill] sm:$0xff]  ;;  %v14013_v31 = vld [vmem:[#allocation275_spill] sm:$0xff]  ;;  %v9013_v23 = vpop.eup %5739 }
 0x2f9   : > { %14004 = vst [vmem:[#allocation258_spill] sm:$0xff] %v8993_v42  ;;  %v9005_v13 = vadd.f32 %v14010_v26, %v14009_v18  ;;  %v14012_v54 = vld [vmem:[#allocation38_spill] sm:$0xff]  ;;  %14015 = vst [vmem:[#allocation24_spill] sm:$0xff] %v9013_v23  ;;  %v14016_v24 = vld [vmem:[#allocation39_spill] sm:$0xff]  ;;  %v2858_v18 = vsub.f32 %v6991_v45, %v8927_v28  ;;  %5765 = vtanh.f32 %v2857_v58 }
 0x2fa   : > { %14007 = vst [vmem:[#allocation22_spill] sm:$0xff] %v8997_v8  ;;  %v9009_v47 = vadd.f32 %v14013_v31, %v14012_v54  ;;  %v14017_v30 = vld [vmem:[#allocation276_spill] sm:$0xff]  ;;  %v14020_v12 = vld [vmem:[#allocation277_spill] sm:$0xff]  ;;  %v9025_v54 = vpop.permute.xlu1 %2526  ;;  %v9027_v31 = vpop.eup %5741  ;;  %v14024_v61 = vld [vmem:[#allocation278_spill] sm:$0xff] }
 0x2fb   : > { %14011 = vst [vmem:[#allocation23_spill] sm:$0xff] %v9005_v13  ;;  %v9017_v53 = vadd.f32 %v14017_v30, %v14016_v24  ;;  %v14019_v8 = vld [vmem:[#allocation40_spill] sm:$0xff]  ;;  %14022 = vst [vmem:[#allocation262_spill] sm:$0xff] %v9027_v31  ;;  %v14023_v26 = vld [vmem:[#allocation41_spill] sm:$0xff]  ;;  %5767 = vtanh.f32 %v2858_v18 }
 0x2fc   : > { %14014 = vst [vmem:[#allocation260_spill] sm:$0xff] %v9009_v47  ;;  %v9021_v42 = vadd.f32 %v14020_v12, %v14019_v8  ;;  %v9031_v47 = vadd.f32 %v14024_v61, %v14023_v26  ;;  %v14026_v23 = vld [vmem:[#allocation42_spill] sm:$0xff]  ;;  %v14027_v13 = vld [vmem:[#allocation279_spill] sm:$0xff]  ;;  %v2859_v8 = vsub.f32 %v6995_v48, %v8927_v28  ;;  %v9039_v12 = vpop.eup %5743  ;;  %v14031_v55 = vld [vmem:[#allocation280_spill] sm:$0xff]  ;;  %v2860_v26 = vsub.f32 %v6998_v50, %v8927_v28 }
 0x2fd   : > { %14018 = vst [vmem:[#allocation261_spill] sm:$0xff] %v9017_v53  ;;  %v9035_v24 = vadd.f32 %v14027_v13, %v14026_v23  ;;  %14029 = vst [vmem:[#allocation27_spill] sm:$0xff] %v9039_v12  ;;  %v14030_v30 = vld [vmem:[#allocation43_spill] sm:$0xff]  ;;  %v14033_v53 = vld [vmem:[#allocation44_spill] sm:$0xff]  ;;  %v9051_v13 = vpop.eup %5745 }
 0x2fe   : > { %14021 = vst [vmem:[#allocation25_spill] sm:$0xff] %v9021_v42  ;;  %14025 = vst [vmem:[#allocation26_spill] sm:$0xff] %v9031_v47  ;;  %v9043_v42 = vadd.f32 %v14031_v55, %v14030_v30  ;;  %v14034_v31 = vld [vmem:[#allocation281_spill] sm:$0xff]  ;;  %v14038_v61 = vld [vmem:[#allocation282_spill] sm:$0xff]  ;;  %v2877_v30 = vsub.f32 %v6977_v29, %v9025_v54  ;;  %5769 = vtanh.f32 %v2859_v8 }
 0x2ff   : > { %14028 = vst [vmem:[#allocation263_spill] sm:$0xff] %v9035_v24  ;;  %v9047_v62 = vadd.f32 %v14034_v31, %v14033_v53  ;;  %14036 = vst [vmem:[#allocation265_spill] sm:$0xff] %v9051_v13  ;;  %v14037_v23 = vld [vmem:[#allocation45_spill] sm:$0xff]  ;;  %v14040_v2 = vld [vmem:[#allocation46_spill] sm:$0xff]  ;;  %v9063_v53 = vpop.eup %5747  ;;  %5771 = vtanh.f32 %v2860_v26 }
 0x300   : > { %14032 = vst [vmem:[#allocation264_spill] sm:$0xff] %v9043_v42  ;;  %v9055_v24 = vadd.f32 %v14038_v61, %v14037_v23  ;;  %v14041_v12 = vld [vmem:[#allocation283_spill] sm:$0xff]  ;;  %14043 = vst [vmem:[#allocation30_spill] sm:$0xff] %v9063_v53  ;;  %v14045_v55 = vld [vmem:[#allocation284_spill] sm:$0xff]  ;;  %v2878_v23 = vsub.f32 %v6980_v34, %v9025_v54  ;;  %5773 = vtanh.f32 %v2877_v30 }
 0x301   : > { %14035 = vst [vmem:[#allocation28_spill] sm:$0xff] %v9047_v62  ;;  %v9059_v47 = vadd.f32 %v14041_v12, %v14040_v2  ;;  %v14044_v31 = vld [vmem:[#allocation47_spill] sm:$0xff]  ;;  %v14047_v10 = vld [vmem:[#allocation48_spill] sm:$0xff]  ;;  %v14048_v13 = vld [vmem:[#allocation285_spill] sm:$0xff]  ;;  %v9075_v12 = vpop.eup %5749 }
 0x302   : > { %14039 = vst [vmem:[#allocation29_spill] sm:$0xff] %v9055_v24  ;;  %v9067_v28 = vadd.f32 %v14045_v55, %v14044_v31  ;;  %v9071_v62 = vadd.f32 %v14048_v13, %v14047_v10  ;;  %14050 = vst [vmem:[#allocation268_spill] sm:$0xff] %v9075_v12  ;;  %v14051_v58 = vld [vmem:[#allocation49_spill] sm:$0xff]  ;;  %v14052_v61 = vld [vmem:[#allocation286_spill] sm:$0xff]  ;;  %v2879_v31 = vsub.f32 %v6983_v37, %v9025_v54  ;;  %v9087_v13 = vpop.eup %5751  ;;  %5775 = vtanh.f32 %v2878_v23 }
 0x303   : > { %14042 = vst [vmem:[#allocation266_spill] sm:$0xff] %v9059_v47  ;;  %v9079_v2 = vadd.f32 %v14052_v61, %v14051_v58  ;;  %v14054_v47 = vld [vmem:[#allocation50_spill] sm:$0xff]  ;;  %v14055_v53 = vld [vmem:[#allocation287_spill] sm:$0xff]  ;;  %14057 = vst [vmem:[#allocation33_spill] sm:$0xff] %v9087_v13  ;;  %v2880_v58 = vsub.f32 %v6985_v39, %v9025_v54 }
 0x304   : > { %14046 = vst [vmem:[#allocation267_spill] sm:$0xff] %v9067_v28  ;;  %14049 = vst [vmem:[#allocation31_spill] sm:$0xff] %v9071_v62  ;;  %v9083_v24 = vadd.f32 %v14055_v53, %v14054_v47  ;;  %v14058_v18 = vld [vmem:[#allocation51_spill] sm:$0xff]  ;;  %v14059_v55 = vld [vmem:[#allocation288_spill] sm:$0xff]  ;;  %v9099_v47 = vpop.eup %5753  ;;  %5777 = vtanh.f32 %v2879_v31 }
 0x305   : > { %14053 = vst [vmem:[#allocation32_spill] sm:$0xff] %v9079_v2  ;;  %v9091_v10 = vadd.f32 %v14059_v55, %v14058_v18  ;;  %v14061_v62 = vld [vmem:[#allocation52_spill] sm:$0xff]  ;;  %v14062_v12 = vld [vmem:[#allocation289_spill] sm:$0xff]  ;;  %14064 = vst [vmem:[#allocation271_spill] sm:$0xff] %v9099_v47  ;;  %v2881_v18 = vsub.f32 %v6987_v41, %v9025_v54  ;;  %5779 = vtanh.f32 %v2880_v58 }
 0x306   : > { %14056 = vst [vmem:[#allocation269_spill] sm:$0xff] %v9083_v24  ;;  %v9095_v28 = vadd.f32 %v14062_v12, %v14061_v62  ;;  %v14065_v8 = vld [vmem:[#allocation53_spill] sm:$0xff]  ;;  %v14066_v53 = vld [vmem:[#allocation290_spill] sm:$0xff]  ;;  %v14069_v13 = vld [vmem:[#allocation291_spill] sm:$0xff]  ;;  %v9111_v62 = vpop.eup %5755 }
 0x307   : > { %14060 = vst [vmem:[#allocation270_spill] sm:$0xff] %v9091_v10  ;;  %v9103_v61 = vadd.f32 %v14066_v53, %v14065_v8  ;;  %v14068_v24 = vld [vmem:[#allocation54_spill] sm:$0xff]  ;;  %14071 = vst [vmem:[#allocation36_spill] sm:$0xff] %v9111_v62  ;;  %v14072_v26 = vld [vmem:[#allocation55_spill] sm:$0xff]  ;;  %v2882_v8 = vsub.f32 %v6991_v45, %v9025_v54  ;;  %5781 = vtanh.f32 %v2881_v18 }
 0x308   : > { %14063 = vst [vmem:[#allocation34_spill] sm:$0xff] %v9095_v28  ;;  %v9107_v2 = vadd.f32 %v14069_v13, %v14068_v24  ;;  %v14073_v12 = vld [vmem:[#allocation292_spill] sm:$0xff]  ;;  %v14076_v47 = vld [vmem:[#allocation293_spill] sm:$0xff]  ;;  %v9123_v24 = vpop.permute.xlu0 %2521  ;;  %v9125_v13 = vpop.eup %5757  ;;  %v14080_v30 = vld [vmem:[#allocation294_spill] sm:$0xff] }
 0x309   : > { %14067 = vst [vmem:[#allocation35_spill] sm:$0xff] %v9103_v61  ;;  %v9115_v55 = vadd.f32 %v14073_v12, %v14072_v26  ;;  %v14075_v28 = vld [vmem:[#allocation56_spill] sm:$0xff]  ;;  %14078 = vst [vmem:[#allocation274_spill] sm:$0xff] %v9125_v13  ;;  %v14079_v53 = vld [vmem:[#allocation57_spill] sm:$0xff]  ;;  %5783 = vtanh.f32 %v2882_v8 }
 0x30a   : > { %14070 = vst [vmem:[#allocation272_spill] sm:$0xff] %v9107_v2  ;;  %v9119_v10 = vadd.f32 %v14076_v47, %v14075_v28  ;;  %v9129_v2 = vadd.f32 %v14080_v30, %v14079_v53  ;;  %v14082_v62 = vld [vmem:[#allocation58_spill] sm:$0xff]  ;;  %v14083_v61 = vld [vmem:[#allocation295_spill] sm:$0xff]  ;;  %v2883_v28 = vsub.f32 %v6995_v48, %v9025_v54  ;;  %v9137_v47 = vpop.eup %5759  ;;  %v14087_v23 = vld [vmem:[#allocation296_spill] sm:$0xff]  ;;  %v2884_v53 = vsub.f32 %v6998_v50, %v9025_v54 }
 0x30b   : > { %14074 = vst [vmem:[#allocation273_spill] sm:$0xff] %v9115_v55  ;;  %v9133_v26 = vadd.f32 %v14083_v61, %v14082_v62  ;;  %14085 = vst [vmem:[#allocation39_spill] sm:$0xff] %v9137_v47  ;;  %v14086_v12 = vld [vmem:[#allocation59_spill] sm:$0xff]  ;;  %v14089_v55 = vld [vmem:[#allocation60_spill] sm:$0xff]  ;;  %v9149_v61 = vpop.eup %5761 }
 0x30c   : > { %14077 = vst [vmem:[#allocation37_spill] sm:$0xff] %v9119_v10  ;;  %14081 = vst [vmem:[#allocation38_spill] sm:$0xff] %v9129_v2  ;;  %v9141_v10 = vadd.f32 %v14087_v23, %v14086_v12  ;;  %v14090_v13 = vld [vmem:[#allocation297_spill] sm:$0xff]  ;;  %v14094_v30 = vld [vmem:[#allocation298_spill] sm:$0xff]  ;;  %v2869_v12 = vsub.f32 %v6977_v29, %v9123_v24  ;;  %5785 = vtanh.f32 %v2883_v28 }
 0x30d   : > { %14084 = vst [vmem:[#allocation275_spill] sm:$0xff] %v9133_v26  ;;  %v9145_v42 = vadd.f32 %v14090_v13, %v14089_v55  ;;  %14092 = vst [vmem:[#allocation277_spill] sm:$0xff] %v9149_v61  ;;  %v14093_v62 = vld [vmem:[#allocation61_spill] sm:$0xff]  ;;  %v14096_v31 = vld [vmem:[#allocation62_spill] sm:$0xff]  ;;  %v9161_v55 = vpop.eup %5763  ;;  %5787 = vtanh.f32 %v2884_v53 }
 0x30e   : > { %14088 = vst [vmem:[#allocation276_spill] sm:$0xff] %v9141_v10  ;;  %v9153_v26 = vadd.f32 %v14094_v30, %v14093_v62  ;;  %v14097_v47 = vld [vmem:[#allocation299_spill] sm:$0xff]  ;;  %14099 = vst [vmem:[#allocation42_spill] sm:$0xff] %v9161_v55  ;;  %v14101_v23 = vld [vmem:[#allocation300_spill] sm:$0xff]  ;;  %v2870_v62 = vsub.f32 %v6980_v34, %v9123_v24  ;;  %5789 = vtanh.f32 %v2869_v12 }
 0x30f   : > { %14091 = vst [vmem:[#allocation40_spill] sm:$0xff] %v9145_v42  ;;  %v9157_v2 = vadd.f32 %v14097_v47, %v14096_v31  ;;  %v14100_v13 = vld [vmem:[#allocation63_spill] sm:$0xff]  ;;  %v14103_v58 = vld [vmem:[#allocation64_spill] sm:$0xff]  ;;  %v14104_v61 = vld [vmem:[#allocation301_spill] sm:$0xff]  ;;  %v9173_v47 = vpop.eup %5765 }
 0x310   : > { %14095 = vst [vmem:[#allocation41_spill] sm:$0xff] %v9153_v26  ;;  %v9165_v54 = vadd.f32 %v14101_v23, %v14100_v13  ;;  %v9169_v42 = vadd.f32 %v14104_v61, %v14103_v58  ;;  %14106 = vst [vmem:[#allocation280_spill] sm:$0xff] %v9173_v47  ;;  %v14107_v18 = vld [vmem:[#allocation65_spill] sm:$0xff]  ;;  %v14108_v30 = vld [vmem:[#allocation302_spill] sm:$0xff]  ;;  %v2871_v13 = vsub.f32 %v6983_v37, %v9123_v24  ;;  %v9185_v61 = vpop.eup %5767  ;;  %5791 = vtanh.f32 %v2870_v62 }
 0x311   : > { %14098 = vst [vmem:[#allocation278_spill] sm:$0xff] %v9157_v2  ;;  %v9177_v31 = vadd.f32 %v14108_v30, %v14107_v18  ;;  %v14110_v2 = vld [vmem:[#allocation66_spill] sm:$0xff]  ;;  %v14111_v55 = vld [vmem:[#allocation303_spill] sm:$0xff]  ;;  %14113 = vst [vmem:[#allocation45_spill] sm:$0xff] %v9185_v61  ;;  %v2872_v18 = vsub.f32 %v6985_v39, %v9123_v24 }
 0x312   : > { %14102 = vst [vmem:[#allocation279_spill] sm:$0xff] %v9165_v54  ;;  %14105 = vst [vmem:[#allocation43_spill] sm:$0xff] %v9169_v42  ;;  %v9181_v26 = vadd.f32 %v14111_v55, %v14110_v2  ;;  %v14114_v8 = vld [vmem:[#allocation67_spill] sm:$0xff]  ;;  %v14115_v23 = vld [vmem:[#allocation304_spill] sm:$0xff]  ;;  %v9197_v2 = vpop.eup %5769  ;;  %5793 = vtanh.f32 %v2871_v13 }
 0x313   : > { %14109 = vst [vmem:[#allocation44_spill] sm:$0xff] %v9177_v31  ;;  %v9189_v58 = vadd.f32 %v14115_v23, %v14114_v8  ;;  %v14117_v42 = vld [vmem:[#allocation68_spill] sm:$0xff]  ;;  %v14118_v47 = vld [vmem:[#allocation305_spill] sm:$0xff]  ;;  %14120 = vst [vmem:[#allocation283_spill] sm:$0xff] %v9197_v2  ;;  %v2873_v8 = vsub.f32 %v6987_v41, %v9123_v24  ;;  %5795 = vtanh.f32 %v2872_v18 }
 0x314   : > { %14112 = vst [vmem:[#allocation281_spill] sm:$0xff] %v9181_v26  ;;  %v9193_v54 = vadd.f32 %v14118_v47, %v14117_v42  ;;  %v14121_v28 = vld [vmem:[#allocation69_spill] sm:$0xff]  ;;  %v14122_v55 = vld [vmem:[#allocation306_spill] sm:$0xff]  ;;  %v14125_v61 = vld [vmem:[#allocation307_spill] sm:$0xff]  ;;  %v9209_v42 = vpop.eup %5771 }
 0x315   : > { %14116 = vst [vmem:[#allocation282_spill] sm:$0xff] %v9189_v58  ;;  %v9201_v30 = vadd.f32 %v14122_v55, %v14121_v28  ;;  %v14124_v26 = vld [vmem:[#allocation70_spill] sm:$0xff]  ;;  %14127 = vst [vmem:[#allocation48_spill] sm:$0xff] %v9209_v42  ;;  %v14128_v53 = vld [vmem:[#allocation71_spill] sm:$0xff]  ;;  %v2874_v28 = vsub.f32 %v6991_v45, %v9123_v24  ;;  %5797 = vtanh.f32 %v2873_v8 }
 0x316   : > { %14119 = vst [vmem:[#allocation46_spill] sm:$0xff] %v9193_v54  ;;  %v9205_v31 = vadd.f32 %v14125_v61, %v14124_v26  ;;  %v14129_v47 = vld [vmem:[#allocation308_spill] sm:$0xff]  ;;  %v14132_v2 = vld [vmem:[#allocation309_spill] sm:$0xff]  ;;  %v9221_v26 = vpop.permute.xlu1 %2536  ;;  %v9223_v61 = vpop.eup %5773  ;;  %v14136_v12 = vld [vmem:[#allocation310_spill] sm:$0xff] }
 0x317   : > { %14123 = vst [vmem:[#allocation47_spill] sm:$0xff] %v9201_v30  ;;  %v9213_v23 = vadd.f32 %v14129_v47, %v14128_v53  ;;  %v14131_v54 = vld [vmem:[#allocation72_spill] sm:$0xff]  ;;  %14134 = vst [vmem:[#allocation286_spill] sm:$0xff] %v9223_v61  ;;  %v14135_v55 = vld [vmem:[#allocation73_spill] sm:$0xff]  ;;  %5799 = vtanh.f32 %v2874_v28 }
 0x318   : > { %14126 = vst [vmem:[#allocation284_spill] sm:$0xff] %v9205_v31  ;;  %v9217_v58 = vadd.f32 %v14132_v2, %v14131_v54  ;;  %v9227_v31 = vadd.f32 %v14136_v12, %v14135_v55  ;;  %v14138_v42 = vld [vmem:[#allocation74_spill] sm:$0xff]  ;;  %v14139_v30 = vld [vmem:[#allocation311_spill] sm:$0xff]  ;;  %v2875_v54 = vsub.f32 %v6995_v48, %v9123_v24  ;;  %v9235_v2 = vpop.eup %5775  ;;  %v14143_v62 = vld [vmem:[#allocation312_spill] sm:$0xff]  ;;  %v2876_v55 = vsub.f32 %v6998_v50, %v9123_v24 }
 0x319   : > { %14130 = vst [vmem:[#allocation285_spill] sm:$0xff] %v9213_v23  ;;  %v9231_v53 = vadd.f32 %v14139_v30, %v14138_v42  ;;  %14141 = vst [vmem:[#allocation51_spill] sm:$0xff] %v9235_v2  ;;  %v14142_v47 = vld [vmem:[#allocation75_spill] sm:$0xff]  ;;  %v14145_v23 = vld [vmem:[#allocation76_spill] sm:$0xff]  ;;  %v9247_v30 = vpop.eup %5777 }
 0x31a   : > { %14133 = vst [vmem:[#allocation49_spill] sm:$0xff] %v9217_v58  ;;  %14137 = vst [vmem:[#allocation50_spill] sm:$0xff] %v9227_v31  ;;  %v9239_v58 = vadd.f32 %v14143_v62, %v14142_v47  ;;  %v14146_v61 = vld [vmem:[#allocation313_spill] sm:$0xff]  ;;  %v14150_v12 = vld [vmem:[#allocation314_spill] sm:$0xff]  ;;  %v2893_v47 = vsub.f32 %v6977_v29, %v9221_v26  ;;  %5801 = vtanh.f32 %v2875_v54 }
 0x31b   : > { %14140 = vst [vmem:[#allocation287_spill] sm:$0xff] %v9231_v53  ;;  %v9243_v10 = vadd.f32 %v14146_v61, %v14145_v23  ;;  %14148 = vst [vmem:[#allocation289_spill] sm:$0xff] %v9247_v30  ;;  %v14149_v42 = vld [vmem:[#allocation77_spill] sm:$0xff]  ;;  %v14152_v13 = vld [vmem:[#allocation78_spill] sm:$0xff]  ;;  %v9259_v23 = vpop.eup %5779  ;;  %5803 = vtanh.f32 %v2876_v55 }
 0x31c   : > { %14144 = vst [vmem:[#allocation288_spill] sm:$0xff] %v9239_v58  ;;  %v9251_v53 = vadd.f32 %v14150_v12, %v14149_v42  ;;  %v14153_v2 = vld [vmem:[#allocation315_spill] sm:$0xff]  ;;  %14155 = vst [vmem:[#allocation54_spill] sm:$0xff] %v9259_v23  ;;  %v14157_v62 = vld [vmem:[#allocation316_spill] sm:$0xff]  ;;  %v2894_v42 = vsub.f32 %v6980_v34, %v9221_v26  ;;  %5805 = vtanh.f32 %v2893_v47 }
 0x31d   : > { %14147 = vst [vmem:[#allocation52_spill] sm:$0xff] %v9243_v10  ;;  %v9255_v31 = vadd.f32 %v14153_v2, %v14152_v13  ;;  %v14156_v61 = vld [vmem:[#allocation79_spill] sm:$0xff]  ;;  %v14159_v18 = vld [vmem:[#allocation80_spill] sm:$0xff]  ;;  %v14160_v30 = vld [vmem:[#allocation317_spill] sm:$0xff]  ;;  %v9271_v2 = vpop.eup %5781 }
 0x31e   : > { %14151 = vst [vmem:[#allocation53_spill] sm:$0xff] %v9251_v53  ;;  %v9263_v24 = vadd.f32 %v14157_v62, %v14156_v61  ;;  %v9267_v10 = vadd.f32 %v14160_v30, %v14159_v18  ;;  %14162 = vst [vmem:[#allocation292_spill] sm:$0xff] %v9271_v2  ;;  %v14163_v8 = vld [vmem:[#allocation81_spill] sm:$0xff]  ;;  %v14164_v12 = vld [vmem:[#allocation318_spill] sm:$0xff]  ;;  %v2895_v61 = vsub.f32 %v6983_v37, %v9221_v26  ;;  %v9283_v30 = vpop.eup %5783  ;;  %5807 = vtanh.f32 %v2894_v42 }
 0x31f   : > { %14154 = vst [vmem:[#allocation290_spill] sm:$0xff] %v9255_v31  ;;  %v9275_v13 = vadd.f32 %v14164_v12, %v14163_v8  ;;  %v14166_v31 = vld [vmem:[#allocation82_spill] sm:$0xff]  ;;  %v14167_v23 = vld [vmem:[#allocation319_spill] sm:$0xff]  ;;  %14169 = vst [vmem:[#allocation57_spill] sm:$0xff] %v9283_v30  ;;  %v2896_v8 = vsub.f32 %v6985_v39, %v9221_v26 }
 0x320   : > { %14158 = vst [vmem:[#allocation291_spill] sm:$0xff] %v9263_v24  ;;  %14161 = vst [vmem:[#allocation55_spill] sm:$0xff] %v9267_v10  ;;  %v9279_v53 = vadd.f32 %v14167_v23, %v14166_v31  ;;  %v14170_v28 = vld [vmem:[#allocation83_spill] sm:$0xff]  ;;  %v14171_v62 = vld [vmem:[#allocation320_spill] sm:$0xff]  ;;  %v9295_v31 = vpop.eup %5785  ;;  %5809 = vtanh.f32 %v2895_v61 }
 0x321   : > { %14165 = vst [vmem:[#allocation56_spill] sm:$0xff] %v9275_v13  ;;  %v9287_v18 = vadd.f32 %v14171_v62, %v14170_v28  ;;  %v14173_v10 = vld [vmem:[#allocation84_spill] sm:$0xff]  ;;  %v14174_v2 = vld [vmem:[#allocation321_spill] sm:$0xff]  ;;  %14176 = vst [vmem:[#allocation295_spill] sm:$0xff] %v9295_v31  ;;  %v2897_v28 = vsub.f32 %v6987_v41, %v9221_v26  ;;  %5811 = vtanh.f32 %v2896_v8 }
 0x322   : > { %14168 = vst [vmem:[#allocation293_spill] sm:$0xff] %v9279_v53  ;;  %v9291_v24 = vadd.f32 %v14174_v2, %v14173_v10  ;;  %v14177_v54 = vld [vmem:[#allocation85_spill] sm:$0xff]  ;;  %v14178_v23 = vld [vmem:[#allocation322_spill] sm:$0xff]  ;;  %v14181_v30 = vld [vmem:[#allocation323_spill] sm:$0xff]  ;;  %v9307_v10 = vpop.eup %5787 }
 0x323   : > { %14172 = vst [vmem:[#allocation294_spill] sm:$0xff] %v9287_v18  ;;  %v9299_v12 = vadd.f32 %v14178_v23, %v14177_v54  ;;  %v14180_v53 = vld [vmem:[#allocation86_spill] sm:$0xff]  ;;  %14183 = vst [vmem:[#allocation60_spill] sm:$0xff] %v9307_v10  ;;  %v14184_v55 = vld [vmem:[#allocation87_spill] sm:$0xff]  ;;  %v2898_v54 = vsub.f32 %v6991_v45, %v9221_v26  ;;  %5813 = vtanh.f32 %v2897_v28 }
 0x324   : > { %14175 = vst [vmem:[#allocation58_spill] sm:$0xff] %v9291_v24  ;;  %v9303_v13 = vadd.f32 %v14181_v30, %v14180_v53  ;;  %v14185_v2 = vld [vmem:[#allocation324_spill] sm:$0xff]  ;;  %v14188_v31 = vld [vmem:[#allocation325_spill] sm:$0xff]  ;;  %v9319_v53 = vpop.permute.xlu0 %2531  ;;  %v9321_v30 = vpop.eup %5789  ;;  %v14192_v47 = vld [vmem:[#allocation326_spill] sm:$0xff] }
 0x325   : > { %14179 = vst [vmem:[#allocation59_spill] sm:$0xff] %v9299_v12  ;;  %v9311_v62 = vadd.f32 %v14185_v2, %v14184_v55  ;;  %v14187_v24 = vld [vmem:[#allocation88_spill] sm:$0xff]  ;;  %14190 = vst [vmem:[#allocation298_spill] sm:$0xff] %v9321_v30  ;;  %v14191_v23 = vld [vmem:[#allocation89_spill] sm:$0xff]  ;;  %5815 = vtanh.f32 %v2898_v54 }
 0x326   : > { %14182 = vst [vmem:[#allocation296_spill] sm:$0xff] %v9303_v13  ;;  %v9315_v18 = vadd.f32 %v14188_v31, %v14187_v24  ;;  %v9325_v13 = vadd.f32 %v14192_v47, %v14191_v23  ;;  %v14194_v10 = vld [vmem:[#allocation90_spill] sm:$0xff]  ;;  %v14195_v12 = vld [vmem:[#allocation327_spill] sm:$0xff]  ;;  %v2899_v24 = vsub.f32 %v6995_v48, %v9221_v26  ;;  %v9333_v31 = vpop.eup %5791  ;;  %v14199_v42 = vld [vmem:[#allocation328_spill] sm:$0xff]  ;;  %v2900_v23 = vsub.f32 %v6998_v50, %v9221_v26 }
 0x327   : > { %14186 = vst [vmem:[#allocation297_spill] sm:$0xff] %v9311_v62  ;;  %v9329_v55 = vadd.f32 %v14195_v12, %v14194_v10  ;;  %14197 = vst [vmem:[#allocation63_spill] sm:$0xff] %v9333_v31  ;;  %v14198_v2 = vld [vmem:[#allocation91_spill] sm:$0xff]  ;;  %v14201_v62 = vld [vmem:[#allocation92_spill] sm:$0xff]  ;;  %v9345_v12 = vpop.eup %5793 }
 0x328   : > { %14189 = vst [vmem:[#allocation61_spill] sm:$0xff] %v9315_v18  ;;  %14193 = vst [vmem:[#allocation62_spill] sm:$0xff] %v9325_v13  ;;  %v9337_v18 = vadd.f32 %v14199_v42, %v14198_v2  ;;  %v14202_v30 = vld [vmem:[#allocation329_spill] sm:$0xff]  ;;  %v14206_v47 = vld [vmem:[#allocation330_spill] sm:$0xff]  ;;  %v2885_v2 = vsub.f32 %v6977_v29, %v9319_v53  ;;  %5817 = vtanh.f32 %v2899_v24 }
 0x329   : > { %14196 = vst [vmem:[#allocation299_spill] sm:$0xff] %v9329_v55  ;;  %v9341_v58 = vadd.f32 %v14202_v30, %v14201_v62  ;;  %14204 = vst [vmem:[#allocation301_spill] sm:$0xff] %v9345_v12  ;;  %v14205_v10 = vld [vmem:[#allocation93_spill] sm:$0xff]  ;;  %v14208_v61 = vld [vmem:[#allocation94_spill] sm:$0xff]  ;;  %v9357_v62 = vpop.eup %5795  ;;  %5819 = vtanh.f32 %v2900_v23 }
 0x32a   : > { %14200 = vst [vmem:[#allocation300_spill] sm:$0xff] %v9337_v18  ;;  %v9349_v55 = vadd.f32 %v14206_v47, %v14205_v10  ;;  %v9353_v31 = vadd.f32 %v8144_v7, %v14208_v61  ;;  %14210 = vst [vmem:[#allocation66_spill] sm:$0xff] %v9357_v62  ;;  %v14211_v30 = vld [vmem:[#allocation95_spill] sm:$0xff]  ;;  %v14213_v8 = vld [vmem:[#allocation96_spill] sm:$0xff]  ;;  %v2886_v10 = vsub.f32 %v6980_v34, %v9319_v53  ;;  %v9369_v7 = vpop.eup %5797  ;;  %5821 = vtanh.f32 %v2885_v2 }
 0x32b   : > { %14203 = vst [vmem:[#allocation64_spill] sm:$0xff] %v9341_v58  ;;  %v9361_v26 = vadd.f32 %v8147_v40, %v14211_v30  ;;  %v14214_v42 = vld [vmem:[#allocation331_spill] sm:$0xff]  ;;  %14216 = vst [vmem:[#allocation304_spill] sm:$0xff] %v9369_v7  ;;  %v14217_v28 = vld [vmem:[#allocation97_spill] sm:$0xff]  ;;  %v2887_v40 = vsub.f32 %v6983_v37, %v9319_v53  ;;  %v9381_v30 = vpop.eup %5799 }
 0x32c   : > { %14207 = vst [vmem:[#allocation65_spill] sm:$0xff] %v9349_v55  ;;  %14209 = vst [vmem:[#allocation302_spill] sm:$0xff] %v9353_v31  ;;  %v9365_v12 = vadd.f32 %v14214_v42, %v14213_v8  ;;  %v14218_v47 = vld [vmem:[#allocation332_spill] sm:$0xff]  ;;  %v14220_v31 = vld [vmem:[#allocation98_spill] sm:$0xff]  ;;  %5823 = vtanh.f32 %v2886_v10 }
 0x32d   : > { %14212 = vst [vmem:[#allocation303_spill] sm:$0xff] %v9361_v26  ;;  %v9373_v61 = vadd.f32 %v14218_v47, %v14217_v28  ;;  %v14221_v62 = vld [vmem:[#allocation333_spill] sm:$0xff]  ;;  %14223 = vst [vmem:[#allocation69_spill] sm:$0xff] %v9381_v30  ;;  %v14224_v54 = vld [vmem:[#allocation99_spill] sm:$0xff]  ;;  %v2888_v28 = vsub.f32 %v6985_v39, %v9319_v53  ;;  %5825 = vtanh.f32 %v2887_v40 }
 0x32e   : > { %14215 = vst [vmem:[#allocation67_spill] sm:$0xff] %v9365_v12  ;;  %v9377_v55 = vadd.f32 %v14221_v62, %v14220_v31  ;;  %v14225_v8 = vld [vmem:[#allocation334_spill] sm:$0xff]  ;;  %v14227_v12 = vld [vmem:[#allocation100_spill] sm:$0xff]  ;;  %v14228_v7 = vld [vmem:[#allocation335_spill] sm:$0xff]  ;;  %v9393_v31 = vpop.eup %5801 }
 0x32f   : > { %14219 = vst [vmem:[#allocation68_spill] sm:$0xff] %v9373_v61  ;;  %v9385_v42 = vadd.f32 %v14225_v8, %v14224_v54  ;;  %v9389_v26 = vadd.f32 %v14228_v7, %v14227_v12  ;;  %14230 = vst [vmem:[#allocation307_spill] sm:$0xff] %v9393_v31  ;;  %v14231_v24 = vld [vmem:[#allocation101_spill] sm:$0xff]  ;;  %v14232_v62 = vld [vmem:[#allocation336_spill] sm:$0xff]  ;;  %v2889_v54 = vsub.f32 %v6987_v41, %v9319_v53  ;;  %v9405_v12 = vpop.eup %5803  ;;  %5827 = vtanh.f32 %v2888_v28 }
 0x330   : > { %14222 = vst [vmem:[#allocation305_spill] sm:$0xff] %v9377_v55  ;;  %v9397_v47 = vadd.f32 %v14232_v62, %v14231_v24  ;;  %v14234_v55 = vld [vmem:[#allocation102_spill] sm:$0xff]  ;;  %v14235_v30 = vld [vmem:[#allocation337_spill] sm:$0xff]  ;;  %14237 = vst [vmem:[#allocation72_spill] sm:$0xff] %v9405_v12  ;;  %v2890_v24 = vsub.f32 %v6991_v45, %v9319_v53 }
 0x331   : > { %14226 = vst [vmem:[#allocation306_spill] sm:$0xff] %v9385_v42  ;;  %14229 = vst [vmem:[#allocation70_spill] sm:$0xff] %v9389_v26  ;;  %v9401_v61 = vadd.f32 %v14235_v30, %v14234_v55  ;;  %v14238_v23 = vld [vmem:[#allocation103_spill] sm:$0xff]  ;;  %v14239_v7 = vld [vmem:[#allocation338_spill] sm:$0xff]  ;;  %v9417_v55 = vpop.permute.xlu1 %2546  ;;  %v9419_v30 = vpop.eup %5805  ;;  %5829 = vtanh.f32 %v2889_v54 }
 0x332   : > { %14233 = vst [vmem:[#allocation71_spill] sm:$0xff] %v9397_v47  ;;  %v9409_v8 = vadd.f32 %v14239_v7, %v14238_v23  ;;  %v14241_v26 = vld [vmem:[#allocation104_spill] sm:$0xff]  ;;  %v14242_v31 = vld [vmem:[#allocation339_spill] sm:$0xff]  ;;  %14244 = vst [vmem:[#allocation310_spill] sm:$0xff] %v9419_v30  ;;  %5831 = vtanh.f32 %v2890_v24 }
 0x333   : > { %14236 = vst [vmem:[#allocation308_spill] sm:$0xff] %v9401_v61  ;;  %v9413_v42 = vadd.f32 %v14242_v31, %v14241_v26  ;;  %v14245_v62 = vld [vmem:[#allocation105_spill] sm:$0xff]  ;;  %v14246_v2 = vld [vmem:[#allocation340_spill] sm:$0xff]  ;;  %v14248_v12 = vld [vmem:[#allocation106_spill] sm:$0xff]  ;;  %v2891_v26 = vsub.f32 %v6995_v48, %v9319_v53  ;;  %v9431_v31 = vpop.eup %5807 }
 0x334   : > { %14240 = vst [vmem:[#allocation309_spill] sm:$0xff] %v9409_v8  ;;  %v9423_v61 = vadd.f32 %v14246_v2, %v14245_v62  ;;  %v14249_v47 = vld [vmem:[#allocation341_spill] sm:$0xff]  ;;  %14251 = vst [vmem:[#allocation75_spill] sm:$0xff] %v9431_v31  ;;  %v14252_v7 = vld [vmem:[#allocation107_spill] sm:$0xff]  ;;  %v2892_v62 = vsub.f32 %v6998_v50, %v9319_v53 }
 0x335   : > { %14243 = vst [vmem:[#allocation73_spill] sm:$0xff] %v9413_v42  ;;  %v9427_v23 = vadd.f32 %v14249_v47, %v14248_v12  ;;  %v14253_v10 = vld [vmem:[#allocation342_spill] sm:$0xff]  ;;  %v14255_v8 = vld [vmem:[#allocation108_spill] sm:$0xff]  ;;  %v14256_v30 = vld [vmem:[#allocation343_spill] sm:$0xff]  ;;  %v9443_v47 = vpop.eup %5809  ;;  %5833 = vtanh.f32 %v2891_v26 }
 0x336   : > { %14247 = vst [vmem:[#allocation74_spill] sm:$0xff] %v9423_v61  ;;  %v9435_v42 = vadd.f32 %v14253_v10, %v14252_v7  ;;  %v9439_v58 = vadd.f32 %v14256_v30, %v14255_v8  ;;  %14258 = vst [vmem:[#allocation313_spill] sm:$0xff] %v9443_v47  ;;  %v14259_v12 = vld [vmem:[#allocation109_spill] sm:$0xff]  ;;  %v14260_v2 = vld [vmem:[#allocation344_spill] sm:$0xff]  ;;  %v2909_v7 = vsub.f32 %v6977_v29, %v9417_v55  ;;  %v9455_v8 = vpop.eup %5811  ;;  %5835 = vtanh.f32 %v2892_v62 }
 0x337   : > { %14250 = vst [vmem:[#allocation311_spill] sm:$0xff] %v9427_v23  ;;  %v9447_v23 = vadd.f32 %v14260_v2, %v14259_v12  ;;  %v14262_v40 = vld [vmem:[#allocation110_spill] sm:$0xff]  ;;  %v14263_v31 = vld [vmem:[#allocation345_spill] sm:$0xff]  ;;  %14265 = vst [vmem:[#allocation78_spill] sm:$0xff] %v9455_v8  ;;  %v2910_v12 = vsub.f32 %v6980_v34, %v9417_v55 }
 0x338   : > { %14254 = vst [vmem:[#allocation312_spill] sm:$0xff] %v9435_v42  ;;  %14257 = vst [vmem:[#allocation76_spill] sm:$0xff] %v9439_v58  ;;  %v9451_v61 = vadd.f32 %v14263_v31, %v14262_v40  ;;  %v14266_v30 = vld [vmem:[#allocation111_spill] sm:$0xff]  ;;  %v14267_v10 = vld [vmem:[#allocation346_spill] sm:$0xff]  ;;  %v9467_v31 = vpop.eup %5813  ;;  %5837 = vtanh.f32 %v2909_v7 }
 0x339   : > { %14261 = vst [vmem:[#allocation77_spill] sm:$0xff] %v9447_v23  ;;  %v9459_v53 = vadd.f32 %v14267_v10, %v14266_v30  ;;  %v14269_v28 = vld [vmem:[#allocation112_spill] sm:$0xff]  ;;  %v14270_v47 = vld [vmem:[#allocation347_spill] sm:$0xff]  ;;  %14272 = vst [vmem:[#allocation316_spill] sm:$0xff] %v9467_v31  ;;  %v2911_v30 = vsub.f32 %v6983_v37, %v9417_v55  ;;  %v9477_v10 = vpop.eup %5815  ;;  %5839 = vtanh.f32 %v2910_v12 }
 0x33a   : > { %14264 = vst [vmem:[#allocation314_spill] sm:$0xff] %v9451_v61  ;;  %v9463_v58 = vadd.f32 %v14270_v47, %v14269_v28  ;;  %v14273_v54 = vld [vmem:[#allocation113_spill] sm:$0xff]  ;;  %v14274_v2 = vld [vmem:[#allocation348_spill] sm:$0xff]  ;;  %14278 = vst [vmem:[#allocation317_spill] sm:$0xff] %v9477_v10 }
 0x33b   : > { %14268 = vst [vmem:[#allocation315_spill] sm:$0xff] %v9459_v53  ;;  %v9471_v40 = vadd.f32 %v14274_v2, %v14273_v54  ;;  %v14276_v61 = vld [vmem:[#allocation117_spill] sm:$0xff]  ;;  %v14277_v8 = vld [vmem:[#allocation352_spill] sm:$0xff]  ;;  %v14279_v47 = vld [vmem:[#allocation118_spill] sm:$0xff]  ;;  %v2912_v54 = vsub.f32 %v6985_v39, %v9417_v55  ;;  %v9485_v2 = vpop.eup %5817  ;;  %5841 = vtanh.f32 %v2911_v30 }
 0x33c   : > { %14271 = vst [vmem:[#allocation79_spill] sm:$0xff] %v9463_v58  ;;  %v1949_v23 = vadd.f32 %v14277_v8, %v14276_v61  ;;  %v14280_v24 = vld [vmem:[#allocation353_spill] sm:$0xff]  ;;  %v14281_v58 = vld [vmem:[#allocation119_spill] sm:$0xff]  ;;  %v14282_v53 = vld [vmem:[#allocation354_spill] sm:$0xff] }
 0x33d   : > { %14275 = vst [vmem:[#allocation80_spill] sm:$0xff] %v9471_v40  ;;  %v1950_v28 = vadd.f32 %v14280_v24, %v14279_v47  ;;  %v1951_v42 = vadd.f32 %v14282_v53, %v14281_v58  ;;  %14283 = vst [vmem:[#allocation81_spill] sm:$0xff] %v9485_v2  ;;  %v14284_v31 = vld [vmem:[#allocation114_spill] sm:$0xff]  ;;  %v14285_v61 = vld [vmem:[#allocation349_spill] sm:$0xff]  ;;  %v2913_v47 = vsub.f32 %v6987_v41, %v9417_v55  ;;  %v9497_v24 = vpop.eup %5819  ;;  %5843 = vtanh.f32 %v2912_v54 }
 0x33e   : > { %v9489_v26 = vadd.f32 %v14285_v61, %v14284_v31  ;;  %v14287_v8 = vld [vmem:[#allocation115_spill] sm:$0xff]  ;;  %v14288_v40 = vld [vmem:[#allocation350_spill] sm:$0xff]  ;;  %14290 = vst [vmem:[#allocation319_spill] sm:$0xff] %v9497_v24  ;;  %v14291_v58 = vld [vmem:[#allocation116_spill] sm:$0xff]  ;;  %v2914_v31 = vsub.f32 %v6991_v45, %v9417_v55  ;;  %v9507_v61 = vpop.permute.xlu0 %2541  ;;  %v9514_v24 = vadd.f32 %v1949_v23, %v8715_v16 }
 0x33f   : > { %v9493_v18 = vadd.f32 %v14288_v40, %v14287_v8  ;;  %v14292_v62 = vld [vmem:[#allocation351_spill] sm:$0xff]  ;;  %v14294_v10 = vld [vmem:[#allocation120_spill] sm:$0xff]  ;;  %v9509_v40 = vpop.eup %5821  ;;  %v14297_v8 = vld [vmem:[#allocation121_spill] sm:$0xff]  ;;  %v9524_v12 = vadd.f32 %v1951_v42, %v8726_v6  ;;  %5845 = vtanh.f32 %v2913_v47  ;;  %v2902_v54 = vsub.f32 %v6980_v34, %v9507_v61 }
 0x340   : > { %14286 = vst [vmem:[#allocation318_spill] sm:$0xff] %v9489_v26  ;;  %v9501_v53 = vadd.f32 %v14292_v62, %v14291_v58  ;;  %v14295_v2 = vld [vmem:[#allocation355_spill] sm:$0xff]  ;;  %14296 = vst [vmem:[#allocation320_spill] sm:$0xff] %v9509_v40  ;;  %v2915_v58 = vsub.f32 %v6995_v48, %v9417_v55  ;;  %v9518_v62 = vpop.eup %5823  ;;  %v14301_v16 = vld [vmem:[#allocation122_spill] sm:$0xff]  ;;  %5847 = vtanh.f32 %v2914_v31 }
 0x341   : > { %14289 = vst [vmem:[#allocation82_spill] sm:$0xff] %v9493_v18  ;;  %v1952_v13 = vadd.f32 %v14295_v2, %v14294_v10  ;;  %v14298_v18 = vld [vmem:[#allocation356_spill] sm:$0xff]  ;;  %14299 = vst [vmem:[#allocation84_spill] sm:$0xff] %v9518_v62  ;;  %v9521_v10 = vadd.f32 %v1950_v28, %v8719_v0  ;;  %v2916_v2 = vsub.f32 %v6998_v50, %v9417_v55  ;;  %v14302_v23 = vld [vmem:[#allocation357_spill] sm:$0xff] }
 0x342   : > { %14293 = vst [vmem:[#allocation83_spill] sm:$0xff] %v9501_v53  ;;  %v1953_v7 = vadd.f32 %v14298_v18, %v14297_v8  ;;  %v9528_v18 = vpop.eup %5825  ;;  %v1954_v8 = vadd.f32 %v14302_v23, %v14301_v16  ;;  %v14303_v40 = vld [vmem:[#allocation123_spill] sm:$0xff]  ;;  %v14304_v53 = vld [vmem:[#allocation358_spill] sm:$0xff]  ;;  %v2901_v0 = vsub.f32 %v6977_v29, %v9507_v61  ;;  %v14306_v6 = vld [vmem:[#allocation124_spill] sm:$0xff]  ;;  %5849 = vtanh.f32 %v2915_v58 }
 0x343   : > { %14300 = vst [vmem:[#allocation321_spill] sm:$0xff] %v9528_v18  ;;  %v1955_v30 = vadd.f32 %v14304_v53, %v14303_v40  ;;  %v9536_v28 = vpop.eup %5827  ;;  %v14307_v42 = vld [vmem:[#allocation359_spill] sm:$0xff]  ;;  %v9541_v55 = vadd.f32 %v1952_v13, %v8730_v19  ;;  %v14309_v47 = vld [vmem:[#allocation125_spill] sm:$0xff]  ;;  %v14310_v40 = vld [vmem:[#allocation360_spill] sm:$0xff]  ;;  %5851 = vtanh.f32 %v2916_v2 }
 0x344   : > { %14305 = vst [vmem:[#allocation85_spill] sm:$0xff] %v9536_v28  ;;  %v1956_v62 = vadd.f32 %v14307_v42, %v14306_v6  ;;  %v9545_v16 = vpop.eup %5829  ;;  %v9548_v53 = vadd.f32 %v1953_v7, %v8739_v51  ;;  %v1941_v23 = vadd.f32 %v14310_v40, %v14309_v47  ;;  %v2903_v28 = vsub.f32 %v6983_v37, %v9507_v61  ;;  %v14312_v19 = vld [vmem:[#allocation126_spill] sm:$0xff]  ;;  %v14313_v13 = vld [vmem:[#allocation361_spill] sm:$0xff]  ;;  %v14314_v42 = vld [vmem:[#allocation127_spill] sm:$0xff] }
 0x345   : > { %14308 = vst [vmem:[#allocation322_spill] sm:$0xff] %v9545_v16  ;;  %v9554_v6 = vpop.eup %5831  ;;  %v1942_v31 = vadd.f32 %v14313_v13, %v14312_v19  ;;  %v14315_v18 = vld [vmem:[#allocation362_spill] sm:$0xff]  ;;  %v2904_v51 = vsub.f32 %v6985_v39, %v9507_v61  ;;  %v9565_v47 = vadd.f32 %v1954_v8, %v8743_v5  ;;  %v9568_v58 = vadd.f32 %v1955_v30, %v8750_v57  ;;  %v14318_v2 = vld [vmem:[#allocation128_spill] sm:$0xff]  ;;  %v14319_v13 = vld [vmem:[#allocation363_spill] sm:$0xff]  ;;  %v9581_v5 = vpop.permute.xlu1 %2556 }
 0x346   : > { %14311 = vst [vmem:[#allocation86_spill] sm:$0xff] %v9554_v6  ;;  %v1943_v26 = vadd.f32 %v14315_v18, %v14314_v42  ;;  %v9562_v7 = vpop.eup %5833  ;;  %v2905_v40 = vsub.f32 %v6987_v41, %v9507_v61  ;;  %5853 = vtanh.f32 %v2901_v0  ;;  %v9575_v18 = vadd.f32 %v1956_v62, %v8754_v46  ;;  %v14321_v8 = vld [vmem:[#allocation129_spill] sm:$0xff]  ;;  %v14322_v30 = vld [vmem:[#allocation364_spill] sm:$0xff] }
 0x347   : > { %14316 = vst [vmem:[#allocation323_spill] sm:$0xff] %v9562_v7  ;;  %v9572_v19 = vpop.eup %5835  ;;  %v1944_v42 = vadd.f32 %v14319_v13, %v14318_v2  ;;  %v2906_v7 = vsub.f32 %v6991_v45, %v9507_v61  ;;  %5855 = vtanh.f32 %v2902_v54  ;;  %v1945_v6 = vadd.f32 %v14322_v30, %v14321_v8 }
 0x348   : > { %14317 = vst [vmem:[#allocation87_spill] sm:$0xff] %v9572_v19  ;;  %v9583_v57 = vpop.eup %5837  ;;  %v9588_v0 = vadd.f32 %v1941_v23, %v8761_v43  ;;  %v2907_v46 = vsub.f32 %v6995_v48, %v9507_v61  ;;  %5857 = vtanh.f32 %v2903_v28  ;;  %v9595_v2 = vadd.f32 %v1942_v31, %v8765_v1  ;;  %v14325_v43 = vld [vmem:[#allocation130_spill] sm:$0xff]  ;;  %v14326_v23 = vld [vmem:[#allocation365_spill] sm:$0xff] }
 0x349   : > { %14320 = vst [vmem:[#allocation324_spill] sm:$0xff] %v9583_v57  ;;  %v9592_v62 = vpop.eup %5839  ;;  %v9598_v54 = vadd.f32 %v1943_v26, %v8773_v52  ;;  %v2908_v13 = vsub.f32 %v6998_v50, %v9507_v61  ;;  %5859 = vtanh.f32 %v2904_v51  ;;  %v1946_v30 = vadd.f32 %v14326_v23, %v14325_v43  ;;  %v14327_v57 = vld [vmem:[#allocation131_spill] sm:$0xff]  ;;  %v14328_v19 = vld [vmem:[#allocation366_spill] sm:$0xff]  ;;  %v14330_v52 = vld [vmem:[#allocation132_spill] sm:$0xff] }
 0x34a   : > { %14323 = vst [vmem:[#allocation88_spill] sm:$0xff] %v9592_v62  ;;  %v9602_v8 = vpop.eup %5841  ;;  %v1947_v28 = vadd.f32 %v14328_v19, %v14327_v57  ;;  %5861 = vtanh.f32 %v2905_v40  ;;  %v2925_v1 = vsub.f32 %v6977_v29, %v9581_v5  ;;  %v14331_v26 = vld [vmem:[#allocation367_spill] sm:$0xff]  ;;  %v9615_v61 = vadd.f32 %v1944_v42, %v8777_v4  ;;  %v14333_v40 = vld [vmem:[#allocation133_spill] sm:$0xff]  ;;  %v14334_v57 = vld [vmem:[#allocation368_spill] sm:$0xff] }
 0x34b   : > { %14324 = vst [vmem:[#allocation325_spill] sm:$0xff] %v9602_v8  ;;  %v9610_v31 = vpop.eup %5843  ;;  %v1948_v62 = vadd.f32 %v14331_v26, %v14330_v52  ;;  %5863 = vtanh.f32 %v2906_v7  ;;  %v2926_v51 = vsub.f32 %v6980_v34, %v9581_v5  ;;  %v9622_v19 = vadd.f32 %v1945_v6, %v8785_v11  ;;  %v14336_v4 = vld [vmem:[#allocation134_spill] sm:$0xff]  ;;  %v14337_v42 = vld [vmem:[#allocation369_spill] sm:$0xff]  ;;  %v14338_v26 = vld [vmem:[#allocation135_spill] sm:$0xff] }
 0x34c   : > { %14329 = vst [vmem:[#allocation89_spill] sm:$0xff] %v9610_v31  ;;  %v9619_v43 = vpop.eup %5845  ;;  %v1965_v23 = vadd.f32 %v14334_v57, %v14333_v40  ;;  %5865 = vtanh.f32 %v2907_v46  ;;  %v2927_v31 = vsub.f32 %v6983_v37, %v9581_v5  ;;  %v1966_v7 = vadd.f32 %v14337_v42, %v14336_v4  ;;  %v14339_v8 = vld [vmem:[#allocation370_spill] sm:$0xff]  ;;  %v14343_v42 = vld [vmem:[#allocation371_spill] sm:$0xff] }
 0x34d   : > { %14332 = vst [vmem:[#allocation326_spill] sm:$0xff] %v9619_v43  ;;  %v9628_v52 = vpop.eup %5847  ;;  %v1967_v16 = vadd.f32 %v14339_v8, %v14338_v26  ;;  %5867 = vtanh.f32 %v2908_v13  ;;  %v2928_v11 = vsub.f32 %v6985_v39, %v9581_v5  ;;  %v9639_v40 = vadd.f32 %v1946_v30, %v8789_v22  ;;  %v14342_v13 = vld [vmem:[#allocation136_spill] sm:$0xff]  ;;  %v9655_v22 = vpop.permute.xlu0 %2551  ;;  %v14345_v30 = vld [vmem:[#allocation137_spill] sm:$0xff] }
 0x34e   : > { %14335 = vst [vmem:[#allocation90_spill] sm:$0xff] %v9628_v52  ;;  %v9636_v6 = vpop.eup %5849  ;;  %v9642_v46 = vadd.f32 %v1947_v28, %v8797_v3  ;;  %v2929_v57 = vsub.f32 %v6987_v41, %v9581_v5  ;;  %5869 = vtanh.f32 %v2925_v1  ;;  %v9649_v8 = vadd.f32 %v1948_v62, %v8801_v15  ;;  %v14346_v28 = vld [vmem:[#allocation372_spill] sm:$0xff] }
 0x34f   : > { %14340 = vst [vmem:[#allocation327_spill] sm:$0xff] %v9636_v6  ;;  %v9646_v4 = vpop.eup %5851  ;;  %v1968_v26 = vadd.f32 %v14343_v42, %v14342_v13  ;;  %v2930_v6 = vsub.f32 %v6991_v45, %v9581_v5  ;;  %5871 = vtanh.f32 %v2926_v51  ;;  %v1969_v52 = vadd.f32 %v14346_v28, %v14345_v30 }
 0x350   : > { %14341 = vst [vmem:[#allocation91_spill] sm:$0xff] %v9646_v4  ;;  %v9657_v3 = vpop.eup %5853  ;;  %v9662_v1 = vadd.f32 %v1965_v23, %v8809_v60  ;;  %v2931_v15 = vsub.f32 %v6995_v48, %v9581_v5  ;;  %5873 = vtanh.f32 %v2927_v31  ;;  %v9669_v13 = vadd.f32 %v1966_v7, %v8813_v63  ;;  %v14349_v60 = vld [vmem:[#allocation138_spill] sm:$0xff]  ;;  %v14350_v23 = vld [vmem:[#allocation373_spill] sm:$0xff] }
 0x351   : > { %14344 = vst [vmem:[#allocation328_spill] sm:$0xff] %v9657_v3  ;;  %v9666_v62 = vpop.eup %5855  ;;  %v9672_v51 = vadd.f32 %v1967_v16, %v8821_v44  ;;  %v2932_v42 = vsub.f32 %v6998_v50, %v9581_v5  ;;  %5875 = vtanh.f32 %v2928_v11  ;;  %v1970_v28 = vadd.f32 %v14350_v23, %v14349_v60  ;;  %v14351_v3 = vld [vmem:[#allocation139_spill] sm:$0xff]  ;;  %v14352_v4 = vld [vmem:[#allocation374_spill] sm:$0xff]  ;;  %v14354_v44 = vld [vmem:[#allocation140_spill] sm:$0xff] }
 0x352   : > { %14347 = vst [vmem:[#allocation92_spill] sm:$0xff] %v9666_v62  ;;  %v9676_v30 = vpop.eup %5857  ;;  %v1971_v31 = vadd.f32 %v14352_v4, %v14351_v3  ;;  %5877 = vtanh.f32 %v2929_v57  ;;  %v2917_v63 = vsub.f32 %v6977_v29, %v9655_v22  ;;  %v14355_v16 = vld [vmem:[#allocation375_spill] sm:$0xff]  ;;  %v9689_v5 = vadd.f32 %v1968_v26, %v8825_v59  ;;  %v14357_v57 = vld [vmem:[#allocation141_spill] sm:$0xff]  ;;  %v14358_v3 = vld [vmem:[#allocation376_spill] sm:$0xff] }
 0x353   : > { %14348 = vst [vmem:[#allocation329_spill] sm:$0xff] %v9676_v30  ;;  %v9684_v7 = vpop.eup %5859  ;;  %v1972_v62 = vadd.f32 %v14355_v16, %v14354_v44  ;;  %5879 = vtanh.f32 %v2930_v6  ;;  %v2918_v11 = vsub.f32 %v6980_v34, %v9655_v22  ;;  %v9696_v4 = vadd.f32 %v1969_v52, %v8835_v21  ;;  %v14360_v59 = vld [vmem:[#allocation142_spill] sm:$0xff]  ;;  %v14361_v26 = vld [vmem:[#allocation377_spill] sm:$0xff]  ;;  %v14362_v16 = vld [vmem:[#allocation143_spill] sm:$0xff] }
 0x354   : > { %14353 = vst [vmem:[#allocation93_spill] sm:$0xff] %v9684_v7  ;;  %v9693_v60 = vpop.eup %5861  ;;  %v1957_v23 = vadd.f32 %v14358_v3, %v14357_v57  ;;  %5881 = vtanh.f32 %v2931_v15  ;;  %v2919_v7 = vsub.f32 %v6983_v37, %v9655_v22  ;;  %v1958_v6 = vadd.f32 %v14361_v26, %v14360_v59  ;;  %v14363_v30 = vld [vmem:[#allocation378_spill] sm:$0xff]  ;;  %v14367_v26 = vld [vmem:[#allocation379_spill] sm:$0xff] }
 0x355   : > { %14356 = vst [vmem:[#allocation330_spill] sm:$0xff] %v9693_v60  ;;  %v9702_v44 = vpop.eup %5863  ;;  %v1959_v43 = vadd.f32 %v14363_v30, %v14362_v16  ;;  %5883 = vtanh.f32 %v2932_v42  ;;  %v2920_v21 = vsub.f32 %v6985_v39, %v9655_v22  ;;  %v9713_v57 = vadd.f32 %v1970_v28, %v8839_v56  ;;  %v14366_v42 = vld [vmem:[#allocation144_spill] sm:$0xff]  ;;  %v9729_v56 = vpop.permute.xlu1 %2566  ;;  %v14369_v28 = vld [vmem:[#allocation145_spill] sm:$0xff]  ;;  %v14376_v60 = vld [vmem:[#allocation382_spill] sm:$0xff] }
 0x356   : > { %14359 = vst [vmem:[#allocation94_spill] sm:$0xff] %v9702_v44  ;;  %v9710_v52 = vpop.eup %5865  ;;  %v9716_v15 = vadd.f32 %v1971_v31, %v8847_v33  ;;  %v2921_v3 = vsub.f32 %v6987_v41, %v9655_v22  ;;  %5885 = vtanh.f32 %v2917_v63  ;;  %v9723_v30 = vadd.f32 %v1972_v62, %v8851_v36  ;;  %v14370_v31 = vld [vmem:[#allocation380_spill] sm:$0xff] }
 0x357   : > { %14364 = vst [vmem:[#allocation95_spill] sm:$0xff] %v9710_v52  ;;  %v9720_v59 = vpop.eup %5867  ;;  %v1960_v16 = vadd.f32 %v14367_v26, %v14366_v42  ;;  %v2922_v52 = vsub.f32 %v6991_v45, %v9655_v22  ;;  %5887 = vtanh.f32 %v2918_v11  ;;  %v1961_v44 = vadd.f32 %v14370_v31, %v14369_v28 }
 0x358   : > { %14365 = vst [vmem:[#allocation96_spill] sm:$0xff] %v9720_v59  ;;  %v9731_v33 = vpop.eup %5869  ;;  %v9736_v63 = vadd.f32 %v1957_v23, %v8859_v49  ;;  %v2923_v36 = vsub.f32 %v6995_v48, %v9655_v22  ;;  %5889 = vtanh.f32 %v2919_v7  ;;  %v9743_v42 = vadd.f32 %v1958_v6, %v8863_v14  ;;  %v14373_v49 = vld [vmem:[#allocation146_spill] sm:$0xff]  ;;  %v14374_v23 = vld [vmem:[#allocation381_spill] sm:$0xff]  ;;  %v14375_v59 = vld [vmem:[#allocation147_spill] sm:$0xff] }
 0x359   : > { %14368 = vst [vmem:[#allocation331_spill] sm:$0xff] %v9731_v33  ;;  %v9740_v62 = vpop.eup %5871  ;;  %v9746_v11 = vadd.f32 %v1959_v43, %v8871_v9  ;;  %v2924_v26 = vsub.f32 %v6998_v50, %v9655_v22  ;;  %5891 = vtanh.f32 %v2920_v21  ;;  %v1962_v31 = vadd.f32 %v14374_v23, %v14373_v49  ;;  %v14378_v9 = vld [vmem:[#allocation148_spill] sm:$0xff]  ;;  %v14379_v43 = vld [vmem:[#allocation383_spill] sm:$0xff] }
 0x35a   : > { %14371 = vst [vmem:[#allocation97_spill] sm:$0xff] %v9740_v62  ;;  %v9750_v28 = vpop.eup %5873  ;;  %v1963_v7 = vadd.f32 %v14376_v60, %v14375_v59  ;;  %5893 = vtanh.f32 %v2921_v3  ;;  %v2941_v14 = vsub.f32 %v6977_v29, %v9729_v56  ;;  %v1964_v62 = vadd.f32 %v14379_v43, %v14378_v9  ;;  %v14381_v3 = vld [vmem:[#allocation149_spill] sm:$0xff]  ;;  %v14382_v59 = vld [vmem:[#allocation384_spill] sm:$0xff]  ;;  %v14386_v43 = vld [vmem:[#allocation151_spill] sm:$0xff] }
 0x35b   : > { %14372 = vst [vmem:[#allocation332_spill] sm:$0xff] %v9750_v28  ;;  %v9758_v6 = vpop.eup %5875  ;;  %v9763_v22 = vadd.f32 %v1960_v16, %v8875_v35  ;;  %5895 = vtanh.f32 %v2922_v52  ;;  %v2942_v21 = vsub.f32 %v6980_v34, %v9729_v56  ;;  %v9770_v60 = vadd.f32 %v1961_v44, %v8883_v27  ;;  %v14384_v35 = vld [vmem:[#allocation150_spill] sm:$0xff]  ;;  %v14385_v16 = vld [vmem:[#allocation385_spill] sm:$0xff] }
 0x35c   : > { %14377 = vst [vmem:[#allocation98_spill] sm:$0xff] %v9758_v6  ;;  %v9767_v49 = vpop.eup %5877  ;;  %v1981_v23 = vadd.f32 %v14382_v59, %v14381_v3  ;;  %5897 = vtanh.f32 %v2923_v36  ;;  %v2943_v6 = vsub.f32 %v6983_v37, %v9729_v56  ;;  %v1982_v52 = vadd.f32 %v14385_v16, %v14384_v35  ;;  %v14387_v28 = vld [vmem:[#allocation386_spill] sm:$0xff]  ;;  %v14392_v16 = vld [vmem:[#allocation387_spill] sm:$0xff] }
 0x35d   : > { %14380 = vst [vmem:[#allocation333_spill] sm:$0xff] %v9767_v49  ;;  %v9776_v9 = vpop.eup %5879  ;;  %v1983_v33 = vadd.f32 %v14387_v28, %v14386_v43  ;;  %5899 = vtanh.f32 %v2924_v26  ;;  %v2944_v27 = vsub.f32 %v6985_v39, %v9729_v56  ;;  %v9787_v3 = vadd.f32 %v1962_v31, %v8887_v25  ;;  %v14391_v26 = vld [vmem:[#allocation152_spill] sm:$0xff]  ;;  %v9803_v25 = vpop.permute.xlu0 %2561  ;;  %v14394_v31 = vld [vmem:[#allocation153_spill] sm:$0xff]  ;;  %v14404_v49 = vld [vmem:[#allocation390_spill] sm:$0xff] }
 0x35e   : > { %14383 = vst [vmem:[#allocation99_spill] sm:$0xff] %v9776_v9  ;;  %v9784_v44 = vpop.eup %5881  ;;  %v9790_v36 = vadd.f32 %v1963_v7, %v8895_v32  ;;  %v2945_v59 = vsub.f32 %v6987_v41, %v9729_v56  ;;  %5901 = vtanh.f32 %v2941_v14  ;;  %v9797_v28 = vadd.f32 %v1964_v62, %v8899_v38  ;;  %v14395_v7 = vld [vmem:[#allocation388_spill] sm:$0xff] }
 0x35f   : > { %14388 = vst [vmem:[#allocation334_spill] sm:$0xff] %v9784_v44  ;;  %v9794_v35 = vpop.eup %5883  ;;  %v1984_v43 = vadd.f32 %v14392_v16, %v14391_v26  ;;  %v2946_v44 = vsub.f32 %v6991_v45, %v9729_v56  ;;  %5903 = vtanh.f32 %v2942_v21  ;;  %v1985_v9 = vadd.f32 %v14395_v7, %v14394_v31  ;;  %v14398_v21 = vld [vmem:[#allocation249_spill] sm:$0xff] }
 0x360   : > { %14389 = vst [vmem:[#allocation100_spill] sm:$0xff] %v9794_v35  ;;  %14390 = vst [vmem:[#allocation335_spill] sm:$0xff] %v9797_v28  ;;  %v9805_v32 = vpop.eup %5885  ;;  %v9810_v14 = vadd.f32 %v1981_v23, %v8907_v20  ;;  %v2947_v38 = vsub.f32 %v6995_v48, %v9729_v56  ;;  %5905 = vtanh.f32 %v2943_v6  ;;  %v9817_v26 = vadd.f32 %v1982_v52, %v8911_v17  ;;  %v14401_v20 = vld [vmem:[#allocation154_spill] sm:$0xff]  ;;  %v14402_v23 = vld [vmem:[#allocation389_spill] sm:$0xff] }
 0x361   : > { %14393 = vst [vmem:[#allocation101_spill] sm:$0xff] %v9805_v32  ;;  %v9814_v62 = vpop.eup %5887  ;;  %v9820_v16 = vadd.f32 %v1983_v33, %v14398_v21  ;;  %v2948_v32 = vsub.f32 %v6998_v50, %v9729_v56  ;;  %5907 = vtanh.f32 %v2944_v27  ;;  %v1986_v7 = vadd.f32 %v14402_v23, %v14401_v20  ;;  %v14403_v35 = vld [vmem:[#allocation155_spill] sm:$0xff]  ;;  %v14406_v33 = vld [vmem:[#allocation156_spill] sm:$0xff]  ;;  %v14411_v23 = vld [vmem:[#allocation10_spill] sm:$0xff] }
 0x362   : > { %14396 = vst [vmem:[#allocation336_spill] sm:$0xff] %v9814_v62  ;;  %14397 = vst [vmem:[#allocation102_spill] sm:$0xff] %v9817_v26  ;;  %v9824_v31 = vpop.eup %5889  ;;  %v1987_v6 = vadd.f32 %v14404_v49, %v14403_v35  ;;  %5909 = vtanh.f32 %v2945_v59  ;;  %v2933_v17 = vsub.f32 %v6977_v29, %v9803_v25  ;;  %v14407_v21 = vld [vmem:[#allocation391_spill] sm:$0xff]  ;;  %v2934_v27 = vsub.f32 %v6980_v34, %v9803_v25  ;;  %v14413_v59 = vld [vmem:[#allocation157_spill] sm:$0xff] }
 0x363   : > { %14399 = vst [vmem:[#allocation337_spill] sm:$0xff] %v9820_v16  ;;  %14400 = vst [vmem:[#allocation103_spill] sm:$0xff] %v9824_v31  ;;  %v9832_v52 = vpop.eup %5891  ;;  %v1988_v62 = vadd.f32 %v14407_v21, %v14406_v33  ;;  %v14408_v16 = vld [vmem:[#allocation9_spill] sm:$0xff]  ;;  %5911 = vtanh.f32 %v2946_v44  ;;  %v9844_v49 = vadd.f32 %v1985_v9, %v14411_v23  ;;  %v14414_v35 = vld [vmem:[#allocation392_spill] sm:$0xff]  ;;  %v2936_v9 = vsub.f32 %v6985_v39, %v9803_v25 }
 0x364   : > { %14405 = vst [vmem:[#allocation338_spill] sm:$0xff] %v9832_v52  ;;  %v9837_v56 = vadd.f32 %v1984_v43, %v14408_v16  ;;  %v9841_v20 = vpop.eup %5893  ;;  %v1973_v31 = vadd.f32 %v14414_v35, %v14413_v59  ;;  %5913 = vtanh.f32 %v2947_v38  ;;  %v2935_v52 = vsub.f32 %v6983_v37, %v9803_v25  ;;  %v14416_v43 = vld [vmem:[#allocation158_spill] sm:$0xff]  ;;  %v14417_v16 = vld [vmem:[#allocation393_spill] sm:$0xff]  ;;  %v14418_v21 = vld [vmem:[#allocation159_spill] sm:$0xff] }
 0x365   : > { %14410 = vst [vmem:[#allocation339_spill] sm:$0xff] %v9841_v20  ;;  %14412 = vst [vmem:[#allocation105_spill] sm:$0xff] %v9844_v49  ;;  %v9850_v33 = vpop.eup %5895  ;;  %v1974_v44 = vadd.f32 %v14417_v16, %v14416_v43  ;;  %5915 = vtanh.f32 %v2948_v32  ;;  %v14421_v20 = vld [vmem:[#allocation251_spill] sm:$0xff]  ;;  %v14423_v38 = vld [vmem:[#allocation252_spill] sm:$0xff] }
 0x366   : > { %14409 = vst [vmem:[#allocation104_spill] sm:$0xff] %v9837_v56  ;;  %14415 = vst [vmem:[#allocation340_spill] sm:$0xff] %v9850_v33  ;;  %v14419_v56 = vld [vmem:[#allocation394_spill] sm:$0xff]  ;;  %v9858_v23 = vpop.eup %5897  ;;  %v9861_v59 = vadd.f32 %v1986_v7, %v14421_v20  ;;  %v9864_v35 = vadd.f32 %v1987_v6, %v14423_v38  ;;  %v2937_v33 = vsub.f32 %v6987_v41, %v9803_v25  ;;  %5917 = vtanh.f32 %v2933_v17  ;;  %v14426_v16 = vld [vmem:[#allocation12_spill] sm:$0xff]  ;;  %v9877_v7 = vpop.permute.xlu1 %2576 }
 0x367   : > { %v1975_v26 = vadd.f32 %v14419_v56, %v14418_v21  ;;  %14420 = vst [vmem:[#allocation106_spill] sm:$0xff] %v9858_v23  ;;  %v9868_v43 = vpop.eup %5899  ;;  %v9871_v56 = vadd.f32 %v1988_v62, %v14426_v16  ;;  %v14428_v32 = vld [vmem:[#allocation160_spill] sm:$0xff]  ;;  %v14429_v21 = vld [vmem:[#allocation395_spill] sm:$0xff]  ;;  %v2938_v23 = vsub.f32 %v6991_v45, %v9803_v25  ;;  %5919 = vtanh.f32 %v2934_v27  ;;  %v14431_v20 = vld [vmem:[#allocation161_spill] sm:$0xff] }
 0x368   : > { %14422 = vst [vmem:[#allocation341_spill] sm:$0xff] %v9861_v59  ;;  %14424 = vst [vmem:[#allocation107_spill] sm:$0xff] %v9864_v35  ;;  %v1976_v49 = vadd.f32 %v14429_v21, %v14428_v32  ;;  %v9879_v6 = vpop.eup %5901  ;;  %v14432_v38 = vld [vmem:[#allocation396_spill] sm:$0xff]  ;;  %v14433_v17 = vld [vmem:[#allocation13_spill] sm:$0xff]  ;;  %v2939_v62 = vsub.f32 %v6995_v48, %v9803_v25  ;;  %5921 = vtanh.f32 %v2935_v52 }
 0x369   : > { %14425 = vst [vmem:[#allocation342_spill] sm:$0xff] %v9868_v43  ;;  %14427 = vst [vmem:[#allocation108_spill] sm:$0xff] %v9871_v56  ;;  %v1977_v35 = vadd.f32 %v14432_v38, %v14431_v20  ;;  %v9884_v59 = vadd.f32 %v1973_v31, %v14433_v17  ;;  %v9888_v16 = vpop.eup %5903  ;;  %v14436_v32 = vld [vmem:[#allocation254_spill] sm:$0xff]  ;;  %v14438_v27 = vld [vmem:[#allocation255_spill] sm:$0xff]  ;;  %5923 = vtanh.f32 %v2936_v9  ;;  %v2958_v9 = vsub.f32 %v6980_v34, %v9877_v7 }
 0x36a   : > { %14430 = vst [vmem:[#allocation343_spill] sm:$0xff] %v9879_v6  ;;  %14435 = vst [vmem:[#allocation344_spill] sm:$0xff] %v9888_v16  ;;  %v9891_v21 = vadd.f32 %v1974_v44, %v14436_v32  ;;  %v9894_v43 = vadd.f32 %v1975_v26, %v14438_v27  ;;  %v2940_v6 = vsub.f32 %v6998_v50, %v9803_v25  ;;  %v9898_v20 = vpop.eup %5905  ;;  %v14441_v31 = vld [vmem:[#allocation162_spill] sm:$0xff]  ;;  %v14442_v38 = vld [vmem:[#allocation397_spill] sm:$0xff]  ;;  %5925 = vtanh.f32 %v2937_v33 }
 0x36b   : > { %14434 = vst [vmem:[#allocation109_spill] sm:$0xff] %v9884_v59  ;;  %14440 = vst [vmem:[#allocation111_spill] sm:$0xff] %v9898_v20  ;;  %v1978_v17 = vadd.f32 %v14442_v38, %v14441_v31  ;;  %v14443_v59 = vld [vmem:[#allocation163_spill] sm:$0xff]  ;;  %v14444_v56 = vld [vmem:[#allocation398_spill] sm:$0xff]  ;;  %v2957_v44 = vsub.f32 %v6977_v29, %v9877_v7  ;;  %v9906_v32 = vpop.eup %5907  ;;  %5927 = vtanh.f32 %v2938_v23 }
 0x36c   : > { %14437 = vst [vmem:[#allocation110_spill] sm:$0xff] %v9891_v21  ;;  %14439 = vst [vmem:[#allocation345_spill] sm:$0xff] %v9894_v43  ;;  %v1979_v52 = vadd.f32 %v14444_v56, %v14443_v59  ;;  %v14446_v26 = vld [vmem:[#allocation164_spill] sm:$0xff]  ;;  %v14447_v27 = vld [vmem:[#allocation399_spill] sm:$0xff]  ;;  %v9915_v31 = vpop.eup %5909  ;;  %5929 = vtanh.f32 %v2939_v62 }
 0x36d   : > { %14445 = vst [vmem:[#allocation346_spill] sm:$0xff] %v9906_v32  ;;  %v1980_v16 = vadd.f32 %v14447_v27, %v14446_v26  ;;  %v14448_v43 = vld [vmem:[#allocation15_spill] sm:$0xff]  ;;  %14450 = vst [vmem:[#allocation347_spill] sm:$0xff] %v9915_v31  ;;  %v14451_v38 = vld [vmem:[#allocation16_spill] sm:$0xff]  ;;  %v2959_v32 = vsub.f32 %v6983_v37, %v9877_v7  ;;  %v9924_v26 = vpop.eup %5911  ;;  %5931 = vtanh.f32 %v2940_v6 }
 0x36e   : > { %v9911_v25 = vadd.f32 %v1976_v49, %v14448_v43  ;;  %v9918_v59 = vadd.f32 %v1977_v35, %v14451_v38  ;;  %v14453_v33 = vld [vmem:[#allocation165_spill] sm:$0xff]  ;;  %v14454_v56 = vld [vmem:[#allocation400_spill] sm:$0xff]  ;;  %14455 = vst [vmem:[#allocation348_spill] sm:$0xff] %v9924_v26  ;;  %v14456_v49 = vld [vmem:[#allocation166_spill] sm:$0xff]  ;;  %v2960_v35 = vsub.f32 %v6985_v39, %v9877_v7  ;;  %v9932_v38 = vpop.eup %5913  ;;  %v2961_v26 = vsub.f32 %v6987_v41, %v9877_v7 }
 0x36f   : > { %v1997_v20 = vadd.f32 %v14454_v56, %v14453_v33  ;;  %v14457_v43 = vld [vmem:[#allocation401_spill] sm:$0xff]  ;;  %v14458_v27 = vld [vmem:[#allocation167_spill] sm:$0xff]  ;;  %14460 = vst [vmem:[#allocation117_spill] sm:$0xff] %v9932_v38  ;;  %v14463_v62 = vld [vmem:[#allocation258_spill] sm:$0xff]  ;;  %5933 = vtanh.f32 %v2957_v44  ;;  %v2962_v38 = vsub.f32 %v6991_v45, %v9877_v7 }
 0x370   : > { %14449 = vst [vmem:[#allocation112_spill] sm:$0xff] %v9911_v25  ;;  %14452 = vst [vmem:[#allocation113_spill] sm:$0xff] %v9918_v59  ;;  %v1998_v23 = vadd.f32 %v14457_v43, %v14456_v49  ;;  %v14459_v25 = vld [vmem:[#allocation402_spill] sm:$0xff]  ;;  %v14461_v31 = vld [vmem:[#allocation257_spill] sm:$0xff]  ;;  %v9938_v56 = vadd.f32 %v1979_v52, %v14463_v62  ;;  %v9942_v49 = vpop.eup %5915  ;;  %5935 = vtanh.f32 %v2958_v9 }
 0x371   : > { %v1999_v21 = vadd.f32 %v14459_v25, %v14458_v27  ;;  %v9935_v33 = vadd.f32 %v1978_v17, %v14461_v31  ;;  %14465 = vst [vmem:[#allocation353_spill] sm:$0xff] %v9942_v49  ;;  %v14466_v43 = vld [vmem:[#allocation22_spill] sm:$0xff]  ;;  %v14468_v6 = vld [vmem:[#allocation168_spill] sm:$0xff]  ;;  %v14469_v27 = vld [vmem:[#allocation403_spill] sm:$0xff]  ;;  %v9951_v17 = vpop.permute.xlu0 %2571  ;;  %v9953_v52 = vpop.eup %5917  ;;  %5937 = vtanh.f32 %v2959_v32 }
 0x372   : > { %14464 = vst [vmem:[#allocation118_spill] sm:$0xff] %v9938_v56  ;;  %v9945_v25 = vadd.f32 %v1980_v16, %v14466_v43  ;;  %v2000_v59 = vadd.f32 %v14469_v27, %v14468_v6  ;;  %14470 = vst [vmem:[#allocation354_spill] sm:$0xff] %v9953_v52  ;;  %v14471_v31 = vld [vmem:[#allocation169_spill] sm:$0xff]  ;;  %v14472_v62 = vld [vmem:[#allocation404_spill] sm:$0xff]  ;;  %v2963_v16 = vsub.f32 %v6995_v48, %v9877_v7  ;;  %v9962_v43 = vpop.eup %5919  ;;  %5939 = vtanh.f32 %v2960_v35 }
 0x373   : > { %14462 = vst [vmem:[#allocation352_spill] sm:$0xff] %v9935_v33  ;;  %v2001_v56 = vadd.f32 %v14472_v62, %v14471_v31  ;;  %v14473_v44 = vld [vmem:[#allocation23_spill] sm:$0xff]  ;;  %14475 = vst [vmem:[#allocation349_spill] sm:$0xff] %v9962_v43  ;;  %v14476_v6 = vld [vmem:[#allocation260_spill] sm:$0xff]  ;;  %v2964_v52 = vsub.f32 %v6998_v50, %v9877_v7  ;;  %v9972_v31 = vpop.eup %5921  ;;  %5941 = vtanh.f32 %v2961_v26  ;;  %v2950_v35 = vsub.f32 %v6980_v34, %v9951_v17 }
 0x374   : > { %14467 = vst [vmem:[#allocation119_spill] sm:$0xff] %v9945_v25  ;;  %v9958_v33 = vadd.f32 %v1997_v20, %v14473_v44  ;;  %v9965_v27 = vadd.f32 %v1998_v23, %v14476_v6  ;;  %v14478_v9 = vld [vmem:[#allocation261_spill] sm:$0xff]  ;;  %14480 = vst [vmem:[#allocation116_spill] sm:$0xff] %v9972_v31  ;;  %v14481_v20 = vld [vmem:[#allocation170_spill] sm:$0xff]  ;;  %v2949_v23 = vsub.f32 %v6977_v29, %v9951_v17  ;;  %v9980_v6 = vpop.eup %5923  ;;  %5943 = vtanh.f32 %v2962_v38 }
 0x375   : > { %v9968_v49 = vadd.f32 %v1999_v21, %v14478_v9  ;;  %v14482_v62 = vld [vmem:[#allocation405_spill] sm:$0xff]  ;;  %v14484_v25 = vld [vmem:[#allocation406_spill] sm:$0xff]  ;;  %14485 = vst [vmem:[#allocation351_spill] sm:$0xff] %v9980_v6  ;;  %v14486_v21 = vld [vmem:[#allocation172_spill] sm:$0xff]  ;;  %5945 = vtanh.f32 %v2963_v16  ;;  %v2951_v6 = vsub.f32 %v6983_v37, %v9951_v17 }
 0x376   : > { %14474 = vst [vmem:[#allocation114_spill] sm:$0xff] %v9958_v33  ;;  %14477 = vst [vmem:[#allocation115_spill] sm:$0xff] %v9965_v27  ;;  %v2002_v44 = vadd.f32 %v14482_v62, %v14481_v20  ;;  %v14483_v33 = vld [vmem:[#allocation171_spill] sm:$0xff]  ;;  %v9989_v20 = vpop.eup %5925  ;;  %v14491_v62 = vld [vmem:[#allocation26_spill] sm:$0xff]  ;;  %5947 = vtanh.f32 %v2964_v52 }
 0x377   : > { %14479 = vst [vmem:[#allocation350_spill] sm:$0xff] %v9968_v49  ;;  %v2003_v32 = vadd.f32 %v14484_v25, %v14483_v33  ;;  %v14487_v9 = vld [vmem:[#allocation407_spill] sm:$0xff]  ;;  %v14488_v49 = vld [vmem:[#allocation25_spill] sm:$0xff]  ;;  %14490 = vst [vmem:[#allocation355_spill] sm:$0xff] %v9989_v20  ;;  %v9992_v33 = vadd.f32 %v2001_v56, %v14491_v62  ;;  %v2952_v56 = vsub.f32 %v6985_v39, %v9951_v17  ;;  %5949 = vtanh.f32 %v2949_v23 }
 0x378   : > { %v2004_v43 = vadd.f32 %v14487_v9, %v14486_v21  ;;  %v9985_v7 = vadd.f32 %v2000_v59, %v14488_v49  ;;  %v14493_v26 = vld [vmem:[#allocation173_spill] sm:$0xff]  ;;  %v14494_v25 = vld [vmem:[#allocation408_spill] sm:$0xff]  ;;  %v9998_v21 = vpop.eup %5927  ;;  %v14496_v59 = vld [vmem:[#allocation174_spill] sm:$0xff]  ;;  %5951 = vtanh.f32 %v2950_v35 }
 0x379   : > { %14492 = vst [vmem:[#allocation121_spill] sm:$0xff] %v9992_v33  ;;  %v1989_v31 = vadd.f32 %v14494_v25, %v14493_v26  ;;  %14495 = vst [vmem:[#allocation356_spill] sm:$0xff] %v9998_v21  ;;  %v14497_v49 = vld [vmem:[#allocation409_spill] sm:$0xff]  ;;  %v14498_v9 = vld [vmem:[#allocation175_spill] sm:$0xff]  ;;  %v10006_v62 = vpop.eup %5929  ;;  %v2953_v21 = vsub.f32 %v6987_v41, %v9951_v17  ;;  %5953 = vtanh.f32 %v2951_v6 }
 0x37a   : > { %14489 = vst [vmem:[#allocation120_spill] sm:$0xff] %v9985_v7  ;;  %v1990_v38 = vadd.f32 %v14497_v49, %v14496_v59  ;;  %v14499_v7 = vld [vmem:[#allocation410_spill] sm:$0xff]  ;;  %14500 = vst [vmem:[#allocation122_spill] sm:$0xff] %v10006_v62  ;;  %v14501_v20 = vld [vmem:[#allocation263_spill] sm:$0xff]  ;;  %v10016_v59 = vpop.eup %5931  ;;  %v2954_v62 = vsub.f32 %v6991_v45, %v9951_v17  ;;  %5955 = vtanh.f32 %v2952_v56 }
 0x37b   : > { %v1991_v27 = vadd.f32 %v14499_v7, %v14498_v9  ;;  %v10009_v26 = vadd.f32 %v2002_v44, %v14501_v20  ;;  %v14503_v16 = vld [vmem:[#allocation264_spill] sm:$0xff]  ;;  %14505 = vst [vmem:[#allocation358_spill] sm:$0xff] %v10016_v59  ;;  %v14509_v9 = vld [vmem:[#allocation411_spill] sm:$0xff]  ;;  %v10025_v44 = vpop.permute.xlu1 %2586  ;;  %v14511_v20 = vld [vmem:[#allocation177_spill] sm:$0xff]  ;;  %5957 = vtanh.f32 %v2953_v21 }
 0x37c   : > { %v10012_v25 = vadd.f32 %v2003_v32, %v14503_v16  ;;  %v14506_v49 = vld [vmem:[#allocation28_spill] sm:$0xff]  ;;  %v10027_v32 = vpop.eup %5933  ;;  %v14513_v23 = vld [vmem:[#allocation29_spill] sm:$0xff]  ;;  %v14518_v35 = vld [vmem:[#allocation267_spill] sm:$0xff]  ;;  %5959 = vtanh.f32 %v2954_v62  ;;  %v2978_v28 = vsub.f32 %v6991_v45, %v10025_v44 }
 0x37d   : > { %14502 = vst [vmem:[#allocation357_spill] sm:$0xff] %v10009_v26  ;;  %v10019_v7 = vadd.f32 %v2004_v43, %v14506_v49  ;;  %v14508_v52 = vld [vmem:[#allocation176_spill] sm:$0xff]  ;;  %14510 = vst [vmem:[#allocation359_spill] sm:$0xff] %v10027_v32  ;;  %v10032_v26 = vadd.f32 %v1989_v31, %v14513_v23  ;;  %v2955_v43 = vsub.f32 %v6995_v48, %v9951_v17  ;;  %v10036_v49 = vpop.eup %5935  ;;  %v14521_v31 = vld [vmem:[#allocation178_spill] sm:$0xff] }
 0x37e   : > { %14504 = vst [vmem:[#allocation123_spill] sm:$0xff] %v10012_v25  ;;  %v1992_v33 = vadd.f32 %v14509_v9, %v14508_v52  ;;  %v14512_v16 = vld [vmem:[#allocation412_spill] sm:$0xff]  ;;  %14515 = vst [vmem:[#allocation360_spill] sm:$0xff] %v10036_v49  ;;  %v14516_v52 = vld [vmem:[#allocation266_spill] sm:$0xff]  ;;  %v10042_v59 = vadd.f32 %v1991_v27, %v14518_v35  ;;  %v2956_v32 = vsub.f32 %v6998_v50, %v9951_v17 }
 0x37f   : > { %14507 = vst [vmem:[#allocation124_spill] sm:$0xff] %v10019_v7  ;;  %v1993_v25 = vadd.f32 %v14512_v16, %v14511_v20  ;;  %14514 = vst [vmem:[#allocation125_spill] sm:$0xff] %v10032_v26  ;;  %v10039_v9 = vadd.f32 %v1990_v38, %v14516_v52  ;;  %v10046_v20 = vpop.eup %5937  ;;  %v14522_v16 = vld [vmem:[#allocation413_spill] sm:$0xff]  ;;  %v14524_v7 = vld [vmem:[#allocation416_spill] sm:$0xff]  ;;  %v2973_v38 = vsub.f32 %v6977_v29, %v10025_v44  ;;  %5961 = vtanh.f32 %v2955_v43 }
 0x380   : > { %14519 = vst [vmem:[#allocation361_spill] sm:$0xff] %v10042_v59  ;;  %14520 = vst [vmem:[#allocation127_spill] sm:$0xff] %v10046_v20  ;;  %v1994_v23 = vadd.f32 %v14522_v16, %v14521_v31  ;;  %v14523_v26 = vld [vmem:[#allocation181_spill] sm:$0xff]  ;;  %v10054_v52 = vpop.eup %5939  ;;  %v14526_v27 = vld [vmem:[#allocation31_spill] sm:$0xff]  ;;  %v2974_v20 = vsub.f32 %v6980_v34, %v10025_v44  ;;  %5963 = vtanh.f32 %v2956_v32 }
 0x381   : > { %14517 = vst [vmem:[#allocation126_spill] sm:$0xff] %v10039_v9  ;;  %v2013_v6 = vadd.f32 %v14524_v7, %v14523_v26  ;;  %14525 = vst [vmem:[#allocation362_spill] sm:$0xff] %v10054_v52  ;;  %v10057_v35 = vadd.f32 %v1992_v33, %v14526_v27  ;;  %v14528_v49 = vld [vmem:[#allocation182_spill] sm:$0xff]  ;;  %v14529_v17 = vld [vmem:[#allocation417_spill] sm:$0xff]  ;;  %v10063_v31 = vpop.eup %5941  ;;  %v2975_v33 = vsub.f32 %v6983_v37, %v10025_v44  ;;  %5965 = vtanh.f32 %v2973_v38 }
 0x382   : > { %v2014_v56 = vadd.f32 %v14529_v17, %v14528_v49  ;;  %14530 = vst [vmem:[#allocation363_spill] sm:$0xff] %v10063_v31  ;;  %v14531_v16 = vld [vmem:[#allocation179_spill] sm:$0xff]  ;;  %v14532_v26 = vld [vmem:[#allocation414_spill] sm:$0xff]  ;;  %v14533_v7 = vld [vmem:[#allocation32_spill] sm:$0xff]  ;;  %v10072_v27 = vpop.eup %5943  ;;  %v2976_v31 = vsub.f32 %v6985_v39, %v10025_v44  ;;  %5967 = vtanh.f32 %v2974_v20 }
 0x383   : > { %14527 = vst [vmem:[#allocation128_spill] sm:$0xff] %v10057_v35  ;;  %v1995_v21 = vadd.f32 %v14532_v26, %v14531_v16  ;;  %v10068_v59 = vadd.f32 %v1993_v25, %v14533_v7  ;;  %14535 = vst [vmem:[#allocation364_spill] sm:$0xff] %v10072_v27  ;;  %v14536_v52 = vld [vmem:[#allocation180_spill] sm:$0xff]  ;;  %v14537_v49 = vld [vmem:[#allocation415_spill] sm:$0xff]  ;;  %v10080_v16 = vpop.eup %5945  ;;  %v2977_v27 = vsub.f32 %v6987_v41, %v10025_v44  ;;  %5969 = vtanh.f32 %v2975_v33 }
 0x384   : > { %v1996_v62 = vadd.f32 %v14537_v49, %v14536_v52  ;;  %v14538_v17 = vld [vmem:[#allocation183_spill] sm:$0xff]  ;;  %v14539_v35 = vld [vmem:[#allocation418_spill] sm:$0xff]  ;;  %14540 = vst [vmem:[#allocation130_spill] sm:$0xff] %v10080_v16  ;;  %v14541_v25 = vld [vmem:[#allocation269_spill] sm:$0xff]  ;;  %v10095_v16 = vpop.permute.xlu0 %2581  ;;  %5971 = vtanh.f32 %v2976_v31 }
 0x385   : > { %14534 = vst [vmem:[#allocation129_spill] sm:$0xff] %v10068_v59  ;;  %v2015_v9 = vadd.f32 %v14539_v35, %v14538_v17  ;;  %v10083_v26 = vadd.f32 %v1994_v23, %v14541_v25  ;;  %v14543_v43 = vld [vmem:[#allocation35_spill] sm:$0xff]  ;;  %v10088_v59 = vpop.eup %5947  ;;  %v14545_v52 = vld [vmem:[#allocation184_spill] sm:$0xff]  ;;  %v14556_v20 = vld [vmem:[#allocation273_spill] sm:$0xff]  ;;  %5973 = vtanh.f32 %v2977_v27  ;;  %v2965_v33 = vsub.f32 %v6977_v29, %v10095_v16 }
 0x386   : > { %v2141_v7 = vadd.f32 %v2013_v6, %v14543_v43  ;;  %14544 = vst [vmem:[#allocation131_spill] sm:$0xff] %v10088_v59  ;;  %v14546_v49 = vld [vmem:[#allocation419_spill] sm:$0xff]  ;;  %v14547_v32 = vld [vmem:[#allocation272_spill] sm:$0xff]  ;;  %v10097_v23 = vpop.eup %5949  ;;  %v14549_v6 = vld [vmem:[#allocation270_spill] sm:$0xff]  ;;  %v2979_v59 = vsub.f32 %v6995_v48, %v10025_v44  ;;  %5975 = vtanh.f32 %v2978_v28 }
 0x387   : > { %14542 = vst [vmem:[#allocation365_spill] sm:$0xff] %v10083_v26  ;;  %v2016_v35 = vadd.f32 %v14546_v49, %v14545_v52  ;;  %v2142_v17 = vadd.f32 %v2014_v56, %v14547_v32  ;;  %14548 = vst [vmem:[#allocation366_spill] sm:$0xff] %v10097_v23  ;;  %v10100_v25 = vadd.f32 %v1995_v21, %v14549_v6  ;;  %v14551_v43 = vld [vmem:[#allocation185_spill] sm:$0xff]  ;;  %v14552_v38 = vld [vmem:[#allocation420_spill] sm:$0xff]  ;;  %v10106_v52 = vpop.eup %5951 }
 0x388   : > { %v2017_v26 = vadd.f32 %v14552_v38, %v14551_v43  ;;  %14553 = vst [vmem:[#allocation367_spill] sm:$0xff] %v10106_v52  ;;  %v14554_v56 = vld [vmem:[#allocation34_spill] sm:$0xff]  ;;  %v2143_v32 = vadd.f32 %v2015_v9, %v14556_v20  ;;  %v2980_v23 = vsub.f32 %v6998_v50, %v10025_v44  ;;  %v10114_v21 = vpop.eup %5953  ;;  %v10119_v38 = vadd.f32 %v2141_v7, %v9514_v24 }
 0x389   : > { %14550 = vst [vmem:[#allocation132_spill] sm:$0xff] %v10100_v25  ;;  %v10109_v49 = vadd.f32 %v1996_v62, %v14554_v56  ;;  %14557 = vst [vmem:[#allocation368_spill] sm:$0xff] %v10114_v21  ;;  %v14558_v6 = vld [vmem:[#allocation186_spill] sm:$0xff]  ;;  %v14559_v25 = vld [vmem:[#allocation421_spill] sm:$0xff]  ;;  %v10123_v62 = vpop.eup %5955  ;;  %v10127_v20 = vadd.f32 %v2142_v17, %v9521_v10  ;;  %v2966_v44 = vsub.f32 %v6980_v34, %v10095_v16  ;;  %5977 = vtanh.f32 %v2979_v59 }
 0x38a   : > { %v2018_v43 = vadd.f32 %v14559_v25, %v14558_v6  ;;  %14560 = vst [vmem:[#allocation134_spill] sm:$0xff] %v10123_v62  ;;  %v14561_v56 = vld [vmem:[#allocation37_spill] sm:$0xff]  ;;  %v10131_v31 = vpop.eup %5957  ;;  %v14563_v25 = vld [vmem:[#allocation187_spill] sm:$0xff]  ;;  %v14564_v24 = vld [vmem:[#allocation422_spill] sm:$0xff]  ;;  %v2967_v62 = vsub.f32 %v6983_v37, %v10095_v16  ;;  %v10143_v28 = vadd.f32 %v2143_v32, %v9524_v12  ;;  %5979 = vtanh.f32 %v2980_v23 }
 0x38b   : > { %14555 = vst [vmem:[#allocation133_spill] sm:$0xff] %v10109_v49  ;;  %v2144_v9 = vadd.f32 %v2016_v35, %v14561_v56  ;;  %14562 = vst [vmem:[#allocation369_spill] sm:$0xff] %v10131_v31  ;;  %v2019_v7 = vadd.f32 %v14564_v24, %v14563_v25  ;;  %v14565_v27 = vld [vmem:[#allocation38_spill] sm:$0xff]  ;;  %v10138_v21 = vpop.eup %5959  ;;  %v14567_v35 = vld [vmem:[#allocation188_spill] sm:$0xff]  ;;  %v2968_v56 = vsub.f32 %v6985_v39, %v10095_v16  ;;  %5981 = vtanh.f32 %v2965_v33 }
 0x38c   : > { %v2145_v6 = vadd.f32 %v2017_v26, %v14565_v27  ;;  %14566 = vst [vmem:[#allocation135_spill] sm:$0xff] %v10138_v21  ;;  %v14568_v10 = vld [vmem:[#allocation423_spill] sm:$0xff]  ;;  %v10147_v31 = vpop.eup %5961  ;;  %v14571_v59 = vld [vmem:[#allocation189_spill] sm:$0xff]  ;;  %v14572_v24 = vld [vmem:[#allocation424_spill] sm:$0xff]  ;;  %v2969_v21 = vsub.f32 %v6987_v41, %v10095_v16  ;;  %5983 = vtanh.f32 %v2966_v44  ;;  %v2972_v49 = vsub.f32 %v6998_v50, %v10095_v16 }
 0x38d   : > { %v2020_v17 = vadd.f32 %v14568_v10, %v14567_v35  ;;  %14569 = vst [vmem:[#allocation370_spill] sm:$0xff] %v10147_v31  ;;  %v14570_v25 = vld [vmem:[#allocation275_spill] sm:$0xff]  ;;  %v2005_v27 = vadd.f32 %v14572_v24, %v14571_v59  ;;  %v10154_v52 = vpop.eup %5963  ;;  %v10157_v12 = vadd.f32 %v2144_v9, %v9541_v55  ;;  %v14574_v23 = vld [vmem:[#allocation190_spill] sm:$0xff]  ;;  %v14575_v32 = vld [vmem:[#allocation425_spill] sm:$0xff]  ;;  %v2970_v10 = vsub.f32 %v6991_v45, %v10095_v16 }
 0x38e   : > { %v2146_v26 = vadd.f32 %v2018_v43, %v14570_v25  ;;  %14573 = vst [vmem:[#allocation136_spill] sm:$0xff] %v10154_v52  ;;  %v2006_v35 = vadd.f32 %v14575_v32, %v14574_v23  ;;  %v10163_v43 = vpop.permute.xlu1 %2596  ;;  %v10165_v25 = vpop.eup %5965  ;;  %v14577_v59 = vld [vmem:[#allocation276_spill] sm:$0xff]  ;;  %v10169_v33 = vadd.f32 %v2145_v6, %v9548_v53  ;;  %v2971_v55 = vsub.f32 %v6995_v48, %v10095_v16  ;;  %v14580_v52 = vld [vmem:[#allocation191_spill] sm:$0xff]  ;;  %v14581_v31 = vld [vmem:[#allocation426_spill] sm:$0xff] }
 0x38f   : > { %14576 = vst [vmem:[#allocation371_spill] sm:$0xff] %v10165_v25  ;;  %v2147_v24 = vadd.f32 %v2019_v7, %v14577_v59  ;;  %5985 = vtanh.f32 %v2967_v62  ;;  %v10173_v9 = vpop.eup %5967  ;;  %v14579_v23 = vld [vmem:[#allocation40_spill] sm:$0xff]  ;;  %v2007_v44 = vadd.f32 %v14581_v31, %v14580_v52  ;;  %v14583_v7 = vld [vmem:[#allocation41_spill] sm:$0xff]  ;;  %v2989_v62 = vsub.f32 %v6977_v29, %v10163_v43  ;;  %v14587_v31 = vld [vmem:[#allocation278_spill] sm:$0xff] }
 0x390   : > { %14578 = vst [vmem:[#allocation137_spill] sm:$0xff] %v10173_v9  ;;  %v2148_v32 = vadd.f32 %v2020_v17, %v14579_v23  ;;  %5987 = vtanh.f32 %v2968_v56  ;;  %v10180_v25 = vpop.eup %5969  ;;  %v10183_v53 = vadd.f32 %v2146_v26, %v9565_v47  ;;  %v2133_v6 = vadd.f32 %v2005_v27, %v14583_v7  ;;  %v14585_v17 = vld [vmem:[#allocation192_spill] sm:$0xff]  ;;  %v14586_v23 = vld [vmem:[#allocation427_spill] sm:$0xff] }
 0x391   : > { %14582 = vst [vmem:[#allocation372_spill] sm:$0xff] %v10180_v25  ;;  %5989 = vtanh.f32 %v2969_v21  ;;  %v10188_v59 = vpop.eup %5971  ;;  %v2008_v52 = vadd.f32 %v14586_v23, %v14585_v17  ;;  %v2134_v9 = vadd.f32 %v2006_v35, %v14587_v31  ;;  %v2990_v16 = vsub.f32 %v6980_v34, %v10163_v43  ;;  %v14589_v21 = vld [vmem:[#allocation193_spill] sm:$0xff]  ;;  %v14590_v26 = vld [vmem:[#allocation428_spill] sm:$0xff] }
 0x392   : > { %14584 = vst [vmem:[#allocation138_spill] sm:$0xff] %v10188_v59  ;;  %5991 = vtanh.f32 %v2970_v10  ;;  %v10195_v56 = vpop.eup %5973  ;;  %v10198_v47 = vadd.f32 %v2147_v24, %v9568_v58  ;;  %v2009_v27 = vadd.f32 %v14590_v26, %v14589_v21  ;;  %v2991_v7 = vsub.f32 %v6983_v37, %v10163_v43  ;;  %v14593_v10 = vld [vmem:[#allocation279_spill] sm:$0xff]  ;;  %v14595_v24 = vld [vmem:[#allocation194_spill] sm:$0xff]  ;;  %v14596_v31 = vld [vmem:[#allocation429_spill] sm:$0xff] }
 0x393   : > { %14588 = vst [vmem:[#allocation373_spill] sm:$0xff] %v10195_v56  ;;  %5993 = vtanh.f32 %v2971_v55  ;;  %v10204_v59 = vpop.eup %5975  ;;  %v10207_v35 = vadd.f32 %v2148_v32, %v9575_v18  ;;  %v2135_v17 = vadd.f32 %v2007_v44, %v14593_v10  ;;  %v2992_v23 = vsub.f32 %v6985_v39, %v10163_v43  ;;  %v14598_v32 = vld [vmem:[#allocation43_spill] sm:$0xff] }
 0x394   : > { %14591 = vst [vmem:[#allocation139_spill] sm:$0xff] %v10204_v59  ;;  %5995 = vtanh.f32 %v2972_v49  ;;  %v10212_v58 = vpop.eup %5977  ;;  %v2010_v21 = vadd.f32 %v14596_v31, %v14595_v24  ;;  %v10217_v55 = vadd.f32 %v2133_v6, %v9588_v0  ;;  %v2993_v26 = vsub.f32 %v6987_v41, %v10163_v43  ;;  %v14600_v0 = vld [vmem:[#allocation195_spill] sm:$0xff]  ;;  %v14601_v6 = vld [vmem:[#allocation430_spill] sm:$0xff]  ;;  %v14602_v59 = vld [vmem:[#allocation44_spill] sm:$0xff] }
 0x395   : > { %14592 = vst [vmem:[#allocation374_spill] sm:$0xff] %v10207_v35  ;;  %14594 = vst [vmem:[#allocation140_spill] sm:$0xff] %v10212_v58  ;;  %5997 = vtanh.f32 %v2989_v62  ;;  %v10221_v18 = vpop.eup %5979  ;;  %v2136_v44 = vadd.f32 %v2008_v52, %v14598_v32  ;;  %v10225_v49 = vadd.f32 %v2134_v9, %v9595_v2  ;;  %v2994_v10 = vsub.f32 %v6991_v45, %v10163_v43  ;;  %v10229_v58 = vpop.permute.xlu0 %2591  ;;  %v14604_v2 = vld [vmem:[#allocation196_spill] sm:$0xff]  ;;  %v14605_v9 = vld [vmem:[#allocation431_spill] sm:$0xff] }
 0x396   : > { %14597 = vst [vmem:[#allocation375_spill] sm:$0xff] %v10221_v18  ;;  %5999 = vtanh.f32 %v2990_v16  ;;  %v10231_v24 = vpop.eup %5981  ;;  %v2011_v31 = vadd.f32 %v14601_v6, %v14600_v0  ;;  %v2137_v62 = vadd.f32 %v2009_v27, %v14602_v59  ;;  %v2995_v18 = vsub.f32 %v6995_v48, %v10163_v43  ;;  %v14607_v0 = vld [vmem:[#allocation281_spill] sm:$0xff]  ;;  %v14609_v6 = vld [vmem:[#allocation432_spill] sm:$0xff] }
 0x397   : > { %14599 = vst [vmem:[#allocation141_spill] sm:$0xff] %v10231_v24  ;;  %6001 = vtanh.f32 %v2991_v7  ;;  %v10238_v52 = vpop.eup %5983  ;;  %v2012_v32 = vadd.f32 %v14605_v9, %v14604_v2  ;;  %v10243_v16 = vadd.f32 %v2135_v17, %v9598_v54  ;;  %v2996_v24 = vsub.f32 %v6998_v50, %v10163_v43  ;;  %v14608_v27 = vld [vmem:[#allocation197_spill] sm:$0xff]  ;;  %v14611_v17 = vld [vmem:[#allocation198_spill] sm:$0xff] }
 0x398   : > { %14603 = vst [vmem:[#allocation376_spill] sm:$0xff] %v10238_v52  ;;  %6003 = vtanh.f32 %v2992_v23  ;;  %v2138_v59 = vadd.f32 %v2010_v21, %v14607_v0  ;;  %v2029_v25 = vadd.f32 %v14609_v6, %v14608_v27  ;;  %v2981_v7 = vsub.f32 %v6977_v29, %v10229_v58  ;;  %v14612_v2 = vld [vmem:[#allocation433_spill] sm:$0xff]  ;;  %v14614_v9 = vld [vmem:[#allocation282_spill] sm:$0xff] }
 0x399   : > { %v10247_v56 = vpop.eup %5985  ;;  %6005 = vtanh.f32 %v2993_v26  ;;  %v10257_v54 = vadd.f32 %v2136_v44, %v9615_v61  ;;  %v2030_v43 = vadd.f32 %v14612_v2, %v14611_v17  ;;  %v2982_v23 = vsub.f32 %v6980_v34, %v10229_v58  ;;  %v14616_v44 = vld [vmem:[#allocation46_spill] sm:$0xff]  ;;  %v14617_v17 = vld [vmem:[#allocation199_spill] sm:$0xff] }
 0x39a   : > { %14606 = vst [vmem:[#allocation142_spill] sm:$0xff] %v10247_v56  ;;  %v10254_v52 = vpop.eup %5987  ;;  %6007 = vtanh.f32 %v2994_v10  ;;  %v2139_v0 = vadd.f32 %v2011_v31, %v14614_v9  ;;  %v10267_v26 = vadd.f32 %v2137_v62, %v9622_v19  ;;  %v2983_v27 = vsub.f32 %v6983_v37, %v10229_v58  ;;  %v14618_v10 = vld [vmem:[#allocation434_spill] sm:$0xff] }
 0x39b   : > { %14610 = vst [vmem:[#allocation377_spill] sm:$0xff] %v10254_v52  ;;  %v10263_v21 = vpop.eup %5989  ;;  %6009 = vtanh.f32 %v2995_v18  ;;  %v2140_v6 = vadd.f32 %v2012_v32, %v14616_v44  ;;  %v2031_v2 = vadd.f32 %v14618_v10, %v14617_v17  ;;  %v10281_v19 = vadd.f32 %v2138_v59, %v9639_v40  ;;  %v14620_v18 = vld [vmem:[#allocation47_spill] sm:$0xff]  ;;  %v14622_v32 = vld [vmem:[#allocation200_spill] sm:$0xff]  ;;  %v14627_v59 = vld [vmem:[#allocation201_spill] sm:$0xff] }
 0x39c   : > { %14613 = vst [vmem:[#allocation143_spill] sm:$0xff] %v10263_v21  ;;  %v10271_v61 = vpop.eup %5991  ;;  %6011 = vtanh.f32 %v2996_v24  ;;  %v2984_v21 = vsub.f32 %v6985_v39, %v10229_v58  ;;  %v2157_v31 = vadd.f32 %v2029_v25, %v14620_v18  ;;  %v2985_v62 = vsub.f32 %v6987_v41, %v10229_v58  ;;  %v14623_v44 = vld [vmem:[#allocation435_spill] sm:$0xff]  ;;  %v14624_v24 = vld [vmem:[#allocation284_spill] sm:$0xff] }
 0x39d   : > { %14615 = vst [vmem:[#allocation378_spill] sm:$0xff] %v10271_v61  ;;  %v10278_v52 = vpop.eup %5993  ;;  %6013 = vtanh.f32 %v2981_v7  ;;  %v2032_v17 = vadd.f32 %v14623_v44, %v14622_v32  ;;  %v2158_v10 = vadd.f32 %v2030_v43, %v14624_v24  ;;  %v2986_v61 = vsub.f32 %v6991_v45, %v10229_v58  ;;  %v14628_v7 = vld [vmem:[#allocation436_spill] sm:$0xff] }
 0x39e   : > { %14619 = vst [vmem:[#allocation144_spill] sm:$0xff] %v10278_v52  ;;  %v10286_v9 = vpop.eup %5995  ;;  %6015 = vtanh.f32 %v2982_v23  ;;  %v10293_v52 = vpop.permute.xlu1 %2606  ;;  %v10298_v25 = vadd.f32 %v2139_v0, %v9642_v46  ;;  %v2033_v18 = vadd.f32 %v14628_v7, %v14627_v59  ;;  %v10307_v43 = vadd.f32 %v2140_v6, %v9649_v8  ;;  %v14631_v23 = vld [vmem:[#allocation285_spill] sm:$0xff]  ;;  %v14633_v0 = vld [vmem:[#allocation202_spill] sm:$0xff] }
 0x39f   : > { %14621 = vst [vmem:[#allocation379_spill] sm:$0xff] %v10286_v9  ;;  %v10295_v40 = vpop.eup %5997  ;;  %v2987_v9 = vsub.f32 %v6995_v48, %v10229_v58  ;;  %6017 = vtanh.f32 %v2983_v27  ;;  %v2159_v44 = vadd.f32 %v2031_v2, %v14631_v23  ;;  %v2988_v24 = vsub.f32 %v6998_v50, %v10229_v58  ;;  %v14636_v6 = vld [vmem:[#allocation49_spill] sm:$0xff] }
 0x3a0   : > { %14625 = vst [vmem:[#allocation145_spill] sm:$0xff] %v10295_v40  ;;  %14626 = vst [vmem:[#allocation380_spill] sm:$0xff] %v10298_v25  ;;  %v10304_v32 = vpop.eup %5999  ;;  %6019 = vtanh.f32 %v2984_v21  ;;  %v14634_v40 = vld [vmem:[#allocation437_spill] sm:$0xff]  ;;  %v10317_v7 = vadd.f32 %v2157_v31, %v9662_v1  ;;  %v3005_v27 = vsub.f32 %v6977_v29, %v10293_v52  ;;  %v2160_v2 = vadd.f32 %v2032_v17, %v14636_v6  ;;  %v14639_v1 = vld [vmem:[#allocation438_spill] sm:$0xff] }
 0x3a1   : > { %14629 = vst [vmem:[#allocation146_spill] sm:$0xff] %v10304_v32  ;;  %14630 = vst [vmem:[#allocation381_spill] sm:$0xff] %v10307_v43  ;;  %v10312_v46 = vpop.eup %6001  ;;  %v2034_v59 = vadd.f32 %v14634_v40, %v14633_v0  ;;  %6021 = vtanh.f32 %v2985_v62  ;;  %v10325_v23 = vadd.f32 %v2158_v10, %v9669_v13  ;;  %v3006_v58 = vsub.f32 %v6980_v34, %v10293_v52  ;;  %v14638_v40 = vld [vmem:[#allocation203_spill] sm:$0xff]  ;;  %v14640_v62 = vld [vmem:[#allocation50_spill] sm:$0xff] }
 0x3a2   : > { %14632 = vst [vmem:[#allocation147_spill] sm:$0xff] %v10312_v46  ;;  %v10321_v8 = vpop.eup %6003  ;;  %6023 = vtanh.f32 %v2986_v61  ;;  %v2035_v31 = vadd.f32 %v14639_v1, %v14638_v40  ;;  %v2161_v0 = vadd.f32 %v2033_v18, %v14640_v62  ;;  %v14642_v17 = vld [vmem:[#allocation204_spill] sm:$0xff]  ;;  %v14643_v13 = vld [vmem:[#allocation439_spill] sm:$0xff]  ;;  %v10341_v61 = vadd.f32 %v2159_v44, %v9672_v51  ;;  %v14649_v44 = vld [vmem:[#allocation206_spill] sm:$0xff] }
 0x3a3   : > { %14635 = vst [vmem:[#allocation382_spill] sm:$0xff] %v10321_v8  ;;  %v10329_v21 = vpop.eup %6005  ;;  %6025 = vtanh.f32 %v2987_v9  ;;  %v3007_v8 = vsub.f32 %v6983_v37, %v10293_v52  ;;  %v2036_v10 = vadd.f32 %v14643_v13, %v14642_v17  ;;  %v3008_v6 = vsub.f32 %v6985_v39, %v10293_v52  ;;  %v14645_v40 = vld [vmem:[#allocation287_spill] sm:$0xff]  ;;  %v14646_v9 = vld [vmem:[#allocation205_spill] sm:$0xff]  ;;  %v14647_v1 = vld [vmem:[#allocation440_spill] sm:$0xff] }
 0x3a4   : > { %14637 = vst [vmem:[#allocation148_spill] sm:$0xff] %v10329_v21  ;;  %v10336_v46 = vpop.eup %6007  ;;  %6027 = vtanh.f32 %v2988_v24  ;;  %v2162_v18 = vadd.f32 %v2034_v59, %v14645_v40  ;;  %v2021_v62 = vadd.f32 %v14647_v1, %v14646_v9  ;;  %v10355_v51 = vadd.f32 %v2160_v2, %v9689_v5  ;;  %v14650_v24 = vld [vmem:[#allocation441_spill] sm:$0xff]  ;;  %v10361_v59 = vpop.permute.xlu0 %2601  ;;  %v14652_v9 = vld [vmem:[#allocation288_spill] sm:$0xff] }
 0x3a5   : > { %14641 = vst [vmem:[#allocation383_spill] sm:$0xff] %v10336_v46  ;;  %v10345_v21 = vpop.eup %6009  ;;  %v3009_v46 = vsub.f32 %v6987_v41, %v10293_v52  ;;  %6029 = vtanh.f32 %v3005_v27  ;;  %v2022_v17 = vadd.f32 %v14650_v24, %v14649_v44  ;;  %v3010_v13 = vsub.f32 %v6991_v45, %v10293_v52  ;;  %v14654_v44 = vld [vmem:[#allocation52_spill] sm:$0xff] }
 0x3a6   : > { %14644 = vst [vmem:[#allocation149_spill] sm:$0xff] %v10345_v21  ;;  %v10352_v32 = vpop.eup %6011  ;;  %6031 = vtanh.f32 %v3006_v58  ;;  %v2163_v1 = vadd.f32 %v2035_v31, %v14652_v9  ;;  %v10367_v27 = vadd.f32 %v2161_v0, %v9696_v4  ;;  %v3011_v5 = vsub.f32 %v6995_v48, %v10293_v52  ;;  %v14656_v21 = vld [vmem:[#allocation442_spill] sm:$0xff]  ;;  %v14658_v31 = vld [vmem:[#allocation53_spill] sm:$0xff]  ;;  %v14843_v25 = vld [vmem:[#allocation124_spill] sm:$0xff] }
 0x3a7   : > { %14648 = vst [vmem:[#allocation384_spill] sm:$0xff] %v10352_v32  ;;  %v10363_v40 = vpop.eup %6013  ;;  %6033 = vtanh.f32 %v3007_v8  ;;  %v2164_v24 = vadd.f32 %v2036_v10, %v14654_v44  ;;  %v14655_v32 = vld [vmem:[#allocation207_spill] sm:$0xff]  ;;  %v3012_v56 = vsub.f32 %v6998_v50, %v10293_v52  ;;  %v10381_v4 = vadd.f32 %v2162_v18, %v9713_v57  ;;  %v14660_v10 = vld [vmem:[#allocation208_spill] sm:$0xff] }
 0x3a8   : > { %14651 = vst [vmem:[#allocation150_spill] sm:$0xff] %v10363_v40  ;;  %v10371_v2 = vpop.eup %6015  ;;  %v2023_v58 = vadd.f32 %v14656_v21, %v14655_v32  ;;  %6035 = vtanh.f32 %v3008_v6  ;;  %v2149_v0 = vadd.f32 %v2021_v62, %v14658_v31  ;;  %v2997_v8 = vsub.f32 %v6977_v29, %v10361_v59  ;;  %v14661_v44 = vld [vmem:[#allocation443_spill] sm:$0xff]  ;;  %v14662_v21 = vld [vmem:[#allocation290_spill] sm:$0xff]  ;;  %v14665_v18 = vld [vmem:[#allocation444_spill] sm:$0xff] }
 0x3a9   : > { %14653 = vst [vmem:[#allocation385_spill] sm:$0xff] %v10371_v2  ;;  %v10378_v40 = vpop.eup %6017  ;;  %6037 = vtanh.f32 %v3009_v46  ;;  %v2024_v32 = vadd.f32 %v14661_v44, %v14660_v10  ;;  %v2150_v2 = vadd.f32 %v2022_v17, %v14662_v21  ;;  %v2998_v52 = vsub.f32 %v6980_v34, %v10361_v59  ;;  %v14664_v46 = vld [vmem:[#allocation209_spill] sm:$0xff] }
 0x3aa   : > { %14657 = vst [vmem:[#allocation151_spill] sm:$0xff] %v10378_v40  ;;  %v10386_v9 = vpop.eup %6019  ;;  %6039 = vtanh.f32 %v3010_v13  ;;  %v10396_v57 = vadd.f32 %v2163_v1, %v9716_v15  ;;  %v2025_v62 = vadd.f32 %v14665_v18, %v14664_v46  ;;  %v2999_v31 = vsub.f32 %v6983_v37, %v10361_v59  ;;  %v14667_v13 = vld [vmem:[#allocation291_spill] sm:$0xff]  ;;  %v14669_v1 = vld [vmem:[#allocation210_spill] sm:$0xff]  ;;  %v14670_v21 = vld [vmem:[#allocation445_spill] sm:$0xff] }
 0x3ab   : > { %14659 = vst [vmem:[#allocation386_spill] sm:$0xff] %v10386_v9  ;;  %v10393_v6 = vpop.eup %6021  ;;  %6041 = vtanh.f32 %v3011_v5  ;;  %v10405_v17 = vadd.f32 %v2164_v24, %v9723_v30  ;;  %v2151_v10 = vadd.f32 %v2023_v58, %v14667_v13  ;;  %v3000_v44 = vsub.f32 %v6985_v39, %v10361_v59  ;;  %v14672_v24 = vld [vmem:[#allocation55_spill] sm:$0xff] }
 0x3ac   : > { %14663 = vst [vmem:[#allocation152_spill] sm:$0xff] %v10393_v6  ;;  %v10402_v9 = vpop.eup %6023  ;;  %6043 = vtanh.f32 %v3012_v56  ;;  %v2026_v46 = vadd.f32 %v14670_v21, %v14669_v1  ;;  %v10415_v5 = vadd.f32 %v2149_v0, %v9736_v63  ;;  %v3001_v18 = vsub.f32 %v6987_v41, %v10361_v59  ;;  %v14674_v63 = vld [vmem:[#allocation211_spill] sm:$0xff]  ;;  %v14675_v0 = vld [vmem:[#allocation446_spill] sm:$0xff] }
 0x3ad   : > { %14666 = vst [vmem:[#allocation387_spill] sm:$0xff] %v10402_v9  ;;  %v10410_v15 = vpop.eup %6025  ;;  %6045 = vtanh.f32 %v2997_v8  ;;  %v2152_v58 = vadd.f32 %v2024_v32, %v14672_v24  ;;  %v10423_v56 = vadd.f32 %v2150_v2, %v9743_v42  ;;  %v3002_v13 = vsub.f32 %v6991_v45, %v10361_v59  ;;  %v14676_v9 = vld [vmem:[#allocation56_spill] sm:$0xff]  ;;  %v14678_v2 = vld [vmem:[#allocation213_spill] sm:$0xff] }
 0x3ae   : > { %14668 = vst [vmem:[#allocation153_spill] sm:$0xff] %v10410_v15  ;;  %v10419_v30 = vpop.eup %6027  ;;  %6047 = vtanh.f32 %v2998_v52  ;;  %v10427_v15 = vpop.permute.xlu1 %2616  ;;  %v2027_v21 = vadd.f32 %v14675_v0, %v14674_v63  ;;  %v2153_v8 = vadd.f32 %v2025_v62, %v14676_v9  ;;  %v10439_v42 = vadd.f32 %v2151_v10, %v9746_v11  ;;  %v14679_v52 = vld [vmem:[#allocation448_spill] sm:$0xff]  ;;  %v14682_v9 = vld [vmem:[#allocation447_spill] sm:$0xff]  ;;  %v14683_v0 = vld [vmem:[#allocation293_spill] sm:$0xff] }
 0x3af   : > { %14671 = vst [vmem:[#allocation388_spill] sm:$0xff] %v10419_v30  ;;  %v10429_v1 = vpop.eup %6029  ;;  %v3003_v30 = vsub.f32 %v6995_v48, %v10361_v59  ;;  %6049 = vtanh.f32 %v2999_v31  ;;  %v2045_v24 = vadd.f32 %v14679_v52, %v14678_v2  ;;  %v14681_v63 = vld [vmem:[#allocation212_spill] sm:$0xff]  ;;  %v2154_v40 = vadd.f32 %v2026_v46, %v14683_v0  ;;  %v14685_v2 = vld [vmem:[#allocation214_spill] sm:$0xff]  ;;  %v14686_v52 = vld [vmem:[#allocation449_spill] sm:$0xff] }
 0x3b0   : > { %14673 = vst [vmem:[#allocation249_spill] sm:$0xff] %v10429_v1  ;;  %v10436_v32 = vpop.eup %6031  ;;  %v3004_v1 = vsub.f32 %v6998_v50, %v10361_v59  ;;  %6051 = vtanh.f32 %v3000_v44  ;;  %v2028_v62 = vadd.f32 %v14682_v9, %v14681_v63  ;;  %v3021_v31 = vsub.f32 %v6977_v29, %v10427_v15  ;;  %v14688_v63 = vld [vmem:[#allocation294_spill] sm:$0xff] }
 0x3b1   : > { %14677 = vst [vmem:[#allocation154_spill] sm:$0xff] %v10436_v32  ;;  %v10445_v6 = vpop.eup %6033  ;;  %6053 = vtanh.f32 %v3001_v18  ;;  %v10455_v10 = vadd.f32 %v2152_v58, %v9763_v22  ;;  %v2046_v59 = vadd.f32 %v14686_v52, %v14685_v2  ;;  %v3022_v44 = vsub.f32 %v6980_v34, %v10427_v15  ;;  %v14690_v58 = vld [vmem:[#allocation215_spill] sm:$0xff]  ;;  %v14691_v0 = vld [vmem:[#allocation450_spill] sm:$0xff] }
 0x3b2   : > { %14680 = vst [vmem:[#allocation389_spill] sm:$0xff] %v10445_v6  ;;  %v10452_v11 = vpop.eup %6035  ;;  %6055 = vtanh.f32 %v3002_v13  ;;  %v2155_v46 = vadd.f32 %v2027_v21, %v14688_v63  ;;  %v10465_v18 = vadd.f32 %v2153_v8, %v9770_v60  ;;  %v3023_v9 = vsub.f32 %v6983_v37, %v10427_v15  ;;  %v14692_v13 = vld [vmem:[#allocation59_spill] sm:$0xff]  ;;  %v14694_v21 = vld [vmem:[#allocation58_spill] sm:$0xff] }
 0x3b3   : > { %14684 = vst [vmem:[#allocation155_spill] sm:$0xff] %v10452_v11  ;;  %v10461_v6 = vpop.eup %6037  ;;  %6057 = vtanh.f32 %v3003_v30  ;;  %v2047_v2 = vadd.f32 %v14691_v0, %v14690_v58  ;;  %v2173_v52 = vadd.f32 %v2045_v24, %v14692_v13  ;;  %v2156_v60 = vadd.f32 %v2028_v62, %v14694_v21  ;;  %v14696_v58 = vld [vmem:[#allocation216_spill] sm:$0xff]  ;;  %v14697_v0 = vld [vmem:[#allocation451_spill] sm:$0xff] }
 0x3b4   : > { %14687 = vst [vmem:[#allocation390_spill] sm:$0xff] %v10461_v6  ;;  %v10469_v22 = vpop.eup %6039  ;;  %6059 = vtanh.f32 %v3004_v1  ;;  %v3024_v6 = vsub.f32 %v6985_v39, %v10427_v15  ;;  %v10480_v30 = vadd.f32 %v2154_v40, %v9787_v3  ;;  %v3025_v8 = vsub.f32 %v6987_v41, %v10427_v15  ;;  %v14698_v1 = vld [vmem:[#allocation296_spill] sm:$0xff]  ;;  %v14700_v40 = vld [vmem:[#allocation217_spill] sm:$0xff] }
 0x3b5   : > { %14689 = vst [vmem:[#allocation156_spill] sm:$0xff] %v10469_v22  ;;  %v10476_v11 = vpop.eup %6041  ;;  %6061 = vtanh.f32 %v3021_v31  ;;  %v2048_v24 = vadd.f32 %v14697_v0, %v14696_v58  ;;  %v2174_v13 = vadd.f32 %v2046_v59, %v14698_v1  ;;  %v3026_v22 = vsub.f32 %v6991_v45, %v10427_v15  ;;  %v14701_v31 = vld [vmem:[#allocation452_spill] sm:$0xff]  ;;  %v14703_v59 = vld [vmem:[#allocation297_spill] sm:$0xff] }
 0x3b6   : > { %14693 = vst [vmem:[#allocation391_spill] sm:$0xff] %v10476_v11  ;;  %v10484_v63 = vpop.eup %6043  ;;  %6063 = vtanh.f32 %v3022_v44  ;;  %v10491_v11 = vpop.permute.xlu0 %2611  ;;  %v10496_v3 = vadd.f32 %v2155_v46, %v9790_v36  ;;  %v2049_v21 = vadd.f32 %v14701_v31, %v14700_v40  ;;  %v2175_v0 = vadd.f32 %v2047_v2, %v14703_v59  ;;  %v14705_v36 = vld [vmem:[#allocation335_spill] sm:$0xff]  ;;  %v14706_v40 = vld [vmem:[#allocation218_spill] sm:$0xff]  ;;  %v14707_v31 = vld [vmem:[#allocation453_spill] sm:$0xff] }
 0x3b7   : > { %14695 = vst [vmem:[#allocation9_spill] sm:$0xff] %v10484_v63  ;;  %v10493_v62 = vpop.eup %6045  ;;  %v3027_v63 = vsub.f32 %v6995_v48, %v10427_v15  ;;  %6065 = vtanh.f32 %v3023_v9  ;;  %v2237_v44 = vadd.f32 %v2173_v52, %v9810_v14  ;;  %v3028_v1 = vsub.f32 %v6998_v50, %v10427_v15  ;;  %v14709_v2 = vld [vmem:[#allocation61_spill] sm:$0xff]  ;;  %v14710_v52 = vld [vmem:[#allocation102_spill] sm:$0xff] }
 0x3b8   : > { %14699 = vst [vmem:[#allocation10_spill] sm:$0xff] %v10493_v62  ;;  %v10502_v58 = vpop.eup %6047  ;;  %6067 = vtanh.f32 %v3024_v6  ;;  %v10511_v46 = vadd.f32 %v2156_v60, %v14705_v36  ;;  %v2050_v32 = vadd.f32 %v14707_v31, %v14706_v40  ;;  %v3013_v9 = vsub.f32 %v6977_v29, %v10491_v11  ;;  %v14712_v60 = vld [vmem:[#allocation219_spill] sm:$0xff]  ;;  %v14713_v36 = vld [vmem:[#allocation454_spill] sm:$0xff] }
 0x3b9   : > { %14702 = vst [vmem:[#allocation157_spill] sm:$0xff] %v10502_v58  ;;  %v10508_v62 = vpop.eup %6049  ;;  %6069 = vtanh.f32 %v3025_v8  ;;  %v2176_v14 = vadd.f32 %v2048_v24, %v14709_v2  ;;  %v2238_v59 = vadd.f32 %v2174_v13, %v14710_v52  ;;  %v3014_v6 = vsub.f32 %v6980_v34, %v10491_v11  ;;  %v14714_v40 = vld [vmem:[#allocation62_spill] sm:$0xff]  ;;  %v14716_v24 = vld [vmem:[#allocation337_spill] sm:$0xff] }
 0x3ba   : > { %14704 = vst [vmem:[#allocation392_spill] sm:$0xff] %v10508_v62  ;;  %v10517_v58 = vpop.eup %6051  ;;  %6071 = vtanh.f32 %v3026_v22  ;;  %v2051_v62 = vadd.f32 %v14713_v36, %v14712_v60  ;;  %v2177_v8 = vadd.f32 %v2049_v21, %v14714_v40  ;;  %v3015_v31 = vsub.f32 %v6983_v37, %v10491_v11  ;;  %v14718_v60 = vld [vmem:[#allocation220_spill] sm:$0xff]  ;;  %v14719_v36 = vld [vmem:[#allocation455_spill] sm:$0xff] }
 0x3bb   : > { %14708 = vst [vmem:[#allocation158_spill] sm:$0xff] %v10517_v58  ;;  %v10523_v15 = vpop.eup %6053  ;;  %6073 = vtanh.f32 %v3027_v63  ;;  %v2239_v2 = vadd.f32 %v2175_v0, %v14716_v24  ;;  %v10534_v22 = vadd.f32 %v2237_v44, %v10119_v38  ;;  %v3016_v13 = vsub.f32 %v6985_v39, %v10491_v11  ;;  %v14720_v63 = vld [vmem:[#allocation299_spill] sm:$0xff]  ;;  %v14722_v0 = vld [vmem:[#allocation104_spill] sm:$0xff]  ;;  %v10553_v24 = vpop.permute.xlu1 %2626 }
 0x3bc   : > { %14711 = vst [vmem:[#allocation393_spill] sm:$0xff] %v10523_v15  ;;  %v10530_v58 = vpop.eup %6055  ;;  %6075 = vtanh.f32 %v3028_v1  ;;  %v2052_v21 = vadd.f32 %v14719_v36, %v14718_v60  ;;  %v2178_v40 = vadd.f32 %v2050_v32, %v14720_v63  ;;  %v3017_v15 = vsub.f32 %v6987_v41, %v10491_v11  ;;  %v14724_v32 = vld [vmem:[#allocation300_spill] sm:$0xff]  ;;  %v14725_v63 = vld [vmem:[#allocation221_spill] sm:$0xff] }
 0x3bd   : > { %14715 = vst [vmem:[#allocation159_spill] sm:$0xff] %v10530_v58  ;;  %v10538_v52 = vpop.eup %6057  ;;  %6077 = vtanh.f32 %v3013_v9  ;;  %v2240_v38 = vadd.f32 %v2176_v14, %v14722_v0  ;;  %v10549_v44 = vadd.f32 %v2238_v59, %v10127_v20  ;;  %v3018_v1 = vsub.f32 %v6991_v45, %v10491_v11  ;;  %v14728_v20 = vld [vmem:[#allocation105_spill] sm:$0xff] }
 0x3be   : > { %14717 = vst [vmem:[#allocation394_spill] sm:$0xff] %v10538_v52  ;;  %v10545_v58 = vpop.eup %6059  ;;  %6079 = vtanh.f32 %v3014_v6  ;;  %v2179_v36 = vadd.f32 %v2051_v62, %v14724_v32  ;;  %v14726_v52 = vld [vmem:[#allocation456_spill] sm:$0xff]  ;;  %v2241_v59 = vadd.f32 %v2177_v8, %v14728_v20  ;;  %v10566_v0 = vadd.f32 %v2239_v2, %v10143_v28  ;;  %v14734_v8 = vld [vmem:[#allocation341_spill] sm:$0xff]  ;;  %v14737_v20 = vld [vmem:[#allocation458_spill] sm:$0xff] }
 0x3bf   : > { %14721 = vst [vmem:[#allocation251_spill] sm:$0xff] %v10545_v58  ;;  %v10555_v60 = vpop.eup %6061  ;;  %v2037_v9 = vadd.f32 %v14726_v52, %v14725_v63  ;;  %v3019_v58 = vsub.f32 %v6995_v48, %v10491_v11  ;;  %6081 = vtanh.f32 %v3015_v31  ;;  %v3020_v6 = vsub.f32 %v6998_v50, %v10491_v11  ;;  %v14730_v62 = vld [vmem:[#allocation64_spill] sm:$0xff]  ;;  %v14731_v52 = vld [vmem:[#allocation222_spill] sm:$0xff]  ;;  %v14732_v63 = vld [vmem:[#allocation457_spill] sm:$0xff] }
 0x3c0   : > { %14723 = vst [vmem:[#allocation252_spill] sm:$0xff] %v10555_v60  ;;  %v10562_v14 = vpop.eup %6063  ;;  %6083 = vtanh.f32 %v3016_v13  ;;  %v2180_v32 = vadd.f32 %v2052_v21, %v14730_v62  ;;  %v2038_v43 = vadd.f32 %v14732_v63, %v14731_v52  ;;  %v3037_v31 = vsub.f32 %v6977_v29, %v10553_v24  ;;  %v14736_v21 = vld [vmem:[#allocation223_spill] sm:$0xff] }
 0x3c1   : > { %14727 = vst [vmem:[#allocation12_spill] sm:$0xff] %v10562_v14  ;;  %v10570_v60 = vpop.eup %6065  ;;  %6085 = vtanh.f32 %v3017_v15  ;;  %v2242_v28 = vadd.f32 %v2178_v40, %v14734_v8  ;;  %v10581_v2 = vadd.f32 %v2240_v38, %v10157_v12  ;;  %v3038_v11 = vsub.f32 %v6980_v34, %v10553_v24  ;;  %v14738_v15 = vld [vmem:[#allocation65_spill] sm:$0xff]  ;;  %v14740_v40 = vld [vmem:[#allocation107_spill] sm:$0xff] }
 0x3c2   : > { %14729 = vst [vmem:[#allocation160_spill] sm:$0xff] %v10570_v60  ;;  %v10577_v14 = vpop.eup %6067  ;;  %6087 = vtanh.f32 %v3018_v1  ;;  %v2039_v62 = vadd.f32 %v14737_v20, %v14736_v21  ;;  %v2165_v52 = vadd.f32 %v2037_v9, %v14738_v15  ;;  %v3039_v63 = vsub.f32 %v6983_v37, %v10553_v24  ;;  %v14742_v21 = vld [vmem:[#allocation224_spill] sm:$0xff]  ;;  %v14743_v9 = vld [vmem:[#allocation459_spill] sm:$0xff]  ;;  %v14744_v20 = vld [vmem:[#allocation302_spill] sm:$0xff]  ;;  %v10618_v60 = vpop.permute.xlu0 %2621 }
 0x3c3   : > { %14733 = vst [vmem:[#allocation395_spill] sm:$0xff] %v10577_v14  ;;  %v10585_v13 = vpop.eup %6069  ;;  %6089 = vtanh.f32 %v3019_v58  ;;  %v10595_v12 = vadd.f32 %v2179_v36, %v14740_v40  ;;  %v10598_v38 = vadd.f32 %v2241_v59, %v10169_v33  ;;  %v3040_v1 = vsub.f32 %v6985_v39, %v10553_v24  ;;  %v14746_v40 = vld [vmem:[#allocation108_spill] sm:$0xff]  ;;  %v14748_v59 = vld [vmem:[#allocation225_spill] sm:$0xff] }
 0x3c4   : > { %14735 = vst [vmem:[#allocation161_spill] sm:$0xff] %v10585_v13  ;;  %v10592_v14 = vpop.eup %6071  ;;  %6091 = vtanh.f32 %v3020_v6  ;;  %v2040_v58 = vadd.f32 %v14743_v9, %v14742_v21  ;;  %v2166_v15 = vadd.f32 %v2038_v43, %v14744_v20  ;;  %v10612_v33 = vadd.f32 %v2180_v32, %v14746_v40  ;;  %v14749_v6 = vld [vmem:[#allocation460_spill] sm:$0xff]  ;;  %v14751_v43 = vld [vmem:[#allocation303_spill] sm:$0xff]  ;;  %v14752_v20 = vld [vmem:[#allocation109_spill] sm:$0xff] }
 0x3c5   : > { %14739 = vst [vmem:[#allocation396_spill] sm:$0xff] %v10592_v14  ;;  %v10602_v8 = vpop.eup %6073  ;;  %v3041_v14 = vsub.f32 %v6987_v41, %v10553_v24  ;;  %6093 = vtanh.f32 %v3037_v31  ;;  %v2041_v13 = vadd.f32 %v14749_v6, %v14748_v59  ;;  %v2167_v9 = vadd.f32 %v2039_v62, %v14751_v43  ;;  %v14754_v59 = vld [vmem:[#allocation226_spill] sm:$0xff]  ;;  %v14755_v6 = vld [vmem:[#allocation461_spill] sm:$0xff]  ;;  %v14757_v62 = vld [vmem:[#allocation67_spill] sm:$0xff] }
 0x3c6   : > { %14741 = vst [vmem:[#allocation13_spill] sm:$0xff] %v10602_v8  ;;  %v10609_v36 = vpop.eup %6075  ;;  %14747 = vst [vmem:[#allocation255_spill] sm:$0xff] %v10612_v33  ;;  %v3042_v8 = vsub.f32 %v6991_v45, %v10553_v24  ;;  %6095 = vtanh.f32 %v3038_v11  ;;  %v2229_v31 = vadd.f32 %v2165_v52, %v14752_v20  ;;  %v10629_v40 = vadd.f32 %v2242_v28, %v10183_v53  ;;  %v14758_v43 = vld [vmem:[#allocation110_spill] sm:$0xff]  ;;  %v14760_v53 = vld [vmem:[#allocation227_spill] sm:$0xff] }
 0x3c7   : > { %14745 = vst [vmem:[#allocation254_spill] sm:$0xff] %v10609_v36  ;;  %v10620_v21 = vpop.eup %6077  ;;  %v3043_v36 = vsub.f32 %v6995_v48, %v10553_v24  ;;  %6097 = vtanh.f32 %v3039_v63  ;;  %v2042_v11 = vadd.f32 %v14755_v6, %v14754_v59  ;;  %v3044_v33 = vsub.f32 %v6998_v50, %v10553_v24  ;;  %v14761_v28 = vld [vmem:[#allocation462_spill] sm:$0xff]  ;;  %v14762_v59 = vld [vmem:[#allocation68_spill] sm:$0xff] }
 0x3c8   : > { %14750 = vst [vmem:[#allocation162_spill] sm:$0xff] %v10620_v21  ;;  %v10626_v32 = vpop.eup %6079  ;;  %6099 = vtanh.f32 %v3040_v1  ;;  %v2168_v52 = vadd.f32 %v2040_v58, %v14757_v62  ;;  %v2230_v20 = vadd.f32 %v2166_v15, %v14758_v43  ;;  %v3029_v63 = vsub.f32 %v6977_v29, %v10618_v60  ;;  %v14764_v58 = vld [vmem:[#allocation345_spill] sm:$0xff] }
 0x3c9   : > { %14753 = vst [vmem:[#allocation397_spill] sm:$0xff] %v10626_v32  ;;  %v10635_v21 = vpop.eup %6081  ;;  %6101 = vtanh.f32 %v3041_v14  ;;  %v2043_v35 = vadd.f32 %v14761_v28, %v14760_v53  ;;  %v2169_v6 = vadd.f32 %v2041_v13, %v14762_v59  ;;  %v3030_v24 = vsub.f32 %v6980_v34, %v10618_v60  ;;  %v14766_v53 = vld [vmem:[#allocation228_spill] sm:$0xff]  ;;  %v14767_v28 = vld [vmem:[#allocation463_spill] sm:$0xff] }
 0x3ca   : > { %14756 = vst [vmem:[#allocation163_spill] sm:$0xff] %v10635_v21  ;;  %v10641_v32 = vpop.eup %6083  ;;  %6103 = vtanh.f32 %v3042_v8  ;;  %v2231_v62 = vadd.f32 %v2167_v9, %v14764_v58  ;;  %v10652_v14 = vadd.f32 %v2229_v31, %v10217_v55  ;;  %v3031_v15 = vsub.f32 %v6983_v37, %v10618_v60  ;;  %v14768_v8 = vld [vmem:[#allocation305_spill] sm:$0xff]  ;;  %v14770_v9 = vld [vmem:[#allocation112_spill] sm:$0xff] }
 0x3cb   : > { %14759 = vst [vmem:[#allocation398_spill] sm:$0xff] %v10641_v32  ;;  %v10648_v1 = vpop.eup %6085  ;;  %6105 = vtanh.f32 %v3043_v36  ;;  %v2044_v13 = vadd.f32 %v14767_v28, %v14766_v53  ;;  %v2170_v59 = vadd.f32 %v2042_v11, %v14768_v8  ;;  %v2232_v55 = vadd.f32 %v2168_v52, %v14770_v9  ;;  %v14772_v53 = vld [vmem:[#allocation306_spill] sm:$0xff]  ;;  %v14773_v11 = vld [vmem:[#allocation229_spill] sm:$0xff] }
 0x3cc   : > { %14763 = vst [vmem:[#allocation164_spill] sm:$0xff] %v10648_v1  ;;  %v10656_v43 = vpop.eup %6087  ;;  %6107 = vtanh.f32 %v3044_v33  ;;  %v3032_v1 = vsub.f32 %v6985_v39, %v10618_v60  ;;  %v10667_v36 = vadd.f32 %v2230_v20, %v10225_v49  ;;  %v3033_v31 = vsub.f32 %v6987_v41, %v10618_v60  ;;  %v14774_v33 = vld [vmem:[#allocation464_spill] sm:$0xff]  ;;  %v14776_v49 = vld [vmem:[#allocation113_spill] sm:$0xff] }
 0x3cd   : > { %14765 = vst [vmem:[#allocation399_spill] sm:$0xff] %v10656_v43  ;;  %v10663_v32 = vpop.eup %6089  ;;  %6109 = vtanh.f32 %v3029_v63  ;;  %v2171_v28 = vadd.f32 %v2043_v35, %v14772_v53  ;;  %v2061_v8 = vadd.f32 %v14774_v33, %v14773_v11  ;;  %v3034_v43 = vsub.f32 %v6991_v45, %v10618_v60  ;;  %v14778_v53 = vld [vmem:[#allocation70_spill] sm:$0xff] }
 0x3ce   : > { %14769 = vst [vmem:[#allocation15_spill] sm:$0xff] %v10663_v32  ;;  %v10671_v58 = vpop.eup %6091  ;;  %6111 = vtanh.f32 %v3030_v24  ;;  %v10678_v32 = vpop.permute.xlu1 %2636  ;;  %v2233_v20 = vadd.f32 %v2169_v6, %v14776_v49  ;;  %v10684_v9 = vadd.f32 %v2231_v62, %v10243_v16  ;;  %v3035_v63 = vsub.f32 %v6995_v48, %v10618_v60  ;;  %v14779_v33 = vld [vmem:[#allocation230_spill] sm:$0xff]  ;;  %v14782_v6 = vld [vmem:[#allocation352_spill] sm:$0xff] }
 0x3cf   : > { %14771 = vst [vmem:[#allocation16_spill] sm:$0xff] %v10671_v58  ;;  %v10680_v52 = vpop.eup %6093  ;;  %6113 = vtanh.f32 %v3031_v15  ;;  %v2172_v11 = vadd.f32 %v2044_v13, %v14778_v53  ;;  %v14780_v58 = vld [vmem:[#allocation465_spill] sm:$0xff]  ;;  %v3036_v21 = vsub.f32 %v6998_v50, %v10618_v60  ;;  %v2234_v16 = vadd.f32 %v2170_v59, %v14782_v6  ;;  %v14784_v13 = vld [vmem:[#allocation231_spill] sm:$0xff]  ;;  %v14785_v53 = vld [vmem:[#allocation466_spill] sm:$0xff] }
 0x3d0   : > { %14775 = vst [vmem:[#allocation165_spill] sm:$0xff] %v10680_v52  ;;  %v10688_v35 = vpop.eup %6095  ;;  %v2062_v24 = vadd.f32 %v14780_v58, %v14779_v33  ;;  %6115 = vtanh.f32 %v3032_v1  ;;  %v10699_v62 = vadd.f32 %v2232_v55, %v10257_v54  ;;  %v3053_v15 = vsub.f32 %v6977_v29, %v10678_v32  ;;  %v14786_v33 = vld [vmem:[#allocation71_spill] sm:$0xff]  ;;  %v14788_v59 = vld [vmem:[#allocation118_spill] sm:$0xff] }
 0x3d1   : > { %14777 = vst [vmem:[#allocation400_spill] sm:$0xff] %v10688_v35  ;;  %v10695_v52 = vpop.eup %6097  ;;  %6117 = vtanh.f32 %v3033_v31  ;;  %v2063_v58 = vadd.f32 %v14785_v53, %v14784_v13  ;;  %v2189_v35 = vadd.f32 %v2061_v8, %v14786_v33  ;;  %v3054_v60 = vsub.f32 %v6980_v34, %v10678_v32  ;;  %v14791_v13 = vld [vmem:[#allocation232_spill] sm:$0xff]  ;;  %v14792_v8 = vld [vmem:[#allocation467_spill] sm:$0xff] }
 0x3d2   : > { %14781 = vst [vmem:[#allocation166_spill] sm:$0xff] %v10695_v52  ;;  %v10703_v49 = vpop.eup %6099  ;;  %6119 = vtanh.f32 %v3034_v43  ;;  %v10713_v54 = vadd.f32 %v2171_v28, %v14788_v59  ;;  %v10716_v55 = vadd.f32 %v2233_v20, %v10267_v26  ;;  %v3055_v31 = vsub.f32 %v6983_v37, %v10678_v32  ;;  %v14793_v53 = vld [vmem:[#allocation308_spill] sm:$0xff]  ;;  %v14795_v59 = vld [vmem:[#allocation119_spill] sm:$0xff]  ;;  %v14797_v20 = vld [vmem:[#allocation233_spill] sm:$0xff] }
 0x3d3   : > { %14783 = vst [vmem:[#allocation401_spill] sm:$0xff] %v10703_v49  ;;  %v10710_v1 = vpop.eup %6101  ;;  %6121 = vtanh.f32 %v3035_v63  ;;  %v2064_v43 = vadd.f32 %v14792_v8, %v14791_v13  ;;  %v2190_v33 = vadd.f32 %v2062_v24, %v14793_v53  ;;  %v10730_v26 = vadd.f32 %v2172_v11, %v14795_v59  ;;  %v14798_v63 = vld [vmem:[#allocation468_spill] sm:$0xff]  ;;  %v14800_v13 = vld [vmem:[#allocation309_spill] sm:$0xff] }
 0x3d4   : > { %14787 = vst [vmem:[#allocation167_spill] sm:$0xff] %v10710_v1  ;;  %14789 = vst [vmem:[#allocation402_spill] sm:$0xff] %v10713_v54  ;;  %v10720_v6 = vpop.eup %6103  ;;  %6123 = vtanh.f32 %v3036_v21  ;;  %v3056_v1 = vsub.f32 %v6985_v39, %v10678_v32  ;;  %v2065_v49 = vadd.f32 %v14798_v63, %v14797_v20  ;;  %v2191_v24 = vadd.f32 %v2063_v58, %v14800_v13  ;;  %v14801_v21 = vld [vmem:[#allocation114_spill] sm:$0xff]  ;;  %v14804_v63 = vld [vmem:[#allocation469_spill] sm:$0xff] }
 0x3d5   : > { %14790 = vst [vmem:[#allocation257_spill] sm:$0xff] %v10720_v6  ;;  %v10727_v28 = vpop.eup %6105  ;;  %14796 = vst [vmem:[#allocation22_spill] sm:$0xff] %v10730_v26  ;;  %v3057_v6 = vsub.f32 %v6987_v41, %v10678_v32  ;;  %6125 = vtanh.f32 %v3053_v15  ;;  %v2253_v8 = vadd.f32 %v2189_v35, %v14801_v21  ;;  %v3058_v53 = vsub.f32 %v6991_v45, %v10678_v32  ;;  %v14803_v20 = vld [vmem:[#allocation234_spill] sm:$0xff]  ;;  %v14806_v35 = vld [vmem:[#allocation73_spill] sm:$0xff] }
 0x3d6   : > { %14794 = vst [vmem:[#allocation258_spill] sm:$0xff] %v10727_v28  ;;  %v10736_v52 = vpop.eup %6107  ;;  %6127 = vtanh.f32 %v3054_v60  ;;  %v10742_v28 = vpop.permute.xlu0 %2631  ;;  %v10747_v59 = vadd.f32 %v2234_v16, %v10281_v19  ;;  %v2066_v15 = vadd.f32 %v14804_v63, %v14803_v20  ;;  %v2192_v13 = vadd.f32 %v2064_v43, %v14806_v35  ;;  %v14807_v21 = vld [vmem:[#allocation115_spill] sm:$0xff]  ;;  %v14810_v16 = vld [vmem:[#allocation470_spill] sm:$0xff] }
 0x3d7   : > { %14799 = vst [vmem:[#allocation168_spill] sm:$0xff] %v10736_v52  ;;  %v10744_v11 = vpop.eup %6109  ;;  %v3059_v52 = vsub.f32 %v6995_v48, %v10678_v32  ;;  %6129 = vtanh.f32 %v3055_v31  ;;  %v2254_v60 = vadd.f32 %v2190_v33, %v14807_v21  ;;  %v3060_v26 = vsub.f32 %v6998_v50, %v10678_v32  ;;  %v14809_v19 = vld [vmem:[#allocation235_spill] sm:$0xff]  ;;  %v14811_v20 = vld [vmem:[#allocation74_spill] sm:$0xff]  ;;  %v14815_v21 = vld [vmem:[#allocation236_spill] sm:$0xff] }
 0x3d8   : > { %14802 = vst [vmem:[#allocation403_spill] sm:$0xff] %v10744_v11  ;;  %v10753_v58 = vpop.eup %6111  ;;  %6131 = vtanh.f32 %v3056_v1  ;;  %v2067_v54 = vadd.f32 %v14810_v16, %v14809_v19  ;;  %v2193_v63 = vadd.f32 %v2065_v49, %v14811_v20  ;;  %v3045_v31 = vsub.f32 %v6977_v29, %v10742_v28  ;;  %v14813_v43 = vld [vmem:[#allocation350_spill] sm:$0xff]  ;;  %v14816_v19 = vld [vmem:[#allocation471_spill] sm:$0xff] }
 0x3d9   : > { %14805 = vst [vmem:[#allocation169_spill] sm:$0xff] %v10753_v58  ;;  %v10759_v11 = vpop.eup %6113  ;;  %6133 = vtanh.f32 %v3057_v6  ;;  %v2255_v35 = vadd.f32 %v2191_v24, %v14813_v43  ;;  %v10770_v33 = vadd.f32 %v2253_v8, %v10317_v7  ;;  %v3046_v32 = vsub.f32 %v6980_v34, %v10742_v28  ;;  %v14817_v6 = vld [vmem:[#allocation311_spill] sm:$0xff]  ;;  %v14819_v24 = vld [vmem:[#allocation120_spill] sm:$0xff] }
 0x3da   : > { %14808 = vst [vmem:[#allocation404_spill] sm:$0xff] %v10759_v11  ;;  %v10766_v58 = vpop.eup %6115  ;;  %6135 = vtanh.f32 %v3058_v53  ;;  %v2068_v49 = vadd.f32 %v14816_v19, %v14815_v21  ;;  %v2194_v16 = vadd.f32 %v2066_v15, %v14817_v6  ;;  %v3047_v20 = vsub.f32 %v6983_v37, %v10742_v28  ;;  %v14821_v21 = vld [vmem:[#allocation312_spill] sm:$0xff]  ;;  %v14822_v15 = vld [vmem:[#allocation121_spill] sm:$0xff] }
 0x3db   : > { %14812 = vst [vmem:[#allocation23_spill] sm:$0xff] %v10766_v58  ;;  %v10774_v1 = vpop.eup %6117  ;;  %6137 = vtanh.f32 %v3059_v52  ;;  %v2256_v7 = vadd.f32 %v2192_v13, %v14819_v24  ;;  %v10785_v8 = vadd.f32 %v2254_v60, %v10325_v23  ;;  %v3048_v53 = vsub.f32 %v6985_v39, %v10742_v28  ;;  %v14824_v23 = vld [vmem:[#allocation237_spill] sm:$0xff] }
 0x3dc   : > { %14814 = vst [vmem:[#allocation260_spill] sm:$0xff] %v10774_v1  ;;  %v10781_v58 = vpop.eup %6119  ;;  %6139 = vtanh.f32 %v3060_v26  ;;  %v2195_v19 = vadd.f32 %v2067_v54, %v14821_v21  ;;  %v2257_v52 = vadd.f32 %v2193_v63, %v14822_v15  ;;  %v3049_v6 = vsub.f32 %v6987_v41, %v10742_v28  ;;  %v14825_v26 = vld [vmem:[#allocation472_spill] sm:$0xff]  ;;  %v14828_v15 = vld [vmem:[#allocation357_spill] sm:$0xff] }
 0x3dd   : > { %14818 = vst [vmem:[#allocation261_spill] sm:$0xff] %v10781_v58  ;;  %v10789_v43 = vpop.eup %6121  ;;  %6141 = vtanh.f32 %v3045_v31  ;;  %v10798_v13 = vadd.f32 %v2255_v35, %v10341_v61  ;;  %v2053_v60 = vadd.f32 %v14825_v26, %v14824_v23  ;;  %v3050_v24 = vsub.f32 %v6991_v45, %v10742_v28  ;;  %v14827_v63 = vld [vmem:[#allocation76_spill] sm:$0xff]  ;;  %v14829_v23 = vld [vmem:[#allocation238_spill] sm:$0xff]  ;;  %v14830_v26 = vld [vmem:[#allocation473_spill] sm:$0xff] }
 0x3de   : > { %14820 = vst [vmem:[#allocation170_spill] sm:$0xff] %v10789_v43  ;;  %v10795_v58 = vpop.eup %6123  ;;  %6143 = vtanh.f32 %v3046_v32  ;;  %v10804_v43 = vpop.permute.xlu1 %2646  ;;  %v2196_v21 = vadd.f32 %v2068_v49, %v14827_v63  ;;  %v2258_v31 = vadd.f32 %v2194_v16, %v14828_v15  ;;  %v10813_v35 = vadd.f32 %v2256_v7, %v10355_v51  ;;  %v14832_v63 = vld [vmem:[#allocation481_spill] sm:$0xff]  ;;  %v14834_v7 = vld [vmem:[#allocation482_spill] sm:$0xff] }
 0x3df   : > { %14823 = vst [vmem:[#allocation405_spill] sm:$0xff] %v10795_v58  ;;  %v10806_v54 = vpop.eup %6125  ;;  %v3051_v58 = vsub.f32 %v6995_v48, %v10742_v28  ;;  %6145 = vtanh.f32 %v3047_v20  ;;  %v2054_v1 = vadd.f32 %v14830_v26, %v14829_v23  ;;  %v3052_v32 = vsub.f32 %v6998_v50, %v10742_v28  ;;  %v14838_v26 = vld [vmem:[#allocation483_spill] sm:$0xff] }
 0x3e0   : > { %14826 = vst [vmem:[#allocation171_spill] sm:$0xff] %v10806_v54  ;;  %v6128_v61 = vpop.eup %6127  ;;  %6147 = vtanh.f32 %v3048_v53  ;;  %v14831_v54 = vld [vmem:[#allocation123_spill] sm:$0xff]  ;;  %v3069_v20 = vsub.f32 %v6977_v29, %v10804_v43  ;;  %v10826_v51 = vadd.f32 %v2257_v52, %v10367_v27  ;;  %v3070_v28 = vsub.f32 %v6980_v34, %v10804_v43  ;;  %v14840_v52 = vld [vmem:[#allocation77_spill] sm:$0xff] }
 0x3e1   : > { %v6130_v11 = vpop.eup %6129  ;;  %v2259_v49 = vadd.f32 %v2195_v19, %v14831_v54  ;;  %v10821_v16 = vadd.f32 %v6128_v61, %v14832_v63  ;;  %6149 = vtanh.f32 %v3049_v6  ;;  %v14836_v19 = vld [vmem:[#allocation239_spill] sm:$0xff]  ;;  %v14837_v54 = vld [vmem:[#allocation474_spill] sm:$0xff]  ;;  %v3071_v63 = vsub.f32 %v6983_v37, %v10804_v43 }
 0x3e2   : > { %v6132_v15 = vpop.eup %6131  ;;  %v10829_v23 = vadd.f32 %v6130_v11, %v14834_v7  ;;  %6151 = vtanh.f32 %v3050_v24  ;;  %v2055_v61 = vadd.f32 %v14837_v54, %v14836_v19  ;;  %v14841_v11 = vld [vmem:[#allocation484_spill] sm:$0xff]  ;;  %v3072_v24 = vsub.f32 %v6985_v39, %v10804_v43 }
 0x3e3   : > { %14833 = vst [vmem:[#allocation406_spill] sm:$0xff] %v10821_v16  ;;  %v6134_v53 = vpop.eup %6133  ;;  %v10836_v6 = vadd.f32 %v6132_v15, %v14838_v26  ;;  %6153 = vtanh.f32 %v3051_v58  ;;  %v2181_v16 = vadd.f32 %v2053_v60, %v14840_v52  ;;  %v10847_v19 = vadd.f32 %v2196_v21, %v14843_v25  ;;  %v14844_v15 = vld [vmem:[#allocation485_spill] sm:$0xff]  ;;  %v10862_v25 = vpop.permute.xlu0 %2641 }
 0x3e4   : > { %14835 = vst [vmem:[#allocation172_spill] sm:$0xff] %v10829_v23  ;;  %v6136_v27 = vpop.eup %6135  ;;  %v10842_v7 = vadd.f32 %v6134_v53, %v14841_v11  ;;  %6155 = vtanh.f32 %v3052_v32  ;;  %v3073_v58 = vsub.f32 %v6987_v41, %v10804_v43  ;;  %v10855_v60 = vadd.f32 %v2258_v31, %v10381_v4  ;;  %v14846_v53 = vld [vmem:[#allocation486_spill] sm:$0xff]  ;;  %v14850_v11 = vld [vmem:[#allocation475_spill] sm:$0xff] }
 0x3e5   : > { %14839 = vst [vmem:[#allocation407_spill] sm:$0xff] %v10836_v6  ;;  %v6138_v23 = vpop.eup %6137  ;;  %v10850_v54 = vadd.f32 %v6136_v27, %v14844_v15  ;;  %6157 = vtanh.f32 %v3069_v20  ;;  %v3074_v52 = vsub.f32 %v6991_v45, %v10804_v43  ;;  %v14849_v27 = vld [vmem:[#allocation240_spill] sm:$0xff]  ;;  %v3075_v4 = vsub.f32 %v6995_v48, %v10804_v43  ;;  %v14855_v6 = vld [vmem:[#allocation241_spill] sm:$0xff] }
 0x3e6   : > { %14842 = vst [vmem:[#allocation25_spill] sm:$0xff] %v10842_v7  ;;  %v6140_v26 = vpop.eup %6139  ;;  %v10858_v32 = vadd.f32 %v6138_v23, %v14846_v53  ;;  %6159 = vtanh.f32 %v3070_v28  ;;  %v2056_v15 = vadd.f32 %v14850_v11, %v14849_v27  ;;  %v10874_v23 = vadd.f32 %v2259_v49, %v10396_v57  ;;  %v14854_v53 = vld [vmem:[#allocation314_spill] sm:$0xff]  ;;  %v14856_v27 = vld [vmem:[#allocation476_spill] sm:$0xff]  ;;  %v14859_v57 = vld [vmem:[#allocation315_spill] sm:$0xff] }
 0x3e7   : > { %14845 = vst [vmem:[#allocation26_spill] sm:$0xff] %v10850_v54  ;;  %v10864_v21 = vpop.eup %6141  ;;  %v14851_v54 = vld [vmem:[#allocation487_spill] sm:$0xff]  ;;  %6161 = vtanh.f32 %v3071_v63  ;;  %v2182_v28 = vadd.f32 %v2054_v1, %v14854_v53  ;;  %v2057_v11 = vadd.f32 %v14856_v27, %v14855_v6  ;;  %v3061_v63 = vsub.f32 %v6977_v29, %v10862_v25  ;;  %v14862_v53 = vld [vmem:[#allocation125_spill] sm:$0xff] }
 0x3e8   : > { %14847 = vst [vmem:[#allocation173_spill] sm:$0xff] %v10858_v32  ;;  %14848 = vst [vmem:[#allocation408_spill] sm:$0xff] %v10864_v21  ;;  %v10869_v20 = vadd.f32 %v6140_v26, %v14851_v54  ;;  %v6144_v31 = vpop.eup %6143  ;;  %v3076_v32 = vsub.f32 %v6998_v50, %v10804_v43  ;;  %6163 = vtanh.f32 %v3072_v24  ;;  %v14857_v54 = vld [vmem:[#allocation489_spill] sm:$0xff]  ;;  %v2183_v49 = vadd.f32 %v2055_v61, %v14859_v57  ;;  %v14860_v21 = vld [vmem:[#allocation490_spill] sm:$0xff] }
 0x3e9   : > { %14853 = vst [vmem:[#allocation409_spill] sm:$0xff] %v10874_v23  ;;  %v6146_v7 = vpop.eup %6145  ;;  %v10882_v26 = vadd.f32 %v6144_v31, %v14857_v54  ;;  %6165 = vtanh.f32 %v3073_v58  ;;  %v3062_v43 = vsub.f32 %v6980_v34, %v10862_v25  ;;  %v2245_v6 = vadd.f32 %v2181_v16, %v14862_v53  ;;  %v14863_v27 = vld [vmem:[#allocation491_spill] sm:$0xff]  ;;  %v14866_v61 = vld [vmem:[#allocation477_spill] sm:$0xff]  ;;  %v14872_v23 = vld [vmem:[#allocation126_spill] sm:$0xff] }
 0x3ea   : > { %14852 = vst [vmem:[#allocation174_spill] sm:$0xff] %v10869_v20  ;;  %v6148_v20 = vpop.eup %6147  ;;  %v10888_v1 = vadd.f32 %v6146_v7, %v14860_v21  ;;  %6167 = vtanh.f32 %v3074_v52  ;;  %v3063_v58 = vsub.f32 %v6983_v37, %v10862_v25  ;;  %v14867_v7 = vld [vmem:[#allocation492_spill] sm:$0xff]  ;;  %v3064_v52 = vsub.f32 %v6985_v39, %v10862_v25  ;;  %v14869_v16 = vld [vmem:[#allocation79_spill] sm:$0xff] }
 0x3eb   : > { %14858 = vst [vmem:[#allocation175_spill] sm:$0xff] %v10882_v26  ;;  %v6150_v24 = vpop.eup %6149  ;;  %v10894_v31 = vadd.f32 %v6148_v20, %v14863_v27  ;;  %6169 = vtanh.f32 %v3075_v4  ;;  %v14865_v26 = vld [vmem:[#allocation242_spill] sm:$0xff]  ;;  %v2184_v53 = vadd.f32 %v2056_v15, %v14869_v16  ;;  %v14870_v20 = vld [vmem:[#allocation493_spill] sm:$0xff]  ;;  %v3065_v4 = vsub.f32 %v6987_v41, %v10862_v25 }
 0x3ec   : > { %14861 = vst [vmem:[#allocation410_spill] sm:$0xff] %v10888_v1  ;;  %v6152_v54 = vpop.eup %6151  ;;  %v2058_v57 = vadd.f32 %v14866_v61, %v14865_v26  ;;  %v10901_v21 = vadd.f32 %v6150_v24, %v14867_v7  ;;  %6171 = vtanh.f32 %v3076_v32  ;;  %v2246_v26 = vadd.f32 %v2182_v28, %v14872_v23  ;;  %v14873_v61 = vld [vmem:[#allocation494_spill] sm:$0xff]  ;;  %v10917_v7 = vpop.permute.xlu1 %2656 }
 0x3ed   : > { %14864 = vst [vmem:[#allocation263_spill] sm:$0xff] %v10894_v31  ;;  %v6154_v1 = vpop.eup %6153  ;;  %v10907_v27 = vadd.f32 %v6152_v54, %v14870_v20  ;;  %6173 = vtanh.f32 %v3061_v63  ;;  %v3066_v32 = vsub.f32 %v6991_v45, %v10862_v25  ;;  %v14876_v54 = vld [vmem:[#allocation243_spill] sm:$0xff]  ;;  %v14877_v16 = vld [vmem:[#allocation478_spill] sm:$0xff]  ;;  %v3067_v23 = vsub.f32 %v6995_v48, %v10862_v25  ;;  %v14881_v63 = vld [vmem:[#allocation80_spill] sm:$0xff] }
 0x3ee   : > { %14868 = vst [vmem:[#allocation264_spill] sm:$0xff] %v10901_v21  ;;  %v6156_v31 = vpop.eup %6155  ;;  %v10913_v24 = vadd.f32 %v6154_v1, %v14873_v61  ;;  %6175 = vtanh.f32 %v3062_v43  ;;  %v2059_v20 = vadd.f32 %v14877_v16, %v14876_v54  ;;  %v2185_v1 = vadd.f32 %v2057_v11, %v14881_v63  ;;  %v14882_v61 = vld [vmem:[#allocation361_spill] sm:$0xff]  ;;  %v14884_v54 = vld [vmem:[#allocation318_spill] sm:$0xff]  ;;  %v14886_v11 = vld [vmem:[#allocation244_spill] sm:$0xff] }
 0x3ef   : > { %14871 = vst [vmem:[#allocation28_spill] sm:$0xff] %v10907_v27  ;;  %v10919_v15 = vpop.eup %6157  ;;  %v14878_v27 = vld [vmem:[#allocation495_spill] sm:$0xff]  ;;  %6177 = vtanh.f32 %v3063_v58  ;;  %v2247_v43 = vadd.f32 %v2183_v49, %v14882_v61  ;;  %v2186_v16 = vadd.f32 %v2058_v57, %v14884_v54  ;;  %v3085_v58 = vsub.f32 %v6977_v29, %v10917_v7  ;;  %v14888_v61 = vld [vmem:[#allocation128_spill] sm:$0xff]  ;;  %v14889_v57 = vld [vmem:[#allocation82_spill] sm:$0xff] }
 0x3f0   : > { %14874 = vst [vmem:[#allocation176_spill] sm:$0xff] %v10913_v24  ;;  %14875 = vst [vmem:[#allocation411_spill] sm:$0xff] %v10919_v15  ;;  %v10924_v21 = vadd.f32 %v6156_v31, %v14878_v27  ;;  %v10928_v28 = vpop.eup %6159  ;;  %v3068_v24 = vsub.f32 %v6998_v50, %v10862_v25  ;;  %6179 = vtanh.f32 %v3064_v52  ;;  %v10938_v31 = vadd.f32 %v2245_v6, %v10415_v5  ;;  %v14887_v63 = vld [vmem:[#allocation479_spill] sm:$0xff] }
 0x3f1   : > { %14880 = vst [vmem:[#allocation412_spill] sm:$0xff] %v10928_v28  ;;  %v10934_v15 = vpop.eup %6161  ;;  %6181 = vtanh.f32 %v3065_v4  ;;  %v2060_v49 = vadd.f32 %v14887_v63, %v14886_v11  ;;  %v3086_v25 = vsub.f32 %v6980_v34, %v10917_v7  ;;  %v2187_v54 = vadd.f32 %v2059_v20, %v14889_v57  ;;  %v14891_v28 = vld [vmem:[#allocation500_spill] sm:$0xff]  ;;  %v14893_v63 = vld [vmem:[#allocation365_spill] sm:$0xff] }
 0x3f2   : > { %14879 = vst [vmem:[#allocation177_spill] sm:$0xff] %v10924_v21  ;;  %14883 = vst [vmem:[#allocation29_spill] sm:$0xff] %v10934_v15  ;;  %v10942_v27 = vpop.eup %6163  ;;  %v2248_v21 = vadd.f32 %v2184_v53, %v14888_v61  ;;  %6183 = vtanh.f32 %v3066_v32  ;;  %v2278_v5 = vadd.f32 %v2246_v26, %v10423_v56  ;;  %v3087_v6 = vsub.f32 %v6983_v37, %v10917_v7  ;;  %v14894_v20 = vld [vmem:[#allocation501_spill] sm:$0xff] }
 0x3f3   : > { %14885 = vst [vmem:[#allocation266_spill] sm:$0xff] %v10942_v27  ;;  %v6166_v52 = vpop.eup %6165  ;;  %6185 = vtanh.f32 %v3067_v23  ;;  %v14890_v27 = vld [vmem:[#allocation129_spill] sm:$0xff]  ;;  %v3088_v53 = vsub.f32 %v6985_v39, %v10917_v7  ;;  %v2250_v61 = vadd.f32 %v2186_v16, %v14893_v63  ;;  %v3089_v56 = vsub.f32 %v6987_v41, %v10917_v7  ;;  %v14899_v63 = vld [vmem:[#allocation503_spill] sm:$0xff] }
 0x3f4   : > { %v6168_v4 = vpop.eup %6167  ;;  %v2249_v15 = vadd.f32 %v2185_v1, %v14890_v27  ;;  %v10955_v11 = vadd.f32 %v6166_v52, %v14891_v28  ;;  %6187 = vtanh.f32 %v3068_v24  ;;  %v2279_v23 = vadd.f32 %v2247_v43, %v10439_v42  ;;  %v14896_v1 = vld [vmem:[#allocation502_spill] sm:$0xff]  ;;  %v10971_v27 = vpop.permute.xlu0 %2651  ;;  %v14898_v52 = vld [vmem:[#allocation83_spill] sm:$0xff]  ;;  %v14902_v43 = vld [vmem:[#allocation132_spill] sm:$0xff] }
 0x3f5   : > { %v6170_v32 = vpop.eup %6169  ;;  %v10961_v57 = vadd.f32 %v6168_v4, %v14894_v20  ;;  %6189 = vtanh.f32 %v3085_v58  ;;  %v3090_v24 = vsub.f32 %v6991_v45, %v10917_v7  ;;  %v2188_v4 = vadd.f32 %v2060_v49, %v14898_v52  ;;  %v10993_v52 = vpop.permute.xlu1 %2666 }
 0x3f6   : > { %14892 = vst [vmem:[#allocation267_spill] sm:$0xff] %v10955_v11  ;;  %v6172_v26 = vpop.eup %6171  ;;  %v10967_v28 = vadd.f32 %v6170_v32, %v14896_v1  ;;  %6191 = vtanh.f32 %v3086_v25  ;;  %v3091_v58 = vsub.f32 %v6995_v48, %v10917_v7  ;;  %v2251_v32 = vadd.f32 %v2187_v54, %v14902_v43 }
 0x3f7   : > { %14895 = vst [vmem:[#allocation178_spill] sm:$0xff] %v10961_v57  ;;  %v10973_v16 = vpop.eup %6173  ;;  %v10977_v20 = vadd.f32 %v6172_v26, %v14899_v63  ;;  %6193 = vtanh.f32 %v3087_v6  ;;  %v2280_v1 = vadd.f32 %v2248_v21, %v10455_v10  ;;  %v3092_v25 = vsub.f32 %v6998_v50, %v10917_v7 }
 0x3f8   : > { %14897 = vst [vmem:[#allocation413_spill] sm:$0xff] %v10967_v28  ;;  %v10981_v42 = vpop.eup %6175  ;;  %6195 = vtanh.f32 %v3088_v53  ;;  %v2281_v49 = vadd.f32 %v2249_v15, %v10465_v18  ;;  %v2282_v26 = vadd.f32 %v2250_v61, %v10480_v30  ;;  %v3077_v6 = vsub.f32 %v6977_v29, %v10971_v27  ;;  %v14905_v61 = vld [vmem:[#allocation508_spill] sm:$0xff] }
 0x3f9   : > { %14900 = vst [vmem:[#allocation181_spill] sm:$0xff] %v10977_v20  ;;  %14901 = vst [vmem:[#allocation416_spill] sm:$0xff] %v10981_v42  ;;  %v10987_v28 = vpop.eup %6177  ;;  %6197 = vtanh.f32 %v3089_v56  ;;  %v3078_v10 = vsub.f32 %v6980_v34, %v10971_v27  ;;  %v3079_v21 = vsub.f32 %v6983_v37, %v10971_v27  ;;  %v3080_v18 = vsub.f32 %v6985_v39, %v10971_v27  ;;  %v14907_v20 = vld [vmem:[#allocation509_spill] sm:$0xff]  ;;  %v14911_v42 = vld [vmem:[#allocation511_spill] sm:$0xff] }
 0x3fa   : > { %14903 = vst [vmem:[#allocation31_spill] sm:$0xff] %v10987_v28  ;;  %v10995_v63 = vpop.eup %6179  ;;  %6199 = vtanh.f32 %v3090_v24  ;;  %v3081_v30 = vsub.f32 %v6987_v41, %v10971_v27  ;;  %v3082_v15 = vsub.f32 %v6991_v45, %v10971_v27  ;;  %v3083_v54 = vsub.f32 %v6995_v48, %v10971_v27 }
 0x3fb   : > { %14904 = vst [vmem:[#allocation182_spill] sm:$0xff] %v10995_v63  ;;  %v6182_v7 = vpop.eup %6181  ;;  %6201 = vtanh.f32 %v3091_v58  ;;  %v3084_v24 = vsub.f32 %v6998_v50, %v10971_v27  ;;  %v3101_v58 = vsub.f32 %v6977_v29, %v10993_v52  ;;  %v2293_v11 = vadd.f32 %v10938_v31, %v10652_v14 }
 0x3fc   : > { %v6184_v53 = vpop.eup %6183  ;;  %v11010_v56 = vadd.f32 %v6182_v7, %v14905_v61  ;;  %6203 = vtanh.f32 %v3092_v25  ;;  %v2294_v63 = vadd.f32 %v2278_v5, %v10667_v36  ;;  %v14909_v7 = vld [vmem:[#allocation510_spill] sm:$0xff]  ;;  %v2295_v27 = vadd.f32 %v2279_v23, %v10684_v9 }
 0x3fd   : > { %v6186_v43 = vpop.eup %6185  ;;  %v11017_v57 = vadd.f32 %v6184_v53, %v14907_v20  ;;  %6205 = vtanh.f32 %v3077_v6  ;;  %v2296_v25 = vadd.f32 %v2280_v1, %v10699_v62  ;;  %v2301_v14 = vadd.f32 %v10770_v33, %v10534_v22 }
 0x3fe   : > { %14906 = vst [vmem:[#allocation417_spill] sm:$0xff] %v11010_v56  ;;  %v6188_v28 = vpop.eup %6187  ;;  %v11023_v61 = vadd.f32 %v6186_v43, %v14909_v7  ;;  %6207 = vtanh.f32 %v3078_v10  ;;  %v2302_v36 = vadd.f32 %v10785_v8, %v10549_v44  ;;  %v2297_v5 = vadd.f32 %v2281_v49, %v10716_v55  ;;  %v14913_v55 = vld [vmem:[#allocation133_spill] sm:$0xff] }
 0x3ff   : > { %14908 = vst [vmem:[#allocation179_spill] sm:$0xff] %v11017_v57  ;;  %v11027_v56 = vpop.eup %6189  ;;  %v11030_v20 = vadd.f32 %v6188_v28, %v14911_v42  ;;  %6209 = vtanh.f32 %v3079_v21  ;;  %v2303_v9 = vadd.f32 %v10798_v13, %v10566_v0  ;;  %v2304_v62 = vadd.f32 %v10813_v35, %v10581_v2 }
 0x400   : > { %14910 = vst [vmem:[#allocation414_spill] sm:$0xff] %v11023_v61  ;;  %v11036_v31 = vpop.eup %6191  ;;  %6211 = vtanh.f32 %v3080_v18  ;;  %v2298_v28 = vadd.f32 %v2282_v26, %v10747_v59  ;;  %v2305_v22 = vadd.f32 %v10826_v51, %v10598_v38  ;;  %v2306_v44 = vadd.f32 %v10855_v60, %v10629_v40  ;;  %v14914_v18 = vld [vmem:[#allocation380_spill] sm:$0xff] }
 0x401   : > { %14912 = vst [vmem:[#allocation32_spill] sm:$0xff] %v11030_v20  ;;  %v11043_v23 = vpop.eup %6193  ;;  %6213 = vtanh.f32 %v3081_v30  ;;  %v2252_v8 = vadd.f32 %v2188_v4, %v14913_v55  ;;  %v2283_v0 = vadd.f32 %v2251_v32, %v10496_v3  ;;  %v3102_v2 = vsub.f32 %v6980_v34, %v10993_v52  ;;  %v14915_v30 = vld [vmem:[#allocation402_spill] sm:$0xff]  ;;  %v420_v55 = vld [vmem:[%s6879_s30] sm:$0xff] }
 0x402   : > { %v11050_v33 = vpop.eup %6195  ;;  %6215 = vtanh.f32 %v3082_v15  ;;  %v3103_v59 = vsub.f32 %v6983_v37, %v10993_v52  ;;  %v11060_v38 = vadd.f32 %v2301_v14, %v2293_v11  ;;  %v11062_v35 = vadd.f32 %v2302_v36, %v2294_v63  ;;  %v11087_v63 = vpop.permute.xlu0 %2661 }
 0x403   : > { %v11056_v13 = vpop.eup %6197  ;;  %6217 = vtanh.f32 %v3083_v54  ;;  %v3104_v3 = vsub.f32 %v6985_v39, %v10993_v52  ;;  %v11068_v51 = vadd.f32 %v2303_v9, %v2295_v27  ;;  %v11070_v60 = vadd.f32 %v2304_v62, %v2296_v25 }
 0x404   : > { %v11064_v40 = vpop.eup %6199  ;;  %6219 = vtanh.f32 %v3084_v24  ;;  %v3105_v42 = vsub.f32 %v6987_v41, %v10993_v52  ;;  %v11076_v11 = vadd.f32 %v2305_v22, %v2297_v5  ;;  %v11078_v32 = vadd.f32 %v2306_v44, %v2298_v28  ;;  %v14918_v24 = vld [vmem:[#allocation381_spill] sm:$0xff] }
 0x405   : > { %v11072_v4 = vpop.eup %6201  ;;  %6221 = vtanh.f32 %v3101_v58  ;;  %v2292_v49 = vadd.f32 %v10847_v19, %v10405_v17  ;;  %v2284_v26 = vadd.f32 %v2252_v8, %v10511_v46  ;;  %v3106_v6 = vsub.f32 %v6991_v45, %v10993_v52  ;;  %v14916_v46 = vld [vmem:[#allocation374_spill] sm:$0xff]  ;;  %v14917_v19 = vld [vmem:[#allocation255_spill] sm:$0xff] }
 0x406   : > { %v11080_v1 = vpop.eup %6203  ;;  %6223 = vtanh.f32 %v3102_v2  ;;  %v2275_v21 = vadd.f32 %v10595_v12, %v10198_v47  ;;  %v2267_v15 = vadd.f32 %v14915_v30, %v14914_v18  ;;  %v3107_v54 = vsub.f32 %v6995_v48, %v10993_v52  ;;  %v14919_v58 = vld [vmem:[#allocation22_spill] sm:$0xff] }
 0x407   : > { %v11089_v10 = vpop.eup %6205  ;;  %6225 = vtanh.f32 %v3103_v59  ;;  %v2276_v53 = vadd.f32 %v14917_v19, %v14916_v46  ;;  %v2268_v43 = vadd.f32 %v14919_v58, %v14918_v24  ;;  %v3108_v7 = vsub.f32 %v6998_v50, %v10993_v52  ;;  %v14920_v52 = vld [vmem:[#allocation409_spill] sm:$0xff]  ;;  %v421_v8 = vld [vmem:[%s6879_s30 + $0x8] sm:$0xff]  ;;  %v422_v59 = vld [vmem:[%s6879_s30 + $0x10] sm:$0xff] }
 0x408   : > { %v11097_v17 = vpop.eup %6207  ;;  %6227 = vtanh.f32 %v3104_v3  ;;  %v3093_v12 = vsub.f32 %v6977_v29, %v11087_v63  ;;  %v3094_v27 = vsub.f32 %v6980_v34, %v11087_v63  ;;  %v2299_v25 = vadd.f32 %v2283_v0, %v2267_v15  ;;  %v423_v3 = vld [vmem:[%s6879_s30 + $0x18] sm:$0xff]  ;;  %v426_v46 = vld [vmem:[%s6879_s30 + $0x30] sm:$0xff] }
 0x409   : > { %v11105_v47 = vpop.eup %6209  ;;  %6229 = vtanh.f32 %v3105_v42  ;;  %v2300_v36 = vadd.f32 %v2284_v26, %v2268_v43  ;;  %v2307_v5 = vadd.f32 %v14920_v52, %v2275_v21  ;;  %v2308_v9 = vadd.f32 %v2292_v49, %v2276_v53  ;;  %v11134_v26 = vpop.permute.xlu1 %2676  ;;  %v425_v21 = vld [vmem:[%s6879_s30 + $0x28] sm:$0xff]  ;;  %v427_v19 = vld [vmem:[%s6879_s30 + $0x38] sm:$0xff] }
 0x40a   : > { %v11111_v14 = vpop.eup %6211  ;;  %6231 = vtanh.f32 %v3106_v6  ;;  %v3095_v28 = vsub.f32 %v6983_v37, %v11087_v63  ;;  %v3096_v44 = vsub.f32 %v6985_v39, %v11087_v63  ;;  %v3097_v2 = vsub.f32 %v6987_v41, %v11087_v63  ;;  %v424_v6 = vld [vmem:[%s6879_s30 + $0x20] sm:$0xff] }
 0x40b   : > { %v11114_v62 = vpop.eup %6213  ;;  %6233 = vtanh.f32 %v3107_v54  ;;  %v3098_v49 = vsub.f32 %v6991_v45, %v11087_v63  ;;  %v2315_v18 = vadd.f32 %v2307_v5, %v2299_v25  ;;  %v2316_v30 = vadd.f32 %v2308_v9, %v2300_v36 }
 0x40c   : > { %v11118_v22 = vpop.eup %6215  ;;  %6235 = vtanh.f32 %v3108_v7  ;;  %v3099_v54 = vsub.f32 %v6995_v48, %v11087_v63  ;;  %v2317_v53 = vadd.f32 %v11060_v38, %v420_v55  ;;  %v2318_v24 = vadd.f32 %v11062_v35, %v421_v8 }
 0x40d   : > { %v11124_v0 = vpop.eup %6217  ;;  %6237 = vtanh.f32 %v3093_v12  ;;  %v3100_v43 = vsub.f32 %v6998_v50, %v11087_v63  ;;  %v2319_v7 = vadd.f32 %v11068_v51, %v422_v59  ;;  %v2320_v12 = vadd.f32 %v11070_v60, %v423_v3 }
 0x40e   : > { %v11130_v42 = vpop.eup %6219  ;;  %6239 = vtanh.f32 %v3094_v27  ;;  %v3117_v38 = vsub.f32 %v6977_v29, %v11134_v26  ;;  %v2321_v35 = vadd.f32 %v11076_v11, %v424_v6  ;;  %v2322_v25 = vadd.f32 %v11078_v32, %v425_v21  ;;  %2325 = vst [vmem:[%s6879_s30] sm:$0xff] %v2317_v53  ;;  %2326 = vst [vmem:[%s6879_s30 + $0x8] sm:$0xff] %v2318_v24  ;;  %v11170_v32 = vpop.permute.xlu0 %2671 }
 0x40f   : > { %v11138_v15 = vpop.eup %6221  ;;  %6241 = vtanh.f32 %v3095_v28  ;;  %v3118_v51 = vsub.f32 %v6980_v34, %v11134_v26  ;;  %v2323_v60 = vadd.f32 %v2315_v18, %v426_v46  ;;  %v2324_v36 = vadd.f32 %v2316_v30, %v427_v19  ;;  %2327 = vst [vmem:[%s6879_s30 + $0x10] sm:$0xff] %v2319_v7  ;;  %2328 = vst [vmem:[%s6879_s30 + $0x18] sm:$0xff] %v2320_v12 }
 0x410   : > { %v11146_v58 = vpop.eup %6223  ;;  %6243 = vtanh.f32 %v3096_v44  ;;  %v3119_v11 = vsub.f32 %v6983_v37, %v11134_v26  ;;  %2329 = vst [vmem:[%s6879_s30 + $0x20] sm:$0xff] %v2321_v35  ;;  %2330 = vst [vmem:[%s6879_s30 + $0x28] sm:$0xff] %v2322_v25  ;;  %v3120_v9 = vsub.f32 %v6985_v39, %v11134_v26  ;;  %v3121_v44 = vsub.f32 %v6987_v41, %v11134_v26 }
 0x411   : > { %v11152_v27 = vpop.eup %6225  ;;  %6245 = vtanh.f32 %v3097_v2  ;;  %2331 = vst [vmem:[%s6879_s30 + $0x30] sm:$0xff] %v2323_v60  ;;  %2332 = vst [vmem:[%s6879_s30 + $0x38] sm:$0xff] %v2324_v36  ;;  %v3122_v8 = vsub.f32 %v6991_v45, %v11134_v26  ;;  %v11188_v2 = vpop.permute.xlu1 %2686  ;;  %v3123_v3 = vsub.f32 %v6995_v48, %v11134_v26  ;;  %v3124_v6 = vsub.f32 %v6998_v50, %v11134_v26 }
 0x412   : > { %v11160_v63 = vpop.eup %6227  ;;  %6247 = vtanh.f32 %v3098_v49  ;;  %v3109_v18 = vsub.f32 %v6977_v29, %v11170_v32  ;;  %v3110_v30 = vsub.f32 %v6980_v34, %v11170_v32  ;;  %v11206_v46 = vpop.permute.xlu0 %2681  ;;  %v3112_v26 = vsub.f32 %v6985_v39, %v11170_v32 }
 0x413   : > { %v11166_v52 = vpop.eup %6229  ;;  %6249 = vtanh.f32 %v3099_v54  ;;  %v3111_v54 = vsub.f32 %v6983_v37, %v11170_v32  ;;  %v3113_v53 = vsub.f32 %v6987_v41, %v11170_v32  ;;  %v3114_v24 = vsub.f32 %v6991_v45, %v11170_v32 }
 0x414   : > { %v11174_v5 = vpop.eup %6231  ;;  %6251 = vtanh.f32 %v3100_v43  ;;  %v3115_v7 = vsub.f32 %v6995_v48, %v11170_v32  ;;  %v3116_v12 = vsub.f32 %v6998_v50, %v11170_v32  ;;  %v3134_v25 = vsub.f32 %v6980_v34, %v11188_v2 }
 0x415   : > { %v11180_v28 = vpop.eup %6233  ;;  %6253 = vtanh.f32 %v3117_v38  ;;  %v3133_v38 = vsub.f32 %v6977_v29, %v11188_v2  ;;  %v3136_v60 = vsub.f32 %v6985_v39, %v11188_v2  ;;  %v11232_v36 = vpop.permute.xlu1 %2696  ;;  %v3137_v32 = vsub.f32 %v6987_v41, %v11188_v2 }
 0x416   : > { %v11184_v55 = vpop.eup %6235  ;;  %6255 = vtanh.f32 %v3118_v51  ;;  %v3135_v51 = vsub.f32 %v6983_v37, %v11188_v2  ;;  %v11258_v61 = vpop.permute.xlu0 %2691 }
 0x417   : > { %v11190_v59 = vpop.eup %6237  ;;  %6257 = vtanh.f32 %v3119_v11 }
 0x418   : > { %v11194_v49 = vpop.eup %6239  ;;  %6259 = vtanh.f32 %v3120_v9 }
 0x419   : > { %v11198_v21 = vpop.eup %6241  ;;  %6261 = vtanh.f32 %v3121_v44 }
 0x41a   : > { %v11208_v19 = vpop.eup %6243  ;;  %6263 = vtanh.f32 %v3122_v8 }
 0x41b   : > { %v11216_v43 = vpop.eup %6245  ;;  %6265 = vtanh.f32 %v3123_v3 }
 0x41c   : > { %v11224_v35 = vpop.eup %6247  ;;  %6267 = vtanh.f32 %v3124_v6 }
 0x41d   : > { %v11234_v11 = vpop.eup %6249  ;;  %6269 = vtanh.f32 %v3109_v18  ;;  %v11284_v18 = vpop.permute.xlu1 %2706 }
 0x41e   : > { %v11242_v8 = vpop.eup %6251  ;;  %6271 = vtanh.f32 %v3110_v30 }
 0x41f   : > { %v11250_v20 = vpop.eup %6253  ;;  %6273 = vtanh.f32 %v3111_v54 }
 0x420   : > { %v11260_v3 = vpop.eup %6255  ;;  %6275 = vtanh.f32 %v3112_v26  ;;  %v11310_v26 = vpop.permute.xlu0 %2701 }
 0x421   : > { %v11268_v6 = vpop.eup %6257  ;;  %6277 = vtanh.f32 %v3113_v53 }
 0x422   : > { %v11276_v57 = vpop.eup %6259  ;;  %6279 = vtanh.f32 %v3114_v24  ;;  %v14930_v24 = vsub.f32 %v6991_v45, %v11188_v2 }
 0x423   : > { %v11286_v30 = vpop.eup %6261  ;;  %6281 = vtanh.f32 %v3115_v7  ;;  %v11336_v7 = vpop.permute.xlu1 %2716 }
 0x424   : > { %14921 = vst [vmem:[#allocation180_spill] sm:$0xff] %v11286_v30  ;;  %v11294_v44 = vpop.eup %6263  ;;  %6283 = vtanh.f32 %v3116_v12  ;;  %14927 = vst [vmem:[#allocation184_spill] sm:$0xff] %v11336_v7 }
 0x425   : > { %14922 = vst [vmem:[#allocation415_spill] sm:$0xff] %v11294_v44  ;;  %v11302_v30 = vpop.eup %6265  ;;  %6285 = vtanh.f32 %v3133_v38  ;;  %v14932_v38 = vsub.f32 %v6995_v48, %v11188_v2  ;;  %v14972_v44 = vld [vmem:[#allocation29_spill] sm:$0xff] }
 0x426   : > { %14923 = vst [vmem:[#allocation183_spill] sm:$0xff] %v11302_v30  ;;  %v11312_v53 = vpop.eup %6267  ;;  %6287 = vtanh.f32 %v3134_v25  ;;  %v14935_v25 = vsub.f32 %v6998_v50, %v11188_v2 }
 0x427   : > { %14924 = vst [vmem:[#allocation418_spill] sm:$0xff] %v11312_v53  ;;  %v11320_v9 = vpop.eup %6269  ;;  %6289 = vtanh.f32 %v3135_v51  ;;  %v14937_v51 = vsub.f32 %v6977_v29, %v11206_v46 }
 0x428   : > { %14925 = vst [vmem:[#allocation269_spill] sm:$0xff] %v11320_v9  ;;  %v11328_v53 = vpop.eup %6271  ;;  %6291 = vtanh.f32 %v3136_v60  ;;  %v14946_v60 = vld [vmem:[#allocation480_spill] sm:$0xff]  ;;  %v14947_v9 = vld [vmem:[#allocation171_spill] sm:$0xff] }
 0x429   : > { %14926 = vst [vmem:[#allocation35_spill] sm:$0xff] %v11328_v53  ;;  %v11338_v12 = vpop.eup %6273  ;;  %6293 = vtanh.f32 %v3137_v32 }
 0x42a   : > { %14928 = vst [vmem:[#allocation419_spill] sm:$0xff] %v11338_v12  ;;  %v11346_v54 = vpop.eup %6275  ;;  %6295 = vtanh.f32 %v14930_v24  ;;  %v14939_v24 = vsub.f32 %v6980_v34, %v11206_v46 }
 0x42b   : > { %14929 = vst [vmem:[#allocation272_spill] sm:$0xff] %v11346_v54  ;;  %v11357_v12 = vpop.eup %6277  ;;  %6297 = vtanh.f32 %v14932_v38  ;;  %v11368_v54 = vpop.permute.xlu0 %2711 }
 0x42c   : > { %14931 = vst [vmem:[#allocation270_spill] sm:$0xff] %v11357_v12  ;;  %14933 = vst [vmem:[#allocation185_spill] sm:$0xff] %v11368_v54  ;;  %v11370_v32 = vpop.eup %6279  ;;  %6299 = vtanh.f32 %v14935_v25  ;;  %v14942_v25 = vsub.f32 %v6983_v37, %v11206_v46 }
 0x42d   : > { %14934 = vst [vmem:[#allocation420_spill] sm:$0xff] %v11370_v32  ;;  %v11381_v12 = vpop.eup %6281  ;;  %6301 = vtanh.f32 %v14937_v51  ;;  %v14944_v32 = vsub.f32 %v6985_v39, %v11206_v46  ;;  %v11431_v51 = vadd.f32 %v14947_v9, %v14946_v60  ;;  %v14955_v9 = vsub.f32 %v6991_v45, %v11206_v46 }
 0x42e   : > { %14936 = vst [vmem:[#allocation34_spill] sm:$0xff] %v11381_v12  ;;  %v11392_v38 = vpop.eup %6283  ;;  %6303 = vtanh.f32 %v14939_v24  ;;  %v11403_v12 = vpop.permute.xlu1 %2726  ;;  %v14952_v24 = vld [vmem:[#allocation488_spill] sm:$0xff] }
 0x42f   : > { %14938 = vst [vmem:[#allocation273_spill] sm:$0xff] %v11392_v38  ;;  %14940 = vst [vmem:[#allocation186_spill] sm:$0xff] %v11403_v12  ;;  %v11405_v2 = vpop.eup %6285  ;;  %6305 = vtanh.f32 %v14942_v25  ;;  %v11440_v25 = vpop.permute.xlu0 %2721 }
 0x430   : > { %14941 = vst [vmem:[#allocation421_spill] sm:$0xff] %v11405_v2  ;;  %v11416_v38 = vpop.eup %6287  ;;  %6307 = vtanh.f32 %v14944_v32  ;;  %14948 = vst [vmem:[#allocation422_spill] sm:$0xff] %v11431_v51  ;;  %v14957_v2 = vsub.f32 %v6995_v48, %v11206_v46 }
 0x431   : > { %14943 = vst [vmem:[#allocation37_spill] sm:$0xff] %v11416_v38  ;;  %v11427_v53 = vpop.eup %6289  ;;  %v14949_v38 = vsub.f32 %v6987_v41, %v11206_v46  ;;  %14950 = vst [vmem:[#allocation38_spill] sm:$0xff] %v11440_v25  ;;  %v14976_v25 = vld [vmem:[#allocation266_spill] sm:$0xff] }
 0x432   : > { %14945 = vst [vmem:[#allocation187_spill] sm:$0xff] %v11427_v53  ;;  %v11442_v30 = vpop.eup %6291  ;;  %v14953_v53 = vld [vmem:[#allocation408_spill] sm:$0xff]  ;;  %v11488_v60 = vpop.permute.xlu1 %2736 }
 0x433   : > { %6309 = vtanh.f32 %v14949_v38  ;;  %14951 = vst [vmem:[#allocation188_spill] sm:$0xff] %v11442_v30  ;;  %v11446_v54 = vadd.f32 %v14953_v53, %v14952_v24  ;;  %v11455_v32 = vpop.eup %6293  ;;  %v14959_v38 = vsub.f32 %v6998_v50, %v11206_v46  ;;  %v14963_v53 = vsub.f32 %v6980_v34, %v11232_v36  ;;  %v14975_v46 = vld [vmem:[#allocation499_spill] sm:$0xff] }
 0x434   : > { %6311 = vtanh.f32 %v14955_v9  ;;  %14956 = vst [vmem:[#allocation275_spill] sm:$0xff] %v11455_v32  ;;  %v14961_v9 = vsub.f32 %v6977_v29, %v11232_v36  ;;  %v14969_v32 = vld [vmem:[#allocation412_spill] sm:$0xff]  ;;  %v14974_v24 = vsub.f32 %v6983_v37, %v11232_v36 }
 0x435   : > { %14954 = vst [vmem:[#allocation423_spill] sm:$0xff] %v11446_v54  ;;  %6313 = vtanh.f32 %v14957_v2  ;;  %v11466_v54 = vpop.eup %6295 }
 0x436   : > { %14958 = vst [vmem:[#allocation189_spill] sm:$0xff] %v11466_v54  ;;  %6315 = vtanh.f32 %v14959_v38  ;;  %v11477_v51 = vpop.eup %6297  ;;  %v14965_v38 = vld [vmem:[#allocation496_spill] sm:$0xff] }
 0x437   : > { %14960 = vst [vmem:[#allocation424_spill] sm:$0xff] %v11477_v51  ;;  %6317 = vtanh.f32 %v14961_v9  ;;  %v11490_v2 = vpop.eup %6299  ;;  %v14966_v51 = vld [vmem:[#allocation411_spill] sm:$0xff] }
 0x438   : > { %14962 = vst [vmem:[#allocation190_spill] sm:$0xff] %v11490_v2  ;;  %6319 = vtanh.f32 %v14963_v53  ;;  %v11501_v12 = vpop.eup %6301  ;;  %v11505_v54 = vadd.f32 %v14966_v51, %v14965_v38  ;;  %v14968_v2 = vld [vmem:[#allocation497_spill] sm:$0xff]  ;;  %v14971_v53 = vld [vmem:[#allocation498_spill] sm:$0xff]  ;;  %v14978_v51 = vsub.f32 %v6985_v39, %v11232_v36  ;;  %v14979_v38 = vld [vmem:[#allocation504_spill] sm:$0xff] }
 0x439   : > { %14964 = vst [vmem:[#allocation425_spill] sm:$0xff] %v11501_v12  ;;  %v11509_v30 = vadd.f32 %v14969_v32, %v14968_v2  ;;  %v11513_v7 = vadd.f32 %v14972_v44, %v14971_v53  ;;  %6321 = vtanh.f32 %v14974_v24  ;;  %v11518_v9 = vpop.eup %6303  ;;  %v11522_v12 = vadd.f32 %v14976_v25, %v14975_v46  ;;  %v14983_v44 = vld [vmem:[#allocation505_spill] sm:$0xff]  ;;  %v14987_v53 = vld [vmem:[#allocation506_spill] sm:$0xff] }
 0x43a   : > { %14967 = vst [vmem:[#allocation276_spill] sm:$0xff] %v11505_v54  ;;  %6323 = vtanh.f32 %v14978_v51  ;;  %v11531_v2 = vpop.eup %6305  ;;  %v11535_v24 = vadd.f32 %v10973_v16, %v14979_v38  ;;  %v14981_v25 = vsub.f32 %v6987_v41, %v11232_v36  ;;  %v11544_v51 = vpop.permute.xlu0 %2731  ;;  %v14986_v16 = vsub.f32 %v6991_v45, %v11232_v36 }
 0x43b   : > { %14970 = vst [vmem:[#allocation40_spill] sm:$0xff] %v11509_v30  ;;  %14973 = vst [vmem:[#allocation191_spill] sm:$0xff] %v11513_v7  ;;  %v11546_v32 = vpop.eup %6307 }
 0x43c   : > { %14977 = vst [vmem:[#allocation426_spill] sm:$0xff] %v11522_v12  ;;  %14980 = vst [vmem:[#allocation41_spill] sm:$0xff] %v11535_v24  ;;  %6325 = vtanh.f32 %v14981_v25  ;;  %v14984_v12 = vld [vmem:[#allocation416_spill] sm:$0xff]  ;;  %v14988_v24 = vld [vmem:[#allocation31_spill] sm:$0xff] }
 0x43d   : > { %14982 = vst [vmem:[#allocation192_spill] sm:$0xff] %v11544_v51  ;;  %v11550_v7 = vadd.f32 %v14984_v12, %v14983_v44  ;;  %6327 = vtanh.f32 %v14986_v16  ;;  %v11559_v46 = vpop.eup %6309  ;;  %v11563_v30 = vadd.f32 %v14988_v24, %v14987_v53  ;;  %v14990_v12 = vsub.f32 %v6995_v48, %v11232_v36  ;;  %v14992_v25 = vld [vmem:[#allocation182_spill] sm:$0xff]  ;;  %v15005_v51 = vld [vmem:[#allocation515_spill] sm:$0xff] }
 0x43e   : > { %v11572_v38 = vpop.eup %6311  ;;  %v14994_v24 = vsub.f32 %v6998_v50, %v11232_v36  ;;  %v14996_v16 = vsub.f32 %v6977_v29, %v11258_v61  ;;  %v15000_v36 = vld [vmem:[#allocation512_spill] sm:$0xff] }
 0x43f   : > { %14985 = vst [vmem:[#allocation427_spill] sm:$0xff] %v11550_v7  ;;  %14989 = vst [vmem:[#allocation278_spill] sm:$0xff] %v11563_v30  ;;  %6329 = vtanh.f32 %v14990_v12  ;;  %v14991_v7 = vld [vmem:[#allocation507_spill] sm:$0xff]  ;;  %v11585_v44 = vpop.eup %6313  ;;  %v14998_v12 = vsub.f32 %v6980_v34, %v11258_v61  ;;  %v11613_v30 = vadd.f32 %v11027_v56, %v15000_v36  ;;  %v15006_v56 = vld [vmem:[#allocation516_spill] sm:$0xff] }
 0x440   : > { %v11576_v54 = vadd.f32 %v14992_v25, %v14991_v7  ;;  %6331 = vtanh.f32 %v14994_v24  ;;  %14995 = vst [vmem:[#allocation428_spill] sm:$0xff] %v11585_v44  ;;  %v11596_v24 = vpop.eup %6315  ;;  %v15002_v44 = vld [vmem:[#allocation514_spill] sm:$0xff]  ;;  %v11634_v36 = vadd.f32 %v11056_v13, %v15006_v56  ;;  %v15012_v56 = vld [vmem:[#allocation519_spill] sm:$0xff] }
 0x441   : > { %6333 = vtanh.f32 %v14996_v16  ;;  %14997 = vst [vmem:[#allocation279_spill] sm:$0xff] %v11596_v24  ;;  %v11609_v25 = vpop.eup %6317  ;;  %v15001_v24 = vld [vmem:[#allocation513_spill] sm:$0xff]  ;;  %v11621_v53 = vadd.f32 %v11043_v23, %v15002_v44  ;;  %v15004_v16 = vsub.f32 %v6983_v37, %v11258_v61  ;;  %v15008_v23 = vsub.f32 %v6985_v39, %v11258_v61 }
 0x442   : > { %14993 = vst [vmem:[#allocation193_spill] sm:$0xff] %v11576_v54  ;;  %6335 = vtanh.f32 %v14998_v12  ;;  %v11607_v54 = vpop.permute.xlu1 %2746  ;;  %14999 = vst [vmem:[#allocation194_spill] sm:$0xff] %v11609_v25  ;;  %v11617_v12 = vadd.f32 %v11036_v31, %v15001_v24  ;;  %v11626_v7 = vpop.eup %6319  ;;  %v11630_v25 = vadd.f32 %v11050_v33, %v15005_v51  ;;  %v15007_v31 = vld [vmem:[#allocation517_spill] sm:$0xff]  ;;  %v15011_v33 = vsub.f32 %v6987_v41, %v11258_v61 }
 0x443   : > { %15003 = vst [vmem:[#allocation429_spill] sm:$0xff] %v11621_v53  ;;  %6337 = vtanh.f32 %v15004_v16  ;;  %v11638_v24 = vadd.f32 %v11064_v40, %v15007_v31  ;;  %v11643_v44 = vpop.eup %6321  ;;  %v15009_v16 = vld [vmem:[#allocation518_spill] sm:$0xff]  ;;  %v11660_v31 = vadd.f32 %v11080_v1, %v15012_v56  ;;  %v15016_v40 = vld [vmem:[#allocation520_spill] sm:$0xff]  ;;  %v15018_v1 = vsub.f32 %v6995_v48, %v11258_v61 }
 0x444   : > { %6339 = vtanh.f32 %v15008_v23  ;;  %v11647_v53 = vadd.f32 %v11072_v4, %v15009_v16  ;;  %v11656_v51 = vpop.eup %6323  ;;  %v15014_v4 = vsub.f32 %v6991_v45, %v11258_v61  ;;  %v15019_v16 = vld [vmem:[#allocation521_spill] sm:$0xff] }
 0x445   : > { %6341 = vtanh.f32 %v15011_v33  ;;  %15013 = vst [vmem:[#allocation195_spill] sm:$0xff] %v11660_v31  ;;  %v11669_v33 = vpop.permute.xlu0 %2741  ;;  %v11688_v31 = vadd.f32 %v11097_v17, %v15019_v16  ;;  %v15024_v17 = vsub.f32 %v6977_v29, %v11284_v18 }
 0x446   : > { %15010 = vst [vmem:[#allocation43_spill] sm:$0xff] %v11647_v53  ;;  %6343 = vtanh.f32 %v15014_v4  ;;  %15015 = vst [vmem:[#allocation430_spill] sm:$0xff] %v11669_v33  ;;  %v11671_v13 = vpop.eup %6325  ;;  %v11675_v53 = vadd.f32 %v11089_v10, %v15016_v40  ;;  %v15021_v10 = vsub.f32 %v6998_v50, %v11258_v61  ;;  %v15025_v40 = vld [vmem:[#allocation523_spill] sm:$0xff]  ;;  %v15040_v33 = vld [vmem:[#allocation17_spill] sm:$0xff] }
 0x447   : > { %6345 = vtanh.f32 %v15018_v1  ;;  %v11684_v23 = vpop.eup %6327  ;;  %15020 = vst [vmem:[#allocation196_spill] sm:$0xff] %v11688_v31  ;;  %v11714_v1 = vadd.f32 %v11111_v14, %v15025_v40  ;;  %v15030_v14 = vsub.f32 %v6983_v37, %v11284_v18  ;;  %v15035_v31 = vld [vmem:[#allocation527_spill] sm:$0xff] }
 0x448   : > { %15017 = vst [vmem:[#allocation44_spill] sm:$0xff] %v11675_v53  ;;  %6347 = vtanh.f32 %v15021_v10  ;;  %v15022_v53 = vld [vmem:[#allocation522_spill] sm:$0xff] }
 0x449   : > { %v11697_v56 = vpop.eup %6329  ;;  %v11701_v4 = vadd.f32 %v11105_v47, %v15022_v53  ;;  %6349 = vtanh.f32 %v15024_v17  ;;  %15026 = vst [vmem:[#allocation281_spill] sm:$0xff] %v11714_v1  ;;  %v15027_v47 = vsub.f32 %v6980_v34, %v11284_v18  ;;  %v15031_v1 = vld [vmem:[#allocation525_spill] sm:$0xff] }
 0x44a   : > { %v11710_v10 = vpop.eup %6331  ;;  %v11740_v17 = vadd.f32 %v11118_v22, %v15031_v1  ;;  %v11757_v22 = vadd.f32 %v11130_v42, %v15035_v31  ;;  %v15037_v1 = vld [vmem:[#allocation245_spill] sm:$0xff]  ;;  %v15042_v31 = vld [vmem:[#allocation18_spill] sm:$0xff] }
 0x44b   : > { %15023 = vst [vmem:[#allocation431_spill] sm:$0xff] %v11701_v4  ;;  %6351 = vtanh.f32 %v15027_v47  ;;  %v11723_v61 = vpop.eup %6333  ;;  %v15028_v4 = vld [vmem:[#allocation524_spill] sm:$0xff] }
 0x44c   : > { %v11727_v16 = vadd.f32 %v11114_v62, %v15028_v4  ;;  %6353 = vtanh.f32 %v15030_v14  ;;  %v11736_v53 = vpop.eup %6335  ;;  %15032 = vst [vmem:[#allocation432_spill] sm:$0xff] %v11740_v17  ;;  %v15033_v62 = vsub.f32 %v6985_v39, %v11284_v18  ;;  %15036 = vst [vmem:[#allocation198_spill] sm:$0xff] %v11757_v22  ;;  %v11761_v17 = vadd.f32 %v11138_v15, %v15037_v1  ;;  %v11766_v4 = vpop.permute.xlu1 %2756 }
 0x44d   : > { %v11749_v40 = vpop.eup %6337  ;;  %v11780_v15 = vadd.f32 %v11160_v63, %v15042_v31  ;;  %v15044_v1 = vsub.f32 %v6991_v45, %v11284_v18  ;;  %v15048_v63 = vsub.f32 %v6995_v48, %v11284_v18 }
 0x44e   : > { %15029 = vst [vmem:[#allocation197_spill] sm:$0xff] %v11727_v16  ;;  %6355 = vtanh.f32 %v15033_v62  ;;  %v15034_v16 = vld [vmem:[#allocation526_spill] sm:$0xff]  ;;  %15038 = vst [vmem:[#allocation433_spill] sm:$0xff] %v11761_v17  ;;  %v15039_v62 = vsub.f32 %v6987_v41, %v11284_v18  ;;  %v11768_v14 = vpop.eup %6339  ;;  %v15045_v17 = vld [vmem:[#allocation247_spill] sm:$0xff] }
 0x44f   : > { %v11753_v47 = vadd.f32 %v11124_v0, %v15034_v16  ;;  %v11772_v0 = vadd.f32 %v11146_v58, %v15040_v33  ;;  %v15041_v16 = vld [vmem:[#allocation246_spill] sm:$0xff]  ;;  %15043 = vst [vmem:[#allocation282_spill] sm:$0xff] %v11780_v15  ;;  %v11789_v22 = vadd.f32 %v11166_v52, %v15045_v17  ;;  %v15046_v58 = vld [vmem:[#allocation19_spill] sm:$0xff]  ;;  %v15050_v52 = vsub.f32 %v6998_v50, %v11284_v18 }
 0x450   : > { %6357 = vtanh.f32 %v15039_v62  ;;  %v11776_v42 = vadd.f32 %v11152_v27, %v15041_v16  ;;  %v11785_v62 = vpop.eup %6341  ;;  %v11793_v33 = vadd.f32 %v11174_v5, %v15046_v58  ;;  %v15047_v27 = vld [vmem:[#allocation248_spill] sm:$0xff]  ;;  %v15051_v58 = vld [vmem:[#allocation250_spill] sm:$0xff] }
 0x451   : > { %6359 = vtanh.f32 %v15044_v1  ;;  %v11797_v16 = vadd.f32 %v11180_v28, %v15047_v27  ;;  %v11802_v31 = vpop.eup %6343  ;;  %v15049_v1 = vld [vmem:[#allocation20_spill] sm:$0xff]  ;;  %v11819_v27 = vadd.f32 %v11190_v59, %v15051_v58  ;;  %v15055_v28 = vld [vmem:[#allocation11_spill] sm:$0xff]  ;;  %v15057_v59 = vsub.f32 %v6980_v34, %v11310_v26 }
 0x452   : > { %6361 = vtanh.f32 %v15048_v63  ;;  %v11806_v15 = vadd.f32 %v11184_v55, %v15049_v1  ;;  %v11815_v17 = vpop.eup %6345  ;;  %v15053_v55 = vsub.f32 %v6977_v29, %v11310_v26  ;;  %v11828_v1 = vpop.permute.xlu0 %2751  ;;  %v11834_v5 = vadd.f32 %v11194_v49, %v15055_v28  ;;  %v15059_v63 = vld [vmem:[#allocation253_spill] sm:$0xff] }
 0x453   : > { %6363 = vtanh.f32 %v15050_v52  ;;  %15052 = vst [vmem:[#allocation46_spill] sm:$0xff] %v11819_v27  ;;  %15054 = vst [vmem:[#allocation199_spill] sm:$0xff] %v11828_v1  ;;  %v11830_v52 = vpop.eup %6347  ;;  %v11847_v27 = vadd.f32 %v11198_v21, %v15059_v63  ;;  %v15061_v49 = vsub.f32 %v6983_v37, %v11310_v26  ;;  %v15065_v21 = vsub.f32 %v6985_v39, %v11310_v26  ;;  %v15173_v1 = vld [vmem:[#allocation424_spill] sm:$0xff] }
 0x454   : > { %6365 = vtanh.f32 %v15053_v55  ;;  %15056 = vst [vmem:[#allocation434_spill] sm:$0xff] %v11834_v5  ;;  %v11843_v18 = vpop.eup %6349  ;;  %v15063_v5 = vld [vmem:[#allocation14_spill] sm:$0xff] }
 0x455   : > { %6367 = vtanh.f32 %v15057_v59  ;;  %15058 = vst [vmem:[#allocation47_spill] sm:$0xff] %v11843_v18  ;;  %15060 = vst [vmem:[#allocation200_spill] sm:$0xff] %v11847_v27  ;;  %v11856_v58 = vpop.eup %6351  ;;  %v11860_v55 = vadd.f32 %v11208_v19, %v15063_v5  ;;  %v15067_v27 = vld [vmem:[#allocation256_spill] sm:$0xff]  ;;  %v15069_v19 = vsub.f32 %v6987_v41, %v11310_v26 }
 0x456   : > { %6369 = vtanh.f32 %v15061_v49  ;;  %15062 = vst [vmem:[#allocation435_spill] sm:$0xff] %v11856_v58  ;;  %v11869_v28 = vpop.eup %6353  ;;  %v11873_v59 = vadd.f32 %v11216_v43, %v15067_v27  ;;  %v15073_v43 = vsub.f32 %v6991_v45, %v11310_v26  ;;  %v11908_v27 = vpop.permute.xlu1 %2766 }
 0x457   : > { %15064 = vst [vmem:[#allocation284_spill] sm:$0xff] %v11860_v55  ;;  %6371 = vtanh.f32 %v15065_v21  ;;  %15066 = vst [vmem:[#allocation201_spill] sm:$0xff] %v11869_v28  ;;  %v15071_v55 = vld [vmem:[#allocation21_spill] sm:$0xff]  ;;  %v15172_v28 = vld [vmem:[#allocation295_spill] sm:$0xff] }
 0x458   : > { %15068 = vst [vmem:[#allocation436_spill] sm:$0xff] %v11873_v59  ;;  %6373 = vtanh.f32 %v15069_v19  ;;  %v11882_v63 = vpop.eup %6355  ;;  %v11886_v49 = vadd.f32 %v11224_v35, %v15071_v55  ;;  %v15075_v59 = vld [vmem:[#allocation259_spill] sm:$0xff]  ;;  %v15077_v35 = vsub.f32 %v6995_v48, %v11310_v26  ;;  %15078 = vst [vmem:[#allocation203_spill] sm:$0xff] %v11908_v27  ;;  %v15080_v19 = vld [vmem:[#allocation24_spill] sm:$0xff]  ;;  %v15086_v55 = vsub.f32 %v6998_v50, %v11310_v26 }
 0x459   : > { %15070 = vst [vmem:[#allocation285_spill] sm:$0xff] %v11882_v63  ;;  %6375 = vtanh.f32 %v15073_v43  ;;  %v11899_v21 = vadd.f32 %v11234_v11, %v15075_v59  ;;  %v15082_v11 = vld [vmem:[#allocation262_spill] sm:$0xff]  ;;  %v15088_v63 = vld [vmem:[#allocation265_spill] sm:$0xff]  ;;  %v12102_v58 = vadd.f32 %v15173_v1, %v15172_v28 }
 0x45a   : > { %15072 = vst [vmem:[#allocation202_spill] sm:$0xff] %v11886_v49  ;;  %v11895_v5 = vpop.eup %6357  ;;  %6377 = vtanh.f32 %v15077_v35  ;;  %v11918_v59 = vadd.f32 %v11250_v20, %v15082_v11  ;;  %v15092_v20 = vld [vmem:[#allocation268_spill] sm:$0xff]  ;;  %v15147_v27 = vld [vmem:[#allocation273_spill] sm:$0xff] }
 0x45b   : > { %15074 = vst [vmem:[#allocation437_spill] sm:$0xff] %v11895_v5  ;;  %15076 = vst [vmem:[#allocation49_spill] sm:$0xff] %v11899_v21  ;;  %v11910_v49 = vpop.eup %6359  ;;  %v11914_v5 = vadd.f32 %v11242_v8, %v15080_v19  ;;  %v15084_v21 = vld [vmem:[#allocation27_spill] sm:$0xff]  ;;  %6379 = vtanh.f32 %v15086_v55  ;;  %v15090_v8 = vld [vmem:[#allocation30_spill] sm:$0xff] }
 0x45c   : > { %15079 = vst [vmem:[#allocation438_spill] sm:$0xff] %v11910_v49  ;;  %15083 = vst [vmem:[#allocation204_spill] sm:$0xff] %v11918_v59  ;;  %v11922_v35 = vadd.f32 %v11260_v3, %v15084_v21  ;;  %v11927_v43 = vpop.eup %6361  ;;  %v11931_v49 = vadd.f32 %v11268_v6, %v15088_v63  ;;  %v11935_v19 = vadd.f32 %v11276_v57, %v15090_v8  ;;  %v15093_v11 = vld [vmem:[#allocation180_spill] sm:$0xff]  ;;  %v15098_v55 = vld [vmem:[#allocation33_spill] sm:$0xff] }
 0x45d   : > { %15081 = vst [vmem:[#allocation50_spill] sm:$0xff] %v11914_v5  ;;  %15087 = vst [vmem:[#allocation287_spill] sm:$0xff] %v11927_v43  ;;  %v11939_v59 = vadd.f32 %v15093_v11, %v15092_v20  ;;  %v15095_v3 = vld [vmem:[#allocation184_spill] sm:$0xff]  ;;  %v11944_v26 = vpop.eup %6363  ;;  %v15101_v6 = vld [vmem:[#allocation271_spill] sm:$0xff] }
 0x45e   : > { %15085 = vst [vmem:[#allocation439_spill] sm:$0xff] %v11922_v35  ;;  %15089 = vst [vmem:[#allocation205_spill] sm:$0xff] %v11931_v49  ;;  %v15096_v21 = vsub.f32 %v6977_v29, %v15095_v3  ;;  %v15099_v35 = vld [vmem:[#allocation415_spill] sm:$0xff]  ;;  %v15104_v57 = vsub.f32 %v6980_v34, %v15095_v3  ;;  %v11959_v20 = vpop.eup %6365  ;;  %v15106_v11 = vld [vmem:[#allocation36_spill] sm:$0xff] }
 0x45f   : > { %15091 = vst [vmem:[#allocation440_spill] sm:$0xff] %v11935_v19  ;;  %15094 = vst [vmem:[#allocation206_spill] sm:$0xff] %v11939_v59  ;;  %v11948_v5 = vadd.f32 %v15099_v35, %v15098_v55  ;;  %v15102_v63 = vld [vmem:[#allocation183_spill] sm:$0xff]  ;;  %v15109_v35 = vsub.f32 %v6983_v37, %v15095_v3  ;;  %v15112_v8 = vld [vmem:[#allocation274_spill] sm:$0xff] }
 0x460   : > { %6381 = vtanh.f32 %v15096_v21  ;;  %15097 = vst [vmem:[#allocation441_spill] sm:$0xff] %v11944_v26  ;;  %v11952_v49 = vadd.f32 %v15102_v63, %v15101_v6  ;;  %15105 = vst [vmem:[#allocation207_spill] sm:$0xff] %v11959_v20  ;;  %v15107_v21 = vld [vmem:[#allocation418_spill] sm:$0xff]  ;;  %v11972_v63 = vpop.permute.xlu0 %2761  ;;  %v15117_v6 = vld [vmem:[#allocation39_spill] sm:$0xff] }
 0x461   : > { %15100 = vst [vmem:[#allocation288_spill] sm:$0xff] %v11948_v5  ;;  %6383 = vtanh.f32 %v15104_v57  ;;  %v11963_v59 = vadd.f32 %v15107_v21, %v15106_v11  ;;  %15110 = vst [vmem:[#allocation53_spill] sm:$0xff] %v11972_v63  ;;  %v11974_v57 = vpop.eup %6367  ;;  %v15115_v11 = vsub.f32 %v6985_v39, %v15095_v3  ;;  %v15154_v26 = vld [vmem:[#allocation37_spill] sm:$0xff]  ;;  %v15162_v63 = vld [vmem:[#allocation188_spill] sm:$0xff] }
 0x462   : > { %15103 = vst [vmem:[#allocation52_spill] sm:$0xff] %v11952_v49  ;;  %6385 = vtanh.f32 %v15109_v35  ;;  %15111 = vst [vmem:[#allocation208_spill] sm:$0xff] %v11974_v57  ;;  %v15113_v49 = vld [vmem:[#allocation269_spill] sm:$0xff]  ;;  %v11987_v55 = vpop.eup %6369  ;;  %v15123_v35 = vld [vmem:[#allocation419_spill] sm:$0xff] }
 0x463   : > { %15108 = vst [vmem:[#allocation442_spill] sm:$0xff] %v11963_v59  ;;  %v11978_v5 = vadd.f32 %v15113_v49, %v15112_v8  ;;  %6387 = vtanh.f32 %v15115_v11  ;;  %15116 = vst [vmem:[#allocation290_spill] sm:$0xff] %v11987_v55  ;;  %v15118_v59 = vld [vmem:[#allocation35_spill] sm:$0xff]  ;;  %v15120_v49 = vsub.f32 %v6987_v41, %v15095_v3  ;;  %v12000_v21 = vpop.eup %6371  ;;  %v15122_v57 = vld [vmem:[#allocation277_spill] sm:$0xff] }
 0x464   : > { %v11991_v19 = vadd.f32 %v15118_v59, %v15117_v6  ;;  %15121 = vst [vmem:[#allocation444_spill] sm:$0xff] %v12000_v21  ;;  %v15125_v59 = vsub.f32 %v6991_v45, %v15095_v3  ;;  %v12013_v8 = vpop.eup %6373  ;;  %v15127_v55 = vld [vmem:[#allocation42_spill] sm:$0xff]  ;;  %v15128_v11 = vld [vmem:[#allocation272_spill] sm:$0xff]  ;;  %15174 = vst [vmem:[#allocation59_spill] sm:$0xff] %v12102_v58 }
 0x465   : > { %15114 = vst [vmem:[#allocation443_spill] sm:$0xff] %v11978_v5  ;;  %6389 = vtanh.f32 %v15120_v49  ;;  %v12004_v5 = vadd.f32 %v15123_v35, %v15122_v57  ;;  %15126 = vst [vmem:[#allocation210_spill] sm:$0xff] %v12013_v8  ;;  %v15130_v57 = vsub.f32 %v6995_v48, %v15095_v3  ;;  %v12026_v6 = vpop.eup %6375  ;;  %v15132_v21 = vld [vmem:[#allocation280_spill] sm:$0xff]  ;;  %v15133_v49 = vld [vmem:[#allocation270_spill] sm:$0xff] }
 0x466   : > { %15119 = vst [vmem:[#allocation209_spill] sm:$0xff] %v11991_v19  ;;  %6391 = vtanh.f32 %v15125_v59  ;;  %v12017_v19 = vadd.f32 %v15128_v11, %v15127_v55  ;;  %15131 = vst [vmem:[#allocation55_spill] sm:$0xff] %v12026_v6  ;;  %v15135_v55 = vsub.f32 %v6998_v50, %v15095_v3  ;;  %v12039_v35 = vpop.eup %6377  ;;  %v15137_v8 = vld [vmem:[#allocation45_spill] sm:$0xff]  ;;  %v15138_v59 = vld [vmem:[#allocation420_spill] sm:$0xff] }
 0x467   : > { %15124 = vst [vmem:[#allocation291_spill] sm:$0xff] %v12004_v5  ;;  %6393 = vtanh.f32 %v15130_v57  ;;  %v12030_v5 = vadd.f32 %v15133_v49, %v15132_v21  ;;  %15136 = vst [vmem:[#allocation446_spill] sm:$0xff] %v12039_v35  ;;  %v15140_v6 = vld [vmem:[#allocation185_spill] sm:$0xff]  ;;  %v15143_v11 = vld [vmem:[#allocation283_spill] sm:$0xff] }
 0x468   : > { %15129 = vst [vmem:[#allocation445_spill] sm:$0xff] %v12017_v19  ;;  %6395 = vtanh.f32 %v15135_v55  ;;  %v12043_v19 = vadd.f32 %v15138_v59, %v15137_v8  ;;  %v15141_v21 = vsub.f32 %v6977_v29, %v15140_v6  ;;  %v12052_v55 = vpop.eup %6379  ;;  %v15144_v57 = vld [vmem:[#allocation34_spill] sm:$0xff]  ;;  %v15146_v35 = vld [vmem:[#allocation48_spill] sm:$0xff]  ;;  %v15149_v59 = vsub.f32 %v6980_v34, %v15140_v6  ;;  %v15151_v49 = vld [vmem:[#allocation421_spill] sm:$0xff] }
 0x469   : > { %15134 = vst [vmem:[#allocation211_spill] sm:$0xff] %v12030_v5  ;;  %15142 = vst [vmem:[#allocation213_spill] sm:$0xff] %v12052_v55  ;;  %v12056_v5 = vadd.f32 %v15144_v57, %v15143_v11  ;;  %v12060_v8 = vadd.f32 %v15147_v27, %v15146_v35  ;;  %v15153_v55 = vld [vmem:[#allocation51_spill] sm:$0xff]  ;;  %v15156_v57 = vld [vmem:[#allocation289_spill] sm:$0xff]  ;;  %v15159_v35 = vsub.f32 %v6983_v37, %v15140_v6 }
 0x46a   : > { %15139 = vst [vmem:[#allocation56_spill] sm:$0xff] %v12043_v19  ;;  %6397 = vtanh.f32 %v15141_v21  ;;  %v6382_v3 = vpop.eup %6381  ;;  %v15150_v19 = vld [vmem:[#allocation286_spill] sm:$0xff]  ;;  %v12073_v11 = vadd.f32 %v15154_v26, %v15153_v55  ;;  %v15167_v26 = vld [vmem:[#allocation331_spill] sm:$0xff] }
 0x46b   : > { %15145 = vst [vmem:[#allocation448_spill] sm:$0xff] %v12056_v5  ;;  %15148 = vst [vmem:[#allocation212_spill] sm:$0xff] %v12060_v8  ;;  %6399 = vtanh.f32 %v15149_v59  ;;  %v12069_v20 = vadd.f32 %v15151_v49, %v15150_v19  ;;  %v15157_v5 = vld [vmem:[#allocation187_spill] sm:$0xff]  ;;  %v12082_v59 = vpop.permute.xlu1 %2776  ;;  %v6384_v21 = vpop.eup %6383  ;;  %v15161_v8 = vld [vmem:[#allocation54_spill] sm:$0xff]  ;;  %v3949_v55 = vadd.f32 %v6382_v3, %v15167_v26 }
 0x46c   : > { %15155 = vst [vmem:[#allocation293_spill] sm:$0xff] %v12073_v11  ;;  %v12077_v27 = vadd.f32 %v15157_v5, %v15156_v57  ;;  %6401 = vtanh.f32 %v15159_v35  ;;  %15160 = vst [vmem:[#allocation449_spill] sm:$0xff] %v12082_v59  ;;  %v12086_v43 = vadd.f32 %v15162_v63, %v15161_v8  ;;  %v15164_v19 = vld [vmem:[#allocation292_spill] sm:$0xff]  ;;  %v15165_v49 = vld [vmem:[#allocation275_spill] sm:$0xff]  ;;  %v15168_v5 = vsub.f32 %v6985_v39, %v15140_v6  ;;  %v6386_v57 = vpop.eup %6385 }
 0x46d   : > { %15152 = vst [vmem:[#allocation447_spill] sm:$0xff] %v12069_v20  ;;  %v12090_v20 = vadd.f32 %v15165_v49, %v15164_v19  ;;  %v15170_v35 = vld [vmem:[#allocation189_spill] sm:$0xff]  ;;  %v15176_v19 = vsub.f32 %v6987_v41, %v15140_v6  ;;  %v6388_v3 = vpop.eup %6387  ;;  %v15177_v49 = vld [vmem:[#allocation332_spill] sm:$0xff] }
 0x46e   : > { %15158 = vst [vmem:[#allocation214_spill] sm:$0xff] %v12077_v27  ;;  %15163 = vst [vmem:[#allocation294_spill] sm:$0xff] %v12086_v43  ;;  %6403 = vtanh.f32 %v15168_v5  ;;  %v15169_v27 = vld [vmem:[#allocation57_spill] sm:$0xff]  ;;  %v3951_v26 = vadd.f32 %v6386_v57, %v15177_v49  ;;  %v15185_v57 = vld [vmem:[#allocation60_spill] sm:$0xff] }
 0x46f   : > { %15166 = vst [vmem:[#allocation215_spill] sm:$0xff] %v12090_v20  ;;  %v12098_v11 = vadd.f32 %v15170_v35, %v15169_v27  ;;  %v15175_v63 = vld [vmem:[#allocation97_spill] sm:$0xff]  ;;  %6405 = vtanh.f32 %v15176_v19  ;;  %v15178_v20 = vld [vmem:[#allocation422_spill] sm:$0xff]  ;;  %v15180_v27 = vsub.f32 %v6991_v45, %v15140_v6  ;;  %v6390_v28 = vpop.eup %6389  ;;  %v15184_v19 = vsub.f32 %v6995_v48, %v15140_v6  ;;  %v15189_v43 = vld [vmem:[#allocation172_spill] sm:$0xff] }
 0x470   : > { %v3950_v8 = vadd.f32 %v6384_v21, %v15175_v63  ;;  %v12110_v5 = vadd.f32 %v3949_v55, %v15178_v20  ;;  %v15181_v35 = vld [vmem:[#allocation98_spill] sm:$0xff]  ;;  %v6392_v55 = vpop.eup %6391 }
 0x471   : > { %15171 = vst [vmem:[#allocation450_spill] sm:$0xff] %v12098_v11  ;;  %6407 = vtanh.f32 %v15180_v27  ;;  %v3952_v21 = vadd.f32 %v6388_v3, %v15181_v35  ;;  %v15182_v63 = vld [vmem:[#allocation406_spill] sm:$0xff]  ;;  %v15188_v11 = vld [vmem:[#allocation333_spill] sm:$0xff]  ;;  %v6394_v3 = vpop.eup %6393  ;;  %v15191_v35 = vld [vmem:[#allocation99_spill] sm:$0xff] }
 0x472   : > { %15179 = vst [vmem:[#allocation58_spill] sm:$0xff] %v12110_v5  ;;  %v12119_v58 = vadd.f32 %v3950_v8, %v15182_v63  ;;  %6409 = vtanh.f32 %v15184_v19  ;;  %v15186_v49 = vld [vmem:[#allocation190_spill] sm:$0xff]  ;;  %v3953_v1 = vadd.f32 %v6390_v28, %v15188_v11  ;;  %v12132_v5 = vadd.f32 %v3951_v26, %v15189_v43  ;;  %v15192_v19 = vld [vmem:[#allocation407_spill] sm:$0xff]  ;;  %v6396_v28 = vpop.eup %6395 }
 0x473   : > { %v12128_v27 = vadd.f32 %v15186_v49, %v15185_v57  ;;  %v15190_v8 = vsub.f32 %v6998_v50, %v15140_v6  ;;  %v3954_v63 = vadd.f32 %v6392_v55, %v15191_v35  ;;  %v15194_v20 = vld [vmem:[#allocation186_spill] sm:$0xff]  ;;  %v15197_v57 = vld [vmem:[#allocation25_spill] sm:$0xff] }
 0x474   : > { %15183 = vst [vmem:[#allocation216_spill] sm:$0xff] %v12119_v58  ;;  %v12139_v58 = vadd.f32 %v3952_v21, %v15192_v19  ;;  %v15195_v18 = vsub.f32 %v6977_v29, %v15194_v20  ;;  %v15196_v43 = vld [vmem:[#allocation334_spill] sm:$0xff]  ;;  %v12148_v49 = vadd.f32 %v3953_v1, %v15197_v57  ;;  %v15199_v6 = vsub.f32 %v6980_v34, %v15194_v20  ;;  %v6398_v55 = vpop.eup %6397  ;;  %v15201_v35 = vld [vmem:[#allocation425_spill] sm:$0xff]  ;;  %v15203_v19 = vld [vmem:[#allocation100_spill] sm:$0xff] }
 0x475   : > { %15187 = vst [vmem:[#allocation451_spill] sm:$0xff] %v12128_v27  ;;  %6411 = vtanh.f32 %v15190_v8  ;;  %v3955_v26 = vadd.f32 %v6394_v3, %v15196_v43  ;;  %v15200_v8 = vld [vmem:[#allocation298_spill] sm:$0xff]  ;;  %v3956_v11 = vadd.f32 %v6396_v28, %v15203_v19  ;;  %v15205_v1 = vsub.f32 %v6983_v37, %v15194_v20  ;;  %v6400_v3 = vpop.eup %6399  ;;  %v15206_v43 = vld [vmem:[#allocation173_spill] sm:$0xff] }
 0x476   : > { %15193 = vst [vmem:[#allocation296_spill] sm:$0xff] %v12139_v58  ;;  %6413 = vtanh.f32 %v15195_v18  ;;  %15198 = vst [vmem:[#allocation217_spill] sm:$0xff] %v12148_v49  ;;  %v12157_v18 = vadd.f32 %v15201_v35, %v15200_v8  ;;  %v15204_v27 = vld [vmem:[#allocation26_spill] sm:$0xff]  ;;  %v15209_v49 = vsub.f32 %v6985_v39, %v15194_v20  ;;  %v6402_v8 = vpop.eup %6401  ;;  %v15212_v35 = vld [vmem:[#allocation336_spill] sm:$0xff] }
 0x477   : > { %6415 = vtanh.f32 %v15199_v6  ;;  %v12161_v58 = vadd.f32 %v3954_v63, %v15204_v27  ;;  %v12167_v57 = vadd.f32 %v3955_v26, %v15206_v43  ;;  %v15208_v6 = vld [vmem:[#allocation101_spill] sm:$0xff]  ;;  %v15210_v27 = vld [vmem:[#allocation174_spill] sm:$0xff]  ;;  %v3942_v19 = vadd.f32 %v6400_v3, %v15212_v35  ;;  %v15214_v43 = vld [vmem:[#allocation63_spill] sm:$0xff] }
 0x478   : > { %15202 = vst [vmem:[#allocation452_spill] sm:$0xff] %v12157_v18  ;;  %6417 = vtanh.f32 %v15205_v1  ;;  %v3941_v21 = vadd.f32 %v6398_v55, %v15208_v6  ;;  %v12176_v63 = vadd.f32 %v3956_v11, %v15210_v27  ;;  %v15213_v1 = vsub.f32 %v6987_v41, %v15194_v20  ;;  %v6404_v55 = vpop.eup %6403  ;;  %v15216_v6 = vld [vmem:[#allocation103_spill] sm:$0xff]  ;;  %v15220_v27 = vld [vmem:[#allocation338_spill] sm:$0xff] }
 0x479   : > { %15207 = vst [vmem:[#allocation297_spill] sm:$0xff] %v12167_v57  ;;  %6419 = vtanh.f32 %v15209_v49  ;;  %v12186_v49 = vadd.f32 %v11518_v9, %v15214_v43  ;;  %v3943_v28 = vadd.f32 %v6402_v8, %v15216_v6  ;;  %v15217_v18 = vld [vmem:[#allocation423_spill] sm:$0xff]  ;;  %v15219_v11 = vsub.f32 %v6991_v45, %v15194_v20  ;;  %v6406_v3 = vpop.eup %6405  ;;  %v12204_v8 = vpop.permute.xlu0 %2771  ;;  %v15226_v6 = vld [vmem:[#allocation410_spill] sm:$0xff]  ;;  %v15231_v9 = vld [vmem:[#allocation340_spill] sm:$0xff] }
 0x47a   : > { %15211 = vst [vmem:[#allocation335_spill] sm:$0xff] %v12176_v63  ;;  %6421 = vtanh.f32 %v15213_v1  ;;  %v12190_v57 = vadd.f32 %v3941_v21, %v15217_v18  ;;  %v3944_v35 = vadd.f32 %v6404_v55, %v15220_v27  ;;  %v15221_v1 = vld [vmem:[#allocation175_spill] sm:$0xff]  ;;  %v15223_v26 = vsub.f32 %v6995_v48, %v15194_v20  ;;  %15224 = vst [vmem:[#allocation102_spill] sm:$0xff] %v12204_v8 }
 0x47b   : > { %15215 = vst [vmem:[#allocation218_spill] sm:$0xff] %v12186_v49  ;;  %6423 = vtanh.f32 %v15219_v11  ;;  %v12197_v63 = vadd.f32 %v3942_v19, %v15221_v1  ;;  %v6408_v21 = vpop.eup %6407  ;;  %v15225_v18 = vld [vmem:[#allocation339_spill] sm:$0xff]  ;;  %v12208_v11 = vadd.f32 %v3943_v28, %v15226_v6  ;;  %v15228_v55 = vsub.f32 %v6998_v50, %v15194_v20  ;;  %v15233_v28 = vld [vmem:[#allocation38_spill] sm:$0xff] }
 0x47c   : > { %15218 = vst [vmem:[#allocation453_spill] sm:$0xff] %v12190_v57  ;;  %6425 = vtanh.f32 %v15223_v26  ;;  %v3945_v43 = vadd.f32 %v6406_v3, %v15225_v18  ;;  %v6410_v27 = vpop.eup %6409  ;;  %v15229_v26 = vld [vmem:[#allocation301_spill] sm:$0xff]  ;;  %v3946_v49 = vadd.f32 %v6408_v21, %v15231_v9  ;;  %v15234_v3 = vsub.f32 %v6977_v29, %v15233_v28  ;;  %v15235_v20 = vld [vmem:[#allocation106_spill] sm:$0xff]  ;;  %v15239_v21 = vld [vmem:[#allocation28_spill] sm:$0xff] }
 0x47d   : > { %15222 = vst [vmem:[#allocation61_spill] sm:$0xff] %v12197_v63  ;;  %15227 = vst [vmem:[#allocation219_spill] sm:$0xff] %v12208_v11  ;;  %6427 = vtanh.f32 %v15228_v55  ;;  %v12217_v1 = vadd.f32 %v11531_v2, %v15229_v26  ;;  %v15232_v63 = vld [vmem:[#allocation263_spill] sm:$0xff]  ;;  %v3947_v6 = vadd.f32 %v6410_v27, %v15235_v20  ;;  %v15236_v55 = vld [vmem:[#allocation264_spill] sm:$0xff]  ;;  %v15237_v19 = vsub.f32 %v6980_v34, %v15233_v28 }
 0x47e   : > { %v12221_v57 = vadd.f32 %v3944_v35, %v15232_v63  ;;  %6429 = vtanh.f32 %v15234_v3  ;;  %v12228_v11 = vadd.f32 %v3945_v43, %v15236_v55  ;;  %v15238_v63 = vld [vmem:[#allocation342_spill] sm:$0xff]  ;;  %v12237_v26 = vadd.f32 %v3946_v49, %v15239_v21  ;;  %v15243_v55 = vld [vmem:[#allocation176_spill] sm:$0xff]  ;;  %v15246_v21 = vld [vmem:[#allocation177_spill] sm:$0xff] }
 0x47f   : > { %15230 = vst [vmem:[#allocation454_spill] sm:$0xff] %v12217_v1  ;;  %v6412_v18 = vpop.eup %6411  ;;  %6431 = vtanh.f32 %v15237_v19  ;;  %v15240_v3 = vsub.f32 %v6983_v37, %v15233_v28  ;;  %v15241_v20 = vld [vmem:[#allocation66_spill] sm:$0xff]  ;;  %v12249_v2 = vadd.f32 %v3947_v6, %v15243_v55  ;;  %v15244_v1 = vld [vmem:[#allocation343_spill] sm:$0xff]  ;;  %v15245_v49 = vsub.f32 %v6985_v39, %v15233_v28  ;;  %v15248_v43 = vld [vmem:[#allocation344_spill] sm:$0xff] }
 0x480   : > { %v6414_v9 = vpop.eup %6413  ;;  %v3948_v35 = vadd.f32 %v6412_v18, %v15238_v63  ;;  %v12246_v19 = vadd.f32 %v11546_v32, %v15241_v20  ;;  %v15249_v32 = vsub.f32 %v6987_v41, %v15233_v28  ;;  %v15251_v55 = vld [vmem:[#allocation276_spill] sm:$0xff]  ;;  %v15256_v6 = vld [vmem:[#allocation346_spill] sm:$0xff] }
 0x481   : > { %6433 = vtanh.f32 %v15240_v3  ;;  %v6416_v27 = vpop.eup %6415  ;;  %v3965_v18 = vadd.f32 %v6414_v9, %v15244_v1  ;;  %v15250_v1 = vld [vmem:[#allocation111_spill] sm:$0xff] }
 0x482   : > { %15242 = vst [vmem:[#allocation62_spill] sm:$0xff] %v12246_v19  ;;  %6435 = vtanh.f32 %v15245_v49  ;;  %v6418_v63 = vpop.eup %6417  ;;  %v12256_v3 = vadd.f32 %v3948_v35, %v15246_v21  ;;  %v3966_v59 = vadd.f32 %v6416_v27, %v15248_v43  ;;  %v15253_v35 = vsub.f32 %v6991_v45, %v15233_v28  ;;  %v15254_v21 = vld [vmem:[#allocation304_spill] sm:$0xff] }
 0x483   : > { %6437 = vtanh.f32 %v15249_v32  ;;  %v6420_v20 = vpop.eup %6419  ;;  %v3967_v9 = vadd.f32 %v6418_v63, %v15250_v1  ;;  %v12266_v49 = vadd.f32 %v3965_v18, %v15251_v55  ;;  %v12275_v32 = vadd.f32 %v11559_v46, %v15254_v21  ;;  %v15260_v55 = vld [vmem:[#allocation347_spill] sm:$0xff] }
 0x484   : > { %15247 = vst [vmem:[#allocation337_spill] sm:$0xff] %v12256_v3  ;;  %6439 = vtanh.f32 %v15253_v35  ;;  %v6422_v27 = vpop.eup %6421  ;;  %v3968_v19 = vadd.f32 %v6420_v20, %v15256_v6  ;;  %v15257_v3 = vld [vmem:[#allocation40_spill] sm:$0xff]  ;;  %v15259_v18 = vsub.f32 %v6995_v48, %v15233_v28  ;;  %v15263_v46 = vsub.f32 %v6998_v50, %v15233_v28 }
 0x485   : > { %15252 = vst [vmem:[#allocation220_spill] sm:$0xff] %v12266_v49  ;;  %15255 = vst [vmem:[#allocation455_spill] sm:$0xff] %v12275_v32  ;;  %v12279_v63 = vadd.f32 %v3966_v59, %v15257_v3  ;;  %v6424_v1 = vpop.eup %6423  ;;  %v3969_v35 = vadd.f32 %v6422_v27, %v15260_v55  ;;  %v15261_v49 = vld [vmem:[#allocation191_spill] sm:$0xff]  ;;  %v15264_v6 = vld [vmem:[#allocation348_spill] sm:$0xff]  ;;  %v15267_v28 = vsub.f32 %v6977_v29, %v11488_v60 }
 0x486   : > { %6441 = vtanh.f32 %v15259_v18  ;;  %v12287_v43 = vadd.f32 %v3967_v9, %v15261_v49  ;;  %v6426_v3 = vpop.eup %6425  ;;  %v3970_v20 = vadd.f32 %v6424_v1, %v15264_v6  ;;  %v15265_v9 = vld [vmem:[#allocation426_spill] sm:$0xff]  ;;  %v15268_v18 = vld [vmem:[#allocation69_spill] sm:$0xff] }
 0x487   : > { %15258 = vst [vmem:[#allocation299_spill] sm:$0xff] %v12279_v63  ;;  %6443 = vtanh.f32 %v15263_v46  ;;  %v12304_v49 = vadd.f32 %v3968_v19, %v15265_v9  ;;  %v6428_v21 = vpop.eup %6427  ;;  %v12315_v55 = vadd.f32 %v11572_v38, %v15268_v18  ;;  %v15270_v1 = vld [vmem:[#allocation117_spill] sm:$0xff]  ;;  %v15271_v46 = vld [vmem:[#allocation267_spill] sm:$0xff]  ;;  %v15273_v9 = vsub.f32 %v6980_v34, %v11488_v60 }
 0x488   : > { %15262 = vst [vmem:[#allocation104_spill] sm:$0xff] %v12287_v43  ;;  %6445 = vtanh.f32 %v15267_v28  ;;  %v3971_v19 = vadd.f32 %v6426_v3, %v15270_v1  ;;  %v12319_v6 = vadd.f32 %v3969_v35, %v15271_v46 }
 0x489   : > { %15266 = vst [vmem:[#allocation300_spill] sm:$0xff] %v12304_v49  ;;  %15269 = vst [vmem:[#allocation221_spill] sm:$0xff] %v12315_v55  ;;  %6447 = vtanh.f32 %v15273_v9 }
 0x48a   : > { %15272 = vst [vmem:[#allocation456_spill] sm:$0xff] %v12319_v6 }
 0x48b   : > { %6650 = shalt.err (!%p6647_p7)
}
 0x48c   : > { %s6651_s30 = scalar_lea.hbm %s12299_s11, 1024  ;;  %s6655_s9 = scalar_lea.hbm %s13374_s3, 2048 }
 0x48d   : > { %p6652_p8 = scmp.ne.s32.totalorder %s12299_s11, %s6651_s30  ;;  %p6656_p12 = scmp.lt.u32.totalorder %s12299_s11, %s13374_s3 }
 0x48e   : > { %p6657_p13 = scmp.lt.u32.totalorder %s6655_s9, %s6651_s30  ;;  %p6659_p1 = scmp.lt.u32.totalorder %s6651_s30, %s12299_s11 }
 0x48f   : > { %p6653_p10 = pnand %p6652_p8, %p6843_p3 }
 0x490   : > { %p6658_p0 = por %p6657_p13, %p6656_p12 }
 0x491   : > { %p6654_p11 = pneg %p6653_p10 }
 0x492   : > { %p6660_p2 = por %p6659_p1, %p6658_p0 }
 0x494   : > { %p6661_p4 = pnand %p6660_p2, %p6654_p11 }
 0x496   : > { %6664 = shalt.err (!%p6661_p4)
}
 0x497   : > { %4509 = dma.vmem_to_hbm [thread:$0]  (%p6843_p3), %s12311_s12, 1024, %s12299_s11, %s4334_s13   ;;  %v6430_v38 = vpop.eup %6429  ;;  %v15274_v35 = vld [vmem:[#allocation353_spill] sm:$0xff]  ;;  %v15275_v28 = vld [vmem:[#allocation178_spill] sm:$0xff]  ;;  %v15277_v1 = vsub.f32 %v6983_v37, %v11488_v60  ;;  %v15281_v6 = vsub.f32 %v6985_v39, %v11488_v60 }
 0x498   : > { %v3972_v3 = vadd.f32 %v6428_v21, %v15274_v35  ;;  %v12348_v18 = vadd.f32 %v3970_v20, %v15275_v28  ;;  %v6432_v9 = vpop.eup %6431  ;;  %v15278_v27 = vld [vmem:[#allocation413_spill] sm:$0xff]  ;;  %v15280_v55 = vld [vmem:[#allocation354_spill] sm:$0xff]  ;;  %v15282_v35 = vld [vmem:[#allocation307_spill] sm:$0xff]  ;;  %s4367_s11 = sshll.u32 %s6881_s26, 4  ;;  %s13315_s14 = scalar_lea.hbm %s13375_s4, %s4507_s8  ;;  %s13317_s11 = int_to_ptr.vmem [resolvable:$true] %s4367_s11 }
 0x499   : > { %6449 = vtanh.f32 %v15277_v1  ;;  %v12356_v59 = vadd.f32 %v3971_v19, %v15278_v27  ;;  %v3957_v32 = vadd.f32 %v6430_v38, %v15280_v55  ;;  %v6434_v21 = vpop.eup %6433  ;;  %v15283_v28 = vld [vmem:[#allocation428_spill] sm:$0xff]  ;;  %v15287_v49 = vld [vmem:[#allocation349_spill] sm:$0xff]  ;;  %v15288_v55 = vsub.f32 %v6987_v41, %v11488_v60  ;;  %s4339_s24 = scalar_lea.sflag [#allocation5], %s6864_s6  ;;  %s6665_s29 = scalar_lea.vmem %s13317_s11, 1024 }
 0x49a   : > { %15276 = vst [vmem:[#allocation105_spill] sm:$0xff] %v12348_v18  ;;  %6451 = vtanh.f32 %v15281_v6  ;;  %v12366_v1 = vadd.f32 %v15283_v28, %v15282_v35  ;;  %v15285_v18 = vld [vmem:[#allocation181_spill] sm:$0xff]  ;;  %v3958_v27 = vadd.f32 %v6432_v9, %v15287_v49  ;;  %v6436_v19 = vpop.eup %6435  ;;  %v15289_v38 = vld [vmem:[#allocation72_spill] sm:$0xff]  ;;  %v15290_v6 = vld [vmem:[#allocation279_spill] sm:$0xff]  ;;  %p6666_p5 = scmp.ne.s32.totalorder %s13317_s11, %s6665_s29  ;;  %s6768_s30 = smov [#allocation4]  }
 0x49b   : > { %15279 = vst [vmem:[#allocation64_spill] sm:$0xff] %v12356_v59  ;;  %v12369_v46 = vadd.f32 %v3972_v3, %v15285_v18  ;;  %6453 = vtanh.f32 %v15288_v55  ;;  %v12377_v59 = vadd.f32 %v15290_v6, %v15289_v38  ;;  %v15292_v20 = vld [vmem:[#allocation116_spill] sm:$0xff]  ;;  %v15293_v43 = vld [vmem:[#allocation41_spill] sm:$0xff]  ;;  %v15294_v3 = vsub.f32 %v6991_v45, %v11488_v60  ;;  %v6438_v18 = vpop.eup %6437  ;;  %v15295_v49 = vld [vmem:[#allocation310_spill] sm:$0xff]  ;;  %s6669_s19 = sshll.u32 %s6768_s30, 4  ;;  %s6670_s19 = int_to_ptr.vmem [resolvable:$false] %s6669_s19 }
 0x49c   : > { %15284 = vst [vmem:[#allocation222_spill] sm:$0xff] %v12366_v1  ;;  %v3959_v8 = vadd.f32 %v6434_v21, %v15292_v20  ;;  %v12381_v63 = vadd.f32 %v3957_v32, %v15293_v43  ;;  %v15296_v9 = vld [vmem:[#allocation194_spill] sm:$0xff]  ;;  %v15298_v28 = vld [vmem:[#allocation351_spill] sm:$0xff]  ;;  %v15300_v20 = vsub.f32 %v6995_v48, %v11488_v60  ;;  %v6440_v43 = vpop.eup %6439  ;;  %p6667_p6 = pnand %p6666_p5, %p6843_p3  ;;  %s6671_s18 = scalar_lea.vmem %s6670_s19, 2048 }
 0x49d   : > { %15286 = vst [vmem:[#allocation457_spill] sm:$0xff] %v12369_v46  ;;  %15291 = vst [vmem:[#allocation341_spill] sm:$0xff] %v12377_v59  ;;  %6455 = vtanh.f32 %v15294_v3  ;;  %v12388_v35 = vadd.f32 %v15296_v9, %v15295_v49  ;;  %v3960_v55 = vadd.f32 %v6436_v19, %v15298_v28  ;;  %v15299_v1 = vld [vmem:[#allocation427_spill] sm:$0xff]  ;;  %v15304_v3 = vld [vmem:[#allocation278_spill] sm:$0xff]  ;;  %v15305_v19 = vsub.f32 %v6998_v50, %v11488_v60  ;;  %p6672_p8 = scmp.lt.s32.totalorder %s13317_s11, %s6670_s19  ;;  %p6673_p10 = scmp.lt.s32.totalorder %s6671_s18, %s6665_s29 }
 0x49e   : > { %v12392_v46 = vadd.f32 %v3958_v27, %v15299_v1  ;;  %6457 = vtanh.f32 %v15300_v20  ;;  %v15301_v32 = vld [vmem:[#allocation75_spill] sm:$0xff]  ;;  %v12403_v59 = vadd.f32 %v3959_v8, %v15304_v3  ;;  %v6442_v1 = vpop.eup %6441  ;;  %v15306_v27 = vld [vmem:[#allocation313_spill] sm:$0xff]  ;;  %v15308_v9 = vld [vmem:[#allocation356_spill] sm:$0xff]  ;;  %p6668_p7 = pneg %p6667_p6 }
 0x49f   : > { %15297 = vst [vmem:[#allocation223_spill] sm:$0xff] %v12388_v35  ;;  %v12399_v21 = vadd.f32 %v11626_v7, %v15301_v32  ;;  %v15303_v38 = vld [vmem:[#allocation355_spill] sm:$0xff]  ;;  %6459 = vtanh.f32 %v15305_v19  ;;  %v12410_v49 = vadd.f32 %v11643_v44, %v15306_v27  ;;  %v3962_v28 = vadd.f32 %v6440_v43, %v15308_v9  ;;  %v15309_v20 = vld [vmem:[#allocation193_spill] sm:$0xff]  ;;  %v15310_v7 = vld [vmem:[#allocation192_spill] sm:$0xff]  ;;  %v6444_v8 = vpop.eup %6443  ;;  %p6674_p11 = por %p6673_p10, %p6672_p8 }
 0x4a0   : > { %v3961_v6 = vadd.f32 %v6438_v18, %v15303_v38  ;;  %v12414_v35 = vadd.f32 %v3960_v55, %v15309_v20  ;;  %v15311_v18 = vsub.f32 %v6977_v29, %v15310_v7  ;;  %v15312_v32 = vld [vmem:[#allocation78_spill] sm:$0xff]  ;;  %v15315_v19 = vld [vmem:[#allocation417_spill] sm:$0xff]  ;;  %v15316_v44 = vsub.f32 %v6980_v34, %v15310_v7  ;;  %v6446_v55 = vpop.eup %6445  ;;  %v15317_v43 = vld [vmem:[#allocation316_spill] sm:$0xff] }
 0x4a1   : > { %15302 = vst [vmem:[#allocation458_spill] sm:$0xff] %v12399_v21  ;;  %15307 = vst [vmem:[#allocation65_spill] sm:$0xff] %v12410_v49  ;;  %v12421_v38 = vadd.f32 %v11656_v51, %v15312_v32  ;;  %v15314_v60 = vld [vmem:[#allocation122_spill] sm:$0xff]  ;;  %v12432_v27 = vadd.f32 %v11671_v13, %v15317_v43  ;;  %v15321_v51 = vsub.f32 %v6983_v37, %v15310_v7  ;;  %v15322_v32 = vld [vmem:[#allocation317_spill] sm:$0xff]  ;;  %p6675_p12 = pnand %p6674_p11, %p6668_p7 }
 0x4a2   : > { %6461 = vtanh.f32 %v15311_v18  ;;  %v3963_v3 = vadd.f32 %v6442_v1, %v15314_v60  ;;  %v12425_v21 = vadd.f32 %v3961_v6, %v15315_v19  ;;  %v15319_v9 = vld [vmem:[#allocation358_spill] sm:$0xff]  ;;  %v15320_v18 = vld [vmem:[#allocation179_spill] sm:$0xff]  ;;  %v12441_v6 = vpop.permute.xlu1 %2786  ;;  %v6448_v1 = vpop.eup %6447  ;;  %v12445_v60 = vadd.f32 %v11684_v23, %v15322_v32 }
 0x4a3   : > { %15313 = vst [vmem:[#allocation107_spill] sm:$0xff] %v12421_v38  ;;  %6463 = vtanh.f32 %v15316_v44  ;;  %15318 = vst [vmem:[#allocation224_spill] sm:$0xff] %v12432_v27  ;;  %v3964_v20 = vadd.f32 %v6444_v8, %v15319_v9  ;;  %v12436_v49 = vadd.f32 %v3962_v28, %v15320_v18  ;;  %v15323_v19 = vld [vmem:[#allocation414_spill] sm:$0xff]  ;;  %v15324_v13 = vld [vmem:[#allocation359_spill] sm:$0xff]  ;;  %v15325_v28 = vsub.f32 %v6985_v39, %v15310_v7  ;;  %v6450_v8 = vpop.eup %6449 }
 0x4a4   : > { %6465 = vtanh.f32 %v15321_v51  ;;  %v12448_v44 = vadd.f32 %v3963_v3, %v15323_v19  ;;  %v3981_v43 = vadd.f32 %v6446_v55, %v15324_v13  ;;  %v15326_v9 = vld [vmem:[#allocation81_spill] sm:$0xff]  ;;  %v15328_v51 = vld [vmem:[#allocation32_spill] sm:$0xff]  ;;  %v15330_v3 = vsub.f32 %v6987_v41, %v15310_v7  ;;  %v6452_v32 = vpop.eup %6451  ;;  %v15331_v55 = vld [vmem:[#allocation127_spill] sm:$0xff] }
 0x4a5   : > { %6467 = vtanh.f32 %v15325_v28  ;;  %v12456_v18 = vadd.f32 %v11697_v56, %v15326_v9  ;;  %v12459_v27 = vadd.f32 %v3964_v20, %v15328_v51  ;;  %v15329_v38 = vld [vmem:[#allocation360_spill] sm:$0xff]  ;;  %v3983_v19 = vadd.f32 %v6450_v8, %v15331_v55  ;;  %v6454_v20 = vpop.eup %6453  ;;  %v15333_v9 = vld [vmem:[#allocation362_spill] sm:$0xff]  ;;  %v15335_v8 = vld [vmem:[#allocation319_spill] sm:$0xff] }
 0x4a6   : > { %v3982_v23 = vadd.f32 %v6448_v1, %v15329_v38  ;;  %6469 = vtanh.f32 %v15330_v3  ;;  %v12467_v13 = vadd.f32 %v3981_v43, %v11613_v30  ;;  %v15332_v28 = vsub.f32 %v6991_v45, %v15310_v7  ;;  %v15336_v55 = vld [vmem:[#allocation363_spill] sm:$0xff]  ;;  %v15337_v56 = vld [vmem:[#allocation429_spill] sm:$0xff] }
 0x4a7   : > { %15327 = vst [vmem:[#allocation459_spill] sm:$0xff] %v12456_v18  ;;  %v3984_v38 = vadd.f32 %v6452_v32, %v15333_v9  ;;  %v15334_v51 = vsub.f32 %v6995_v48, %v15310_v7  ;;  %v6456_v43 = vpop.eup %6455  ;;  %v12485_v3 = vadd.f32 %v11710_v10, %v15335_v8  ;;  %v12489_v18 = vadd.f32 %v3983_v19, %v15337_v56  ;;  %v15339_v32 = vld [vmem:[#allocation364_spill] sm:$0xff]  ;;  %v15341_v19 = vld [vmem:[#allocation130_spill] sm:$0xff] }
 0x4a8   : > { %6471 = vtanh.f32 %v15332_v28  ;;  %v12476_v1 = vadd.f32 %v3982_v23, %v11617_v12  ;;  %v3985_v28 = vadd.f32 %v6454_v20, %v15336_v55  ;;  %v15338_v12 = vsub.f32 %v6998_v50, %v15310_v7  ;;  %v6458_v23 = vpop.eup %6457  ;;  %v15345_v55 = vld [vmem:[#allocation131_spill] sm:$0xff] }
 0x4a9   : > { %6473 = vtanh.f32 %v15334_v51  ;;  %v3986_v9 = vadd.f32 %v6456_v43, %v15339_v32  ;;  %v12496_v51 = vadd.f32 %v3984_v38, %v11630_v25  ;;  %v15340_v30 = vsub.f32 %v6977_v29, %v11607_v54  ;;  %v6460_v20 = vpop.eup %6459  ;;  %v15343_v43 = vld [vmem:[#allocation320_spill] sm:$0xff] }
 0x4aa   : > { %6475 = vtanh.f32 %v15338_v12  ;;  %v3987_v56 = vadd.f32 %v6458_v23, %v15341_v19  ;;  %v12505_v8 = vadd.f32 %v3985_v28, %v11634_v36  ;;  %v15342_v7 = vsub.f32 %v6980_v34, %v11607_v54  ;;  %v15347_v23 = vld [vmem:[#allocation43_spill] sm:$0xff] }
 0x4ab   : > { %6477 = vtanh.f32 %v15340_v30  ;;  %v12514_v30 = vadd.f32 %v11723_v61, %v15343_v43  ;;  %v3988_v12 = vadd.f32 %v6460_v20, %v15345_v55  ;;  %v12518_v32 = vadd.f32 %v3986_v9, %v11638_v24  ;;  %v15351_v24 = vld [vmem:[#allocation195_spill] sm:$0xff] }
 0x4ac   : > { %6479 = vtanh.f32 %v15342_v7  ;;  %v6462_v38 = vpop.eup %6461  ;;  %v15346_v36 = vsub.f32 %v6983_v37, %v11607_v54  ;;  %v12524_v19 = vadd.f32 %v3987_v56, %v15347_v23  ;;  %v15349_v7 = vld [vmem:[#allocation366_spill] sm:$0xff]  ;;  %v15350_v10 = vsub.f32 %v6985_v39, %v11607_v54  ;;  %v15353_v43 = vld [vmem:[#allocation367_spill] sm:$0xff]  ;;  %v15355_v23 = vld [vmem:[#allocation84_spill] sm:$0xff] }
 0x4ad   : > { %15344 = vst [vmem:[#allocation302_spill] sm:$0xff] %v12514_v30  ;;  %v6464_v28 = vpop.eup %6463  ;;  %v3973_v25 = vadd.f32 %v6462_v38, %v15349_v7  ;;  %v12533_v9 = vadd.f32 %v3988_v12, %v15351_v24  ;;  %v15357_v7 = vld [vmem:[#allocation368_spill] sm:$0xff]  ;;  %v15360_v12 = vsub.f32 %v6991_v45, %v11607_v54  ;;  %v15361_v24 = vld [vmem:[#allocation134_spill] sm:$0xff]  ;;  %v15364_v56 = vsub.f32 %v6995_v48, %v11607_v54 }
 0x4ae   : > { %6481 = vtanh.f32 %v15346_v36  ;;  %15348 = vst [vmem:[#allocation108_spill] sm:$0xff] %v12524_v19  ;;  %v6466_v20 = vpop.eup %6465  ;;  %v3974_v55 = vadd.f32 %v6464_v28, %v15353_v43  ;;  %v15354_v36 = vsub.f32 %v6987_v41, %v11607_v54  ;;  %v15358_v30 = vld [vmem:[#allocation44_spill] sm:$0xff] }
 0x4af   : > { %6483 = vtanh.f32 %v15350_v10  ;;  %15352 = vst [vmem:[#allocation225_spill] sm:$0xff] %v12533_v9  ;;  %v6468_v38 = vpop.eup %6467  ;;  %v12543_v10 = vadd.f32 %v11736_v53, %v15355_v23  ;;  %v3975_v61 = vadd.f32 %v6466_v20, %v15357_v7  ;;  %v12547_v19 = vadd.f32 %v3973_v25, %v15358_v30  ;;  %v12561_v20 = vpop.permute.xlu0 %2781  ;;  %v15366_v30 = vld [vmem:[#allocation369_spill] sm:$0xff]  ;;  %v15367_v7 = vld [vmem:[#allocation431_spill] sm:$0xff] }
 0x4b0   : > { %6485 = vtanh.f32 %v15354_v36  ;;  %v6470_v28 = vpop.eup %6469  ;;  %v3976_v43 = vadd.f32 %v6468_v38, %v15361_v24  ;;  %v15362_v36 = vld [vmem:[#allocation196_spill] sm:$0xff]  ;;  %15365 = vst [vmem:[#allocation226_spill] sm:$0xff] %v12561_v20  ;;  %v15369_v38 = vsub.f32 %v6998_v50, %v11607_v54  ;;  %v15371_v53 = vld [vmem:[#allocation135_spill] sm:$0xff]  ;;  %v15375_v54 = vld [vmem:[#allocation370_spill] sm:$0xff] }
 0x4b1   : > { %15356 = vst [vmem:[#allocation460_spill] sm:$0xff] %v12543_v10  ;;  %15359 = vst [vmem:[#allocation303_spill] sm:$0xff] %v12547_v19  ;;  %6487 = vtanh.f32 %v15360_v12  ;;  %v12554_v9 = vadd.f32 %v3974_v55, %v15362_v36  ;;  %v3977_v23 = vadd.f32 %v6470_v28, %v15366_v30  ;;  %v12565_v12 = vadd.f32 %v3975_v61, %v15367_v7  ;;  %v15372_v19 = vld [vmem:[#allocation281_spill] sm:$0xff]  ;;  %v15373_v61 = vld [vmem:[#allocation430_spill] sm:$0xff] }
 0x4b2   : > { %6489 = vtanh.f32 %v15364_v56  ;;  %v6472_v25 = vpop.eup %6471  ;;  %v15370_v56 = vld [vmem:[#allocation321_spill] sm:$0xff]  ;;  %v12578_v10 = vadd.f32 %v3976_v43, %v15372_v19  ;;  %v15374_v28 = vsub.f32 %v6977_v29, %v15373_v61  ;;  %v15378_v55 = vsub.f32 %v6980_v34, %v15373_v61  ;;  %v15379_v19 = vld [vmem:[#allocation136_spill] sm:$0xff] }
 0x4b3   : > { %15363 = vst [vmem:[#allocation109_spill] sm:$0xff] %v12554_v9  ;;  %15368 = vst [vmem:[#allocation461_spill] sm:$0xff] %v12565_v12  ;;  %6491 = vtanh.f32 %v15369_v38  ;;  %v6474_v24 = vpop.eup %6473  ;;  %v12574_v36 = vadd.f32 %v11749_v40, %v15370_v56  ;;  %v3978_v9 = vadd.f32 %v6472_v25, %v15371_v53  ;;  %v15376_v38 = vld [vmem:[#allocation197_spill] sm:$0xff]  ;;  %v15380_v25 = vld [vmem:[#allocation432_spill] sm:$0xff] }
 0x4b4   : > { %6493 = vtanh.f32 %v15374_v28  ;;  %v6476_v30 = vpop.eup %6475  ;;  %v3979_v7 = vadd.f32 %v6474_v24, %v15375_v54  ;;  %v12585_v12 = vadd.f32 %v3977_v23, %v15376_v38  ;;  %v15382_v28 = vsub.f32 %v6983_v37, %v15373_v61  ;;  %v15383_v54 = vld [vmem:[#allocation85_spill] sm:$0xff]  ;;  %v15384_v40 = vld [vmem:[#allocation371_spill] sm:$0xff] }
 0x4b5   : > { %6495 = vtanh.f32 %v15378_v55  ;;  %v6478_v53 = vpop.eup %6477  ;;  %v3980_v43 = vadd.f32 %v6476_v30, %v15379_v19  ;;  %v12594_v56 = vadd.f32 %v3978_v9, %v15380_v25  ;;  %v12603_v55 = vadd.f32 %v11768_v14, %v15383_v54  ;;  %v15386_v25 = vld [vmem:[#allocation198_spill] sm:$0xff]  ;;  %v15392_v54 = vld [vmem:[#allocation433_spill] sm:$0xff] }
 0x4b6   : > { %15377 = vst [vmem:[#allocation67_spill] sm:$0xff] %v12585_v12  ;;  %6497 = vtanh.f32 %v15382_v28  ;;  %v6480_v24 = vpop.eup %6479  ;;  %v12606_v38 = vadd.f32 %v3979_v7, %v11753_v47  ;;  %v3997_v30 = vadd.f32 %v6478_v53, %v15384_v40  ;;  %v15385_v9 = vsub.f32 %v6985_v39, %v15373_v61  ;;  %v15390_v7 = vld [vmem:[#allocation372_spill] sm:$0xff] }
 0x4b7   : > { %15381 = vst [vmem:[#allocation110_spill] sm:$0xff] %v12594_v56  ;;  %v12613_v28 = vadd.f32 %v3980_v43, %v15386_v25  ;;  %v15388_v56 = vld [vmem:[#allocation137_spill] sm:$0xff]  ;;  %v15389_v12 = vsub.f32 %v6987_v41, %v15373_v61  ;;  %v15391_v53 = vsub.f32 %v6991_v45, %v15373_v61  ;;  %v15395_v25 = vld [vmem:[#allocation138_spill] sm:$0xff]  ;;  %v15399_v43 = vsub.f32 %v6998_v50, %v15373_v61 }
 0x4b8   : > { %6499 = vtanh.f32 %v15385_v9  ;;  %v6482_v19 = vpop.eup %6481  ;;  %v3998_v23 = vadd.f32 %v6480_v24, %v15388_v56  ;;  %v12626_v9 = vadd.f32 %v3997_v30, %v15392_v54  ;;  %v15394_v24 = vld [vmem:[#allocation322_spill] sm:$0xff]  ;;  %v15398_v30 = vld [vmem:[#allocation373_spill] sm:$0xff] }
 0x4b9   : > { %15387 = vst [vmem:[#allocation227_spill] sm:$0xff] %v12613_v28  ;;  %6501 = vtanh.f32 %v15389_v12  ;;  %v6484_v14 = vpop.eup %6483  ;;  %v3999_v40 = vadd.f32 %v6482_v19, %v15390_v7  ;;  %v12632_v12 = vadd.f32 %v11785_v62, %v15394_v24  ;;  %v15396_v19 = vsub.f32 %v6995_v48, %v15373_v61  ;;  %v15401_v24 = vld [vmem:[#allocation139_spill] sm:$0xff] }
 0x4ba   : > { %6503 = vtanh.f32 %v15391_v53  ;;  %15393 = vst [vmem:[#allocation462_spill] sm:$0xff] %v12626_v9  ;;  %v6486_v56 = vpop.eup %6485  ;;  %v4000_v47 = vadd.f32 %v6484_v14, %v15395_v25  ;;  %v12639_v7 = vadd.f32 %v3998_v23, %v11772_v0  ;;  %v15402_v0 = vsub.f32 %v6977_v29, %v11766_v4  ;;  %v15403_v23 = vld [vmem:[#allocation282_spill] sm:$0xff]  ;;  %v15513_v28 = vld [vmem:[#allocation443_spill] sm:$0xff] }
 0x4bb   : > { %6505 = vtanh.f32 %v15396_v19  ;;  %v6488_v53 = vpop.eup %6487  ;;  %v4001_v54 = vadd.f32 %v6486_v56, %v15398_v30  ;;  %v12646_v9 = vadd.f32 %v3999_v40, %v11776_v42  ;;  %v15405_v56 = vld [vmem:[#allocation86_spill] sm:$0xff]  ;;  %v15406_v40 = vld [vmem:[#allocation140_spill] sm:$0xff]  ;;  %v15410_v61 = vsub.f32 %v6983_v37, %v11766_v4 }
 0x4bc   : > { %15397 = vst [vmem:[#allocation68_spill] sm:$0xff] %v12639_v7  ;;  %6507 = vtanh.f32 %v15399_v43  ;;  %v6490_v14 = vpop.eup %6489  ;;  %v4002_v25 = vadd.f32 %v6488_v53, %v15401_v24  ;;  %v12655_v19 = vadd.f32 %v4000_v47, %v15403_v23  ;;  %v12661_v42 = vadd.f32 %v11802_v31, %v15405_v56  ;;  %v15409_v47 = vld [vmem:[#allocation375_spill] sm:$0xff]  ;;  %v15412_v56 = vld [vmem:[#allocation141_spill] sm:$0xff] }
 0x4bd   : > { %15400 = vst [vmem:[#allocation345_spill] sm:$0xff] %v12646_v9  ;;  %6509 = vtanh.f32 %v15402_v0  ;;  %v6492_v43 = vpop.eup %6491  ;;  %v4003_v30 = vadd.f32 %v6490_v14, %v15406_v40  ;;  %v15407_v53 = vsub.f32 %v6980_v34, %v11766_v4  ;;  %v12668_v24 = vadd.f32 %v4001_v54, %v11789_v22 }
 0x4be   : > { %15404 = vst [vmem:[#allocation228_spill] sm:$0xff] %v12655_v19  ;;  %v6494_v0 = vpop.eup %6493  ;;  %v4004_v23 = vadd.f32 %v6492_v43, %v15409_v47  ;;  %v12675_v62 = vadd.f32 %v4002_v25, %v11793_v33  ;;  %v15413_v22 = vsub.f32 %v6985_v39, %v11766_v4  ;;  %v15416_v25 = vld [vmem:[#allocation376_spill] sm:$0xff]  ;;  %v15420_v43 = vld [vmem:[#allocation142_spill] sm:$0xff] }
 0x4bf   : > { %6511 = vtanh.f32 %v15407_v53  ;;  %15408 = vst [vmem:[#allocation463_spill] sm:$0xff] %v12668_v24  ;;  %v6496_v14 = vpop.eup %6495  ;;  %v3989_v40 = vadd.f32 %v6494_v0, %v15412_v56  ;;  %v12684_v54 = vadd.f32 %v4003_v30, %v11797_v16  ;;  %v15415_v53 = vld [vmem:[#allocation323_spill] sm:$0xff]  ;;  %v15417_v0 = vsub.f32 %v6987_v41, %v11766_v4 }
 0x4c0   : > { %6513 = vtanh.f32 %v15410_v61  ;;  %15411 = vst [vmem:[#allocation305_spill] sm:$0xff] %v12675_v62  ;;  %v6498_v61 = vpop.eup %6497  ;;  %v12690_v33 = vadd.f32 %v11815_v17, %v15415_v53  ;;  %v3990_v47 = vadd.f32 %v6496_v14, %v15416_v25  ;;  %v12697_v56 = vadd.f32 %v4004_v23, %v11806_v15  ;;  %v15419_v16 = vld [vmem:[#allocation87_spill] sm:$0xff]  ;;  %v15422_v53 = vld [vmem:[#allocation46_spill] sm:$0xff]  ;;  %v15426_v23 = vld [vmem:[#allocation324_spill] sm:$0xff] }
 0x4c1   : > { %6515 = vtanh.f32 %v15413_v22  ;;  %15414 = vst [vmem:[#allocation112_spill] sm:$0xff] %v12684_v54  ;;  %v12701_v30 = vadd.f32 %v11830_v52, %v15419_v16  ;;  %v3991_v31 = vadd.f32 %v6498_v61, %v15420_v43  ;;  %v15421_v17 = vsub.f32 %v6991_v45, %v11766_v4  ;;  %v15424_v54 = vld [vmem:[#allocation377_spill] sm:$0xff]  ;;  %v15429_v16 = vld [vmem:[#allocation434_spill] sm:$0xff]  ;;  %v15431_v62 = vld [vmem:[#allocation143_spill] sm:$0xff] }
 0x4c2   : > { %6517 = vtanh.f32 %v15417_v0  ;;  %15418 = vst [vmem:[#allocation306_spill] sm:$0xff] %v12697_v56  ;;  %v6500_v22 = vpop.eup %6499  ;;  %v12708_v14 = vadd.f32 %v3989_v40, %v15422_v53  ;;  %v15425_v15 = vsub.f32 %v6995_v48, %v11766_v4  ;;  %v15427_v56 = vld [vmem:[#allocation47_spill] sm:$0xff]  ;;  %v12719_v43 = vadd.f32 %v3990_v47, %v15429_v16  ;;  %v15433_v53 = vld [vmem:[#allocation88_spill] sm:$0xff] }
 0x4c3   : > { %6519 = vtanh.f32 %v15421_v17  ;;  %v6502_v25 = vpop.eup %6501  ;;  %v3992_v0 = vadd.f32 %v6500_v22, %v15424_v54  ;;  %v12716_v52 = vadd.f32 %v15427_v56, %v15426_v23  ;;  %v15432_v40 = vsub.f32 %v6998_v50, %v11766_v4  ;;  %v15434_v54 = vld [vmem:[#allocation435_spill] sm:$0xff]  ;;  %v15438_v56 = vld [vmem:[#allocation378_spill] sm:$0xff]  ;;  %v15444_v4 = vld [vmem:[#allocation284_spill] sm:$0xff] }
 0x4c4   : > { %15423 = vst [vmem:[#allocation229_spill] sm:$0xff] %v12708_v14  ;;  %6521 = vtanh.f32 %v15425_v15  ;;  %15430 = vst [vmem:[#allocation113_spill] sm:$0xff] %v12719_v43  ;;  %v6504_v61 = vpop.eup %6503  ;;  %v3993_v17 = vadd.f32 %v6502_v25, %v15431_v62  ;;  %v12727_v22 = vadd.f32 %v15434_v54, %v15433_v53  ;;  %v15436_v14 = vld [vmem:[#allocation200_spill] sm:$0xff]  ;;  %v15439_v47 = vld [vmem:[#allocation199_spill] sm:$0xff] }
 0x4c5   : > { %15428 = vst [vmem:[#allocation464_spill] sm:$0xff] %v12716_v52  ;;  %6523 = vtanh.f32 %v15432_v40  ;;  %v12730_v15 = vadd.f32 %v3991_v31, %v15436_v14  ;;  %v6506_v24 = vpop.eup %6505  ;;  %v3994_v23 = vadd.f32 %v6504_v61, %v15438_v56  ;;  %v15440_v16 = vsub.f32 %v6977_v29, %v15439_v47  ;;  %v15441_v43 = vld [vmem:[#allocation325_spill] sm:$0xff]  ;;  %v15446_v53 = vld [vmem:[#allocation144_spill] sm:$0xff] }
 0x4c6   : > { %15435 = vst [vmem:[#allocation70_spill] sm:$0xff] %v12727_v22  ;;  %v15442_v62 = vld [vmem:[#allocation201_spill] sm:$0xff]  ;;  %v12741_v40 = vadd.f32 %v3992_v0, %v15444_v4  ;;  %v6508_v19 = vpop.eup %6507  ;;  %v3995_v54 = vadd.f32 %v6506_v24, %v15446_v53  ;;  %v15447_v31 = vsub.f32 %v6980_v34, %v15439_v47  ;;  %v15454_v0 = vsub.f32 %v6983_v37, %v15439_v47  ;;  %v15455_v4 = vld [vmem:[#allocation326_spill] sm:$0xff]  ;;  %v15492_v22 = vld [vmem:[#allocation216_spill] sm:$0xff] }
 0x4c7   : > { %15437 = vst [vmem:[#allocation230_spill] sm:$0xff] %v12730_v15  ;;  %6525 = vtanh.f32 %v15440_v16  ;;  %v12738_v25 = vadd.f32 %v15442_v62, %v15441_v43  ;;  %v15448_v14 = vld [vmem:[#allocation89_spill] sm:$0xff]  ;;  %v15451_v15 = vld [vmem:[#allocation436_spill] sm:$0xff]  ;;  %v6510_v9 = vpop.eup %6509  ;;  %v15453_v43 = vld [vmem:[#allocation379_spill] sm:$0xff] }
 0x4c8   : > { %15445 = vst [vmem:[#allocation352_spill] sm:$0xff] %v12741_v40  ;;  %6527 = vtanh.f32 %v15447_v31  ;;  %v15449_v61 = vld [vmem:[#allocation285_spill] sm:$0xff]  ;;  %v12752_v16 = vadd.f32 %v3993_v17, %v15451_v15  ;;  %v3996_v62 = vadd.f32 %v6508_v19, %v15453_v43  ;;  %v15458_v40 = vld [vmem:[#allocation202_spill] sm:$0xff]  ;;  %v15461_v17 = vsub.f32 %v6985_v39, %v15439_v47 }
 0x4c9   : > { %15443 = vst [vmem:[#allocation465_spill] sm:$0xff] %v12738_v25  ;;  %v12749_v56 = vadd.f32 %v15449_v61, %v15448_v14  ;;  %6529 = vtanh.f32 %v15454_v0  ;;  %v15456_v24 = vld [vmem:[#allocation437_spill] sm:$0xff]  ;;  %v12763_v31 = vadd.f32 %v3994_v23, %v15458_v40  ;;  %v6512_v20 = vpop.eup %6511  ;;  %v15462_v15 = vld [vmem:[#allocation90_spill] sm:$0xff]  ;;  %v15468_v23 = vsub.f32 %v6987_v41, %v15439_v47  ;;  %v15469_v40 = vld [vmem:[#allocation327_spill] sm:$0xff] }
 0x4ca   : > { %15452 = vst [vmem:[#allocation466_spill] sm:$0xff] %v12752_v16  ;;  %v12760_v53 = vadd.f32 %v15456_v24, %v15455_v4  ;;  %v15460_v14 = vld [vmem:[#allocation145_spill] sm:$0xff]  ;;  %6531 = vtanh.f32 %v15461_v17  ;;  %v15463_v19 = vld [vmem:[#allocation438_spill] sm:$0xff]  ;;  %v6514_v7 = vpop.eup %6513 }
 0x4cb   : > { %15450 = vst [vmem:[#allocation231_spill] sm:$0xff] %v12749_v56  ;;  %15459 = vst [vmem:[#allocation118_spill] sm:$0xff] %v12763_v31  ;;  %v4013_v61 = vadd.f32 %v6510_v9, %v15460_v14  ;;  %v12771_v43 = vadd.f32 %v15463_v19, %v15462_v15  ;;  %v15465_v16 = vld [vmem:[#allocation49_spill] sm:$0xff]  ;;  %v15467_v4 = vld [vmem:[#allocation146_spill] sm:$0xff]  ;;  %6533 = vtanh.f32 %v15468_v23 }
 0x4cc   : > { %15457 = vst [vmem:[#allocation71_spill] sm:$0xff] %v12760_v53  ;;  %v12774_v0 = vadd.f32 %v3995_v54, %v15465_v16  ;;  %v4014_v24 = vadd.f32 %v6512_v20, %v15467_v4  ;;  %v15470_v9 = vld [vmem:[#allocation287_spill] sm:$0xff]  ;;  %v15472_v31 = vld [vmem:[#allocation50_spill] sm:$0xff]  ;;  %v6516_v53 = vpop.eup %6515  ;;  %v15476_v16 = vsub.f32 %v6991_v45, %v15439_v47  ;;  %v15478_v4 = vld [vmem:[#allocation441_spill] sm:$0xff] }
 0x4cd   : > { %15464 = vst [vmem:[#allocation232_spill] sm:$0xff] %v12771_v43  ;;  %v12782_v14 = vadd.f32 %v15470_v9, %v15469_v40  ;;  %v12785_v17 = vadd.f32 %v3996_v62, %v15472_v31  ;;  %v15474_v15 = vld [vmem:[#allocation147_spill] sm:$0xff]  ;;  %v15475_v43 = vld [vmem:[#allocation204_spill] sm:$0xff]  ;;  %v6518_v23 = vpop.eup %6517  ;;  %v15480_v56 = vld [vmem:[#allocation382_spill] sm:$0xff]  ;;  %v15482_v62 = vsub.f32 %v6995_v48, %v15439_v47 }
 0x4ce   : > { %15466 = vst [vmem:[#allocation467_spill] sm:$0xff] %v12774_v0  ;;  %v4015_v19 = vadd.f32 %v6514_v7, %v15474_v15  ;;  %v4141_v54 = vadd.f32 %v4013_v61, %v15475_v43  ;;  %6535 = vtanh.f32 %v15476_v16  ;;  %v15477_v20 = vld [vmem:[#allocation91_spill] sm:$0xff]  ;;  %v4016_v40 = vadd.f32 %v6516_v53, %v15480_v56  ;;  %v15483_v7 = vld [vmem:[#allocation328_spill] sm:$0xff]  ;;  %v6520_v43 = vpop.eup %6519 }
 0x4cf   : > { %15471 = vst [vmem:[#allocation308_spill] sm:$0xff] %v12782_v14  ;;  %15473 = vst [vmem:[#allocation119_spill] sm:$0xff] %v12785_v17  ;;  %v12794_v0 = vadd.f32 %v15478_v4, %v15477_v20  ;;  %v15481_v9 = vld [vmem:[#allocation439_spill] sm:$0xff]  ;;  %6537 = vtanh.f32 %v15482_v62  ;;  %v15486_v15 = vld [vmem:[#allocation148_spill] sm:$0xff]  ;;  %v15489_v56 = vsub.f32 %v6998_v50, %v15439_v47  ;;  %v6522_v53 = vpop.eup %6521 }
 0x4d0   : > { %v4142_v14 = vadd.f32 %v4014_v24, %v15481_v9  ;;  %v15484_v31 = vld [vmem:[#allocation207_spill] sm:$0xff]  ;;  %v4017_v16 = vadd.f32 %v6518_v23, %v15486_v15  ;;  %v15487_v17 = vld [vmem:[#allocation205_spill] sm:$0xff]  ;;  %v15488_v20 = vld [vmem:[#allocation58_spill] sm:$0xff] }
 0x4d1   : > { %15479 = vst [vmem:[#allocation233_spill] sm:$0xff] %v12794_v0  ;;  %v12803_v61 = vadd.f32 %v15484_v31, %v15483_v7  ;;  %v4143_v25 = vadd.f32 %v4015_v19, %v15487_v17  ;;  %v12808_v4 = vadd.f32 %v4141_v54, %v15488_v20  ;;  %6539 = vtanh.f32 %v15489_v56  ;;  %v15490_v24 = vld [vmem:[#allocation383_spill] sm:$0xff]  ;;  %v15491_v62 = vld [vmem:[#allocation440_spill] sm:$0xff]  ;;  %v6524_v17 = vpop.eup %6523  ;;  %v15495_v19 = vld [vmem:[#allocation149_spill] sm:$0xff] }
 0x4d2   : > { %v4018_v9 = vadd.f32 %v6520_v43, %v15490_v24  ;;  %v4144_v0 = vadd.f32 %v4016_v40, %v15491_v62  ;;  %v12816_v7 = vadd.f32 %v4142_v14, %v15492_v22  ;;  %v15493_v31 = vld [vmem:[#allocation203_spill] sm:$0xff]  ;;  %v4019_v54 = vadd.f32 %v6522_v53, %v15495_v19  ;;  %v15496_v15 = vld [vmem:[#allocation206_spill] sm:$0xff]  ;;  %v6526_v40 = vpop.eup %6525  ;;  %v15498_v56 = vld [vmem:[#allocation384_spill] sm:$0xff] }
 0x4d3   : > { %15485 = vst [vmem:[#allocation468_spill] sm:$0xff] %v12803_v61  ;;  %v15494_v23 = vsub.f32 %v6977_v29, %v15493_v31  ;;  %v4145_v20 = vadd.f32 %v4017_v16, %v15496_v15  ;;  %v12824_v47 = vadd.f32 %v4143_v25, %v12132_v5  ;;  %v15497_v43 = vsub.f32 %v6980_v34, %v15493_v31  ;;  %v15499_v14 = vld [vmem:[#allocation288_spill] sm:$0xff]  ;;  %v6528_v16 = vpop.eup %6527  ;;  %v15503_v25 = vld [vmem:[#allocation217_spill] sm:$0xff]  ;;  %v15504_v15 = vld [vmem:[#allocation150_spill] sm:$0xff] }
 0x4d4   : > { %v4020_v22 = vadd.f32 %v6524_v17, %v15498_v56  ;;  %v4146_v24 = vadd.f32 %v4018_v9, %v15499_v14  ;;  %v15500_v62 = vld [vmem:[#allocation296_spill] sm:$0xff]  ;;  %v15501_v53 = vsub.f32 %v6983_v37, %v15493_v31  ;;  %v15505_v17 = vsub.f32 %v6985_v39, %v15493_v31  ;;  %v6530_v9 = vpop.eup %6529  ;;  %v15506_v56 = vld [vmem:[#allocation442_spill] sm:$0xff] }
 0x4d5   : > { %6541 = vtanh.f32 %v15494_v23  ;;  %v12832_v61 = vadd.f32 %v4144_v0, %v15500_v62  ;;  %v15502_v23 = vld [vmem:[#allocation52_spill] sm:$0xff]  ;;  %v12839_v19 = vadd.f32 %v4145_v20, %v15503_v25  ;;  %v15508_v62 = vld [vmem:[#allocation385_spill] sm:$0xff]  ;;  %v6532_v20 = vpop.eup %6531 }
 0x4d6   : > { %6543 = vtanh.f32 %v15497_v43  ;;  %v4147_v5 = vadd.f32 %v4019_v54, %v15502_v23  ;;  %v4005_v43 = vadd.f32 %v6526_v40, %v15504_v15  ;;  %v4148_v0 = vadd.f32 %v4020_v22, %v15506_v56  ;;  %v15510_v23 = vld [vmem:[#allocation297_spill] sm:$0xff]  ;;  %v15512_v40 = vld [vmem:[#allocation151_spill] sm:$0xff] }
 0x4d7   : > { %6545 = vtanh.f32 %v15501_v53  ;;  %v12847_v14 = vadd.f32 %v4146_v24, %v12161_v58  ;;  %v4006_v53 = vadd.f32 %v6528_v16, %v15508_v62  ;;  %v15509_v54 = vsub.f32 %v6987_v41, %v15493_v31  ;;  %v6534_v58 = vpop.eup %6533  ;;  %v15515_v24 = vld [vmem:[#allocation335_spill] sm:$0xff]  ;;  %v15517_v16 = vld [vmem:[#allocation386_spill] sm:$0xff] }
 0x4d8   : > { %6547 = vtanh.f32 %v15505_v17  ;;  %v12854_v25 = vadd.f32 %v4147_v5, %v15510_v23  ;;  %v4007_v15 = vadd.f32 %v6530_v9, %v15512_v40  ;;  %v4133_v17 = vadd.f32 %v4005_v43, %v15513_v28  ;;  %v6536_v23 = vpop.eup %6535  ;;  %v15520_v9 = vld [vmem:[#allocation152_spill] sm:$0xff]  ;;  %v15521_v28 = vld [vmem:[#allocation291_spill] sm:$0xff] }
 0x4d9   : > { %15507 = vst [vmem:[#allocation309_spill] sm:$0xff] %v12847_v14  ;;  %6549 = vtanh.f32 %v15509_v54  ;;  %v15514_v22 = vsub.f32 %v6991_v45, %v15493_v31  ;;  %v12862_v56 = vadd.f32 %v4148_v0, %v15515_v24  ;;  %v4008_v62 = vadd.f32 %v6532_v20, %v15517_v16  ;;  %v15518_v14 = vld [vmem:[#allocation209_spill] sm:$0xff]  ;;  %v15525_v20 = vld [vmem:[#allocation387_spill] sm:$0xff] }
 0x4da   : > { %15511 = vst [vmem:[#allocation114_spill] sm:$0xff] %v12854_v25  ;;  %v4134_v54 = vadd.f32 %v4006_v53, %v15518_v14  ;;  %v15519_v5 = vsub.f32 %v6995_v48, %v15493_v31  ;;  %v4009_v40 = vadd.f32 %v6534_v58, %v15520_v9  ;;  %v4135_v43 = vadd.f32 %v4007_v15, %v15521_v28  ;;  %v15522_v25 = vld [vmem:[#allocation453_spill] sm:$0xff] }
 0x4db   : > { %6551 = vtanh.f32 %v15514_v22  ;;  %15516 = vst [vmem:[#allocation234_spill] sm:$0xff] %v12862_v56  ;;  %v12872_v52 = vadd.f32 %v4133_v17, %v15522_v25  ;;  %v15524_v0 = vsub.f32 %v6998_v50, %v15493_v31  ;;  %v6538_v22 = vpop.eup %6537  ;;  %v4010_v24 = vadd.f32 %v6536_v23, %v15525_v20  ;;  %v15526_v14 = vld [vmem:[#allocation445_spill] sm:$0xff]  ;;  %v15532_v17 = vld [vmem:[#allocation211_spill] sm:$0xff]  ;;  %v15537_v20 = vld [vmem:[#allocation56_spill] sm:$0xff] }
 0x4dc   : > { %6553 = vtanh.f32 %v15519_v5  ;;  %v4136_v53 = vadd.f32 %v4008_v62, %v15526_v14  ;;  %v15527_v16 = vld [vmem:[#allocation61_spill] sm:$0xff]  ;;  %v6540_v15 = vpop.eup %6539  ;;  %v4137_v28 = vadd.f32 %v4009_v40, %v15532_v17 }
 0x4dd   : > { %15523 = vst [vmem:[#allocation469_spill] sm:$0xff] %v12872_v52  ;;  %6555 = vtanh.f32 %v15524_v0  ;;  %v12880_v56 = vadd.f32 %v4134_v54, %v15527_v16  ;;  %v15529_v5 = vld [vmem:[#allocation53_spill] sm:$0xff]  ;;  %v15533_v52 = vld [vmem:[#allocation219_spill] sm:$0xff]  ;;  %v15536_v0 = vld [vmem:[#allocation388_spill] sm:$0xff]  ;;  %v4138_v14 = vadd.f32 %v4010_v24, %v15537_v20 }
 0x4de   : > { %v15530_v58 = vsub.f32 %v6977_v29, %v15529_v5  ;;  %v15531_v9 = vld [vmem:[#allocation153_spill] sm:$0xff]  ;;  %v12888_v31 = vadd.f32 %v4135_v43, %v15533_v52  ;;  %v15535_v23 = vsub.f32 %v6980_v34, %v15529_v5  ;;  %v4012_v54 = vadd.f32 %v6540_v15, %v15536_v0  ;;  %v15546_v0 = vld [vmem:[#allocation154_spill] sm:$0xff] }
 0x4df   : > { %15528 = vst [vmem:[#allocation73_spill] sm:$0xff] %v12880_v56  ;;  %v4011_v25 = vadd.f32 %v6538_v22, %v15531_v9  ;;  %v6542_v62 = vpop.eup %6541  ;;  %v12896_v16 = vadd.f32 %v4136_v53, %v12221_v57  ;;  %v15539_v22 = vsub.f32 %v6983_v37, %v15529_v5  ;;  %v12903_v43 = vadd.f32 %v4137_v28, %v12228_v11  ;;  %v15542_v9 = vld [vmem:[#allocation249_spill] sm:$0xff]  ;;  %v15585_v56 = vld [vmem:[#allocation452_spill] sm:$0xff] }
 0x4e0   : > { %6557 = vtanh.f32 %v15530_v58  ;;  %15534 = vst [vmem:[#allocation115_spill] sm:$0xff] %v12888_v31  ;;  %v6544_v40 = vpop.eup %6543  ;;  %v15540_v58 = vld [vmem:[#allocation448_spill] sm:$0xff]  ;;  %v4029_v17 = vadd.f32 %v6542_v62, %v15542_v9  ;;  %v15543_v15 = vsub.f32 %v6985_v39, %v15529_v5  ;;  %v12911_v53 = vadd.f32 %v4138_v14, %v12237_v26  ;;  %v15549_v62 = vld [vmem:[#allocation389_spill] sm:$0xff] }
 0x4e1   : > { %6559 = vtanh.f32 %v15535_v23  ;;  %15538 = vst [vmem:[#allocation235_spill] sm:$0xff] %v12896_v16  ;;  %v4139_v52 = vadd.f32 %v4011_v25, %v15540_v58  ;;  %15541 = vst [vmem:[#allocation470_spill] sm:$0xff] %v12903_v43  ;;  %v6546_v24 = vpop.eup %6545  ;;  %v15544_v23 = vld [vmem:[#allocation212_spill] sm:$0xff]  ;;  %v4030_v20 = vadd.f32 %v6544_v40, %v15546_v0  ;;  %v15547_v25 = vsub.f32 %v6987_v41, %v15529_v5  ;;  %v15550_v58 = vld [vmem:[#allocation447_spill] sm:$0xff] }
 0x4e2   : > { %6561 = vtanh.f32 %v15539_v22  ;;  %v4140_v57 = vadd.f32 %v4012_v54, %v15544_v23  ;;  %15545 = vst [vmem:[#allocation74_spill] sm:$0xff] %v12911_v53  ;;  %v6548_v11 = vpop.eup %6547  ;;  %v4031_v22 = vadd.f32 %v6546_v24, %v15549_v62  ;;  %v4157_v9 = vadd.f32 %v4029_v17, %v15550_v58  ;;  %v15552_v14 = vld [vmem:[#allocation337_spill] sm:$0xff]  ;;  %v15554_v40 = vld [vmem:[#allocation155_spill] sm:$0xff]  ;;  %v15557_v24 = vld [vmem:[#allocation390_spill] sm:$0xff] }
 0x4e3   : > { %6563 = vtanh.f32 %v15543_v15  ;;  %v12918_v28 = vadd.f32 %v4139_v52, %v12249_v2  ;;  %v15551_v54 = vsub.f32 %v6991_v45, %v15529_v5  ;;  %v6550_v26 = vpop.eup %6549  ;;  %v4032_v23 = vadd.f32 %v6548_v11, %v15554_v40  ;;  %v15555_v0 = vld [vmem:[#allocation293_spill] sm:$0xff]  ;;  %v15558_v17 = vld [vmem:[#allocation214_spill] sm:$0xff]  ;;  %v15561_v11 = vld [vmem:[#allocation156_spill] sm:$0xff] }
 0x4e4   : > { %6565 = vtanh.f32 %v15547_v25  ;;  %v12926_v15 = vadd.f32 %v4140_v57, %v15552_v14  ;;  %v4158_v25 = vadd.f32 %v4030_v20, %v15555_v0  ;;  %v15556_v2 = vsub.f32 %v6995_v48, %v15529_v5  ;;  %v15562_v20 = vld [vmem:[#allocation294_spill] sm:$0xff]  ;;  %v15565_v53 = vld [vmem:[#allocation299_spill] sm:$0xff]  ;;  %v15580_v31 = vld [vmem:[#allocation157_spill] sm:$0xff] }
 0x4e5   : > { %15548 = vst [vmem:[#allocation350_spill] sm:$0xff] %v12918_v28  ;;  %6567 = vtanh.f32 %v15551_v54  ;;  %v6552_v52 = vpop.eup %6551  ;;  %v4033_v62 = vadd.f32 %v6550_v26, %v15557_v24  ;;  %v4159_v58 = vadd.f32 %v4031_v22, %v15558_v17  ;;  %v15559_v54 = vsub.f32 %v6998_v50, %v15529_v5  ;;  %v15560_v28 = vld [vmem:[#allocation220_spill] sm:$0xff]  ;;  %v15566_v24 = vld [vmem:[#allocation391_spill] sm:$0xff]  ;;  %v15571_v43 = vld [vmem:[#allocation450_spill] sm:$0xff] }
 0x4e6   : > { %15553 = vst [vmem:[#allocation236_spill] sm:$0xff] %v12926_v15  ;;  %6569 = vtanh.f32 %v15556_v2  ;;  %v12939_v57 = vadd.f32 %v4157_v9, %v15560_v28  ;;  %v6554_v14 = vpop.eup %6553  ;;  %v4034_v40 = vadd.f32 %v6552_v52, %v15561_v11  ;;  %v4160_v0 = vadd.f32 %v4032_v23, %v15562_v20  ;;  %v15563_v15 = vld [vmem:[#allocation449_spill] sm:$0xff]  ;;  %v15567_v5 = vld [vmem:[#allocation215_spill] sm:$0xff]  ;;  %v15569_v9 = vld [vmem:[#allocation104_spill] sm:$0xff] }
 0x4e7   : > { %6571 = vtanh.f32 %v15559_v54  ;;  %v15564_v2 = vsub.f32 %v6977_v29, %v15563_v15  ;;  %v12947_v26 = vadd.f32 %v4158_v25, %v15565_v53  ;;  %v6556_v22 = vpop.eup %6555  ;;  %v4035_v17 = vadd.f32 %v6554_v14, %v15566_v24  ;;  %v15570_v11 = vld [vmem:[#allocation9_spill] sm:$0xff]  ;;  %v15573_v25 = vld [vmem:[#allocation300_spill] sm:$0xff]  ;;  %v15574_v24 = vld [vmem:[#allocation59_spill] sm:$0xff] }
 0x4e8   : > { %v4161_v54 = vadd.f32 %v4033_v62, %v15567_v5  ;;  %v15568_v28 = vsub.f32 %v6980_v34, %v15563_v15  ;;  %v12955_v52 = vadd.f32 %v4159_v58, %v15569_v9  ;;  %v4036_v20 = vadd.f32 %v6556_v22, %v15570_v11  ;;  %v15575_v16 = vld [vmem:[#allocation10_spill] sm:$0xff]  ;;  %v15577_v9 = vld [vmem:[#allocation456_spill] sm:$0xff] }
 0x4e9   : > { %6573 = vtanh.f32 %v15564_v2  ;;  %v4162_v2 = vadd.f32 %v4034_v40, %v15571_v43  ;;  %v15572_v53 = vsub.f32 %v6983_v37, %v15563_v15  ;;  %v12963_v14 = vadd.f32 %v4160_v0, %v15573_v25  ;;  %v15579_v40 = vld [vmem:[#allocation451_spill] sm:$0xff]  ;;  %v15582_v25 = vld [vmem:[#allocation105_spill] sm:$0xff] }
 0x4ea   : > { %6575 = vtanh.f32 %v15568_v28  ;;  %v6558_v23 = vpop.eup %6557  ;;  %v4163_v5 = vadd.f32 %v4035_v17, %v15574_v24  ;;  %v15576_v58 = vsub.f32 %v6985_v39, %v15563_v15  ;;  %v12971_v22 = vadd.f32 %v4161_v54, %v15577_v9  ;;  %v15587_v9 = vld [vmem:[#allocation64_spill] sm:$0xff] }
 0x4eb   : > { %6577 = vtanh.f32 %v15572_v53  ;;  %v6560_v62 = vpop.eup %6559  ;;  %v4021_v28 = vadd.f32 %v6558_v23, %v15575_v16  ;;  %v4164_v11 = vadd.f32 %v4036_v20, %v15579_v40  ;;  %v15581_v0 = vsub.f32 %v6987_v41, %v15563_v15  ;;  %v15584_v23 = vld [vmem:[#allocation392_spill] sm:$0xff] }
 0x4ec   : > { %6579 = vtanh.f32 %v15576_v58  ;;  %15578 = vst [vmem:[#allocation471_spill] sm:$0xff] %v12971_v22  ;;  %v6562_v43 = vpop.eup %6561  ;;  %v4022_v53 = vadd.f32 %v6560_v62, %v15580_v31  ;;  %v12979_v17 = vadd.f32 %v4162_v2, %v15582_v25  ;;  %v15586_v54 = vsub.f32 %v6991_v45, %v15563_v15  ;;  %v15588_v62 = vld [vmem:[#allocation158_spill] sm:$0xff]  ;;  %v15591_v25 = vld [vmem:[#allocation457_spill] sm:$0xff] }
 0x4ed   : > { %6581 = vtanh.f32 %v15581_v0  ;;  %v6564_v16 = vpop.eup %6563  ;;  %v4023_v24 = vadd.f32 %v6562_v43, %v15584_v23  ;;  %v4149_v58 = vadd.f32 %v4021_v28, %v15585_v56  ;;  %v12987_v20 = vadd.f32 %v4163_v5, %v15587_v9  ;;  %v15589_v22 = vld [vmem:[#allocation218_spill] sm:$0xff]  ;;  %v15592_v28 = vld [vmem:[#allocation393_spill] sm:$0xff] }
 0x4ee   : > { %15583 = vst [vmem:[#allocation311_spill] sm:$0xff] %v12979_v17  ;;  %6583 = vtanh.f32 %v15586_v54  ;;  %v6566_v31 = vpop.eup %6565  ;;  %v4024_v40 = vadd.f32 %v6564_v16, %v15588_v62  ;;  %v4150_v0 = vadd.f32 %v4022_v53, %v15589_v22  ;;  %v15590_v2 = vsub.f32 %v6995_v48, %v15563_v15  ;;  %v15593_v17 = vld [vmem:[#allocation454_spill] sm:$0xff]  ;;  %v15595_v53 = vld [vmem:[#allocation159_spill] sm:$0xff] }
 0x4ef   : > { %v12995_v43 = vadd.f32 %v4164_v11, %v15591_v25  ;;  %v6568_v56 = vpop.eup %6567  ;;  %v4025_v23 = vadd.f32 %v6566_v31, %v15592_v28  ;;  %v4151_v54 = vadd.f32 %v4023_v24, %v15593_v17  ;;  %v15594_v5 = vsub.f32 %v6998_v50, %v15563_v15  ;;  %v15596_v62 = vld [vmem:[#allocation62_spill] sm:$0xff]  ;;  %v15600_v15 = vld [vmem:[#allocation455_spill] sm:$0xff] }
 0x4f0   : > { %6585 = vtanh.f32 %v15590_v2  ;;  %v13003_v16 = vadd.f32 %v4149_v58, %v12381_v63  ;;  %v6570_v22 = vpop.eup %6569  ;;  %v4026_v9 = vadd.f32 %v6568_v56, %v15595_v53  ;;  %v4152_v2 = vadd.f32 %v4024_v40, %v15596_v62  ;;  %v15597_v11 = vld [vmem:[#allocation102_spill] sm:$0xff]  ;;  %v15602_v56 = vld [vmem:[#allocation251_spill] sm:$0xff]  ;;  %v15603_v62 = vld [vmem:[#allocation221_spill] sm:$0xff] }
 0x4f1   : > { %6587 = vtanh.f32 %v15594_v5  ;;  %v15598_v25 = vsub.f32 %v6977_v29, %v15597_v11  ;;  %v13011_v31 = vadd.f32 %v4150_v0, %v12392_v46  ;;  %v6572_v17 = vpop.eup %6571  ;;  %v15599_v24 = vld [vmem:[#allocation394_spill] sm:$0xff]  ;;  %v4153_v5 = vadd.f32 %v4025_v23, %v15600_v15  ;;  %v15606_v15 = vld [vmem:[#allocation252_spill] sm:$0xff] }
 0x4f2   : > { %v4027_v28 = vadd.f32 %v6570_v22, %v15599_v24  ;;  %v15601_v63 = vsub.f32 %v6980_v34, %v15597_v11  ;;  %v13019_v58 = vadd.f32 %v4151_v54, %v12403_v59  ;;  %v4028_v53 = vadd.f32 %v6572_v17, %v15602_v56  ;;  %v15605_v22 = vld [vmem:[#allocation222_spill] sm:$0xff]  ;;  %v15608_v17 = vld [vmem:[#allocation341_spill] sm:$0xff] }
 0x4f3   : > { %6589 = vtanh.f32 %v15598_v25  ;;  %v6574_v40 = vpop.eup %6573  ;;  %v4154_v25 = vadd.f32 %v4026_v9, %v15603_v62  ;;  %v15604_v46 = vsub.f32 %v6983_v37, %v15597_v11  ;;  %v13027_v0 = vadd.f32 %v4152_v2, %v12414_v35  ;;  %v15609_v62 = vld [vmem:[#allocation12_spill] sm:$0xff] }
 0x4f4   : > { %6591 = vtanh.f32 %v15601_v63  ;;  %v6576_v23 = vpop.eup %6575  ;;  %v4155_v24 = vadd.f32 %v4027_v28, %v15605_v22  ;;  %v4045_v63 = vadd.f32 %v6574_v40, %v15606_v15  ;;  %v15607_v59 = vsub.f32 %v6985_v39, %v15597_v11  ;;  %v15611_v40 = vld [vmem:[#allocation160_spill] sm:$0xff]  ;;  %v15612_v15 = vld [vmem:[#allocation223_spill] sm:$0xff] }
 0x4f5   : > { %6593 = vtanh.f32 %v15604_v46  ;;  %v13035_v54 = vadd.f32 %v4153_v5, %v12425_v21  ;;  %v6578_v9 = vpop.eup %6577  ;;  %v4156_v56 = vadd.f32 %v4028_v53, %v15608_v17  ;;  %v4046_v46 = vadd.f32 %v6576_v23, %v15609_v62  ;;  %v15615_v23 = vld [vmem:[#allocation395_spill] sm:$0xff]  ;;  %v15616_v62 = vld [vmem:[#allocation458_spill] sm:$0xff] }
 0x4f6   : > { %6595 = vtanh.f32 %v15607_v59  ;;  %v15610_v35 = vsub.f32 %v6987_v41, %v15597_v11  ;;  %v13043_v2 = vadd.f32 %v4154_v25, %v12436_v49  ;;  %v6580_v28 = vpop.eup %6579  ;;  %v4047_v22 = vadd.f32 %v6578_v9, %v15611_v40  ;;  %v15618_v9 = vld [vmem:[#allocation161_spill] sm:$0xff] }
 0x4f7   : > { %v4173_v59 = vadd.f32 %v4045_v63, %v15612_v15  ;;  %v15613_v21 = vsub.f32 %v6991_v45, %v15597_v11  ;;  %v13051_v5 = vadd.f32 %v4155_v24, %v12448_v44  ;;  %v6582_v53 = vpop.eup %6581  ;;  %v4048_v17 = vadd.f32 %v6580_v28, %v15615_v23  ;;  %v15619_v15 = vld [vmem:[#allocation65_spill] sm:$0xff] }
 0x4f8   : > { %6597 = vtanh.f32 %v15610_v35  ;;  %v4174_v35 = vadd.f32 %v4046_v46, %v15616_v62  ;;  %v15617_v49 = vsub.f32 %v6995_v48, %v15597_v11  ;;  %v13059_v25 = vadd.f32 %v4156_v56, %v12459_v27  ;;  %v6584_v63 = vpop.eup %6583  ;;  %v15621_v46 = vld [vmem:[#allocation396_spill] sm:$0xff]  ;;  %v15622_v62 = vld [vmem:[#allocation107_spill] sm:$0xff] }
 0x4f9   : > { %6599 = vtanh.f32 %v15613_v21  ;;  %15614 = vst [vmem:[#allocation120_spill] sm:$0xff] %v13051_v5  ;;  %v4049_v40 = vadd.f32 %v6582_v53, %v15618_v9  ;;  %v4175_v21 = vadd.f32 %v4047_v22, %v15619_v15  ;;  %v4237_v44 = vadd.f32 %v4173_v59, %v12467_v13  ;;  %v15624_v53 = vld [vmem:[#allocation13_spill] sm:$0xff]  ;;  %v15625_v9 = vld [vmem:[#allocation224_spill] sm:$0xff]  ;;  %v15627_v15 = vld [vmem:[#allocation254_spill] sm:$0xff] }
 0x4fa   : > { %6601 = vtanh.f32 %v15617_v49  ;;  %v15620_v24 = vsub.f32 %v6998_v50, %v15597_v11  ;;  %v6586_v28 = vpop.eup %6585  ;;  %v4050_v23 = vadd.f32 %v6584_v63, %v15621_v46  ;;  %v4176_v5 = vadd.f32 %v4048_v17, %v15622_v62  ;;  %v15629_v46 = vld [vmem:[#allocation459_spill] sm:$0xff] }
 0x4fb   : > { %v4238_v49 = vadd.f32 %v4174_v35, %v12476_v1  ;;  %v15623_v27 = vsub.f32 %v6977_v29, %v12441_v6  ;;  %v6588_v56 = vpop.eup %6587  ;;  %v4051_v22 = vadd.f32 %v6586_v28, %v15624_v53  ;;  %v4177_v13 = vadd.f32 %v4049_v40, %v15625_v9  ;;  %v15634_v9 = vld [vmem:[#allocation108_spill] sm:$0xff] }
 0x4fc   : > { %6603 = vtanh.f32 %v15620_v24  ;;  %v4239_v59 = vadd.f32 %v4175_v21, %v12489_v18  ;;  %v15626_v11 = vsub.f32 %v6980_v34, %v12441_v6  ;;  %v4052_v17 = vadd.f32 %v6588_v56, %v15627_v15  ;;  %v15630_v21 = vld [vmem:[#allocation162_spill] sm:$0xff] }
 0x4fd   : > { %6605 = vtanh.f32 %v15623_v27  ;;  %v6590_v63 = vpop.eup %6589  ;;  %v4178_v1 = vadd.f32 %v4050_v23, %v12445_v60  ;;  %v4240_v35 = vadd.f32 %v4176_v5, %v12496_v51  ;;  %v15628_v24 = vsub.f32 %v6983_v37, %v12441_v6  ;;  %v15632_v5 = vld [vmem:[#allocation397_spill] sm:$0xff] }
 0x4fe   : > { %6607 = vtanh.f32 %v15626_v11  ;;  %v6592_v28 = vpop.eup %6591  ;;  %v4179_v40 = vadd.f32 %v4051_v22, %v15629_v46  ;;  %v4241_v18 = vadd.f32 %v4177_v13, %v12505_v8  ;;  %v4037_v62 = vadd.f32 %v6590_v63, %v15630_v21  ;;  %v15635_v13 = vld [vmem:[#allocation163_spill] sm:$0xff]  ;;  %v15636_v63 = vld [vmem:[#allocation302_spill] sm:$0xff]  ;;  %v15640_v46 = vld [vmem:[#allocation460_spill] sm:$0xff] }
 0x4ff   : > { %6609 = vtanh.f32 %v15628_v24  ;;  %v15631_v27 = vsub.f32 %v6985_v39, %v12441_v6  ;;  %v6594_v56 = vpop.eup %6593  ;;  %v4180_v60 = vadd.f32 %v4052_v17, %v12485_v3  ;;  %v4242_v51 = vadd.f32 %v4178_v1, %v12518_v32  ;;  %v15638_v17 = vld [vmem:[#allocation225_spill] sm:$0xff]  ;;  %v15639_v1 = vld [vmem:[#allocation398_spill] sm:$0xff] }
 0x500   : > { %v4038_v23 = vadd.f32 %v6592_v28, %v15632_v5  ;;  %v15633_v53 = vsub.f32 %v6987_v41, %v12441_v6  ;;  %v6596_v22 = vpop.eup %6595  ;;  %v4243_v8 = vadd.f32 %v4179_v40, %v15634_v9  ;;  %v4039_v11 = vadd.f32 %v6594_v56, %v15635_v13  ;;  %v15642_v5 = vld [vmem:[#allocation164_spill] sm:$0xff] }
 0x501   : > { %6611 = vtanh.f32 %v15631_v27  ;;  %v4165_v15 = vadd.f32 %v4037_v62, %v15636_v63  ;;  %v15637_v24 = vsub.f32 %v6991_v45, %v12441_v6  ;;  %v4244_v32 = vadd.f32 %v4180_v60, %v15638_v17 }
 0x502   : > { %6613 = vtanh.f32 %v15633_v53  ;;  %v6598_v3 = vpop.eup %6597  ;;  %v4040_v28 = vadd.f32 %v6596_v22, %v15639_v1  ;;  %v4166_v21 = vadd.f32 %v4038_v23, %v15640_v46  ;;  %v15641_v27 = vsub.f32 %v6995_v48, %v12441_v6  ;;  %v15643_v53 = vld [vmem:[#allocation303_spill] sm:$0xff] }
 0x503   : > { %6615 = vtanh.f32 %v15637_v24  ;;  %v6600_v40 = vpop.eup %6599  ;;  %v4041_v56 = vadd.f32 %v6598_v3, %v15642_v5  ;;  %v4167_v62 = vadd.f32 %v4039_v11, %v12574_v36  ;;  %v13112_v9 = vadd.f32 %v4165_v15, %v15643_v53  ;;  %v15645_v22 = vld [vmem:[#allocation399_spill] sm:$0xff]  ;;  %v15646_v24 = vld [vmem:[#allocation109_spill] sm:$0xff]  ;;  %v15649_v53 = vld [vmem:[#allocation16_spill] sm:$0xff] }
 0x504   : > { %6617 = vtanh.f32 %v15641_v27  ;;  %v15644_v13 = vsub.f32 %v6998_v50, %v12441_v6  ;;  %v6602_v60 = vpop.eup %6601  ;;  %v4042_v63 = vadd.f32 %v6600_v40, %v15645_v22  ;;  %v4168_v23 = vadd.f32 %v4040_v28, %v12603_v55  ;;  %v15647_v46 = vld [vmem:[#allocation15_spill] sm:$0xff]  ;;  %v15648_v15 = vld [vmem:[#allocation461_spill] sm:$0xff]  ;;  %v15652_v22 = vld [vmem:[#allocation110_spill] sm:$0xff] }
 0x505   : > { %v13120_v17 = vadd.f32 %v4166_v21, %v15646_v24  ;;  %v4269_v1 = vadd.f32 %v4237_v44, %v12808_v4  ;;  %v4043_v36 = vadd.f32 %v6602_v60, %v15647_v46  ;;  %v4169_v11 = vadd.f32 %v4041_v56, %v12632_v12  ;;  %v15651_v56 = vld [vmem:[#allocation165_spill] sm:$0xff] }
 0x506   : > { %6619 = vtanh.f32 %v15644_v13  ;;  %v6604_v3 = vpop.eup %6603  ;;  %v13126_v27 = vadd.f32 %v4167_v62, %v15648_v15  ;;  %v4270_v6 = vadd.f32 %v4238_v49, %v12816_v7  ;;  %v4170_v55 = vadd.f32 %v4042_v63, %v12661_v42  ;;  %v15650_v13 = vld [vmem:[#allocation67_spill] sm:$0xff]  ;;  %v15658_v15 = vld [vmem:[#allocation401_spill] sm:$0xff] }
 0x507   : > { %v6606_v5 = vpop.eup %6605  ;;  %v4044_v40 = vadd.f32 %v6604_v3, %v15649_v53  ;;  %v13132_v28 = vadd.f32 %v4168_v23, %v12578_v10  ;;  %v4271_v4 = vadd.f32 %v4239_v59, %v12824_v47  ;;  %v4171_v21 = vadd.f32 %v4043_v36, %v12690_v33  ;;  %v15653_v10 = vld [vmem:[#allocation400_spill] sm:$0xff]  ;;  %v15654_v23 = vld [vmem:[#allocation166_spill] sm:$0xff]  ;;  %v15656_v36 = vld [vmem:[#allocation309_spill] sm:$0xff] }
 0x508   : > { %v6608_v44 = vpop.eup %6607  ;;  %v13137_v12 = vadd.f32 %v4169_v11, %v15650_v13  ;;  %v4061_v62 = vadd.f32 %v6606_v5, %v15651_v56  ;;  %v4272_v7 = vadd.f32 %v4240_v35, %v12832_v61  ;;  %v13143_v42 = vadd.f32 %v4170_v55, %v15652_v22  ;;  %v15655_v3 = vld [vmem:[#allocation464_spill] sm:$0xff]  ;;  %v15657_v11 = vld [vmem:[#allocation227_spill] sm:$0xff]  ;;  %v15659_v53 = vld [vmem:[#allocation70_spill] sm:$0xff] }
 0x509   : > { %v6610_v49 = vpop.eup %6609  ;;  %v4172_v60 = vadd.f32 %v4044_v40, %v12701_v30  ;;  %v4062_v63 = vadd.f32 %v6608_v44, %v15653_v10  ;;  %v4273_v47 = vadd.f32 %v4241_v18, %v12839_v19  ;;  %v13148_v33 = vadd.f32 %v4171_v21, %v12606_v38  ;;  %v15660_v55 = vld [vmem:[#allocation114_spill] sm:$0xff]  ;;  %v15661_v18 = vld [vmem:[#allocation167_spill] sm:$0xff]  ;;  %v15662_v38 = vld [vmem:[#allocation465_spill] sm:$0xff] }
 0x50a   : > { %v4063_v24 = vadd.f32 %v6610_v49, %v15654_v23  ;;  %v4189_v46 = vadd.f32 %v4061_v62, %v15655_v3  ;;  %v4274_v61 = vadd.f32 %v4242_v51, %v15656_v36  ;;  %v4275_v44 = vadd.f32 %v4243_v8, %v15660_v55  ;;  %v15663_v56 = vld [vmem:[#allocation462_spill] sm:$0xff]  ;;  %v15665_v51 = vld [vmem:[#allocation257_spill] sm:$0xff]  ;;  %v15666_v3 = vld [vmem:[#allocation231_spill] sm:$0xff] }
 0x50b   : > { %v6612_v59 = vpop.eup %6611  ;;  %v4236_v30 = vadd.f32 %v4172_v60, %v15657_v11  ;;  %v4190_v40 = vadd.f32 %v4062_v63, %v15659_v53  ;;  %v15664_v22 = vld [vmem:[#allocation234_spill] sm:$0xff]  ;;  %v15667_v36 = vld [vmem:[#allocation68_spill] sm:$0xff]  ;;  %v15671_v53 = vld [vmem:[#allocation71_spill] sm:$0xff] }
 0x50c   : > { %v6614_v35 = vpop.eup %6613  ;;  %v4064_v5 = vadd.f32 %v6612_v59, %v15658_v15  ;;  %v4191_v21 = vadd.f32 %v4063_v24, %v15662_v38  ;;  %v4253_v49 = vadd.f32 %v4189_v46, %v15663_v56  ;;  %v4276_v62 = vadd.f32 %v4244_v32, %v15664_v22  ;;  %v15668_v63 = vld [vmem:[#allocation226_spill] sm:$0xff]  ;;  %v15672_v55 = vld [vmem:[#allocation345_spill] sm:$0xff] }
 0x50d   : > { %v6616_v19 = vpop.eup %6615  ;;  %v4065_v13 = vadd.f32 %v6614_v35, %v15661_v18  ;;  %v4254_v59 = vadd.f32 %v4190_v40, %v15667_v36  ;;  %v15669_v11 = vsub.f32 %v6977_v29, %v15668_v63  ;;  %v15670_v15 = vld [vmem:[#allocation258_spill] sm:$0xff]  ;;  %v15673_v18 = vld [vmem:[#allocation168_spill] sm:$0xff] }
 0x50e   : > { %v6618_v10 = vpop.eup %6617  ;;  %v4066_v23 = vadd.f32 %v6616_v19, %v15665_v51  ;;  %v4192_v60 = vadd.f32 %v4064_v5, %v15666_v3  ;;  %v4255_v46 = vadd.f32 %v4191_v21, %v15672_v55  ;;  %v4285_v32 = vadd.f32 %v4253_v49, %v12939_v57  ;;  %v15674_v19 = vld [vmem:[#allocation232_spill] sm:$0xff]  ;;  %v15677_v3 = vld [vmem:[#allocation463_spill] sm:$0xff] }
 0x50f   : > { %6621 = vtanh.f32 %v15669_v11  ;;  %v4067_v35 = vadd.f32 %v6618_v10, %v15670_v15  ;;  %v4193_v24 = vadd.f32 %v4065_v13, %v15671_v53  ;;  %v15675_v5 = vld [vmem:[#allocation228_spill] sm:$0xff]  ;;  %v4286_v40 = vadd.f32 %v4254_v59, %v12947_v26  ;;  %v15678_v13 = vld [vmem:[#allocation233_spill] sm:$0xff]  ;;  %v15681_v53 = vld [vmem:[#allocation471_spill] sm:$0xff] }
 0x510   : > { %v6620_v8 = vpop.eup %6619  ;;  %v4194_v56 = vadd.f32 %v4066_v23, %v15674_v19  ;;  %v4256_v22 = vadd.f32 %v4192_v60, %v15675_v5  ;;  %v15676_v51 = vld [vmem:[#allocation308_spill] sm:$0xff]  ;;  %v4287_v10 = vadd.f32 %v4255_v46, %v12955_v52  ;;  %v13178_v11 = vadd.f32 %v4285_v32, %v4269_v1  ;;  %v15679_v15 = vld [vmem:[#allocation305_spill] sm:$0xff]  ;;  %v15683_v52 = vld [vmem:[#allocation306_spill] sm:$0xff] }
 0x511   : > { %v4068_v38 = vadd.f32 %v6620_v8, %v15673_v18  ;;  %v4195_v29 = vadd.f32 %v4067_v35, %v15676_v51  ;;  %v4257_v36 = vadd.f32 %v4193_v24, %v15677_v3  ;;  %v13183_v8 = vadd.f32 %v4286_v40, %v4270_v6  ;;  %v15680_v23 = vld [vmem:[#allocation112_spill] sm:$0xff]  ;;  %v15684_v24 = vld [vmem:[#allocation311_spill] sm:$0xff]  ;;  %v15695_v40 = vld [vmem:[#allocation74_spill] sm:$0xff] }
 0x512   : > { %v4258_v57 = vadd.f32 %v4194_v56, %v15679_v15  ;;  %v4288_v49 = vadd.f32 %v4256_v22, %v12963_v14  ;;  %v13187_v59 = vadd.f32 %v4287_v10, %v4271_v4  ;;  %v15682_v35 = vsub.f32 %v6980_v34, %v15668_v63  ;;  %v15687_v34 = vld [vmem:[#allocation469_spill] sm:$0xff]  ;;  %v15691_v56 = vld [vmem:[#allocation115_spill] sm:$0xff]  ;;  %v15699_v3 = vld [vmem:[#allocation236_spill] sm:$0xff] }
 0x513   : > { %v4196_v21 = vadd.f32 %v4068_v38, %v15678_v13  ;;  %v4259_v60 = vadd.f32 %v4195_v29, %v15680_v23  ;;  %v4289_v26 = vadd.f32 %v4257_v36, %v15681_v53  ;;  %v15685_v14 = vsub.f32 %v6983_v37, %v15668_v63  ;;  %v15689_v37 = vld [vmem:[#allocation73_spill] sm:$0xff]  ;;  %v15692_v5 = vld [vmem:[#allocation235_spill] sm:$0xff]  ;;  %v15698_v29 = vld [vmem:[#allocation350_spill] sm:$0xff] }
 0x514   : > { %6623 = vtanh.f32 %v15682_v35  ;;  %v4290_v55 = vadd.f32 %v4258_v57, %v15684_v24  ;;  %v13194_v46 = vadd.f32 %v4288_v49, %v4272_v7  ;;  %v15686_v4 = vsub.f32 %v6985_v39, %v15668_v63  ;;  %v15697_v51 = vld [vmem:[#allocation403_spill] sm:$0xff]  ;;  %v15700_v36 = vld [vmem:[#allocation468_spill] sm:$0xff]  ;;  %v15701_v13 = vld [vmem:[#allocation229_spill] sm:$0xff] }
 0x515   : > { %v4260_v1 = vadd.f32 %v4196_v21, %v15683_v52  ;;  %6625 = vtanh.f32 %v15685_v14  ;;  %v4291_v6 = vadd.f32 %v4259_v60, %v12987_v20  ;;  %v13200_v32 = vadd.f32 %v4289_v26, %v4273_v47  ;;  %v15702_v15 = vld [vmem:[#allocation92_spill] sm:$0xff]  ;;  %v15705_v60 = vld [vmem:[#allocation329_spill] sm:$0xff]  ;;  %v15706_v53 = vld [vmem:[#allocation290_spill] sm:$0xff] }
 0x516   : > { %6627 = vtanh.f32 %v15686_v4  ;;  %v4261_v18 = vadd.f32 %v13112_v9, %v15687_v34  ;;  %v13208_v19 = vadd.f32 %v4290_v55, %v4274_v61  ;;  %v15688_v7 = vsub.f32 %v6987_v41, %v15668_v63  ;;  %v15703_v57 = vld [vmem:[#allocation208_spill] sm:$0xff]  ;;  %v15710_v14 = vld [vmem:[#allocation330_spill] sm:$0xff] }
 0x517   : > { %v4292_v38 = vadd.f32 %v4260_v1, %v12995_v43  ;;  %v4262_v20 = vadd.f32 %v13120_v17, %v15689_v37  ;;  %v13215_v47 = vadd.f32 %v4291_v6, %v4275_v44  ;;  %v15690_v39 = vsub.f32 %v6991_v45, %v15668_v63  ;;  %v15694_v17 = vld [vmem:[#allocation470_spill] sm:$0xff]  ;;  %v15708_v35 = vld [vmem:[#allocation444_spill] sm:$0xff]  ;;  %v15714_v37 = vld [vmem:[#allocation23_spill] sm:$0xff] }
 0x518   : > { %6629 = vtanh.f32 %v15688_v7  ;;  %v4263_v9 = vadd.f32 %v13126_v27, %v15691_v56  ;;  %v4264_v43 = vadd.f32 %v13132_v28, %v15692_v5  ;;  %v15693_v41 = vsub.f32 %v6995_v48, %v15668_v63  ;;  %v15711_v6 = vld [vmem:[#allocation210_spill] sm:$0xff] }
 0x519   : > { %6631 = vtanh.f32 %v15690_v39  ;;  %v6622_v61 = vpop.eup %6621  ;;  %v13224_v22 = vadd.f32 %v4292_v38, %v4276_v62  ;;  %v4265_v44 = vadd.f32 %v13137_v12, %v15694_v17  ;;  %v13233_v45 = vadd.f32 %v13143_v42, %v15695_v40  ;;  %v15712_v34 = vld [vmem:[#allocation94_spill] sm:$0xff]  ;;  %v15713_v38 = vld [vmem:[#allocation55_spill] sm:$0xff]  ;;  %v15717_v40 = vld [vmem:[#allocation260_spill] sm:$0xff] }
 0x51a   : > { %6633 = vtanh.f32 %v15693_v41  ;;  %v15696_v27 = vsub.f32 %v6998_v50, %v15668_v63  ;;  %v4053_v28 = vadd.f32 %v6622_v61, %v15697_v51  ;;  %v13241_v62 = vadd.f32 %v13148_v33, %v15698_v29  ;;  %v15704_v50 = vld [vmem:[#allocation169_spill] sm:$0xff]  ;;  %v15715_v61 = vld [vmem:[#allocation95_spill] sm:$0xff]  ;;  %v15716_v41 = vld [vmem:[#allocation446_spill] sm:$0xff] }
 0x51b   : > { %v13244_v48 = vadd.f32 %v4236_v30, %v15699_v3  ;;  %v3926_v49 = vadd.f32 %v15703_v57, %v15702_v15  ;;  %v3927_v26 = vadd.f32 %v15706_v53, %v15705_v60  ;;  %v15707_v33 = vld [vmem:[#allocation93_spill] sm:$0xff]  ;;  %v15709_v30 = vld [vmem:[#allocation404_spill] sm:$0xff]  ;;  %v3929_v4 = vadd.f32 %v15711_v6, %v15710_v14 }
 0x51c   : > { %6635 = vtanh.f32 %v15696_v27  ;;  %v4181_v10 = vadd.f32 %v4053_v28, %v15700_v36  ;;  %v3928_v52 = vadd.f32 %v15708_v35, %v15707_v33  ;;  %v3930_v7 = vadd.f32 %v15713_v38, %v15712_v34  ;;  %v15718_v29 = vld [vmem:[#allocation96_spill] sm:$0xff]  ;;  %v15719_v3 = vld [vmem:[#allocation213_spill] sm:$0xff]  ;;  %v15727_v34 = vld [vmem:[#allocation118_spill] sm:$0xff] }
 0x51d   : > { %v3931_v17 = vadd.f32 %v15716_v41, %v15715_v61  ;;  %v3932_v36 = vadd.f32 %v15719_v3, %v15718_v29  ;;  %v2461_v15 = vld [vmem:[%s6881_s26] sm:$0xff]  ;;  %v15725_v35 = vld [vmem:[#allocation352_spill] sm:$0xff]  ;;  %v15729_v61 = vld [vmem:[#allocation119_spill] sm:$0xff] }
 0x51e   : > { %v6624_v12 = vpop.eup %6623  ;;  %v4245_v21 = vadd.f32 %v4181_v10, %v15701_v13  ;;  %v15720_v10 = vld [vmem:[#allocation261_spill] sm:$0xff]  ;;  %v2466_v3 = vld [vmem:[%s6881_s26 + $0x28] sm:$0xff] }
 0x51f   : > { %v6626_v42 = vpop.eup %6625  ;;  %v4054_v63 = vadd.f32 %v6624_v12, %v15704_v50  ;;  %v2465_v29 = vld [vmem:[%s6881_s26 + $0x20] sm:$0xff] }
 0x520   : > { %v6628_v23 = vpop.eup %6627  ;;  %v4055_v1 = vadd.f32 %v6626_v42, %v15709_v30  ;;  %v4277_v24 = vadd.f32 %v4245_v21, %v13003_v16  ;;  %v15721_v21 = vld [vmem:[#allocation113_spill] sm:$0xff] }
 0x521   : > { %v4056_v39 = vadd.f32 %v6628_v23, %v15714_v37  ;;  %v4182_v56 = vadd.f32 %v4054_v63, %v3926_v49  ;;  %v15722_v49 = vld [vmem:[#allocation170_spill] sm:$0xff] }
 0x522   : > { %v6630_v55 = vpop.eup %6629  ;;  %v4183_v51 = vadd.f32 %v4055_v1, %v3927_v26  ;;  %v4293_v28 = vadd.f32 %v4277_v24, %v4261_v18  ;;  %v15723_v23 = vld [vmem:[#allocation230_spill] sm:$0xff]  ;;  %v15724_v26 = vld [vmem:[#allocation405_spill] sm:$0xff] }
 0x523   : > { %v6632_v5 = vpop.eup %6631  ;;  %v4057_v27 = vadd.f32 %v6630_v55, %v15717_v40  ;;  %v4184_v13 = vadd.f32 %v4056_v39, %v3928_v52  ;;  %v4246_v42 = vadd.f32 %v4182_v56, %v15721_v21  ;;  %v15726_v24 = vld [vmem:[#allocation466_spill] sm:$0xff]  ;;  %v15728_v39 = vld [vmem:[#allocation467_spill] sm:$0xff] }
 0x524   : > { %v6634_v16 = vpop.eup %6633  ;;  %v4058_v12 = vadd.f32 %v6632_v5, %v15720_v10  ;;  %v4247_v60 = vadd.f32 %v4183_v51, %v15723_v23  ;;  %v4309_v53 = vadd.f32 %v13178_v11, %v4293_v28  ;;  %v2462_v5 = vld [vmem:[%s6881_s26 + $0x8] sm:$0xff]  ;;  %v2463_v40 = vld [vmem:[%s6881_s26 + $0x10] sm:$0xff]  ;;  %v2464_v28 = vld [vmem:[%s6881_s26 + $0x18] sm:$0xff] }
 0x525   : > { %v4059_v50 = vadd.f32 %v6634_v16, %v15722_v49  ;;  %v4185_v63 = vadd.f32 %v4057_v27, %v3929_v4  ;;  %v4248_v30 = vadd.f32 %v4184_v13, %v15725_v35  ;;  %v4278_v52 = vadd.f32 %v4246_v42, %v13011_v31 }
 0x526   : > { %v6636_v57 = vpop.eup %6635  ;;  %v4186_v33 = vadd.f32 %v4058_v12, %v3930_v7  ;;  %v4279_v14 = vadd.f32 %v4247_v60, %v13019_v58  ;;  %v4317_v6 = vadd.f32 %v4309_v53, %v2461_v15 }
 0x527   : > { %v4060_v18 = vadd.f32 %v6636_v57, %v15724_v26  ;;  %v4187_v1 = vadd.f32 %v4059_v50, %v3931_v17  ;;  %v4249_v55 = vadd.f32 %v4185_v63, %v15726_v24  ;;  %v4280_v38 = vadd.f32 %v4248_v30, %v13027_v0  ;;  %v15730_v0 = vld [vmem:[#allocation120_spill] sm:$0xff] }
 0x528   : > { %v4250_v11 = vadd.f32 %v4186_v33, %v15727_v34  ;;  %v4294_v37 = vadd.f32 %v4278_v52, %v4262_v20  ;;  %v4295_v31 = vadd.f32 %v4279_v14, %v4263_v9  ;;  %4325 = vst [vmem:[%s6881_s26] sm:$0xff] %v4317_v6 }
 0x529   : > { %v4188_v4 = vadd.f32 %v4060_v18, %v3932_v36  ;;  %v4251_v7 = vadd.f32 %v4187_v1, %v15728_v39  ;;  %v4281_v56 = vadd.f32 %v4249_v55, %v13035_v54  ;;  %v4296_v17 = vadd.f32 %v4280_v38, %v4264_v43 }
 0x52a   : > { %v4282_v58 = vadd.f32 %v4250_v11, %v13043_v2  ;;  %v4310_v27 = vadd.f32 %v13183_v8, %v4294_v37  ;;  %v4311_v54 = vadd.f32 %v13187_v59, %v4295_v31 }
 0x52b   : > { %v4252_v41 = vadd.f32 %v4188_v4, %v15729_v61  ;;  %v4283_v20 = vadd.f32 %v4251_v7, %v15730_v0  ;;  %v4297_v51 = vadd.f32 %v4281_v56, %v4265_v44  ;;  %v4312_v2 = vadd.f32 %v13194_v46, %v4296_v17  ;;  %v2468_v46 = vld [vmem:[%s6881_s26 + $0x38] sm:$0xff] }
 0x52c   : > { %v4298_v16 = vadd.f32 %v4282_v58, %v13233_v45  ;;  %v4318_v43 = vadd.f32 %v4310_v27, %v2462_v5  ;;  %v4319_v36 = vadd.f32 %v4311_v54, %v2463_v40 }
 0x52d   : > { %v4284_v9 = vadd.f32 %v4252_v41, %v13059_v25  ;;  %v4299_v8 = vadd.f32 %v4283_v20, %v13241_v62  ;;  %v4313_v44 = vadd.f32 %v13200_v32, %v4297_v51  ;;  %v2467_v25 = vld [vmem:[%s6881_s26 + $0x30] sm:$0xff]  ;;  %v4320_v10 = vadd.f32 %v4312_v2, %v2464_v28 }
 0x52e   : > { %v4314_v45 = vadd.f32 %v13208_v19, %v4298_v16  ;;  %4326 = vst [vmem:[%s6881_s26 + $0x8] sm:$0xff] %v4318_v43  ;;  %4327 = vst [vmem:[%s6881_s26 + $0x10] sm:$0xff] %v4319_v36 }
 0x52f   : > { %v4300_v59 = vadd.f32 %v4284_v9, %v13244_v48  ;;  %v4315_v62 = vadd.f32 %v13215_v47, %v4299_v8  ;;  %v4321_v12 = vadd.f32 %v4313_v44, %v2465_v29  ;;  %4328 = vst [vmem:[%s6881_s26 + $0x18] sm:$0xff] %v4320_v10 }
 0x530   : > { %v4322_v48 = vadd.f32 %v4314_v45, %v2466_v3 }
 0x531   : > { %v4316_v32 = vadd.f32 %v13224_v22, %v4300_v59  ;;  %v4323_v13 = vadd.f32 %v4315_v62, %v2467_v25  ;;  %4329 = vst [vmem:[%s6881_s26 + $0x20] sm:$0xff] %v4321_v12 }
 0x532   : > { %4330 = vst [vmem:[%s6881_s26 + $0x28] sm:$0xff] %v4322_v48 }
 0x533   : > { %v4324_v21 = vadd.f32 %v4316_v32, %v2468_v46  ;;  %4331 = vst [vmem:[%s6881_s26 + $0x30] sm:$0xff] %v4323_v13 }
 0x535   : > { %4332 = vst [vmem:[%s6881_s26 + $0x38] sm:$0xff] %v4324_v21 }
 0x536   : > { %6678 = shalt.err (!%p6675_p12)
}
 0x537   : > { %s6679_s26 = scalar_lea.hbm %s13315_s14, 1024  ;;  %s6683_s7 = scalar_lea.hbm %s13375_s4, 2048 }
 0x538   : > { %p6680_p13 = scmp.ne.s32.totalorder %s13315_s14, %s6679_s26  ;;  %p6684_p2 = scmp.lt.u32.totalorder %s13315_s14, %s13375_s4 }
 0x539   : > { %p6685_p4 = scmp.lt.u32.totalorder %s6683_s7, %s6679_s26  ;;  %p6687_p6 = scmp.lt.u32.totalorder %s6679_s26, %s13315_s14 }
 0x53a   : > { %p6681_p0 = pnand %p6680_p13, %p6843_p3 }
 0x53b   : > { %p6686_p5 = por %p6685_p4, %p6684_p2 }
 0x53c   : > { %p6682_p1 = pneg %p6681_p0 }
 0x53d   : > { %p6688_p7 = por %p6687_p6, %p6686_p5 }
 0x53f   : > { %p6689_p8 = pnand %p6688_p7, %p6682_p1 }
 0x541   : > { %6692 = shalt.err (!%p6689_p8)
}
 0x542   : > { %4510 = dma.vmem_to_hbm [thread:$0]  (%p6843_p3), %s13317_s11, 1024, %s13315_s14, %s4339_s24  }
 0x543 PF: > { %p4520_p10 = scmp.ge.s32.totalorder %s6763_s22, 2  ;;  %s4379_s23 = sand.u32 1, %s6735_s15  }
 0x544   : > { %s4380_s12 = scalar_lea.sflag [#allocation3], %s4379_s23 }
 0x545   : > { %p4514_p11 = pnand %p4520_p10, %p6853_p9 }
 0x547   : > { %6726 = dma.done.wait (!%p4514_p11), %s4380_s12, 1024  }
 0x548   : > { %6728 = vsyncadd (!%p4514_p11), %s4380_s12, 4294966272  ;;  %s4389_s13 = scalar_lea.sflag [#allocation5], %s4379_s23 }
 0x549   : > { %6730 = dma.done.wait (!%p4514_p11), %s4389_s13, 1024  }
 0x54a   : > { %6732 = vsyncadd (!%p4514_p11), %s4389_s13, 4294966272  ;;  %s21_s22 = sadd.s32 1, %s6763_s22   ;;  %s15731_s27 = sld [smem:[#allocation8_spill]] }
 0x54b   : > { %p18_p12 = scmp.ge.s32.totalorder %s21_s22, 6   ;;  %s15732_s15 = smov %s6739_s16 }
 0x54c   : > { %s15733_s16 = smov %s6743_s17  ;;  %s15734_s17 = smov %s6861_s5 }
 0x54d   : > { %s15735_s18 = smov %s6755_s20  ;;  %s15736_s19 = smov %s6759_s21 }
 0x54e   : > { %s15737_s20 = smov %s15740_s25  ;;  %20 = sbr.rel (!%p18_p12) target bundleno = 7 (0x7), region = 91 }
 0x550   : > { %s15738_s21 = smov %s15731_s27 }
 0x555   :  { %4394 = vsyncpa [#allocation3], 1 }
 0x556   :  { %4396 = vsyncpa [#allocation3 + $0x1], 1 }
 0x557   :  { %4397 = vsyncpa [#allocation5], 1 }
 0x558   :  { %4399 = vsyncpa [#allocation5 + $0x1], 1 }

</bundles_post_ra>
